<compile_context>
chip_gen: v5e
topology: v5e:2x2
jax: 0.10.0
libtpu: 0.0.40
codegen_flags: <defaults>
</compile_context>

<pallas_src>
import functools

import jax
import jax.numpy as jnp
from jax.experimental import pallas as pl
from jax.experimental.pallas import tpu as pltpu

EPS = 1e-5


# ----------------------------- kernel helpers --------------------------------

def _reflect_pad_into(pad_ref, t, H, W):
    """Write reflection-pad(1) of t (H, W, C) into pad_ref (H+2, W+2, C).

    Interior + 2 edge rows are written from `t`; the 2 edge columns are then
    copied from the scratch itself so the corners come out right.
    """
    pad_ref[1:H + 1, 1:W + 1, :] = t                      # interior
    pad_ref[0:1, 1:W + 1, :] = t[1:2]                     # top row (reflect)
    pad_ref[H + 1:H + 2, 1:W + 1, :] = t[H - 2:H - 1]     # bottom row
    pad_ref[:, 0:1, :] = pad_ref[:, 2:3, :]               # left col
    pad_ref[:, W + 1:W + 2, :] = pad_ref[:, W - 1:W, :]   # right col


def _conv3x3(pad_ref, w_ref, H, W, C, use_slab):
    """3x3 valid conv over the reflect-padded bf16 scratch -> (HW, C) f32.

    w_ref: (9*C, C) bf16, K ordered tap-major (tap = ky*3+kx) then C_in.
    """
    HW = H * W
    if use_slab:
        # One big-K matmul: accumulation stays inside the MXU (v5e/v6e).
        taps = [pad_ref[ky:ky + H, kx:kx + W, :].reshape(HW, C)
                for ky in range(3) for kx in range(3)]
        slab = jnp.concatenate(taps, axis=-1)             # (HW, 9C) bf16
        return jnp.dot(slab, w_ref[...], preferred_element_type=jnp.float32)
    # Tap-sum form: lower VMEM (no slab), fine on v7x where the MRB
    # accumulates in place.
    y = jnp.zeros((HW, C), jnp.float32)
    for t in range(9):
        ky, kx = t // 3, t % 3
        xs = pad_ref[ky:ky + H, kx:kx + W, :].reshape(HW, C)
        y = y + jnp.dot(xs, w_ref[t * C:(t + 1) * C, :],
                        preferred_element_type=jnp.float32)
    return y


def _instance_norm(y, HW, relu):
    """Per-channel instance norm in f32 with centered (stable) variance."""
    mean = jnp.sum(y, axis=0, keepdims=True) * (1.0 / HW)
    yc = y - mean
    var = jnp.sum(yc * yc, axis=0, keepdims=True) * (1.0 / HW)
    y = yc * jax.lax.rsqrt(var + EPS)
    if relu:
        y = jnp.maximum(y, 0.0)
    return y


# ------------------------------ Pallas kernel ---------------------------------

def _resblock_kernel(x_ref, w1_ref, w2_ref, o_ref, pad_ref, *, H, W, use_slab):
    """Fused ResnetBlock forward for one sample.

    x_ref:   (1, H, W, C) f32 input sample (unpadded)
    w1_ref:  (9*C, C) bf16 conv1 weights (tap-major K)
    w2_ref:  (9*C, C) bf16 conv2 weights
    o_ref:   (1, H, W, C)
    pad_ref: (H+2, W+2, C) bf16 VMEM scratch, reused for both conv stages
    """
    C = o_ref.shape[-1]
    HW = H * W

    # Stage 0: reflection-pad x (bf16) into the shared scratch.
    _reflect_pad_into(pad_ref, x_ref[0].astype(jnp.bfloat16), H, W)

    # Stage 1: conv3x3 -> IN -> ReLU  (all stats / activations in f32).
    h = _conv3x3(pad_ref, w1_ref, H, W, C, use_slab)
    h = _instance_norm(h, HW, relu=True)

    # Stage 2: reflection-pad the intermediate (bf16) into the SAME scratch.
    _reflect_pad_into(pad_ref, h.astype(jnp.bfloat16).reshape(H, W, C), H, W)

    # Stage 3: conv3x3 -> IN -> residual add (residual read from the ref in
    # f32 only here, so no f32 padded copy is live across the kernel).
    y = _conv3x3(pad_ref, w2_ref, H, W, C, use_slab)
    y = _instance_norm(y, HW, relu=False)
    x_res = x_ref[0].astype(jnp.float32).reshape(HW, C)
    o_ref[0] = (y + x_res).reshape(H, W, C).astype(o_ref.dtype)


# ------------------------------- JAX wrapper ----------------------------------

def _vmem_capacity_bytes(default=128 * 1024 * 1024):
    try:
        return int(pltpu.get_tpu_info().vmem_capacity_bytes)
    except Exception:
        return default


def resnet_block_forward(x_nchw, w1_oihw, w2_oihw):
    """ResnetBlock forward. Input/output layout: NCHW (PyTorch)."""
    B, C, H, W = x_nchw.shape

    # NCHW -> NHWC once at the boundary (padding happens inside the kernel).
    x_nhwc = jnp.transpose(x_nchw, (0, 2, 3, 1))

    # PyTorch OIHW -> (tap = ky*3+kx, C_in) x C_out, flattened to (9C, C),
    # cast to bf16 once here (no per-grid-step in-kernel casts).
    def prep_w(w):
        return jnp.transpose(w, (2, 3, 1, 0)).reshape(9 * C, C).astype(jnp.bfloat16)

    w1 = prep_w(w1_oihw)
    w2 = prep_w(w2_oihw)

    vmem_cap = _vmem_capacity_bytes()
    # Big-K slab matmul on 128 MiB-VMEM chips (v5e/v6e); tap-sum accumulate
    # on small-VMEM chips (v7x) where the MRB accumulates in place.
    use_slab = vmem_cap > 80 * 1024 * 1024
    vmem_limit = max(min(int(vmem_cap * 0.45), 100 * 1024 * 1024),
                     16 * 1024 * 1024)

    out_nhwc = pl.pallas_call(
        functools.partial(_resblock_kernel, H=H, W=W, use_slab=use_slab),
        out_shape=jax.ShapeDtypeStruct((B, H, W, C), x_nchw.dtype),
        grid=(B,),
        in_specs=[
            pl.BlockSpec((1, H, W, C), lambda b: (b, 0, 0, 0)),
            pl.BlockSpec((9 * C, C), lambda b: (0, 0)),
            pl.BlockSpec((9 * C, C), lambda b: (0, 0)),
        ],
        out_specs=pl.BlockSpec((1, H, W, C), lambda b: (b, 0, 0, 0)),
        scratch_shapes=[pltpu.VMEM((H + 2, W + 2, C), jnp.bfloat16)],
        compiler_params=pltpu.CompilerParams(
            dimension_semantics=("parallel",),
            vmem_limit_bytes=vmem_limit,
        ),
    )(x_nhwc, w1, w2)

    # TODO(synk): for large feature maps on v7x (C>=256, H=W>=64) add an
    # HW-row-tile grid axis with two-pass instance-norm statistics so blocks
    # fit 64 MiB VMEM and the 2nd TensorCore gets work even at B=1.
    # TODO(synk): pad C up to a lane multiple (128) in the wrapper for models
    # with C=64 to avoid masked partial stores / low MXU utilization.
    return jnp.transpose(out_nhwc, (0, 3, 1, 2))           # NCHW


# ----------------------------- pure-JAX reference -----------------------------

def _reference_forward(x_nchw, w1_oihw, w2_oihw):
    def pad_conv_in(x, w, relu):
        xp = jnp.pad(x, ((0, 0), (0, 0), (1, 1), (1, 1)), mode="reflect")
        y = jax.lax.conv_general_dilated(
            xp, w, window_strides=(1, 1), padding="VALID",
            dimension_numbers=("NCHW", "OIHW", "NCHW"))
        mu = jnp.mean(y, axis=(2, 3), keepdims=True)
        var = jnp.mean((y - mu) ** 2, axis=(2, 3), keepdims=True)
        y = (y - mu) / jnp.sqrt(var + EPS)
        return jnp.maximum(y, 0.0) if relu else y

    h = pad_conv_in(x_nchw, w1_oihw, True)
    h = pad_conv_in(h, w2_oihw, False)
    return h + x_nchw


# ----------------------------------- main --------------------------------------

if __name__ == "__main__":
    B, C, H, W = 2, 4, 16, 16
    key = jax.random.PRNGKey(0)
    kx, k1, k2 = jax.random.split(key, 3)

    x = jax.random.normal(kx, (B, C, H, W), dtype=jnp.float32)
    # Conv2d weights, PyTorch layout (out_C, in_C, kH, kW), no bias.
    wscale = 1.0 / (C * 9) ** 0.5
    w1 = jax.random.normal(k1, (C, C, 3, 3), dtype=jnp.float32) * wscale
    w2 = jax.random.normal(k2, (C, C, 3, 3), dtype=jnp.float32) * wscale

    out = jax.block_until_ready(resnet_block_forward(x, w1, w2))
    ref = jax.block_until_ready(_reference_forward(x, w1, w2))

    assert out.shape == (B, C, H, W)
    # bf16 MXU operands (with f32 accumulation, f32 centered-norm statistics
    # and an f32 residual) land within a few 1e-2 of the pure-f32 reference
    # on unit-scale activations.
    assert jnp.allclose(out, ref, atol=5e-2, rtol=5e-2), "mismatch vs reference"

    print("KERNEL_OK")
</pallas_src>

<mosaic_0001>
module attributes {stable_mosaic.version = 11 : i64} {
  func.func @_resblock_kernel(%arg0: i32, %arg1: memref<1x16x16x4xf32, #tpu.memory_space<vmem>>, %arg2: memref<36x4xbf16, #tpu.memory_space<vmem>>, %arg3: memref<36x4xbf16, #tpu.memory_space<vmem>>, %arg4: memref<1x16x16x4xf32, #tpu.memory_space<vmem>>, %arg5: memref<18x18x4xbf16, #tpu.memory_space<vmem>>) attributes {dimension_semantics = [#tpu.dimension_semantics<parallel>], iteration_bounds = array<i64: 2>, scalar_prefetch = 0 : i64, scratch_operands = 1 : i64, tpu.core_type = #tpu.core_type<tc>, window_params = [{transform_indices = @transform_0, window_bounds = array<i64: 1, 16, 16, 4>}, {pipeline_mode = #tpu.pipeline_mode<synchronous>, transform_indices = @transform_1, window_bounds = array<i64: 36, 4>}, {pipeline_mode = #tpu.pipeline_mode<synchronous>, transform_indices = @transform_2, window_bounds = array<i64: 36, 4>}, {transform_indices = @transform_3, window_bounds = array<i64: 1, 16, 16, 4>}]} {
    %c0 = arith.constant 0 : index
    %c0_0 = arith.constant 0 : index
    %c0_1 = arith.constant 0 : index
    %c0_2 = arith.constant 0 : index
    %0 = vector.load %arg1[%c0, %c0_0, %c0_1, %c0_2] : memref<1x16x16x4xf32, #tpu.memory_space<vmem>>, vector<1x16x16x4xf32>
    %1 = vector.shape_cast %0 : vector<1x16x16x4xf32> to vector<16x16x4xf32>
    %2 = arith.truncf %1 : vector<16x16x4xf32> to vector<16x16x4xbf16>
    %c1 = arith.constant 1 : index
    %c1_3 = arith.constant 1 : index
    %c0_4 = arith.constant 0 : index
    %3 = vector.load %arg5[%c1, %c1_3, %c0_4] : memref<18x18x4xbf16, #tpu.memory_space<vmem>>, vector<16x16x4xbf16>
    tpu.vector_store %arg5[%c1, %c1_3, %c0_4], %2 {strides = array<i32>} : memref<18x18x4xbf16, #tpu.memory_space<vmem>>, vector<16x16x4xbf16>,
    %4 = vector.extract_strided_slice %2 {offsets = [1, 0, 0], sizes = [1, 16, 4], strides = [1, 1, 1]} : vector<16x16x4xbf16> to vector<1x16x4xbf16>
    %c0_5 = arith.constant 0 : index
    %c1_6 = arith.constant 1 : index
    %c0_7 = arith.constant 0 : index
    %5 = vector.load %arg5[%c0_5, %c1_6, %c0_7] : memref<18x18x4xbf16, #tpu.memory_space<vmem>>, vector<1x16x4xbf16>
    tpu.vector_store %arg5[%c0_5, %c1_6, %c0_7], %4 {strides = array<i32>} : memref<18x18x4xbf16, #tpu.memory_space<vmem>>, vector<1x16x4xbf16>,
    %6 = vector.extract_strided_slice %2 {offsets = [14, 0, 0], sizes = [1, 16, 4], strides = [1, 1, 1]} : vector<16x16x4xbf16> to vector<1x16x4xbf16>
    %c17 = arith.constant 17 : index
    %c1_8 = arith.constant 1 : index
    %c0_9 = arith.constant 0 : index
    %7 = vector.load %arg5[%c17, %c1_8, %c0_9] : memref<18x18x4xbf16, #tpu.memory_space<vmem>>, vector<1x16x4xbf16>
    tpu.vector_store %arg5[%c17, %c1_8, %c0_9], %6 {strides = array<i32>} : memref<18x18x4xbf16, #tpu.memory_space<vmem>>, vector<1x16x4xbf16>,
    %c0_10 = arith.constant 0 : index
    %c2 = arith.constant 2 : index
    %c0_11 = arith.constant 0 : index
    %8 = vector.load %arg5[%c0_10, %c2, %c0_11] : memref<18x18x4xbf16, #tpu.memory_space<vmem>>, vector<18x1x4xbf16>
    %c0_12 = arith.constant 0 : index
    %c0_13 = arith.constant 0 : index
    %c0_14 = arith.constant 0 : index
    %9 = vector.load %arg5[%c0_12, %c0_13, %c0_14] : memref<18x18x4xbf16, #tpu.memory_space<vmem>>, vector<18x1x4xbf16>
    tpu.vector_store %arg5[%c0_12, %c0_13, %c0_14], %8 {strides = array<i32>} : memref<18x18x4xbf16, #tpu.memory_space<vmem>>, vector<18x1x4xbf16>,
    %c0_15 = arith.constant 0 : index
    %c15 = arith.constant 15 : index
    %c0_16 = arith.constant 0 : index
    %10 = vector.load %arg5[%c0_15, %c15, %c0_16] : memref<18x18x4xbf16, #tpu.memory_space<vmem>>, vector<18x1x4xbf16>
    %c0_17 = arith.constant 0 : index
    %c17_18 = arith.constant 17 : index
    %c0_19 = arith.constant 0 : index
    %11 = vector.load %arg5[%c0_17, %c17_18, %c0_19] : memref<18x18x4xbf16, #tpu.memory_space<vmem>>, vector<18x1x4xbf16>
    tpu.vector_store %arg5[%c0_17, %c17_18, %c0_19], %10 {strides = array<i32>} : memref<18x18x4xbf16, #tpu.memory_space<vmem>>, vector<18x1x4xbf16>,
    %c0_20 = arith.constant 0 : index
    %c0_21 = arith.constant 0 : index
    %c0_22 = arith.constant 0 : index
    %12 = vector.load %arg5[%c0_20, %c0_21, %c0_22] : memref<18x18x4xbf16, #tpu.memory_space<vmem>>, vector<16x16x4xbf16>
    %13 = vector.shape_cast %12 : vector<16x16x4xbf16> to vector<256x4xbf16>
    %c0_23 = arith.constant 0 : index
    %c1_24 = arith.constant 1 : index
    %c0_25 = arith.constant 0 : index
    %14 = vector.load %arg5[%c0_23, %c1_24, %c0_25] : memref<18x18x4xbf16, #tpu.memory_space<vmem>>, vector<16x16x4xbf16>
    %15 = vector.shape_cast %14 : vector<16x16x4xbf16> to vector<256x4xbf16>
    %c0_26 = arith.constant 0 : index
    %c2_27 = arith.constant 2 : index
    %c0_28 = arith.constant 0 : index
    %16 = vector.load %arg5[%c0_26, %c2_27, %c0_28] : memref<18x18x4xbf16, #tpu.memory_space<vmem>>, vector<16x16x4xbf16>
    %17 = vector.shape_cast %16 : vector<16x16x4xbf16> to vector<256x4xbf16>
    %c1_29 = arith.constant 1 : index
    %c0_30 = arith.constant 0 : index
    %c0_31 = arith.constant 0 : index
    %18 = vector.load %arg5[%c1_29, %c0_30, %c0_31] : memref<18x18x4xbf16, #tpu.memory_space<vmem>>, vector<16x16x4xbf16>
    %19 = vector.shape_cast %18 : vector<16x16x4xbf16> to vector<256x4xbf16>
    %c1_32 = arith.constant 1 : index
    %c1_33 = arith.constant 1 : index
    %c0_34 = arith.constant 0 : index
    %20 = vector.load %arg5[%c1_32, %c1_33, %c0_34] : memref<18x18x4xbf16, #tpu.memory_space<vmem>>, vector<16x16x4xbf16>
    %21 = vector.shape_cast %20 : vector<16x16x4xbf16> to vector<256x4xbf16>
    %c1_35 = arith.constant 1 : index
    %c2_36 = arith.constant 2 : index
    %c0_37 = arith.constant 0 : index
    %22 = vector.load %arg5[%c1_35, %c2_36, %c0_37] : memref<18x18x4xbf16, #tpu.memory_space<vmem>>, vector<16x16x4xbf16>
    %23 = vector.shape_cast %22 : vector<16x16x4xbf16> to vector<256x4xbf16>
    %c2_38 = arith.constant 2 : index
    %c0_39 = arith.constant 0 : index
    %c0_40 = arith.constant 0 : index
    %24 = vector.load %arg5[%c2_38, %c0_39, %c0_40] : memref<18x18x4xbf16, #tpu.memory_space<vmem>>, vector<16x16x4xbf16>
    %25 = vector.shape_cast %24 : vector<16x16x4xbf16> to vector<256x4xbf16>
    %c2_41 = arith.constant 2 : index
    %c1_42 = arith.constant 1 : index
    %c0_43 = arith.constant 0 : index
    %26 = vector.load %arg5[%c2_41, %c1_42, %c0_43] : memref<18x18x4xbf16, #tpu.memory_space<vmem>>, vector<16x16x4xbf16>
    %27 = vector.shape_cast %26 : vector<16x16x4xbf16> to vector<256x4xbf16>
    %c2_44 = arith.constant 2 : index
    %c2_45 = arith.constant 2 : index
    %c0_46 = arith.constant 0 : index
    %28 = vector.load %arg5[%c2_44, %c2_45, %c0_46] : memref<18x18x4xbf16, #tpu.memory_space<vmem>>, vector<16x16x4xbf16>
    %29 = vector.shape_cast %28 : vector<16x16x4xbf16> to vector<256x4xbf16>
    %30 = tpu.concatenate %13, %15, %17, %19, %21, %23, %25, %27, %29 in 1 : vector<256x4xbf16>, vector<256x4xbf16>, vector<256x4xbf16>, vector<256x4xbf16>, vector<256x4xbf16>, vector<256x4xbf16>, vector<256x4xbf16>, vector<256x4xbf16>, vector<256x4xbf16> -> vector<256x36xbf16>
    %c0_47 = arith.constant 0 : index
    %c0_48 = arith.constant 0 : index
    %31 = vector.load %arg2[%c0_47, %c0_48] : memref<36x4xbf16, #tpu.memory_space<vmem>>, vector<36x4xbf16>
    %cst = arith.constant dense<0.000000e+00> : vector<256x4xf32>
    %32 = tpu.matmul %30, %31, %cst {dimension_numbers = #tpu.dot_dimension_numbers<[1], [0], [0], [1], [0, 0, 1, 1], [], []>} : vector<256x36xbf16>, vector<36x4xbf16>, vector<256x4xf32> -> vector<256x4xf32>
    %cst_49 = arith.constant dense<0.000000e+00> : vector<4xf32>
    %33 = vector.multi_reduction <add>, %32, %cst_49 [0] : vector<256x4xf32> to vector<4xf32>
    %34 = vector.shape_cast %33 : vector<4xf32> to vector<1x4xf32>
    %cst_50 = arith.constant 3.906250e-03 : f32
    %35 = vector.broadcast %cst_50 : f32 to vector<1x4xf32>
    %36 = arith.mulf %34, %35 : vector<1x4xf32>
    %37 = vector.broadcast %36 : vector<1x4xf32> to vector<256x4xf32>
    %38 = arith.subf %32, %37 : vector<256x4xf32>
    %39 = arith.mulf %38, %38 : vector<256x4xf32>
    %cst_51 = arith.constant dense<0.000000e+00> : vector<4xf32>
    %40 = vector.multi_reduction <add>, %39, %cst_51 [0] : vector<256x4xf32> to vector<4xf32>
    %41 = vector.shape_cast %40 : vector<4xf32> to vector<1x4xf32>
    %cst_52 = arith.constant 3.906250e-03 : f32
    %42 = vector.broadcast %cst_52 : f32 to vector<1x4xf32>
    %43 = arith.mulf %41, %42 : vector<1x4xf32>
    %cst_53 = arith.constant 9.99999974E-6 : f32
    %44 = vector.broadcast %cst_53 : f32 to vector<1x4xf32>
    %45 = arith.addf %43, %44 : vector<1x4xf32>
    %46 = math.rsqrt %45 : vector<1x4xf32>
    %47 = vector.broadcast %46 : vector<1x4xf32> to vector<256x4xf32>
    %48 = arith.mulf %38, %47 : vector<256x4xf32>
    %cst_54 = arith.constant 0.000000e+00 : f32
    %49 = vector.broadcast %cst_54 : f32 to vector<256x4xf32>
    %50 = arith.maximumf %48, %49 : vector<256x4xf32>
    %51 = arith.truncf %50 : vector<256x4xf32> to vector<256x4xbf16>
    %52 = vector.shape_cast %51 : vector<256x4xbf16> to vector<16x16x4xbf16>
    %c1_55 = arith.constant 1 : index
    %c1_56 = arith.constant 1 : index
    %c0_57 = arith.constant 0 : index
    %53 = vector.load %arg5[%c1_55, %c1_56, %c0_57] : memref<18x18x4xbf16, #tpu.memory_space<vmem>>, vector<16x16x4xbf16>
    tpu.vector_store %arg5[%c1_55, %c1_56, %c0_57], %52 {strides = array<i32>} : memref<18x18x4xbf16, #tpu.memory_space<vmem>>, vector<16x16x4xbf16>,
    %54 = vector.extract_strided_slice %52 {offsets = [1, 0, 0], sizes = [1, 16, 4], strides = [1, 1, 1]} : vector<16x16x4xbf16> to vector<1x16x4xbf16>
    %c0_58 = arith.constant 0 : index
    %c1_59 = arith.constant 1 : index
    %c0_60 = arith.constant 0 : index
    %55 = vector.load %arg5[%c0_58, %c1_59, %c0_60] : memref<18x18x4xbf16, #tpu.memory_space<vmem>>, vector<1x16x4xbf16>
    tpu.vector_store %arg5[%c0_58, %c1_59, %c0_60], %54 {strides = array<i32>} : memref<18x18x4xbf16, #tpu.memory_space<vmem>>, vector<1x16x4xbf16>,
    %56 = vector.extract_strided_slice %52 {offsets = [14, 0, 0], sizes = [1, 16, 4], strides = [1, 1, 1]} : vector<16x16x4xbf16> to vector<1x16x4xbf16>
    %c17_61 = arith.constant 17 : index
    %c1_62 = arith.constant 1 : index
    %c0_63 = arith.constant 0 : index
    %57 = vector.load %arg5[%c17_61, %c1_62, %c0_63] : memref<18x18x4xbf16, #tpu.memory_space<vmem>>, vector<1x16x4xbf16>
    tpu.vector_store %arg5[%c17_61, %c1_62, %c0_63], %56 {strides = array<i32>} : memref<18x18x4xbf16, #tpu.memory_space<vmem>>, vector<1x16x4xbf16>,
    %c0_64 = arith.constant 0 : index
    %c2_65 = arith.constant 2 : index
    %c0_66 = arith.constant 0 : index
    %58 = vector.load %arg5[%c0_64, %c2_65, %c0_66] : memref<18x18x4xbf16, #tpu.memory_space<vmem>>, vector<18x1x4xbf16>
    %c0_67 = arith.constant 0 : index
    %c0_68 = arith.constant 0 : index
    %c0_69 = arith.constant 0 : index
    %59 = vector.load %arg5[%c0_67, %c0_68, %c0_69] : memref<18x18x4xbf16, #tpu.memory_space<vmem>>, vector<18x1x4xbf16>
    tpu.vector_store %arg5[%c0_67, %c0_68, %c0_69], %58 {strides = array<i32>} : memref<18x18x4xbf16, #tpu.memory_space<vmem>>, vector<18x1x4xbf16>,
    %c0_70 = arith.constant 0 : index
    %c15_71 = arith.constant 15 : index
    %c0_72 = arith.constant 0 : index
    %60 = vector.load %arg5[%c0_70, %c15_71, %c0_72] : memref<18x18x4xbf16, #tpu.memory_space<vmem>>, vector<18x1x4xbf16>
    %c0_73 = arith.constant 0 : index
    %c17_74 = arith.constant 17 : index
    %c0_75 = arith.constant 0 : index
    %61 = vector.load %arg5[%c0_73, %c17_74, %c0_75] : memref<18x18x4xbf16, #tpu.memory_space<vmem>>, vector<18x1x4xbf16>
    tpu.vector_store %arg5[%c0_73, %c17_74, %c0_75], %60 {strides = array<i32>} : memref<18x18x4xbf16, #tpu.memory_space<vmem>>, vector<18x1x4xbf16>,
    %c0_76 = arith.constant 0 : index
    %c0_77 = arith.constant 0 : index
    %c0_78 = arith.constant 0 : index
    %62 = vector.load %arg5[%c0_76, %c0_77, %c0_78] : memref<18x18x4xbf16, #tpu.memory_space<vmem>>, vector<16x16x4xbf16>
    %63 = vector.shape_cast %62 : vector<16x16x4xbf16> to vector<256x4xbf16>
    %c0_79 = arith.constant 0 : index
    %c1_80 = arith.constant 1 : index
    %c0_81 = arith.constant 0 : index
    %64 = vector.load %arg5[%c0_79, %c1_80, %c0_81] : memref<18x18x4xbf16, #tpu.memory_space<vmem>>, vector<16x16x4xbf16>
    %65 = vector.shape_cast %64 : vector<16x16x4xbf16> to vector<256x4xbf16>
    %c0_82 = arith.constant 0 : index
    %c2_83 = arith.constant 2 : index
    %c0_84 = arith.constant 0 : index
    %66 = vector.load %arg5[%c0_82, %c2_83, %c0_84] : memref<18x18x4xbf16, #tpu.memory_space<vmem>>, vector<16x16x4xbf16>
    %67 = vector.shape_cast %66 : vector<16x16x4xbf16> to vector<256x4xbf16>
    %c1_85 = arith.constant 1 : index
    %c0_86 = arith.constant 0 : index
    %c0_87 = arith.constant 0 : index
    %68 = vector.load %arg5[%c1_85, %c0_86, %c0_87] : memref<18x18x4xbf16, #tpu.memory_space<vmem>>, vector<16x16x4xbf16>
    %69 = vector.shape_cast %68 : vector<16x16x4xbf16> to vector<256x4xbf16>
    %c1_88 = arith.constant 1 : index
    %c1_89 = arith.constant 1 : index
    %c0_90 = arith.constant 0 : index
    %70 = vector.load %arg5[%c1_88, %c1_89, %c0_90] : memref<18x18x4xbf16, #tpu.memory_space<vmem>>, vector<16x16x4xbf16>
    %71 = vector.shape_cast %70 : vector<16x16x4xbf16> to vector<256x4xbf16>
    %c1_91 = arith.constant 1 : index
    %c2_92 = arith.constant 2 : index
    %c0_93 = arith.constant 0 : index
    %72 = vector.load %arg5[%c1_91, %c2_92, %c0_93] : memref<18x18x4xbf16, #tpu.memory_space<vmem>>, vector<16x16x4xbf16>
    %73 = vector.shape_cast %72 : vector<16x16x4xbf16> to vector<256x4xbf16>
    %c2_94 = arith.constant 2 : index
    %c0_95 = arith.constant 0 : index
    %c0_96 = arith.constant 0 : index
    %74 = vector.load %arg5[%c2_94, %c0_95, %c0_96] : memref<18x18x4xbf16, #tpu.memory_space<vmem>>, vector<16x16x4xbf16>
    %75 = vector.shape_cast %74 : vector<16x16x4xbf16> to vector<256x4xbf16>
    %c2_97 = arith.constant 2 : index
    %c1_98 = arith.constant 1 : index
    %c0_99 = arith.constant 0 : index
    %76 = vector.load %arg5[%c2_97, %c1_98, %c0_99] : memref<18x18x4xbf16, #tpu.memory_space<vmem>>, vector<16x16x4xbf16>
    %77 = vector.shape_cast %76 : vector<16x16x4xbf16> to vector<256x4xbf16>
    %c2_100 = arith.constant 2 : index
    %c2_101 = arith.constant 2 : index
    %c0_102 = arith.constant 0 : index
    %78 = vector.load %arg5[%c2_100, %c2_101, %c0_102] : memref<18x18x4xbf16, #tpu.memory_space<vmem>>, vector<16x16x4xbf16>
    %79 = vector.shape_cast %78 : vector<16x16x4xbf16> to vector<256x4xbf16>
    %80 = tpu.concatenate %63, %65, %67, %69, %71, %73, %75, %77, %79 in 1 : vector<256x4xbf16>, vector<256x4xbf16>, vector<256x4xbf16>, vector<256x4xbf16>, vector<256x4xbf16>, vector<256x4xbf16>, vector<256x4xbf16>, vector<256x4xbf16>, vector<256x4xbf16> -> vector<256x36xbf16>
    %c0_103 = arith.constant 0 : index
    %c0_104 = arith.constant 0 : index
    %81 = vector.load %arg3[%c0_103, %c0_104] : memref<36x4xbf16, #tpu.memory_space<vmem>>, vector<36x4xbf16>
    %cst_105 = arith.constant dense<0.000000e+00> : vector<256x4xf32>
    %82 = tpu.matmul %80, %81, %cst_105 {dimension_numbers = #tpu.dot_dimension_numbers<[1], [0], [0], [1], [0, 0, 1, 1], [], []>} : vector<256x36xbf16>, vector<36x4xbf16>, vector<256x4xf32> -> vector<256x4xf32>
    %cst_106 = arith.constant dense<0.000000e+00> : vector<4xf32>
    %83 = vector.multi_reduction <add>, %82, %cst_106 [0] : vector<256x4xf32> to vector<4xf32>
    %84 = vector.shape_cast %83 : vector<4xf32> to vector<1x4xf32>
    %cst_107 = arith.constant 3.906250e-03 : f32
    %85 = vector.broadcast %cst_107 : f32 to vector<1x4xf32>
    %86 = arith.mulf %84, %85 : vector<1x4xf32>
    %87 = vector.broadcast %86 : vector<1x4xf32> to vector<256x4xf32>
    %88 = arith.subf %82, %87 : vector<256x4xf32>
    %89 = arith.mulf %88, %88 : vector<256x4xf32>
    %cst_108 = arith.constant dense<0.000000e+00> : vector<4xf32>
    %90 = vector.multi_reduction <add>, %89, %cst_108 [0] : vector<256x4xf32> to vector<4xf32>
    %91 = vector.shape_cast %90 : vector<4xf32> to vector<1x4xf32>
    %cst_109 = arith.constant 3.906250e-03 : f32
    %92 = vector.broadcast %cst_109 : f32 to vector<1x4xf32>
    %93 = arith.mulf %91, %92 : vector<1x4xf32>
    %cst_110 = arith.constant 9.99999974E-6 : f32
    %94 = vector.broadcast %cst_110 : f32 to vector<1x4xf32>
    %95 = arith.addf %93, %94 : vector<1x4xf32>
    %96 = math.rsqrt %95 : vector<1x4xf32>
    %97 = vector.broadcast %96 : vector<1x4xf32> to vector<256x4xf32>
    %98 = arith.mulf %88, %97 : vector<256x4xf32>
    %c0_111 = arith.constant 0 : index
    %c0_112 = arith.constant 0 : index
    %c0_113 = arith.constant 0 : index
    %c0_114 = arith.constant 0 : index
    %99 = vector.load %arg1[%c0_111, %c0_112, %c0_113, %c0_114] : memref<1x16x16x4xf32, #tpu.memory_space<vmem>>, vector<1x16x16x4xf32>
    %100 = vector.shape_cast %99 : vector<1x16x16x4xf32> to vector<16x16x4xf32>
    %101 = vector.shape_cast %100 : vector<16x16x4xf32> to vector<256x4xf32>
    %102 = arith.addf %98, %101 : vector<256x4xf32>
    %103 = vector.shape_cast %102 : vector<256x4xf32> to vector<16x16x4xf32>
    %c0_115 = arith.constant 0 : index
    %c0_116 = arith.constant 0 : index
    %c0_117 = arith.constant 0 : index
    %c0_118 = arith.constant 0 : index
    %104 = vector.load %arg4[%c0_115, %c0_116, %c0_117, %c0_118] : memref<1x16x16x4xf32, #tpu.memory_space<vmem>>, vector<1x16x16x4xf32>
    %105 = vector.shape_cast %104 : vector<1x16x16x4xf32> to vector<16x16x4xf32>
    %106 = vector.shape_cast %103 : vector<16x16x4xf32> to vector<1x16x16x4xf32>
    tpu.vector_store %arg4[%c0_115, %c0_116, %c0_117, %c0_118], %106 {strides = array<i32>} : memref<1x16x16x4xf32, #tpu.memory_space<vmem>>, vector<1x16x16x4xf32>,
    return
  }
  func.func @transform_0(%arg0: i32) -> (i32, i32, i32, i32) {
    %c0_i32 = arith.constant 0 : i32
    %c0_i32_0 = arith.constant 0 : i32
    %c0_i32_1 = arith.constant 0 : i32
    %c0_i32_2 = arith.constant 0 : i32
    return %arg0, %c0_i32, %c0_i32_0, %c0_i32_1 : i32, i32, i32, i32
  }
  func.func @transform_1(%arg0: i32) -> (i32, i32) {
    %c0_i32 = arith.constant 0 : i32
    %c0_i32_0 = arith.constant 0 : i32
    %c0_i32_1 = arith.constant 0 : i32
    return %c0_i32, %c0_i32_0 : i32, i32
  }
  func.func @transform_2(%arg0: i32) -> (i32, i32) {
    %c0_i32 = arith.constant 0 : i32
    %c0_i32_0 = arith.constant 0 : i32
    %c0_i32_1 = arith.constant 0 : i32
    return %c0_i32, %c0_i32_0 : i32, i32
  }
  func.func @transform_3(%arg0: i32) -> (i32, i32, i32, i32) {
    %c0_i32 = arith.constant 0 : i32
    %c0_i32_0 = arith.constant 0 : i32
    %c0_i32_1 = arith.constant 0 : i32
    %c0_i32_2 = arith.constant 0 : i32
    return %arg0, %c0_i32, %c0_i32_0, %c0_i32_1 : i32, i32, i32, i32
  }
}

</mosaic_0001>

<bundles_post_ra>
// kernel: tpu_custom_call.1
= control target key start
LH: loop header
LB: loop body
LE: loop exit
PB: predicated region body
PF: predicated region fallthrough
CT: control target
= control target key end

     0   :  { %s9245_s12 = smov 0   ;;  %s13493_s0 = inlined_call_operand.vmem [shape: f32[2,16,16,4], index: 0, kind: input, shape index: {}]   ;;  %s13494_s1 = inlined_call_operand.vmem [shape: bf16[36,4], index: 1, kind: input, shape index: {}]   ;;  %s13495_s2 = inlined_call_operand.vmem [shape: bf16[36,4], index: 2, kind: input, shape index: {}]   ;;  %s13496_s3 = inlined_call_operand.vmem [shape: f32[2,16,16,4], index: 3, kind: output, shape index: {}]  }
   0x1 LB: > { %s8393_s13 = sadd.s32 4294967295, %s9215_s12   ;;  %p8397_p0 = scmp.ge.s32.totalorder %s9215_s12, 1  ;;  %s9215_s12 = sphi %s9245_s12, %s13_s12  }
   0x2   : > { %p137_p1 = scmp.lt.s32.totalorder %s9215_s12, 3 }
   0x4   : > { %p138_p2 = pnand %p8397_p0, %p137_p1 }
   0x6   : > { %141 = sbr.rel (%p138_p2) target bundleno = 1745 (0x6d1), region = 32 }
   0xb   : > { %p161_p3 = scmp.lt.s32.totalorder %s8393_s13, 1  ;;  %vm236_vm0 = vsmask.f32 256  ;;  %vm237_vm1 = vsmask.f32 4368  ;;  %vm560_vm2 = vcmask 27648  }
   0xc   : > { %vm561_vm3 = vsmask.f32 7938  ;;  %vm568_vm4 = vcmask 24576   ;;  %v622_v22 = vld [vmem:[#allocation2 + $0x6c] sm:$0xf]  ;;  %vm9277_vm6 = vmor %vm236_vm0, %vm237_vm1  ;;  %vm1481_vm8 = vcmask 1042432  }
   0xd   : > { %s13646_s13 = smov (!%p161_p3, %s8393_s13), 1  ;;  %vm9271_vm5 = vmand %vm560_vm2, %vm561_vm3  ;;  %v626_v26 = vld [vmem:[#allocation2 + $0x74] sm:$0x1]  ;;  %v563_v36 = vld [vmem:[#allocation2 + $0xc] sm:$0xf]  ;;  %vm1482_vm9 = vcmask 1046532  }
   0xe   : > { %s9004_s14 = sshll.u32 %s13646_s13, 8  ;;  %vm9283_vm7 = vmand %vm568_vm4, %vm236_vm0  ;;  %v570_v42 = vld [vmem:[#allocation2 + $0x14] sm:$0x1]  ;;  %v573_v47 = vld [vmem:[#allocation2 + $0x18] sm:$0xf]  ;;  %s9217_s18 = smov 12  }
   0xf   : > { %s9261_s17 = scalar_lea.vmem %s13493_s0, %s9004_s14  ;;  %v577_v59 = vld [vmem:[#allocation2 + $0x20] sm:$0x1]  ;;  %vm9331_vm10 = vmand %vm568_vm4, %vm561_vm3  ;;  %s9218_s19 = smov 24   ;;  %vm1030_vm12 = vsmask.f32 3328  ;;  %vm3549_vm15 = vcmask 31744  }
  0x10   : > { %v188_v0 = vld [vmem:[%s9261_s17 + $0x80] sm:$0xff]  ;;  %v189_v1 = vld [vmem:[%s9261_s17 + $0x88] sm:$0xff]  ;;  %v174_v7 = vld [vmem:[%s9261_s17 + $0x10] sm:$0xff]  ;;  %s9219_s20 = smov 20   ;;  %s9220_s21 = smov 8   ;;  %vm3598_vm0 = vcmask 64512  }
  0x11   : > { %v172_v2 = vld [vmem:[%s9261_s17] sm:$0xff]  ;;  %v220_v3 = vpack.c.bf16 %v188_v0, %v188_v0  ;;  %v221_v4 = vpack.c.bf16 %v189_v1, %v189_v1  ;;  %v173_v5 = vld [vmem:[%s9261_s17 + $0x8] sm:$0xff]  ;;  %v175_v8 = vld [vmem:[%s9261_s17 + $0x18] sm:$0xff]  ;;  %v206_v10 = vpack.c.bf16 %v174_v7, %v174_v7  ;;  %vm1031_vm13 = vsmask.f32 7440  ;;  %s9221_s22 = smov 32   ;;  %s13342_s16 = scalar_lea.vmem %s13496_s3, %s9004_s14 }
  0x12   : > { %v204_v6 = vpack.c.bf16 %v172_v2, %v172_v2  ;;  %v205_v9 = vpack.c.bf16 %v173_v5, %v173_v5  ;;  %v207_v11 = vpack.c.bf16 %v175_v8, %v175_v8  ;;  %v176_v48 = vld [vmem:[%s9261_s17 + $0x20] sm:$0xff]  ;;  %v177_v49 = vld [vmem:[%s9261_s17 + $0x28] sm:$0xff]  ;;  %v186_v52 = vld [vmem:[%s9261_s17 + $0x70] sm:$0xff]  ;;  %s9222_s23 = smov 16   ;;  %s9223_s24 = smov 4   ;;  %vm3631_vm1 = vcmask 97280  }
  0x13   : > { %v376_v12 = vshrl.u32 %v220_v3, 16  ;;  %v379_v13 = vshll.u32 %v220_v3, 16  ;;  %v384_v14 = vshrl.u32 %v221_v4, 16  ;;  %v387_v15 = vshll.u32 %v221_v4, 16  ;;  %v187_v53 = vld [vmem:[%s9261_s17 + $0x78] sm:$0xff]  ;;  %vm9372_vm11 = vmor %vm1481_vm8, %vm1482_vm9  ;;  %s9224_s25 = smov 28  }
  0x14   : > { %v240_v16 = vshrl.u32 %v204_v6, 16  ;;  %v243_v17 = vshll.u32 %v204_v6, 16  ;;  %v248_v18 = vshrl.u32 %v205_v9, 16  ;;  %v251_v19 = vshll.u32 %v205_v9, 16  ;;  %v682_v2 = vld [vmem:[#allocation2 + $0x8] sm:$0x1]  ;;  %vm9481_vm14 = vmor %vm1030_vm12, %vm1031_vm13 }
  0x15   : > { %v378_v20 = vrot.slane %v376_v12, 7  ;;  %v386_v21 = vrot.slane %v384_v14, 7  ;;  %v257_v23 = vshrl.u32 %v206_v10, 16  ;;  %v260_v24 = vshll.u32 %v206_v10, 16  ;;  %v678_v5 = vld [vmem:[#allocation2] sm:$0xf] }
  0x16   : > { %v242_v27 = vrot.slane %v240_v16, 7  ;;  %v250_v28 = vrot.slane %v248_v18, 7  ;;  %v265_v29 = vshrl.u32 %v207_v11, 16  ;;  %v268_v30 = vshll.u32 %v207_v11, 16 }
  0x17   : > { %v381_v32 = vor.u32 %v379_v13, %v378_v20  ;;  %v382_v33 = vrot.slane %v378_v20, 4  ;;  %v389_v34 = vor.u32 %v387_v15, %v386_v21  ;;  %v391_v35 = vrot.slane %v386_v21, 4  ;;  %v580_v20 = vld [vmem:[#allocation2 + $0x24] sm:$0xf] }
  0x18   : > { %v245_v38 = vor.u32 %v243_v17, %v242_v27  ;;  %v246_v39 = vrot.slane %v242_v27, 4  ;;  %v253_v40 = vor.u32 %v251_v19, %v250_v28  ;;  %v255_v41 = vrot.slane %v250_v28, 4 }
  0x19   : > { %v390_v43 = vsel %vm9277_vm6, %v382_v33, %v389_v34  ;;  %v623_v44 = vsel %vm9271_vm5, %v381_v32, %v622_v22  ;;  %v627_v45 = vsel %vm9283_vm7, %v391_v35, %v626_v26  ;;  %v259_v46 = vrot.slane %v257_v23, 7 }
  0x1a   : > { %624 = vst [vmem:[#allocation2 + $0x6c] sm:$0xf] %v623_v44  ;;  %v564_v50 = vsel %vm9271_vm5, %v245_v38, %v563_v36  ;;  %v267_v51 = vrot.slane %v265_v29, 7  ;;  %v254_v54 = vsel %vm9277_vm6, %v246_v39, %v253_v40  ;;  %v571_v55 = vsel %vm9283_vm7, %v255_v41, %v570_v42 }
  0x1b   : > { %625 = vst.msk [vmem:[#allocation2 + $0x70] sm:$0xf] %vm560_vm2, %v390_v43  ;;  %v262_v56 = vor.u32 %v260_v24, %v259_v46  ;;  %v263_v57 = vrot.slane %v259_v46, 4  ;;  %v208_v60 = vpack.c.bf16 %v176_v48, %v176_v48  ;;  %v209_v61 = vpack.c.bf16 %v177_v49, %v177_v49  ;;  %v584_v43 = vld [vmem:[#allocation2 + $0x2c] sm:$0x1] }
  0x1c   : > { %628 = vst [vmem:[#allocation2 + $0x74] sm:$0x1] %v627_v45  ;;  %v270_v58 = vor.u32 %v268_v30, %v267_v51  ;;  %v272_v62 = vrot.slane %v267_v51, 4  ;;  %v9306_v0 = vpack.c.bf16 %v186_v52, %v186_v52  ;;  %v9308_v1 = vpack.c.bf16 %v187_v53, %v187_v53  ;;  %v615_v49 = vld [vmem:[#allocation2 + $0x60] sm:$0xf] }
  0x1d   : > { %565 = vst [vmem:[#allocation2 + $0xc] sm:$0xf] %v564_v50  ;;  %v574_v63 = vsel %vm9271_vm5, %v262_v56, %v573_v47  ;;  %v274_v3 = vshrl.u32 %v208_v60, 16  ;;  %v282_v6 = vshrl.u32 %v209_v61, 16  ;;  %v277_v10 = vshll.u32 %v208_v60, 16 }
  0x1e   : > { %567 = vst.msk [vmem:[#allocation2 + $0x10] sm:$0xf] %vm560_vm2, %v254_v54  ;;  %v578_v4 = vsel %vm9283_vm7, %v272_v62, %v577_v59  ;;  %v359_v7 = vshrl.u32 %v9306_v0, 16  ;;  %v271_v8 = vsel %vm9277_vm6, %v263_v57, %v270_v58  ;;  %v367_v11 = vshrl.u32 %v9308_v1, 16 }
  0x1f   : > { %572 = vst [vmem:[#allocation2 + $0x14] sm:$0x1] %v571_v55  ;;  %v276_v9 = vrot.slane %v274_v3, 7  ;;  %v683_v14 = vsel %vm9283_vm7, %v272_v62, %v682_v2  ;;  %v679_v16 = vsel %vm9271_vm5, %v262_v56, %v678_v5  ;;  %v284_v17 = vrot.slane %v282_v6, 7 }
  0x20   : > { %575 = vst [vmem:[#allocation2 + $0x18] sm:$0xf] %v574_v63  ;;  %v285_v18 = vshll.u32 %v209_v61, 16  ;;  %v9323_v21 = vrot.slane %v359_v7, 7  ;;  %v362_v22 = vshll.u32 %v9306_v0, 16  ;;  %v370_v23 = vshll.u32 %v9308_v1, 16 }
  0x21   : > { %v702_v12 = vld [vmem:[#allocation2 + $0x6c] sm:$0x2]  ;;  %v810_v13 = vld [vmem:[#allocation2 + $0x6c] sm:$0x1]  ;;  %576 = vst.msk [vmem:[#allocation2 + $0x1c] sm:$0xf] %vm560_vm2, %v271_v8  ;;  %v279_v28 = vor.u32 %v277_v10, %v276_v9 }
  0x22   : > { %v8411_v15 = vrot.slane %v702_v12, 9  ;;  %579 = vst [vmem:[#allocation2 + $0x20] sm:$0x1] %v578_v4  ;;  %v280_v19 = vrot.slane %v276_v9, 4  ;;  %v369_v32 = vrot.slane %v367_v11, 7  ;;  %v287_v36 = vor.u32 %v285_v18, %v284_v17 }
  0x23   : > { %681 = vst.msk [vmem:[#allocation2 + $0x4] sm:$0xf] %vm560_vm2, %v271_v8  ;;  %v289_v38 = vrot.slane %v284_v17, 4  ;;  %v581_v48 = vsel %vm9271_vm5, %v279_v28, %v580_v20  ;;  %v364_v52 = vor.u32 %v362_v22, %v9323_v21  ;;  %v365_v53 = vrot.slane %v9323_v21, 4  ;;  %v619_v61 = vld [vmem:[#allocation2 + $0x68] sm:$0x1] }
  0x24   : > { %v811_v24 = vsel %vm9283_vm7, %v8411_v15, %v810_v13  ;;  %v694_v26 = vld [vmem:[#allocation2 + $0xc] sm:$0x2]  ;;  %v786_v27 = vld [vmem:[#allocation2 + $0xc] sm:$0x1]  ;;  %684 = vst [vmem:[#allocation2 + $0x8] sm:$0x1] %v683_v14  ;;  %v372_v54 = vor.u32 %v370_v23, %v369_v32  ;;  %v288_v59 = vsel %vm9277_vm6, %v280_v19, %v287_v36 }
  0x25   : > { %812 = vst [vmem:[#allocation2 + $0x6c] sm:$0x1] %v811_v24  ;;  %v8403_v29 = vrot.slane %v694_v26, 9  ;;  %v838_v30 = vld [vmem:[#allocation2 + $0x10] sm:$0x8]  ;;  %v374_v60 = vrot.slane %v369_v32, 4  ;;  %v585_v4 = vsel %vm9283_vm7, %v289_v38, %v584_v43  ;;  %v616_v9 = vsel %vm9271_vm5, %v364_v52, %v615_v49 }
  0x26   : > { %680 = vst [vmem:[#allocation2] sm:$0xf] %v679_v16  ;;  %v8421_v34 = vrot.slane %v838_v30, 11  ;;  %v931_v35 = vld [vmem:[#allocation2 + $0x14] sm:$0x1]  ;;  %v373_v13 = vsel %vm9277_vm6, %v365_v53, %v372_v54  ;;  %vm3664_vm3 = vcmask 130048  }
  0x27   : > { %v787_v39 = vsel %vm9283_vm7, %v8403_v29, %v786_v27  ;;  %v695_v40 = vld [vmem:[#allocation2 + $0x18] sm:$0x2]  ;;  %v789_v41 = vld [vmem:[#allocation2 + $0x18] sm:$0x1]  ;;  %v9337_v42 = vld [vmem:[#allocation2 + $0x10] sm:$0xf]  ;;  %v620_v17 = vsel %vm9283_vm7, %v374_v60, %v619_v61 }
  0x28   : > { %788 = vst [vmem:[#allocation2 + $0xc] sm:$0x1] %v787_v39  ;;  %v8404_v44 = vrot.slane %v695_v40, 9  ;;  %v932_v45 = vsel %vm9331_vm10, %v8421_v34, %v931_v35  ;;  %v2028_v46 = vld [vmem:[#allocation2 + $0xc] sm:$0xe]  ;;  %v2094_v47 = vrot.slane %v9337_v42, 5 }
  0x29   : > { %933 = vst [vmem:[#allocation2 + $0x14] sm:$0x1] %v932_v45  ;;  %v8454_v50 = vrot.slane %v2028_v46, 9  ;;  %v9344_v51 = vld [vmem:[#allocation2 + $0x10] sm:$0xf]  ;;  %vm3697_vm4 = vcmask 162816  }
  0x2a   : > { %v790_v55 = vsel %vm9283_vm7, %v8404_v44, %v789_v41  ;;  %v837_v56 = vld [vmem:[#allocation2 + $0x4] sm:$0x8]  ;;  %v1493_v58 = vrot.slane %v9344_v51, 5  ;;  %v2096_v2 = vrot.slane %v2094_v47, 4  ;;  %v1418_v3 = vld [vmem:[#allocation2 + $0xc] sm:$0xe] }
  0x2b   : > { %v9350_v57 = vld [vmem:[#allocation2 + $0x4] sm:$0xf]  ;;  %791 = vst [vmem:[#allocation2 + $0x18] sm:$0x1] %v790_v55  ;;  %v8420_v62 = vrot.slane %v837_v56, 11  ;;  %v8439_v12 = vrot.slane %v1418_v3, 9  ;;  %v2095_v21 = vsel %vm9372_vm11, %v8454_v50, %v2094_v47 }
  0x2c   : > { %v928_v63 = vld [vmem:[#allocation2 + $0x8] sm:$0x1]  ;;  %v1486_v0 = vrot.slane %v9350_v57, 5  ;;  %v9030_v1 = vld [vmem:[#allocation2 + $0x6c] sm:$0xff]  ;;  %582 = vst [vmem:[#allocation2 + $0x24] sm:$0xf] %v581_v48  ;;  %v3213_v36 = vunpack.c.l.b16 %v2095_v21 }
  0x2d   : > { %v929_v5 = vsel %vm9331_vm10, %v8420_v62, %v928_v63  ;;  %v1417_v6 = vld [vmem:[#allocation2] sm:$0xe]  ;;  %v1495_v8 = vrot.slane %v1493_v58, 4  ;;  %583 = vst.msk [vmem:[#allocation2 + $0x28] sm:$0xf] %vm560_vm2, %v288_v59  ;;  %3117 = vrot.lane.b32.xlu0 %v9030_v1, %s9217_s18  ;;  %v1494_v29 = vsel %vm9372_vm11, %v8439_v12, %v1493_v58  ;;  %vm3730_vm8 = vcmask 195584  }
  0x2e   : > { %v9360_v7 = vrot.slane %v1486_v0, 4  ;;  %v9365_v10 = vld [vmem:[#allocation2 + $0x70] sm:$0x8]  ;;  %930 = vst [vmem:[#allocation2 + $0x8] sm:$0x1] %v929_v5  ;;  %v8438_v11 = vrot.slane %v1417_v6, 9  ;;  %v2959_v49 = vunpack.c.l.b16 %v1494_v29 }
  0x2f   : > { %v839_v14 = vld [vmem:[#allocation2 + $0x1c] sm:$0x8]  ;;  %v9022_v15 = vld [vmem:[#allocation2 + $0xc] sm:$0xff]  ;;  %586 = vst [vmem:[#allocation2 + $0x2c] sm:$0x1] %v585_v4  ;;  %v8429_v32 = vrot.slane %v9365_v10, 11 }
  0x30   : > { %v8422_v18 = vrot.slane %v839_v14, 11  ;;  %v934_v19 = vld [vmem:[#allocation2 + $0x20] sm:$0x1]  ;;  %v9378_v20 = vld [vmem:[#allocation2 + $0x14] sm:$0x1]  ;;  %3101 = vrot.lane.b32.xlu1 %v9022_v15, %s9217_s18  ;;  %v1487_v34 = vsel %vm9372_vm11, %v8438_v11, %v1486_v0  ;;  %v1654_v0 = vshll.u32 %v9337_v42, 16 }
  0x31   : > { %v9382_v22 = vld [vmem:[#allocation2 + $0x14] sm:$0x1]  ;;  %617 = vst [vmem:[#allocation2 + $0x60] sm:$0xf] %v616_v9  ;;  %v2097_v23 = vrot.slane %v9378_v20, 5  ;;  %v2957_v55 = vunpack.c.l.b16 %v1487_v34  ;;  %vm13500_vm9 = vcmask 228352  }
  0x32   : > { %v1496_v24 = vrot.slane %v9382_v22, 5  ;;  %618 = vst.msk [vmem:[#allocation2 + $0x64] sm:$0xf] %vm560_vm2, %v373_v13  ;;  %v935_v26 = vsel %vm9331_vm10, %v8422_v18, %v934_v19  ;;  %v9390_v27 = vld [vmem:[#allocation2 + $0x1c] sm:$0xf]  ;;  %v190_v29 = vld [vmem:[%s9261_s17 + $0x90] sm:$0xff] }
  0x33   : > { %v9038_v28 = vld [vmem:[#allocation2 + $0x18] sm:$0xff]  ;;  %621 = vst [vmem:[#allocation2 + $0x68] sm:$0x1] %v620_v17  ;;  %v2098_v35 = vsel %vm9372_vm11, %v2096_v2, %v2097_v23  ;;  %v696_v39 = vld [vmem:[#allocation2 + $0x24] sm:$0x2]  ;;  %v2101_v50 = vrot.slane %v9390_v27, 5 }
  0x34   : > { %v2029_v30 = vld [vmem:[#allocation2 + $0x18] sm:$0xe]  ;;  %v1497_v38 = vsel %vm9372_vm11, %v1495_v8, %v1496_v24  ;;  %v792_v40 = vld [vmem:[#allocation2 + $0x24] sm:$0x1]  ;;  %936 = vst [vmem:[#allocation2 + $0x20] sm:$0x1] %v935_v26  ;;  %3357 = vrot.lane.b32.xlu2 %v9038_v28, %s9218_s19  ;;  %v3214_v41 = vunpack.c.l.b16 %v2098_v35 }
  0x35   : > { %v8405_v43 = vrot.slane %v696_v39, 9  ;;  %v8455_v44 = vrot.slane %v2029_v30, 9  ;;  %v9402_v45 = vld [vmem:[#allocation2 + $0x1c] sm:$0xf]  ;;  %v2637_v46 = vld [vmem:[#allocation2 + $0x18] sm:$0xe]  ;;  %v2960_v56 = vunpack.c.l.b16 %v1497_v38 }
  0x36   : > { %v9404_v47 = vld [vmem:[#allocation2 + $0x8] sm:$0x1]  ;;  %v9023_v48 = vld [vmem:[#allocation2 + $0x18] sm:$0xff]  ;;  %v8470_v52 = vrot.slane %v2637_v46, 9  ;;  %v2703_v53 = vrot.slane %v9402_v45, 5  ;;  %v3245_v60 = vpack.c.b16 %v3214_v41, %v3213_v36  ;;  %v2103_v63 = vrot.slane %v2101_v50, 4 }
  0x37   : > { %v1489_v54 = vrot.slane %v9404_v47, 5  ;;  %v793_v58 = vsel %vm9283_vm7, %v8405_v43, %v792_v40  ;;  %v955_v59 = vld [vmem:[#allocation2 + $0x74] sm:$0x1]  ;;  %v2102_v62 = vsel %vm9372_vm11, %v8455_v44, %v2101_v50  ;;  %v9421_v8 = vld [vmem:[#allocation2 + $0x70] sm:$0xf]  ;;  %v2990_v14 = vpack.c.b16 %v2960_v56, %v2959_v49 }
  0x38   : > { %794 = vst [vmem:[#allocation2 + $0x24] sm:$0x1] %v793_v58  ;;  %v1425_v61 = vld [vmem:[#allocation2 + $0x60] sm:$0xe]  ;;  %v2704_v5 = vsel %vm9372_vm11, %v8470_v52, %v2703_v53  ;;  %v2705_v6 = vrot.slane %v2703_v53, 4  ;;  %3103 = vrot.lane.b32.xlu1 %v9023_v48, %s9217_s18  ;;  %v3215_v17 = vunpack.c.l.b16 %v2102_v62  ;;  %v2150_v38 = vrot.slane %v9421_v8, 5 }
  0x39   : > { %v1490_v1 = vsel %vm9372_vm11, %v9360_v7, %v1489_v54  ;;  %v845_v2 = vld [vmem:[#allocation2 + $0x64] sm:$0x8]  ;;  %v8446_v4 = vrot.slane %v1425_v61, 9  ;;  %v956_v7 = vsel %vm9331_vm10, %v8429_v32, %v955_v59  ;;  %v2036_v13 = vld [vmem:[#allocation2 + $0x6c] sm:$0xe]  ;;  %v3469_v24 = vunpack.c.l.b16 %v2704_v5 }
  0x3a   : > { %v9417_v3 = vld [vmem:[#allocation2 + $0x64] sm:$0xf]  ;;  %v2958_v9 = vunpack.c.l.b16 %v1490_v1  ;;  %v8428_v10 = vrot.slane %v845_v2, 11  ;;  %v952_v11 = vld [vmem:[#allocation2 + $0x68] sm:$0x1]  ;;  %v8462_v35 = vrot.slane %v2036_v13, 9  ;;  %v9446_v43 = vpack.c.bf16 %v190_v29, %v190_v29 }
  0x3b   : > { %v1542_v12 = vrot.slane %v9417_v3, 5  ;;  %v9427_v15 = vld [vmem:[#allocation2 + $0x20] sm:$0x1]  ;;  %957 = vst [vmem:[#allocation2 + $0x74] sm:$0x1] %v956_v7  ;;  %v1664_v7 = vshll.u32 %v9378_v20, 16 }
  0x3c   : > { %v9429_v18 = vld [vmem:[#allocation2 + $0x20] sm:$0x1]  ;;  %v2989_v19 = vpack.c.b16 %v2958_v9, %v2957_v55  ;;  %v953_v21 = vsel %vm9331_vm10, %v8428_v10, %v952_v11  ;;  %v840_v26 = vld [vmem:[#allocation2 + $0x28] sm:$0x8]  ;;  %v937_v28 = vld [vmem:[#allocation2 + $0x2c] sm:$0x1]  ;;  %3261 = vrot.lane.b32.xlu2 %v3245_v60, %s9219_s20  ;;  %v2151_v54 = vsel %vm9372_vm11, %v8462_v35, %v2150_v38 }
  0x3d   : > { %v9435_v23 = vsel %vm9372_vm11, %v8446_v4, %v1542_v12  ;;  %954 = vst [vmem:[#allocation2 + $0x68] sm:$0x1] %v953_v21  ;;  %v1544_v30 = vrot.slane %v1542_v12, 4  ;;  %v2104_v32 = vrot.slane %v9427_v15, 5  ;;  %v2706_v34 = vrot.slane %v9429_v18, 5 }
  0x3e   : > { %3005 = vrot.lane.b32.xlu0 %v2989_v19, %s9220_s21  ;;  %v2973_v36 = vunpack.c.l.b16 %v9435_v23  ;;  %v8423_v39 = vrot.slane %v840_v26, 11  ;;  %v9444_v40 = vld [vmem:[#allocation2 + $0x28] sm:$0xf]  ;;  %v2638_v41 = vld [vmem:[#allocation2 + $0x24] sm:$0xe]  ;;  %v2152_v55 = vrot.slane %v2150_v38, 4  ;;  %v3229_v58 = vunpack.c.l.b16 %v2151_v54 }
  0x3f   : > { %v9039_v44 = vld [vmem:[#allocation2 + $0x24] sm:$0xff]  ;;  %v2105_v46 = vsel %vm9372_vm11, %v2103_v63, %v2104_v32  ;;  %v2707_v48 = vsel %vm9372_vm11, %v2705_v6, %v2706_v34  ;;  %v8471_v49 = vrot.slane %v2638_v41, 9  ;;  %v2710_v50 = vrot.slane %v9444_v40, 5  ;;  %v1596_v56 = vld [vmem:[#allocation2 + $0xc] sm:$0xf] }
  0x40   : > { %v3216_v52 = vunpack.c.l.b16 %v2105_v46  ;;  %v3470_v53 = vunpack.c.l.b16 %v2707_v48  ;;  %v938_v59 = vsel %vm9331_vm10, %v8423_v39, %v937_v28  ;;  %v984_v62 = vld [vmem:[#allocation2 + $0xc] sm:$0xf]  ;;  %3359 = vrot.lane.b32.xlu1 %v9039_v44, %s9218_s19  ;;  %v1645_v6 = vshrl.u32 %v1596_v56, 16  ;;  %v693_v41 = vld [vmem:[#allocation2] sm:$0x2] }
  0x41   : > { %v9459_v60 = vsel %vm9372_vm11, %v8471_v49, %v2710_v50  ;;  %v2712_v61 = vrot.slane %v2710_v50, 4  ;;  %939 = vst [vmem:[#allocation2 + $0x2c] sm:$0x1] %v938_v59  ;;  %v1648_v9 = vshll.u32 %v1596_v56, 16  ;;  %v1656_v11 = vrot.slane %v1654_v0, 5 }
  0x42   : > { %v3246_v63 = vpack.c.b16 %v3216_v52, %v3215_v17  ;;  %v3501_v1 = vpack.c.b16 %v3470_v53, %v3469_v24  ;;  %v9462_v2 = vld [vmem:[#allocation2 + $0x74] sm:$0x1]  ;;  %v3471_v4 = vunpack.c.l.b16 %v9459_v60  ;;  %v1658_v12 = vshrl.u32 %v9337_v42, 16 }
  0x43   : > { %v2153_v5 = vrot.slane %v9462_v2, 5  ;;  %v1058_v13 = vshrl.u32 %v984_v62, 16  ;;  %v1647_v21 = vrot.slane %v1645_v6, 4  ;;  %v1650_v23 = vrot.slane %v1648_v9, 5 }
  0x44   : > { %v9466_v10 = vld [vmem:[#allocation2 + $0x68] sm:$0x1]  ;;  %v1660_v26 = vrot.slane %v1658_v12, 4  ;;  %v1666_v28 = vrot.slane %v1664_v7, 5  ;;  %v1061_v32 = vshll.u32 %v984_v62, 16  ;;  %v1067_v20 = vshll.u32 %v9344_v51, 16 }
  0x45   : > { %v1545_v17 = vrot.slane %v9466_v10, 5  ;;  %v2154_v19 = vsel %vm9372_vm11, %v2152_v55, %v2153_v5  ;;  %v1060_v29 = vrot.slane %v1058_v13, 4  ;;  %v1651_v42 = vor.u32 %v1650_v23, %v1647_v21  ;;  %v783_v55 = vld [vmem:[#allocation2] sm:$0x1]  ;;  %v701_v5 = vld [vmem:[#allocation2 + $0x60] sm:$0x2] }
  0x46   : > { %3007 = vrot.lane.b32.xlu0 %v2990_v14, %s9220_s21  ;;  %v3230_v24 = vunpack.c.l.b16 %v2154_v19  ;;  %v1661_v14 = vor.u32 %v1660_v26, %v1656_v11  ;;  %v1071_v39 = vshrl.u32 %v9344_v51, 16  ;;  %v1069_v48 = vrot.slane %v1067_v20, 5  ;;  %v807_v7 = vld [vmem:[#allocation2 + $0x60] sm:$0x1] }
  0x47   : > { %v1546_v0 = vsel %vm9372_vm11, %v1544_v30, %v1545_v17  ;;  %v1652_v46 = vrot.slane %v1651_v42, 4  ;;  %v1063_v30 = vrot.slane %v1061_v32, 5  ;;  %v1077_v49 = vshll.u32 %v9382_v22, 16 }
  0x48   : > { %v2974_v34 = vunpack.c.l.b16 %v1546_v0  ;;  %v3253_v35 = vpack.c.b16 %v3230_v24, %v3229_v58  ;;  %v9486_v44 = vld [vmem:[#allocation2 + $0x2c] sm:$0x1]  ;;  %3517 = vrot.lane.b32.xlu1 %v3501_v1, %s9221_s22  ;;  %v1662_v53 = vrot.slane %v1661_v14, 4  ;;  %v1073_v54 = vrot.slane %v1071_v39, 4 }
  0x49   : > { %v2713_v52 = vrot.slane %v9486_v44, 5  ;;  %v1657_v51 = vsel %vm9481_vm14, %v1652_v46, %v1656_v11  ;;  %v1064_v56 = vor.u32 %v1063_v30, %v1060_v29  ;;  %v1079_v58 = vrot.slane %v1077_v49, 5 }
  0x4a   : > { %v2997_v50 = vpack.c.b16 %v2974_v34, %v2973_v36  ;;  %v8402_v59 = vrot.slane %v693_v41, 9  ;;  %v1667_v36 = vsel %vm9481_vm14, %v1662_v53, %v1666_v28  ;;  %v3133_v62 = vunpack.c.l.b16 %v1657_v51  ;;  %v1598_v28 = vld [vmem:[#allocation2 + $0x18] sm:$0xf] }
  0x4b   : > { %v2714_v22 = vsel %vm9372_vm11, %v2712_v61, %v2713_v52  ;;  %v1074_v1 = vor.u32 %v1073_v54, %v1069_v48  ;;  %v3134_v9 = vunpack.c.l.b16 %v1667_v36  ;;  %v1065_v12 = vrot.slane %v1064_v56, 4  ;;  %v2205_v53 = vld [vmem:[#allocation2 + $0x18] sm:$0xf] }
  0x4c   : > { %3021 = vrot.lane.b32.xlu2 %v2997_v50, %s9220_s21  ;;  %v3472_v6 = vunpack.c.l.b16 %v2714_v22  ;;  %v784_v11 = vsel %vm9283_vm7, %v8402_v59, %v783_v55  ;;  %v1043_v17 = vshll.u32 %v9350_v57, 16  ;;  %v1047_v61 = vshrl.u32 %v9350_v57, 16 }
  0x4d   : > { %v1075_v13 = vrot.slane %v1074_v1, 4  ;;  %785 = vst [vmem:[#allocation2] sm:$0x1] %v784_v11  ;;  %v1053_v19 = vshll.u32 %v9404_v47, 16  ;;  %v3165_v23 = vpack.c.b16 %v3134_v9, %v3133_v62  ;;  %v1070_v24 = vsel %vm9481_vm14, %v1065_v12, %v1069_v48 }
  0x4e   : > { %3263 = vrot.lane.b32.xlu0 %v3246_v63, %s9219_s20  ;;  %v3502_v21 = vpack.c.b16 %v3472_v6, %v3471_v4  ;;  %v8410_v26 = vrot.slane %v701_v5, 9  ;;  %v2879_v29 = vunpack.c.l.b16 %v1070_v24  ;;  %v9510_v0 = vrot.slane %v1043_v17, 5 }
  0x4f   : > { %v1080_v63 = vsel %vm9481_vm14, %v1075_v13, %v1079_v58  ;;  %v1049_v42 = vrot.slane %v1047_v61, 4  ;;  %v1055_v57 = vrot.slane %v1053_v19, 5  ;;  %v1235_v60 = vshll.u32 %v9417_v3, 16 }
  0x50   : > { %v2880_v32 = vunpack.c.l.b16 %v1080_v63  ;;  %v808_v47 = vsel %vm9283_vm7, %v8410_v26, %v807_v7  ;;  %3181 = vrot.lane.b32.xlu1 %v3165_v23, %s9222_s23  ;;  %v1239_v20 = vshrl.u32 %v9417_v3, 16  ;;  %v1245_v34 = vshll.u32 %v9466_v10, 16 }
  0x51   : > { %v1050_v4 = vor.u32 %v1049_v42, %v9510_v0  ;;  %809 = vst [vmem:[#allocation2 + $0x60] sm:$0x1] %v808_v47  ;;  %v1669_v14 = vshrl.u32 %v1598_v28, 16  ;;  %v9519_v41 = vrot.slane %v1235_v60, 5  ;;  %v1672_v46 = vshll.u32 %v1598_v28, 16 }
  0x52   : > { %v2910_v39 = vpack.c.b16 %v2880_v32, %v2879_v29  ;;  %v1678_v30 = vshll.u32 %v9390_v27, 16  ;;  %v1241_v49 = vrot.slane %v1239_v20, 4  ;;  %v1247_v50 = vrot.slane %v1245_v34, 5 }
  0x53   : > { %v1051_v48 = vrot.slane %v1050_v4, 4  ;;  %v1671_v52 = vrot.slane %v1669_v14, 4  ;;  %v1674_v55 = vrot.slane %v1672_v46, 5  ;;  %v1682_v3 = vshrl.u32 %v9390_v27, 16 }
  0x54   : > { %3277 = vrot.lane.b32.xlu2 %v3253_v35, %s9219_s20  ;;  %v982_v54 = vld [vmem:[#allocation2] sm:$0xf]  ;;  %v1680_v51 = vrot.slane %v1678_v30, 5  ;;  %v1688_v10 = vshll.u32 %v9427_v15, 16  ;;  %v1242_v35 = vor.u32 %v1241_v49, %v9519_v41  ;;  %v2254_v12 = vshrl.u32 %v2205_v53, 16 }
  0x55   : > { %v1034_v56 = vshrl.u32 %v982_v54, 16  ;;  %v1037_v58 = vshll.u32 %v982_v54, 16  ;;  %v1056_v59 = vsel %vm9481_vm14, %v1051_v48, %v1055_v57  ;;  %v1675_v36 = vor.u32 %v1674_v55, %v1671_v52  ;;  %v1612_v57 = vld [vmem:[#allocation2 + $0x6c] sm:$0xf] }
  0x56   : > { %3519 = vrot.lane.b32.xlu0 %v3502_v21, %s9221_s22  ;;  %v2878_v22 = vunpack.c.l.b16 %v1056_v59  ;;  %v1684_v62 = vrot.slane %v1682_v3, 4  ;;  %v1690_v1 = vrot.slane %v1688_v10, 5  ;;  %v1243_v9 = vrot.slane %v1242_v35, 4  ;;  %v2207_v59 = vld [vmem:[#allocation2 + $0x24] sm:$0xf] }
  0x57   : > { %v1036_v5 = vrot.slane %v1034_v56, 4  ;;  %v1039_v6 = vrot.slane %v1037_v58, 5  ;;  %v1676_v11 = vrot.slane %v1675_v36, 4  ;;  %v2257_v7 = vshll.u32 %v2205_v53, 16 }
  0x58   : > { %v998_v27 = vld [vmem:[#allocation2 + $0x60] sm:$0xf]  ;;  %v1685_v15 = vor.u32 %v1684_v62, %v1680_v51  ;;  %v2263_v13 = vshll.u32 %v9402_v45, 16  ;;  %v1248_v21 = vsel %vm9481_vm14, %v1243_v9, %v1247_v50  ;;  %v2256_v28 = vrot.slane %v2254_v12, 4 }
  0x59   : > { %v1040_v17 = vor.u32 %v1039_v6, %v1036_v5  ;;  %v1226_v61 = vshrl.u32 %v998_v27, 16  ;;  %v1229_v19 = vshll.u32 %v998_v27, 16  ;;  %v2894_v23 = vunpack.c.l.b16 %v1248_v21  ;;  %v191_v21 = vld [vmem:[%s9261_s17 + $0x98] sm:$0xff] }
  0x5a   : > { %v1681_v24 = vsel %vm9481_vm14, %v1676_v11, %v1680_v51  ;;  %v1686_v26 = vrot.slane %v1685_v15, 4  ;;  %v2259_v60 = vrot.slane %v2257_v7, 5  ;;  %v2265_v4 = vrot.slane %v2263_v13, 5 }
  0x5b   : > { %v1041_v63 = vrot.slane %v1040_v17, 4  ;;  %v1228_v29 = vrot.slane %v1226_v61, 4  ;;  %v1231_v42 = vrot.slane %v1229_v19, 5  ;;  %v3135_v32 = vunpack.c.l.b16 %v1681_v24 }
  0x5c   : > { %2927 = vrot.lane.b32.xlu2 %v2910_v39, %s9223_s24  ;;  %v1691_v47 = vsel %vm9481_vm14, %v1686_v26, %v1690_v1  ;;  %v2267_v20 = vshrl.u32 %v9402_v45, 16  ;;  %v2273_v39 = vshll.u32 %v9429_v18, 16  ;;  %v2260_v48 = vor.u32 %v2259_v60, %v2256_v28 }
  0x5d   : > { %v1046_v34 = vsel %vm9481_vm14, %v1041_v63, %v9510_v0  ;;  %v1232_v14 = vor.u32 %v1231_v42, %v1228_v29  ;;  %v3136_v46 = vunpack.c.l.b16 %v1691_v47  ;;  %v1837_v50 = vshrl.u32 %v1612_v57, 16  ;;  %v986_v63 = vld [vmem:[#allocation2 + $0x18] sm:$0xf] }
  0x5e   : > { %v2877_v30 = vunpack.c.l.b16 %v1046_v34  ;;  %v2269_v49 = vrot.slane %v2267_v20, 4  ;;  %v2275_v54 = vrot.slane %v2273_v39, 5  ;;  %v1840_v55 = vshll.u32 %v1612_v57, 16 }
  0x5f   : > { %v1233_v52 = vrot.slane %v1232_v14, 4  ;;  %v3166_v53 = vpack.c.b16 %v3136_v46, %v3135_v32  ;;  %v2261_v3 = vrot.slane %v2260_v48, 4  ;;  %v1839_v45 = vrot.slane %v1837_v50, 4 }
  0x60   : > { %v2909_v51 = vpack.c.b16 %v2878_v22, %v2877_v30  ;;  %v2270_v10 = vor.u32 %v2269_v49, %v2265_v4  ;;  %v1842_v56 = vrot.slane %v1840_v55, 5  ;;  %v1846_v58 = vshll.u32 %v9421_v8, 16  ;;  %v987_v49 = vld [vmem:[#allocation2 + $0x1c] sm:$0xf] }
  0x61   : > { %v1238_v0 = vsel %vm9481_vm14, %v1233_v52, %v9519_v41  ;;  %v1850_v18 = vshrl.u32 %v9421_v8, 16  ;;  %v2266_v36 = vsel %vm9481_vm14, %v2261_v3, %v2265_v4  ;;  %v1856_v62 = vshll.u32 %v9462_v2, 16 }
  0x62   : > { %2925 = vrot.lane.b32.xlu0 %v2909_v51, %s9223_s24  ;;  %v2893_v35 = vunpack.c.l.b16 %v1238_v0  ;;  %v2271_v22 = vrot.slane %v2270_v10, 4  ;;  %v3389_v1 = vunpack.c.l.b16 %v2266_v36  ;;  %v1843_v5 = vor.u32 %v1842_v56, %v1839_v45  ;;  %v1016_v0 = vld [vmem:[#allocation2 + $0x20] sm:$0x1] }
  0x63   : > { %v1848_v41 = vrot.slane %v1846_v58, 5  ;;  %v1852_v6 = vrot.slane %v1850_v18, 4  ;;  %v1858_v12 = vrot.slane %v1856_v62, 5  ;;  %v2278_v27 = vshrl.u32 %v2207_v59, 16  ;;  %v633_v58 = vld [vmem:[#allocation2 + $0x80] sm:$0x1] }
  0x64   : > { %3183 = vrot.lane.b32.xlu2 %v3166_v53, %s9222_s23  ;;  %v2917_v9 = vpack.c.b16 %v2894_v23, %v2893_v35  ;;  %v2276_v8 = vsel %vm9481_vm14, %v2271_v22, %v2275_v54  ;;  %v1844_v15 = vrot.slane %v1843_v5, 4  ;;  %v2281_v13 = vshll.u32 %v2207_v59, 16  ;;  %v629_v53 = vld [vmem:[#allocation2 + $0x78] sm:$0xf]  ;;  %v1600_v5 = vld [vmem:[#allocation2 + $0x24] sm:$0xf] }
  0x65   : > { %v3390_v11 = vunpack.c.l.b16 %v2276_v8  ;;  %v1853_v7 = vor.u32 %v1852_v6, %v1848_v41  ;;  %v2280_v2 = vrot.slane %v2278_v27, 4  ;;  %v2287_v17 = vshll.u32 %v9444_v40, 16  ;;  %v1419_v35 = vld [vmem:[#allocation2 + $0x18] sm:$0xe] }
  0x66   : > { %2941 = vrot.lane.b32.xlu1 %v2917_v9, %s9223_s24  ;;  %v2291_v61 = vshrl.u32 %v9444_v40, 16  ;;  %v2297_v19 = vshll.u32 %v9486_v44, 16  ;;  %v1849_v24 = vsel %vm9481_vm14, %v1844_v15, %v1848_v41  ;;  %v2283_v28 = vrot.slane %v2281_v13, 5  ;;  %v9573_v41 = vld [vmem:[#allocation2 + $0x28] sm:$0xf] }
  0x67   : > { %v3421_v23 = vpack.c.b16 %v3390_v11, %v3389_v1  ;;  %v1854_v26 = vrot.slane %v1853_v7, 4  ;;  %v3149_v29 = vunpack.c.l.b16 %v1849_v24  ;;  %v2289_v42 = vrot.slane %v2287_v17, 5 }
  0x68   : > { %v2293_v32 = vrot.slane %v2291_v61, 4  ;;  %v2299_v57 = vrot.slane %v2297_v19, 5  ;;  %v2284_v60 = vor.u32 %v2283_v28, %v2280_v2  ;;  %v223_v4 = vpack.c.bf16 %v191_v21, %v191_v21 }
  0x69   : > { %v1859_v47 = vsel %vm9481_vm14, %v1854_v26, %v1858_v12  ;;  %v393_v40 = vshrl.u32 %v9446_v43, 16  ;;  %v396_v34 = vshll.u32 %v9446_v43, 16  ;;  %v1082_v14 = vshrl.u32 %v986_v63, 16 }
  0x6a   : > { %3437 = vrot.lane.b32.xlu0 %v3421_v23, %s9224_s25  ;;  %v3150_v44 = vunpack.c.l.b16 %v1859_v47  ;;  %v2294_v20 = vor.u32 %v2293_v32, %v2289_v42  ;;  %v2285_v46 = vrot.slane %v2284_v60, 4  ;;  %v401_v30 = vshrl.u32 %v223_v4, 16 }
  0x6b   : > { %v395_v39 = vrot.slane %v393_v40, 7  ;;  %v404_v48 = vshll.u32 %v223_v4, 16  ;;  %v1084_v54 = vrot.slane %v1082_v14, 4  ;;  %v1085_v55 = vshll.u32 %v986_v63, 16  ;;  %v9589_v40 = vld [vmem:[#allocation2 + $0x2c] sm:$0x1] }
  0x6c   : > { %v3173_v50 = vpack.c.b16 %v3150_v44, %v3149_v29  ;;  %v2295_v52 = vrot.slane %v2294_v20, 4  ;;  %v2290_v51 = vsel %vm9481_vm14, %v2285_v46, %v2289_v42  ;;  %v403_v45 = vrot.slane %v401_v30, 7  ;;  %v178_v42 = vld [vmem:[%s9261_s17 + $0x30] sm:$0xff] }
  0x6d   : > { %v398_v3 = vor.u32 %v396_v34, %v395_v39  ;;  %v399_v10 = vrot.slane %v395_v39, 4  ;;  %v3391_v56 = vunpack.c.l.b16 %v2290_v51  ;;  %v1087_v18 = vrot.slane %v1085_v55, 5  ;;  %v179_v34 = vld [vmem:[%s9261_s17 + $0x38] sm:$0xff] }
  0x6e   : > { %3197 = vrot.lane.b32.xlu1 %v3173_v50, %s9222_s23  ;;  %v2300_v43 = vsel %vm9481_vm14, %v2295_v52, %v2299_v57  ;;  %v1091_v59 = vshll.u32 %v987_v49, 16  ;;  %v406_v22 = vor.u32 %v404_v48, %v403_v45  ;;  %v408_v62 = vrot.slane %v403_v45, 4 }
  0x6f   : > { %v3392_v36 = vunpack.c.l.b16 %v2300_v43  ;;  %v630_v1 = vsel %vm9271_vm5, %v398_v3, %v629_v53  ;;  %v1088_v6 = vor.u32 %v1087_v18, %v1084_v54  ;;  %v1095_v8 = vshrl.u32 %v987_v49, 16 }
  0x70   : > { %631 = vst [vmem:[#allocation2 + $0x78] sm:$0xf] %v630_v1  ;;  %v1093_v9 = vrot.slane %v1091_v59, 5  ;;  %v1101_v12 = vshll.u32 %v1016_v0, 16  ;;  %v407_v11 = vsel %vm9277_vm6, %v399_v10, %v406_v22  ;;  %v634_v15 = vsel %vm9283_vm7, %v408_v62, %v633_v58  ;;  %v2030_v1 = vld [vmem:[#allocation2 + $0x24] sm:$0xe] }
  0x71   : > { %v3422_v27 = vpack.c.b16 %v3392_v36, %v3391_v56  ;;  %v8440_v7 = vrot.slane %v1419_v35, 9  ;;  %632 = vst.msk [vmem:[#allocation2 + $0x7c] sm:$0xf] %vm560_vm2, %v407_v11  ;;  %v1089_v13 = vrot.slane %v1088_v6, 4  ;;  %v1097_v2 = vrot.slane %v1095_v8, 4 }
  0x72   : > { %v1103_v17 = vrot.slane %v1101_v12, 5  ;;  %v1500_v61 = vrot.slane %v987_v49, 5  ;;  %635 = vst [vmem:[#allocation2 + $0x80] sm:$0x1] %v634_v15  ;;  %v1503_v19 = vrot.slane %v1016_v0, 5  ;;  %v1693_v21 = vshrl.u32 %v1600_v5, 16 }
  0x73   : > { %3439 = vrot.lane.b32.xlu2 %v3422_v27, %s9224_s25  ;;  %v1696_v23 = vshll.u32 %v1600_v5, 16  ;;  %v1702_v24 = vshll.u32 %v9573_v41, 16  ;;  %v1094_v26 = vsel %vm9481_vm14, %v1089_v13, %v1093_v9  ;;  %v1098_v28 = vor.u32 %v1097_v2, %v1093_v9 }
  0x74   : > { %v1501_v63 = vsel %vm9372_vm11, %v8440_v7, %v1500_v61  ;;  %v1502_v29 = vrot.slane %v1500_v61, 4  ;;  %v2881_v32 = vunpack.c.l.b16 %v1094_v26  ;;  %v1695_v57 = vrot.slane %v1693_v21, 4  ;;  %v192_v61 = vld [vmem:[%s9261_s17 + $0xa0] sm:$0xff] }
  0x75   : > { %v1698_v47 = vrot.slane %v1696_v23, 5  ;;  %v1099_v60 = vrot.slane %v1098_v28, 4  ;;  %v1704_v44 = vrot.slane %v1702_v24, 5  ;;  %v1706_v20 = vshrl.u32 %v9573_v41, 16 }
  0x76   : > { %v1504_v4 = vsel %vm9372_vm11, %v1502_v29, %v1503_v19  ;;  %v2961_v39 = vunpack.c.l.b16 %v1501_v63  ;;  %v210_v50 = vpack.c.bf16 %v178_v42, %v178_v42  ;;  %v1712_v0 = vshll.u32 %v9589_v40, 16  ;;  %v587_v63 = vld [vmem:[#allocation2 + $0x30] sm:$0xf] }
  0x77   : > { %v703_v14 = vld [vmem:[#allocation2 + $0x78] sm:$0x2]  ;;  %v813_v46 = vld [vmem:[#allocation2 + $0x78] sm:$0x1]  ;;  %v2962_v30 = vunpack.c.l.b16 %v1504_v4  ;;  %v1699_v49 = vor.u32 %v1698_v47, %v1695_v57  ;;  %v1104_v53 = vsel %vm9481_vm14, %v1099_v60, %v1103_v17  ;;  %v1708_v55 = vrot.slane %v1706_v20, 4 }
  0x78   : > { %v2645_v48 = vld [vmem:[#allocation2 + $0x78] sm:$0xe]  ;;  %v8412_v52 = vrot.slane %v703_v14, 9  ;;  %v2882_v51 = vunpack.c.l.b16 %v1104_v53  ;;  %v847_v3 = vld [vmem:[#allocation2 + $0x7c] sm:$0x8]  ;;  %v211_v43 = vpack.c.bf16 %v179_v34, %v179_v34  ;;  %v1714_v9 = vrot.slane %v1712_v0, 5 }
  0x79   : > { %v8478_v54 = vrot.slane %v2645_v48, 9  ;;  %v2222_v10 = vld [vmem:[#allocation2 + $0x7c] sm:$0xf]  ;;  %v1700_v45 = vrot.slane %v1699_v49, 4  ;;  %v8430_v58 = vrot.slane %v847_v3, 11  ;;  %v1709_v35 = vor.u32 %v1708_v55, %v1704_v44 }
  0x7a   : > { %v814_v56 = vsel %vm9283_vm7, %v8412_v52, %v813_v46  ;;  %v958_v18 = vld [vmem:[#allocation2 + $0x80] sm:$0x1]  ;;  %v2759_v59 = vrot.slane %v2222_v10, 5  ;;  %v2911_v36 = vpack.c.b16 %v2882_v51, %v2881_v32  ;;  %v2108_v8 = vrot.slane %v9573_v41, 5  ;;  %v591_v60 = vld [vmem:[#allocation2 + $0x38] sm:$0x1] }
  0x7b   : > { %815 = vst [vmem:[#allocation2 + $0x78] sm:$0x1] %v814_v56  ;;  %v959_v22 = vsel %vm9331_vm10, %v8430_v58, %v958_v18  ;;  %v1705_v5 = vsel %vm9481_vm14, %v1700_v45, %v1704_v44  ;;  %v1710_v6 = vrot.slane %v1709_v35, 4  ;;  %v9608_v12 = vpack.c.b16 %v2962_v30, %v2961_v39  ;;  %v9619_v39 = vld [vmem:[#allocation2 + $0x70] sm:$0xf]  ;;  %v193_v51 = vld [vmem:[%s9261_s17 + $0xa8] sm:$0xff] }
  0x7c   : > { %v9602_v62 = vsel %vm9372_vm11, %v8478_v54, %v2759_v59  ;;  %2929 = vrot.lane.b32.xlu1 %v2911_v36, %s9223_s24  ;;  %960 = vst [vmem:[#allocation2 + $0x80] sm:$0x1] %v959_v22  ;;  %v291_v27 = vshrl.u32 %v210_v50, 16  ;;  %v294_v11 = vshll.u32 %v210_v50, 16  ;;  %v299_v15 = vshrl.u32 %v211_v43, 16 }
  0x7d   : > { %v2761_v7 = vrot.slane %v2759_v59, 4  ;;  %v3485_v13 = vunpack.c.l.b16 %v9602_v62  ;;  %v8456_v2 = vrot.slane %v2030_v1, 9  ;;  %v302_v17 = vshll.u32 %v211_v43, 16  ;;  %v9634_v0 = vld [vmem:[#allocation2 + $0x74] sm:$0x1] }
  0x7e   : > { %v9612_v19 = vunpack.c.l.b16 %v1705_v5  ;;  %v293_v21 = vrot.slane %v291_v27, 7  ;;  %v301_v23 = vrot.slane %v299_v15, 7  ;;  %v2455_v24 = vshll.u32 %v2222_v10, 16  ;;  %v1426_v59 = vld [vmem:[#allocation2 + $0x6c] sm:$0xe] }
  0x7f   : > { %v1715_v26 = vsel %vm9481_vm14, %v1710_v6, %v1714_v9  ;;  %v2110_v41 = vrot.slane %v2108_v8, 4  ;;  %v2111_v28 = vrot.slane %v9589_v40, 5  ;;  %v2459_v29 = vshrl.u32 %v2222_v10, 16 }
  0x80   : > { %v296_v32 = vor.u32 %v294_v11, %v293_v21  ;;  %v297_v57 = vrot.slane %v293_v21, 4  ;;  %v304_v47 = vor.u32 %v302_v17, %v301_v23  ;;  %v9617_v44 = vpack.c.bf16 %v192_v61, %v192_v61 }
  0x81   : > { %v306_v20 = vrot.slane %v301_v23, 4  ;;  %v2457_v46 = vrot.slane %v2455_v24, 5  ;;  %v2109_v30 = vsel %vm9372_vm11, %v8456_v2, %v2108_v8  ;;  %v2461_v50 = vrot.slane %v2459_v29, 4 }
  0x82   : > { %v9046_v42 = vld [vmem:[#allocation2 + $0x78] sm:$0xff]  ;;  %v305_v48 = vsel %vm9277_vm6, %v297_v57, %v304_v47  ;;  %v588_v49 = vsel %vm9271_vm5, %v296_v32, %v587_v63  ;;  %v2112_v3 = vsel %vm9372_vm11, %v2110_v41, %v2111_v28  ;;  %v1549_v43 = vrot.slane %v9619_v39, 5 }
  0x83   : > { %v2221_v4 = vld [vmem:[#allocation2 + $0x78] sm:$0xf]  ;;  %3373 = vrot.lane.b32.xlu0 %v9046_v42, %s9218_s19  ;;  %v2245_v40 = vld [vmem:[#allocation2 + $0x80] sm:$0x1]  ;;  %589 = vst [vmem:[#allocation2 + $0x30] sm:$0xf] %v588_v49  ;;  %v592_v53 = vsel %vm9283_vm7, %v306_v20, %v591_v60  ;;  %v2462_v10 = vor.u32 %v2461_v50, %v2457_v46  ;;  %v9639_v58 = vunpack.c.l.b16 %v1715_v26  ;;  %v3217_v22 = vunpack.c.l.b16 %v2109_v30 }
  0x84   : > { %v2446_v34 = vshrl.u32 %v2221_v4, 16  ;;  %v2449_v14 = vshll.u32 %v2221_v4, 16  ;;  %v2762_v52 = vrot.slane %v2245_v40, 5  ;;  %590 = vst.msk [vmem:[#allocation2 + $0x34] sm:$0xf] %vm560_vm2, %v305_v48  ;;  %v2465_v45 = vshll.u32 %v2245_v40, 16 }
  0x85   : > { %593 = vst [vmem:[#allocation2 + $0x38] sm:$0x1] %v592_v53  ;;  %v410_v35 = vshrl.u32 %v9617_v44, 16  ;;  %v2463_v62 = vrot.slane %v2462_v10, 4  ;;  %v3218_v5 = vunpack.c.l.b16 %v2112_v3  ;;  %v8447_v9 = vrot.slane %v1426_v59, 9  ;;  %v180_v40 = vld [vmem:[%s9261_s17 + $0x40] sm:$0xff] }
  0x86   : > { %v2448_v54 = vrot.slane %v2446_v34, 4  ;;  %v2451_v55 = vrot.slane %v2449_v14, 5  ;;  %v2763_v56 = vsel %vm9372_vm11, %v2761_v7, %v2762_v52  ;;  %v2467_v1 = vrot.slane %v2465_v45, 5  ;;  %v9655_v41 = vld [vmem:[#allocation2 + $0x7c] sm:$0xf]  ;;  %v181_v52 = vld [vmem:[%s9261_s17 + $0x48] sm:$0xff] }
  0x87   : > { %v3486_v36 = vunpack.c.l.b16 %v2763_v56  ;;  %v9642_v8 = vpack.c.bf16 %v193_v51, %v193_v51  ;;  %v1551_v15 = vrot.slane %v1549_v43, 4  ;;  %v1552_v7 = vrot.slane %v9634_v0, 5  ;;  %v640_v45 = vld [vmem:[#allocation2 + $0x8c] sm:$0x1] }
  0x88   : > { %v2452_v18 = vor.u32 %v2451_v55, %v2448_v54  ;;  %v2468_v11 = vsel %vm9481_vm14, %v2463_v62, %v2467_v1  ;;  %v9649_v61 = vrot.slane %v410_v35, 7  ;;  %v413_v21 = vshll.u32 %v9617_v44, 16  ;;  %v2037_v54 = vld [vmem:[#allocation2 + $0x78] sm:$0xe] }
  0x89   : > { %v3509_v27 = vpack.c.b16 %v3486_v36, %v3485_v13  ;;  %v3406_v17 = vunpack.c.l.b16 %v2468_v11  ;;  %v3167_v28 = vpack.c.b16 %v9639_v58, %v9612_v19  ;;  %v3247_v63 = vpack.c.b16 %v3218_v5, %v3217_v22  ;;  %v9684_v22 = vld [vmem:[#allocation2 + $0x28] sm:$0xf] }
  0x8a   : > { %v2453_v6 = vrot.slane %v2452_v18, 4  ;;  %v697_v13 = vld [vmem:[#allocation2 + $0x30] sm:$0x2]  ;;  %v795_v23 = vld [vmem:[#allocation2 + $0x30] sm:$0x1]  ;;  %v1550_v57 = vsel %vm9372_vm11, %v8447_v9, %v1549_v43  ;;  %v418_v44 = vshrl.u32 %v9642_v8, 16  ;;  %v1553_v19 = vsel %vm9372_vm11, %v1551_v15, %v1552_v7 }
  0x8b   : > { %3009 = vrot.lane.b32.xlu0 %v9608_v12, %s9220_s21  ;;  %3533 = vrot.lane.b32.xlu1 %v3509_v27, %s9221_s22  ;;  %v2639_v24 = vld [vmem:[#allocation2 + $0x30] sm:$0xe]  ;;  %v8406_v29 = vrot.slane %v697_v13, 9  ;;  %v841_v42 = vld [vmem:[#allocation2 + $0x34] sm:$0x8]  ;;  %v415_v14 = vor.u32 %v413_v21, %v9649_v61  ;;  %v2157_v55 = vrot.slane %v9655_v41, 5  ;;  %v2975_v51 = vunpack.c.l.b16 %v1550_v57 }
  0x8c   : > { %v2458_v2 = vsel %vm9481_vm14, %v2453_v6, %v2457_v46  ;;  %v2210_v32 = vld [vmem:[#allocation2 + $0x34] sm:$0xf]  ;;  %v8424_v12 = vrot.slane %v841_v42, 11  ;;  %v940_v47 = vld [vmem:[#allocation2 + $0x38] sm:$0x1]  ;;  %v8472_v50 = vrot.slane %v2639_v24, 9  ;;  %v2976_v3 = vunpack.c.l.b16 %v1553_v19 }
  0x8d   : > { %v3405_v26 = vunpack.c.l.b16 %v2458_v2  ;;  %v2311_v60 = vshll.u32 %v2210_v32, 16  ;;  %v2315_v4 = vshrl.u32 %v2210_v32, 16  ;;  %v796_v20 = vsel %vm9283_vm7, %v8406_v29, %v795_v23  ;;  %v636_v46 = vld [vmem:[#allocation2 + $0x84] sm:$0xf]  ;;  %v1000_v43 = vld [vmem:[#allocation2 + $0x6c] sm:$0xf] }
  0x8e   : > { %797 = vst [vmem:[#allocation2 + $0x30] sm:$0x1] %v796_v20  ;;  %v941_v30 = vsel %vm9331_vm10, %v8424_v12, %v940_v47  ;;  %v2717_v53 = vrot.slane %v2210_v32, 5  ;;  %v420_v10 = vrot.slane %v418_v44, 7  ;;  %v9675_v56 = vpack.c.bf16 %v180_v40, %v180_v40  ;;  %v9678_v18 = vld [vmem:[#allocation2 + $0x80] sm:$0x1] }
  0x8f   : > { %v3429_v34 = vpack.c.b16 %v3406_v17, %v3405_v26  ;;  %v9670_v48 = vrot.slane %v2311_v60, 5  ;;  %v2317_v49 = vrot.slane %v2315_v4, 4  ;;  %942 = vst [vmem:[#allocation2 + $0x38] sm:$0x1] %v941_v30  ;;  %v416_v59 = vrot.slane %v9649_v61, 4  ;;  %v9024_v27 = vld [vmem:[#allocation2 + $0x24] sm:$0xff]  ;;  %v9711_v30 = vpop.permute.xlu2 %3357 }
  0x90   : > { %v421_v35 = vshll.u32 %v9642_v8, 16  ;;  %v637_v36 = vsel %vm9271_vm5, %v415_v14, %v636_v46  ;;  %v2718_v62 = vsel %vm9372_vm11, %v8472_v50, %v2717_v53  ;;  %v8463_v1 = vrot.slane %v2037_v54, 9  ;;  %v1420_v15 = vld [vmem:[#allocation2 + $0x24] sm:$0xe]  ;;  %v9695_v61 = vld [vmem:[#allocation2 + $0x2c] sm:$0x1] }
  0x91   : > { %3453 = vrot.lane.b32.xlu2 %v3429_v34, %s9224_s25  ;;  %v2318_v58 = vor.u32 %v2317_v49, %v9670_v48  ;;  %v425_v5 = vrot.slane %v420_v10, 4  ;;  %638 = vst [vmem:[#allocation2 + $0x84] sm:$0xf] %v637_v36  ;;  %v9690_v6 = vpack.c.bf16 %v181_v52, %v181_v52  ;;  %v2719_v9 = vrot.slane %v2717_v53, 4 }
  0x92   : > { %v2159_v8 = vrot.slane %v2157_v55, 4  ;;  %v423_v11 = vor.u32 %v421_v35, %v420_v10  ;;  %v1250_v7 = vshrl.u32 %v1000_v43, 16  ;;  %v2160_v2 = vrot.slane %v9678_v18, 5 }
  0x93   : > { %3185 = vrot.lane.b32.xlu0 %v3167_v28, %s9222_s23  ;;  %3265 = vrot.lane.b32.xlu1 %v3247_v63, %s9219_s20  ;;  %v641_v17 = vsel %vm9283_vm7, %v425_v5, %v640_v45  ;;  %v1507_v21 = vrot.slane %v9684_v22, 5  ;;  %v1253_v13 = vshll.u32 %v1000_v43, 16  ;;  %v2319_v24 = vrot.slane %v2318_v58, 4 }
  0x94   : > { %v9698_v26 = vpack.c.b16 %v2976_v3, %v2975_v51  ;;  %v424_v28 = vsel %vm9277_vm6, %v416_v59, %v423_v11  ;;  %642 = vst [vmem:[#allocation2 + $0x8c] sm:$0x1] %v641_v17  ;;  %v8441_v63 = vrot.slane %v1420_v15, 9  ;;  %v3473_v57 = vunpack.c.l.b16 %v2718_v62 }
  0x95   : > { %v2209_v23 = vld [vmem:[#allocation2 + $0x30] sm:$0xf]  ;;  %v9704_v12 = vsel %vm9372_vm11, %v8463_v1, %v2157_v55  ;;  %639 = vst.msk [vmem:[#allocation2 + $0x88] sm:$0xf] %vm560_vm2, %v424_v28  ;;  %v1510_v4 = vrot.slane %v9695_v61, 5  ;;  %v1252_v44 = vrot.slane %v1250_v7, 4  ;;  %v9715_v49 = vsel %vm9372_vm11, %v2159_v8, %v2160_v2 }
  0x96   : > { %v2239_v29 = vld [vmem:[#allocation2 + $0x38] sm:$0x1]  ;;  %v2302_v42 = vshrl.u32 %v2209_v23, 16  ;;  %v2305_v32 = vshll.u32 %v2209_v23, 16  ;;  %v1509_v19 = vrot.slane %v1507_v21, 4  ;;  %v1255_v14 = vrot.slane %v1253_v13, 5 }
  0x97   : > { %v2321_v47 = vshll.u32 %v2239_v29, 16  ;;  %v2720_v60 = vrot.slane %v2239_v29, 5  ;;  %v1259_v53 = vshll.u32 %v9619_v39, 16  ;;  %v9720_v3 = vsel %vm9372_vm11, %v8441_v63, %v1507_v21  ;;  %v9040_v43 = vld [vmem:[#allocation2 + $0x30] sm:$0xff] }
  0x98   : > { %v2304_v20 = vrot.slane %v2302_v42, 4  ;;  %v2307_v34 = vrot.slane %v2305_v32, 5  ;;  %v704_v50 = vld [vmem:[#allocation2 + $0x84] sm:$0x2]  ;;  %v816_v52 = vld [vmem:[#allocation2 + $0x84] sm:$0x1]  ;;  %v3231_v45 = vunpack.c.l.b16 %v9704_v12  ;;  %v1256_v58 = vor.u32 %v1255_v14, %v1252_v44 }
  0x99   : > { %3105 = vrot.lane.b32.xlu2 %v9024_v27, %s9217_s18  ;;  %v2323_v46 = vrot.slane %v2321_v47, 5  ;;  %v2721_v40 = vsel %vm9372_vm11, %v2719_v9, %v2720_v60  ;;  %v8413_v51 = vrot.slane %v704_v50, 9  ;;  %v1263_v59 = vshrl.u32 %v9619_v39, 16  ;;  %v1602_v9 = vld [vmem:[#allocation2 + $0x30] sm:$0xf]  ;;  %v9757_v50 = vpop.permute.xlu2 %3261 }
  0x9a   : > { %v2308_v54 = vor.u32 %v2307_v34, %v2304_v20  ;;  %v3474_v55 = vunpack.c.l.b16 %v2721_v40  ;;  %v1261_v5 = vrot.slane %v1259_v53, 5  ;;  %v3232_v8 = vunpack.c.l.b16 %v9715_v49  ;;  %v9744_v29 = vld [vmem:[#allocation2 + $0x34] sm:$0xf]  ;;  %v1614_v34 = vld [vmem:[#allocation2 + $0x78] sm:$0xf] }
  0x9b   : > { %v2324_v10 = vsel %vm9481_vm14, %v2319_v24, %v2323_v46  ;;  %v817_v62 = vsel %vm9283_vm7, %v8413_v51, %v816_v52  ;;  %v961_v1 = vld [vmem:[#allocation2 + $0x8c] sm:$0x1]  ;;  %v9733_v7 = vsel %vm9372_vm11, %v1509_v19, %v1510_v4  ;;  %v2963_v39 = vunpack.c.l.b16 %v9720_v3 }
  0x9c   : > { %v2309_v35 = vrot.slane %v2308_v54, 4  ;;  %v3503_v36 = vpack.c.b16 %v3474_v55, %v3473_v57  ;;  %v3394_v27 = vunpack.c.l.b16 %v2324_v10  ;;  %818 = vst [vmem:[#allocation2 + $0x84] sm:$0x1] %v817_v62  ;;  %v848_v11 = vld [vmem:[#allocation2 + $0x88] sm:$0x8]  ;;  %v1257_v24 = vrot.slane %v1256_v58, 4 }
  0x9d   : > { %v9729_v15 = vld [vmem:[#allocation2 + $0x88] sm:$0xf]  ;;  %v8431_v17 = vrot.slane %v848_v11, 11  ;;  %v1265_v28 = vrot.slane %v1263_v59, 4  ;;  %v1269_v63 = vshll.u32 %v9634_v0, 16  ;;  %v1717_v47 = vshrl.u32 %v1602_v9, 16 }
  0x9e   : > { %v2314_v2 = vsel %vm9481_vm14, %v2309_v35, %v9670_v48  ;;  %3521 = vrot.lane.b32.xlu1 %v3503_v36, %s9221_s22  ;;  %v2479_v21 = vshll.u32 %v9729_v15, 16  ;;  %v2483_v13 = vshrl.u32 %v9729_v15, 16  ;;  %v9750_v57 = vld [vmem:[#allocation2 + $0x38] sm:$0x1]  ;;  %v1262_v4 = vsel %vm9481_vm14, %v1257_v24, %v1261_v5 }
  0x9f   : > { %v3393_v23 = vunpack.c.l.b16 %v2314_v2  ;;  %v962_v42 = vsel %vm9331_vm10, %v8431_v17, %v961_v1  ;;  %v1266_v44 = vor.u32 %v1265_v28, %v1261_v5  ;;  %v1271_v20 = vrot.slane %v1269_v63, 5  ;;  %v9031_v0 = vld [vmem:[#allocation2 + $0x78] sm:$0xff] }
  0xa0   : > { %v9748_v48 = vrot.slane %v2479_v21, 5  ;;  %v2485_v32 = vrot.slane %v2483_v13, 4  ;;  %963 = vst [vmem:[#allocation2 + $0x8c] sm:$0x1] %v962_v42  ;;  %v2964_v14 = vunpack.c.l.b16 %v9733_v7  ;;  %v1719_v46 = vrot.slane %v1717_v47, 4 }
  0xa1   : > { %3361 = vrot.lane.b32.xlu2 %v9040_v43, %s9218_s19  ;;  %v3423_v60 = vpack.c.b16 %v3394_v27, %v3393_v23  ;;  %v1720_v40 = vshll.u32 %v1602_v9, 16  ;;  %v1267_v52 = vrot.slane %v1266_v44, 4  ;;  %v1726_v53 = vshll.u32 %v9744_v29, 16 }
  0xa2   : > { %v2486_v19 = vor.u32 %v2485_v32, %v9748_v48  ;;  %v1730_v54 = vshrl.u32 %v9744_v29, 16  ;;  %v1736_v55 = vshll.u32 %v9750_v57, 16  ;;  %v2895_v43 = vunpack.c.l.b16 %v1262_v4 }
  0xa3   : > { %3441 = vrot.lane.b32.xlu0 %v3423_v60, %s9224_s25  ;;  %v2223_v51 = vld [vmem:[#allocation2 + $0x84] sm:$0xf]  ;;  %v1722_v58 = vrot.slane %v1720_v40, 5  ;;  %v1861_v59 = vshrl.u32 %v1614_v34, 16  ;;  %v1272_v62 = vsel %vm9481_vm14, %v1267_v52, %v1271_v20  ;;  %v1728_v1 = vrot.slane %v1726_v53, 5 }
  0xa4   : > { %v2487_v10 = vrot.slane %v2486_v19, 4  ;;  %v2470_v35 = vshrl.u32 %v2223_v51, 16  ;;  %v2473_v36 = vshll.u32 %v2223_v51, 16  ;;  %v2896_v5 = vunpack.c.l.b16 %v1272_v62  ;;  %v9047_v4 = vld [vmem:[#allocation2 + $0x84] sm:$0xff] }
  0xa5   : > { %v1723_v9 = vor.u32 %v1722_v58, %v1719_v46  ;;  %v1732_v27 = vrot.slane %v1730_v54, 4  ;;  %v1738_v11 = vrot.slane %v1736_v55, 5  ;;  %v1863_v17 = vrot.slane %v1861_v59, 4  ;;  %v988_v51 = vld [vmem:[#allocation2 + $0x24] sm:$0xf] }
  0xa6   : > { %3119 = vrot.lane.b32.xlu1 %v9031_v0, %s9217_s18  ;;  %v2472_v7 = vrot.slane %v2470_v35, 4  ;;  %v2475_v2 = vrot.slane %v2473_v36, 5  ;;  %v1864_v21 = vshll.u32 %v1614_v34, 16  ;;  %v2918_v23 = vpack.c.b16 %v2896_v5, %v2895_v43  ;;  %v9790_v49 = vpop.permute.xlu2 %3021 }
  0xa7   : > { %v9765_v13 = vld [vmem:[#allocation2 + $0x8c] sm:$0x1]  ;;  %v1724_v24 = vrot.slane %v1723_v9, 4  ;;  %v1733_v28 = vor.u32 %v1732_v27, %v1728_v1  ;;  %v1870_v63 = vshll.u32 %v9655_v41, 16  ;;  %v1874_v60 = vshrl.u32 %v9655_v41, 16 }
  0xa8   : > { %v2476_v42 = vor.u32 %v2475_v2, %v2472_v7  ;;  %v2489_v32 = vshll.u32 %v9765_v13, 16  ;;  %v1866_v47 = vrot.slane %v1864_v21, 5  ;;  %v1880_v0 = vshll.u32 %v9678_v18, 16  ;;  %v598_v2 = vld [vmem:[#allocation2 + $0x44] sm:$0x1] }
  0xa9   : > { %2943 = vrot.lane.b32.xlu2 %v2918_v23, %s9223_s24  ;;  %v1729_v44 = vsel %vm9481_vm14, %v1724_v24, %v1728_v1  ;;  %v1734_v20 = vrot.slane %v1733_v28, 4  ;;  %v1872_v34 = vrot.slane %v1870_v63, 5  ;;  %v3254_v19 = vpack.c.b16 %v3232_v8, %v3231_v45  ;;  %v594_v1 = vld [vmem:[#allocation2 + $0x3c] sm:$0xf]  ;;  %v9807_v24 = vpop.permute.xlu0 %3117 }
  0xaa   : > { %v2477_v46 = vrot.slane %v2476_v42, 4  ;;  %v2491_v41 = vrot.slane %v2489_v32, 5  ;;  %v1867_v40 = vor.u32 %v1866_v47, %v1863_v17  ;;  %v2992_v52 = vpack.c.b16 %v2964_v14, %v2963_v39  ;;  %v1002_v42 = vld [vmem:[#allocation2 + $0x78] sm:$0xf]  ;;  %v9811_v32 = vld [vmem:[#allocation2 + $0x7c] sm:$0xf] }
  0xab   : > { %3023 = vrot.lane.b32.xlu0 %v9698_v26, %s9220_s21  ;;  %v1739_v53 = vsel %vm9481_vm14, %v1734_v20, %v1738_v11  ;;  %v1876_v54 = vrot.slane %v1874_v60, 4  ;;  %v308_v18 = vshrl.u32 %v9675_v56, 16  ;;  %v9792_v45 = vunpack.c.l.b16 %v1729_v44 }
  0xac   : > { %v2482_v26 = vsel %vm9481_vm14, %v2477_v46, %v9748_v48  ;;  %v2492_v12 = vsel %vm9481_vm14, %v2487_v10, %v2491_v41  ;;  %v1868_v8 = vrot.slane %v1867_v40, 4  ;;  %v9795_v3 = vunpack.c.l.b16 %v1739_v53  ;;  %v9822_v40 = vld [vmem:[#allocation2 + $0x80] sm:$0x1] }
  0xad   : > { %v1877_v39 = vor.u32 %v1876_v54, %v1872_v34  ;;  %v1882_v14 = vrot.slane %v1880_v0, 5  ;;  %v310_v55 = vrot.slane %v308_v18, 7  ;;  %v3407_v43 = vunpack.c.l.b16 %v2482_v26 }
  0xae   : > { %3375 = vrot.lane.b32.xlu1 %v9047_v4, %s9218_s19  ;;  %v1873_v48 = vsel %vm9481_vm14, %v1868_v8, %v1872_v34  ;;  %v311_v58 = vshll.u32 %v9675_v56, 16  ;;  %v316_v10 = vshrl.u32 %v9690_v6, 16  ;;  %v3408_v59 = vunpack.c.l.b16 %v2492_v12  ;;  %v9825_v18 = vpop.permute.xlu2 %3277 }
  0xaf   : > { %v1878_v35 = vrot.slane %v1877_v39, 4  ;;  %v3151_v36 = vunpack.c.l.b16 %v1873_v48  ;;  %v314_v62 = vrot.slane %v310_v55, 4  ;;  %v319_v27 = vshll.u32 %v9690_v6, 16 }
  0xb0   : > { %v313_v5 = vor.u32 %v311_v58, %v310_v55  ;;  %v318_v9 = vrot.slane %v316_v10, 7  ;;  %v1106_v11 = vshrl.u32 %v988_v51, 16  ;;  %v1109_v17 = vshll.u32 %v988_v51, 16  ;;  %v1427_v55 = vld [vmem:[#allocation2 + $0x78] sm:$0xe] }
  0xb1   : > { %v1883_v7 = vsel %vm9481_vm14, %v1878_v35, %v1882_v14  ;;  %v1115_v21 = vshll.u32 %v9684_v22, 16  ;;  %v1119_v56 = vshrl.u32 %v9684_v22, 16  ;;  %v9813_v22 = vpop.permute.xlu1 %3101  ;;  %v1274_v53 = vshrl.u32 %v1002_v42, 16 }
  0xb2   : > { %v3152_v23 = vunpack.c.l.b16 %v1883_v7  ;;  %v321_v28 = vor.u32 %v319_v27, %v318_v9  ;;  %v323_v63 = vrot.slane %v318_v9, 4  ;;  %v595_v6 = vsel %vm9271_vm5, %v313_v5, %v594_v1 }
  0xb3   : > { %3279 = vrot.lane.b32.xlu0 %v3254_v19, %s9219_s20  ;;  %596 = vst [vmem:[#allocation2 + $0x3c] sm:$0xf] %v595_v6  ;;  %v1108_v47 = vrot.slane %v1106_v11, 4  ;;  %v1111_v60 = vrot.slane %v1109_v17, 5  ;;  %v1117_v4 = vrot.slane %v1115_v21, 5  ;;  %v1121_v44 = vrot.slane %v1119_v56, 4 }
  0xb4   : > { %v3174_v20 = vpack.c.b16 %v3152_v23, %v3151_v36  ;;  %v322_v34 = vsel %vm9277_vm6, %v314_v62, %v321_v28  ;;  %v599_v0 = vsel %vm9283_vm7, %v323_v63, %v598_v2  ;;  %v1125_v19 = vshll.u32 %v9695_v61, 16  ;;  %v2646_v17 = vld [vmem:[#allocation2 + $0x84] sm:$0xe]  ;;  %v9840_v28 = vpop.permute.xlu0 %3005 }
  0xb5   : > { %597 = vst.msk [vmem:[#allocation2 + $0x40] sm:$0xf] %vm560_vm2, %v322_v34  ;;  %v1112_v46 = vor.u32 %v1111_v60, %v1108_v47  ;;  %v1122_v41 = vor.u32 %v1121_v44, %v1117_v4  ;;  %v3430_v54 = vpack.c.b16 %v3408_v59, %v3407_v43  ;;  %v1277_v12 = vshll.u32 %v1002_v42, 16  ;;  %v9007_v44 = vld [vmem:[#allocation2 + $0xc] sm:$0xff] }
  0xb6   : > { %3011 = vrot.lane.b32.xlu1 %v2992_v52, %s9220_s21  ;;  %3199 = vrot.lane.b32.xlu2 %v3174_v20, %s9222_s23  ;;  %600 = vst [vmem:[#allocation2 + $0x44] sm:$0x1] %v599_v0  ;;  %v1127_v26 = vrot.slane %v1125_v19, 5  ;;  %v1283_v8 = vshll.u32 %v9811_v32, 16  ;;  %v1276_v52 = vrot.slane %v1274_v53, 4  ;;  %v1287_v14 = vshrl.u32 %v9811_v32, 16 }
  0xb7   : > { %v1113_v61 = vrot.slane %v1112_v46, 4  ;;  %v1123_v39 = vrot.slane %v1122_v41, 4  ;;  %v3168_v51 = vpack.c.b16 %v9795_v3, %v9792_v45  ;;  %v1279_v48 = vrot.slane %v1277_v12, 5  ;;  %v9025_v20 = vld [vmem:[#allocation2 + $0x30] sm:$0xff] }
  0xb8   : > { %v1285_v43 = vrot.slane %v1283_v8, 5  ;;  %v1293_v58 = vshll.u32 %v9822_v40, 16  ;;  %v1289_v35 = vrot.slane %v1287_v14, 4  ;;  %v1556_v36 = vrot.slane %v9811_v32, 5 }
  0xb9   : > { %v1118_v10 = vsel %vm9481_vm14, %v1113_v61, %v1117_v4  ;;  %v1128_v59 = vsel %vm9481_vm14, %v1123_v39, %v1127_v26  ;;  %v1280_v45 = vor.u32 %v1279_v48, %v1276_v52  ;;  %v8448_v3 = vrot.slane %v1427_v55, 9  ;;  %v9849_v34 = vpop.permute.xlu1 %3103  ;;  %v2928_v26 = vpop.permute.xlu2 %2927  ;;  %v1616_v55 = vld [vmem:[#allocation2 + $0x84] sm:$0xf] }
  0xba   : > { %v698_v62 = vld [vmem:[#allocation2 + $0x3c] sm:$0x2]  ;;  %v798_v1 = vld [vmem:[#allocation2 + $0x3c] sm:$0x1]  ;;  %v2883_v5 = vunpack.c.l.b16 %v1118_v10  ;;  %v2884_v9 = vunpack.c.l.b16 %v1128_v59  ;;  %v1290_v11 = vor.u32 %v1289_v35, %v1285_v43  ;;  %v1295_v7 = vrot.slane %v1293_v58, 5 }
  0xbb   : > { %3455 = vrot.lane.b32.xlu0 %v3430_v54, %s9224_s25  ;;  %v8407_v27 = vrot.slane %v698_v62, 9  ;;  %v1558_v2 = vrot.slane %v1556_v36, 4  ;;  %v1281_v63 = vrot.slane %v1280_v45, 4  ;;  %v1559_v6 = vrot.slane %v9822_v40, 5  ;;  %v1617_v10 = vld [vmem:[#allocation2 + $0x88] sm:$0xf] }
  0xbc   : > { %v842_v21 = vld [vmem:[#allocation2 + $0x40] sm:$0x8]  ;;  %v2912_v23 = vpack.c.b16 %v2884_v9, %v2883_v5  ;;  %v1291_v0 = vrot.slane %v1290_v11, 4  ;;  %v9853_v19 = vsel %vm9372_vm11, %v8448_v3, %v1556_v36  ;;  %v8479_v46 = vrot.slane %v2646_v17, 9  ;;  %v1638_v36 = vld [vmem:[#allocation2 + $0x8c] sm:$0x1] }
  0xbd   : > { %v9838_v56 = vld [vmem:[#allocation2 + $0x40] sm:$0xf]  ;;  %v799_v42 = vsel %vm9283_vm7, %v8407_v27, %v798_v1  ;;  %v8425_v32 = vrot.slane %v842_v21, 11  ;;  %v943_v47 = vld [vmem:[#allocation2 + $0x44] sm:$0x1]  ;;  %v1286_v54 = vsel %vm9481_vm14, %v1281_v63, %v1285_v43  ;;  %v9865_v8 = vsel %vm9372_vm11, %v1558_v2, %v1559_v6  ;;  %v3008_v21 = vpop.permute.xlu0 %3007 }
  0xbe   : > { %3187 = vrot.lane.b32.xlu1 %v3168_v51, %s9222_s23  ;;  %v2335_v60 = vshll.u32 %v9838_v56, 16  ;;  %v2339_v4 = vshrl.u32 %v9838_v56, 16  ;;  %800 = vst [vmem:[#allocation2 + $0x3c] sm:$0x1] %v799_v42  ;;  %2931 = vrot.lane.b32.xlu2 %v2912_v23, %s9223_s24  ;;  %v1296_v12 = vsel %vm9481_vm14, %v1291_v0, %v1295_v7  ;;  %v2766_v61 = vrot.slane %v9729_v15, 5 }
  0xbf   : > { %v944_v41 = vsel %vm9331_vm10, %v8425_v32, %v943_v47  ;;  %v2769_v39 = vrot.slane %v9765_v13, 5  ;;  %v3555_v14 = vsel %vm3549_vm15, %v9007_v44, %v2928_v26  ;;  %v9872_v51 = vunpack.c.l.b16 %v1286_v54  ;;  %v2038_v11 = vld [vmem:[#allocation2 + $0x84] sm:$0xe] }
  0xc0   : > { %v9857_v40 = vrot.slane %v2335_v60, 5  ;;  %v2341_v53 = vrot.slane %v2339_v4, 4  ;;  %945 = vst [vmem:[#allocation2 + $0x44] sm:$0x1] %v944_v41  ;;  %v2977_v48 = vunpack.c.l.b16 %v9853_v19  ;;  %v2767_v43 = vsel %vm9372_vm11, %v8479_v46, %v2766_v61  ;;  %v195_v19 = vld [vmem:[%s9261_s17 + $0xb8] sm:$0xff] }
  0xc1   : > { %v2768_v58 = vrot.slane %v2766_v61, 4  ;;  %v9877_v59 = vunpack.c.l.b16 %v1296_v12  ;;  %v2978_v15 = vunpack.c.l.b16 %v9865_v8  ;;  %v3487_v13 = vunpack.c.l.b16 %v2767_v43  ;;  %v9885_v0 = vpop.permute.xlu1 %3359  ;;  %v2031_v12 = vld [vmem:[#allocation2 + $0x30] sm:$0xe] }
  0xc2   : > { %v2342_v52 = vor.u32 %v2341_v53, %v9857_v40  ;;  %v1885_v62 = vshrl.u32 %v1616_v55, 16  ;;  %v1888_v1 = vshll.u32 %v1616_v55, 16  ;;  %v1894_v3 = vshll.u32 %v1617_v10, 16 }
  0xc3   : > { %3107 = vrot.lane.b32.xlu0 %v9025_v20, %s9217_s18  ;;  %v2770_v35 = vsel %vm9372_vm11, %v2768_v58, %v2769_v39  ;;  %v1898_v27 = vshrl.u32 %v1617_v10, 16  ;;  %v1904_v60 = vshll.u32 %v1638_v36, 16  ;;  %v3602_v41 = vsel %vm3598_vm0, %v3555_v14, %v3008_v21  ;;  %v990_v21 = vld [vmem:[#allocation2 + $0x30] sm:$0xf] }
  0xc4   : > { %v2343_v9 = vrot.slane %v2342_v52, 4  ;;  %v3488_v45 = vunpack.c.l.b16 %v2770_v35  ;;  %v1887_v23 = vrot.slane %v1885_v62, 4  ;;  %v1890_v63 = vrot.slane %v1888_v1, 5 }
  0xc5   : > { %v2211_v5 = vld [vmem:[#allocation2 + $0x3c] sm:$0xf]  ;;  %v1896_v32 = vrot.slane %v1894_v3, 5  ;;  %v1900_v47 = vrot.slane %v1898_v27, 4  ;;  %v1906_v54 = vrot.slane %v1904_v60, 5  ;;  %v2164_v26 = vrot.slane %v1617_v10, 5 }
  0xc6   : > { %v9041_v7 = vld [vmem:[#allocation2 + $0x3c] sm:$0xff]  ;;  %v2326_v2 = vshrl.u32 %v2211_v5, 16  ;;  %v2329_v17 = vshll.u32 %v2211_v5, 16  ;;  %v3510_v42 = vpack.c.b16 %v3488_v45, %v3487_v13  ;;  %v1891_v46 = vor.u32 %v1890_v63, %v1887_v23 }
  0xc7   : > { %v9882_v6 = vld [vmem:[#allocation2 + $0x44] sm:$0x1]  ;;  %v1901_v53 = vor.u32 %v1900_v47, %v1896_v32  ;;  %v8464_v55 = vrot.slane %v2038_v11, 9  ;;  %v2919_v43 = vpack.c.b16 %v9877_v59, %v9872_v51  ;;  %v2166_v13 = vrot.slane %v2164_v26, 4  ;;  %v194_v51 = vld [vmem:[%s9261_s17 + $0xb0] sm:$0xff] }
  0xc8   : > { %v2328_v4 = vrot.slane %v2326_v2, 4  ;;  %v2331_v44 = vrot.slane %v2329_v17, 5  ;;  %v2345_v20 = vshll.u32 %v9882_v6, 16  ;;  %3535 = vrot.lane.b32.xlu2 %v3510_v42, %s9221_s22  ;;  %v1892_v52 = vrot.slane %v1891_v46, 4 }
  0xc9   : > { %v1902_v58 = vrot.slane %v1901_v53, 4  ;;  %v2167_v35 = vrot.slane %v1638_v36, 5  ;;  %v8457_v1 = vrot.slane %v2031_v12, 9  ;;  %v3635_v45 = vsel %vm3631_vm1, %v3602_v41, %v9849_v34  ;;  %v3184_v36 = vpop.permute.xlu2 %3183 }
  0xca   : > { %v2332_v61 = vor.u32 %v2331_v44, %v2328_v4  ;;  %v2347_v39 = vrot.slane %v2345_v20, 5  ;;  %v1897_v10 = vsel %vm9481_vm14, %v1892_v52, %v1896_v32  ;;  %v2115_v11 = vrot.slane %v9744_v29, 5  ;;  %v9920_v29 = vld [vmem:[#allocation2 + $0x34] sm:$0xf]  ;;  %v9926_v4 = vld [vmem:[#allocation2 + $0x38] sm:$0x1]  ;;  %v9935_v44 = vpop.permute.xlu1 %3517 }
  0xcb   : > { %3363 = vrot.lane.b32.xlu0 %v9041_v7, %s9218_s19  ;;  %v1907_v3 = vsel %vm9481_vm14, %v1902_v58, %v1906_v54  ;;  %v3153_v27 = vunpack.c.l.b16 %v1897_v10  ;;  %v9911_v2 = vsel %vm9372_vm11, %v2166_v13, %v2167_v35  ;;  %v2118_v17 = vrot.slane %v9750_v57, 5  ;;  %v2640_v35 = vld [vmem:[#allocation2 + $0x3c] sm:$0xe] }
  0xcc   : > { %v2333_v62 = vrot.slane %v2332_v61, 4  ;;  %v2348_v14 = vsel %vm9481_vm14, %v2343_v9, %v2347_v39  ;;  %v9906_v9 = vsel %vm9372_vm11, %v8464_v55, %v2164_v26  ;;  %v3154_v34 = vunpack.c.l.b16 %v1907_v3 }
  0xcd   : > { %v3396_v5 = vunpack.c.l.b16 %v2348_v14  ;;  %v2116_v23 = vsel %vm9372_vm11, %v8457_v1, %v2115_v11  ;;  %v2117_v63 = vrot.slane %v2115_v11, 4  ;;  %v226_v42 = vpack.c.bf16 %v194_v51, %v194_v51  ;;  %v643_v11 = vld [vmem:[#allocation2 + $0x90] sm:$0xf] }
  0xce   : > { %v2338_v59 = vsel %vm9481_vm14, %v2333_v62, %v9857_v40  ;;  %v2999_v40 = vpack.c.b16 %v2978_v15, %v2977_v48  ;;  %v9923_v47 = vsel %vm3664_vm3, %v3635_v45, %v3184_v36  ;;  %v3233_v60 = vunpack.c.l.b16 %v9906_v9  ;;  %v9933_v15 = vpop.permute.xlu0 %3263  ;;  %v9983_v9 = vld [vmem:[#allocation2 + $0x40] sm:$0xf] }
  0xcf   : > { %v3395_v7 = vunpack.c.l.b16 %v2338_v59  ;;  %v3219_v57 = vunpack.c.l.b16 %v2116_v23  ;;  %v3234_v8 = vunpack.c.l.b16 %v9911_v2  ;;  %v2119_v48 = vsel %vm9372_vm11, %v2117_v63, %v2118_v17  ;;  %v647_v63 = vld [vmem:[#allocation2 + $0x98] sm:$0x1] }
  0xd0   : > { %v1130_v20 = vshrl.u32 %v990_v21, 16  ;;  %v1133_v46 = vshll.u32 %v990_v21, 16  ;;  %v3175_v41 = vpack.c.b16 %v3154_v34, %v3153_v27  ;;  %v3220_v53 = vunpack.c.l.b16 %v2119_v48 }
  0xd1   : > { %v3424_v32 = vpack.c.b16 %v3396_v5, %v3395_v7  ;;  %v1139_v54 = vshll.u32 %v9920_v29, 16  ;;  %v1143_v26 = vshrl.u32 %v9920_v29, 16  ;;  %v1149_v39 = vshll.u32 %v9926_v4, 16  ;;  %v182_v5 = vld [vmem:[%s9261_s17 + $0x50] sm:$0xff] }
  0xd2   : > { %v1132_v12 = vrot.slane %v1130_v20, 4  ;;  %v1135_v61 = vrot.slane %v1133_v46, 5  ;;  %v227_v52 = vpack.c.bf16 %v195_v19, %v195_v19  ;;  %v3248_v55 = vpack.c.b16 %v3220_v53, %v3219_v57  ;;  %v183_v20 = vld [vmem:[%s9261_s17 + $0x58] sm:$0xff] }
  0xd3   : > { %2945 = vrot.lane.b32.xlu0 %v2919_v43, %s9223_s24  ;;  %3443 = vrot.lane.b32.xlu1 %v3424_v32, %s9224_s25  ;;  %v1141_v43 = vrot.slane %v1139_v54, 5  ;;  %v1145_v58 = vrot.slane %v1143_v26, 4  ;;  %v427_v13 = vshrl.u32 %v226_v42, 16  ;;  %v1151_v14 = vrot.slane %v1149_v39, 5 }
  0xd4   : > { %v1136_v62 = vor.u32 %v1135_v61, %v1132_v12  ;;  %v430_v10 = vshll.u32 %v226_v42, 16  ;;  %v435_v1 = vshrl.u32 %v227_v52, 16  ;;  %3267 = vrot.lane.b32.xlu2 %v3248_v55, %s9219_s20  ;;  %v438_v51 = vshll.u32 %v227_v52, 16 }
  0xd5   : > { %v1146_v45 = vor.u32 %v1145_v58, %v1141_v43  ;;  %v429_v3 = vrot.slane %v427_v13, 7  ;;  %v8473_v59 = vrot.slane %v2640_v35, 9  ;;  %v2724_v7 = vrot.slane %v9838_v56, 5 }
  0xd6   : > { %v1137_v36 = vrot.slane %v1136_v62, 4  ;;  %v437_v27 = vrot.slane %v435_v1, 7  ;;  %v2727_v34 = vrot.slane %v9882_v6, 5  ;;  %v214_v42 = vpack.c.bf16 %v182_v5, %v182_v5  ;;  %v9960_v61 = vpop.permute.xlu0 %3519 }
  0xd7   : > { %v1147_v17 = vrot.slane %v1146_v45, 4  ;;  %v432_v21 = vor.u32 %v430_v10, %v429_v3  ;;  %v433_v23 = vrot.slane %v429_v3, 4  ;;  %v2725_v48 = vsel %vm9372_vm11, %v8473_v59, %v2724_v7  ;;  %v3833_v45 = vld [vmem:[%s13494_s1 + $0x10] sm:$0x3] }
  0xd8   : > { %v1142_v32 = vsel %vm9481_vm14, %v1137_v36, %v1141_v43  ;;  %v440_v57 = vor.u32 %v438_v51, %v437_v27  ;;  %v442_v19 = vrot.slane %v437_v27, 4  ;;  %v2726_v53 = vrot.slane %v2724_v7, 4 }
  0xd9   : > { %v1152_v56 = vsel %vm9481_vm14, %v1147_v17, %v1151_v14  ;;  %v2885_v6 = vunpack.c.l.b16 %v1142_v32  ;;  %v644_v46 = vsel %vm9271_vm5, %v432_v21, %v643_v11  ;;  %v3475_v12 = vunpack.c.l.b16 %v2725_v48 }
  0xda   : > { %v441_v54 = vsel %vm9277_vm6, %v433_v23, %v440_v57  ;;  %645 = vst [vmem:[#allocation2 + $0x90] sm:$0xf] %v644_v46  ;;  %v648_v26 = vsel %vm9283_vm7, %v442_v19, %v647_v63  ;;  %v2728_v39 = vsel %vm9372_vm11, %v2726_v53, %v2727_v34  ;;  %v215_v52 = vpack.c.bf16 %v183_v20, %v183_v20  ;;  %v9032_v46 = vld [vmem:[#allocation2 + $0x84] sm:$0xff] }
  0xdb   : > { %3201 = vrot.lane.b32.xlu0 %v3175_v41, %s9222_s23  ;;  %3025 = vrot.lane.b32.xlu1 %v2999_v40, %s9220_s21  ;;  %v2886_v41 = vunpack.c.l.b16 %v1152_v56  ;;  %v9962_v40 = vpop.permute.xlu1 %3181  ;;  %646 = vst.msk [vmem:[#allocation2 + $0x94] sm:$0xf] %vm560_vm2, %v441_v54  ;;  %v325_v55 = vshrl.u32 %v214_v42, 16  ;;  %v328_v43 = vshll.u32 %v214_v42, 16  ;;  %v3701_v58 = vsel %vm3697_vm4, %v9923_v47, %v9933_v15  ;;  %v3440_v15 = vpop.permute.xlu2 %3439  ;;  %v9006_v53 = vld [vmem:[#allocation2] sm:$0xff] }
  0xdc   : > { %649 = vst [vmem:[#allocation2 + $0x98] sm:$0x1] %v648_v26  ;;  %v3476_v35 = vunpack.c.l.b16 %v2728_v39  ;;  %v3255_v62 = vpack.c.b16 %v3234_v8, %v3233_v60  ;;  %v333_v10 = vshrl.u32 %v215_v52, 16  ;;  %v336_v1 = vshll.u32 %v215_v52, 16  ;;  %v601_v60 = vld [vmem:[#allocation2 + $0x48] sm:$0xf] }
  0xdd   : > { %v2913_v13 = vpack.c.b16 %v2886_v41, %v2885_v6  ;;  %v327_v14 = vrot.slane %v325_v55, 7  ;;  %v3734_v47 = vsel %vm3730_vm8, %v3701_v58, %v9885_v0  ;;  %v3843_v3 = vunpack.c.l.b16 %v3833_v45  ;;  %v9014_v41 = vld [vmem:[#allocation2 + $0x60] sm:$0xff]  ;;  %v2032_v45 = vld [vmem:[#allocation2 + $0x3c] sm:$0xe] }
  0xde   : > { %v3504_v5 = vpack.c.b16 %v3476_v35, %v3475_v12  ;;  %v9979_v59 = vrot.slane %v333_v10, 7  ;;  %vm13499_vm12 = vcmask 261120   ;;  %v3767_v11 = vsel %vm13500_vm9, %v3734_v47, %v3440_v15  ;;  %v2926_v63 = vpop.permute.xlu0 %2925  ;;  %v605_v35 = vld [vmem:[#allocation2 + $0x50] sm:$0x1] }
  0xdf   : > { %v330_v51 = vor.u32 %v328_v43, %v327_v14  ;;  %v331_v2 = vrot.slane %v327_v14, 4  ;;  %v3846_v23 = vpack.c.b16 %v3843_v3, %v3843_v3  ;;  %vm13497_vm13 = vcmask 1041408  }
  0xe0   : > { %3523 = vrot.lane.b32.xlu2 %v3504_v5, %s9221_s22  ;;  %v338_v0 = vor.u32 %v336_v1, %v9979_v59  ;;  %v2122_v54 = vrot.slane %v9983_v9, 5  ;;  %v3552_v58 = vsel %vm3549_vm15, %v9006_v53, %v2926_v63  ;;  %v9055_v5 = vld [vmem:[%s13494_s1 + $0x8] sm:$0xff]  ;;  %v8458_v3 = vrot.slane %v2032_v45, 9 }
  0xe1   : > { %v705_v8 = vld [vmem:[#allocation2 + $0x90] sm:$0x2]  ;;  %v819_v36 = vld [vmem:[#allocation2 + $0x90] sm:$0x1]  ;;  %v602_v20 = vsel %vm9271_vm5, %v330_v51, %v601_v60  ;;  %v3884_v43 = vsel %vm13497_vm13, %v3846_v23, 0  ;;  %v3600_v10 = vsel %vm3598_vm0, %v3552_v58, %v9840_v28  ;;  %v340_v60 = vrot.slane %v9979_v59, 4 }
  0xe2   : > { %v2647_v27 = vld [vmem:[#allocation2 + $0x90] sm:$0xe]  ;;  %v8414_v7 = vrot.slane %v705_v8, 9  ;;  %v849_v34 = vld [vmem:[#allocation2 + $0x94] sm:$0x8]  ;;  %v339_v52 = vsel %vm9277_vm6, %v331_v2, %v338_v0  ;;  %3891 = vmatpush.bf16.msra.mxu0 %v3884_v43  ;;  %v2124_v47 = vrot.slane %v2122_v54, 4  ;;  %9106 = vmatpush.bf16.msra.mxu2 %v3884_v43 }
  0xe3   : > { %2933 = vrot.lane.b32.xlu0 %v2913_v13, %s9223_s24  ;;  %3281 = vrot.lane.b32.xlu1 %v3255_v62, %s9219_s20  ;;  %v2226_v17 = vld [vmem:[#allocation2 + $0x94] sm:$0xf]  ;;  %v8480_v21 = vrot.slane %v2647_v27, 9  ;;  %v2942_v42 = vpop.permute.xlu1 %2941  ;;  %v8432_v32 = vrot.slane %v849_v34, 11  ;;  %v964_v57 = vld [vmem:[#allocation2 + $0x98] sm:$0x1]  ;;  %v10009_v62 = vsel %vm13499_vm12, %v3767_v11, %v9960_v61  ;;  %v3633_v61 = vsel %vm3631_vm1, %v3600_v10, %v9813_v22 }
  0xe4   : > { %v2503_v19 = vshll.u32 %v2226_v17, 16  ;;  %v2507_v48 = vshrl.u32 %v2226_v17, 16  ;;  %v820_v56 = vsel %vm9283_vm7, %v8414_v7, %v819_v36  ;;  %v2773_v6 = vrot.slane %v2226_v17, 5  ;;  %v10005_v13 = vld [vmem:[#allocation2 + $0x44] sm:$0x1] }
  0xe5   : > { %821 = vst [vmem:[#allocation2 + $0x90] sm:$0x1] %v820_v56  ;;  %v965_v26 = vsel %vm9331_vm10, %v8432_v32, %v964_v57  ;;  %v3576_v1 = vsel %vm3549_vm15, %v9014_v41, %v2942_v42  ;;  %v2125_v51 = vrot.slane %v10005_v13, 5  ;;  %v3666_v8 = vsel %vm3664_vm3, %v3633_v61, %v9962_v40  ;;  %v10030_v36 = vld [vmem:[#allocation2 + $0x84] sm:$0xf] }
  0xe6   : > { %v9995_v12 = vrot.slane %v2503_v19, 5  ;;  %v2509_v39 = vrot.slane %v2507_v48, 4  ;;  %966 = vst [vmem:[#allocation2 + $0x98] sm:$0x1] %v965_v26  ;;  %v10001_v55 = vsel %vm9372_vm11, %v8480_v21, %v2773_v6  ;;  %v2775_v15 = vrot.slane %v2773_v6, 4  ;;  %v3438_v0 = vpop.permute.xlu0 %3437  ;;  %3892 = vmatpush.bf16.msra.mxu0 %v9055_v5  ;;  %v9054_v17 = vld [vmem:[%s13494_s1] sm:$0xff]  ;;  %9107 = vmatpush.bf16.msra.mxu2 %v9055_v5 }
  0xe7   : > { %603 = vst [vmem:[#allocation2 + $0x48] sm:$0xf] %v602_v20  ;;  %v3616_v2 = vsel %vm3598_vm0, %v3576_v1, %v9790_v49  ;;  %v2123_v22 = vsel %vm9372_vm11, %v8458_v3, %v2122_v54  ;;  %v2126_v27 = vsel %vm9372_vm11, %v2124_v47, %v2125_v51  ;;  %v3699_v11 = vsel %vm3697_vm4, %v3666_v8, %v9757_v50  ;;  %v196_v49 = vld [vmem:[%s9261_s17 + $0xc0] sm:$0xff] }
  0xe8   : > { %v2510_v14 = vor.u32 %v2509_v39, %v9995_v12  ;;  %3121 = vrot.lane.b32.xlu2 %v9032_v46, %s9217_s18  ;;  %604 = vst.msk [vmem:[#allocation2 + $0x4c] sm:$0xf] %vm560_vm2, %v339_v52  ;;  %vm13498_vm13 = vcmask 293888   ;;  %v3221_v59 = vunpack.c.l.b16 %v2123_v22  ;;  %v3222_v34 = vunpack.c.l.b16 %v2126_v27  ;;  %v197_v39 = vld [vmem:[%s9261_s17 + $0xc8] sm:$0xff] }
  0xe9   : > { %v606_v40 = vsel %vm9283_vm7, %v340_v60, %v605_v35  ;;  %v3732_v21 = vsel %vm3730_vm8, %v3699_v11, %v9711_v30  ;;  %v3489_v63 = vunpack.c.l.b16 %v10001_v55  ;;  %v3649_v32 = vsel %vm3631_vm1, %v3616_v2, %v9807_v24  ;;  %v10052_v30 = vld [vmem:[#allocation2 + $0x88] sm:$0xf]  ;;  %v10070_v2 = vld [vmem:[#allocation2 + $0x8c] sm:$0x1] }
  0xea   : > { %v10023_v28 = vrot.slane %v2510_v14, 4  ;;  %607 = vst [vmem:[#allocation2 + $0x50] sm:$0x1] %v606_v40  ;;  %v3765_v42 = vsel %vm13500_vm9, %v3732_v21, %v3438_v0  ;;  %v1298_v57 = vshrl.u32 %v10030_v36, 16  ;;  %v10054_v6 = vpack.c.bf16 %v196_v49, %v196_v49  ;;  %3893 = vmatpush.bf16.msra.mxu0 %v9054_v17  ;;  %9108 = vmatpush.bf16.msra.mxu2 %v9054_v17 }
  0xeb   : > { %v3198_v7 = vpop.permute.xlu1 %3197  ;;  %v10056_v41 = vpack.c.b16 %v3222_v34, %v3221_v59  ;;  %v3798_v24 = vsel %vm13499_vm12, %v3765_v42, %v9935_v44  ;;  %v1307_v8 = vshll.u32 %v10052_v30, 16  ;;  %v1311_v11 = vshrl.u32 %v10052_v30, 16 }
  0xec   : > { %v2225_v23 = vld [vmem:[#allocation2 + $0x90] sm:$0xf]  ;;  %v3682_v56 = vsel %vm3664_vm3, %v3649_v32, %v3198_v7  ;;  %v1300_v35 = vrot.slane %v1298_v57, 4  ;;  %v10080_v49 = vpack.c.bf16 %v197_v39, %v197_v39  ;;  %v1317_v57 = vshll.u32 %v10070_v2, 16 }
  0xed   : > { %v9048_v50 = vld [vmem:[#allocation2 + $0x90] sm:$0xff]  ;;  %v2247_v19 = vld [vmem:[#allocation2 + $0x98] sm:$0x1]  ;;  %v2494_v48 = vshrl.u32 %v2225_v23, 16  ;;  %v2497_v20 = vshll.u32 %v2225_v23, 16  ;;  %v3715_v44 = vsel %vm3697_vm4, %v3682_v56, %v9825_v18  ;;  %8686 = vmatmul.msk.bf16.vlgmr.msra.gmra.mxu0 %vm13498_vm13, %v3798_v24  ;;  %v1301_v18 = vshll.u32 %v10030_v36, 16 }
  0xee   : > { %v2513_v46 = vshll.u32 %v2247_v19, 16  ;;  %v2776_v53 = vrot.slane %v2247_v19, 5  ;;  %v699_v54 = vld [vmem:[#allocation2 + $0x48] sm:$0x2]  ;;  %v801_v26 = vld [vmem:[#allocation2 + $0x48] sm:$0x1] }
  0xef   : > { %v2496_v52 = vrot.slane %v2494_v48, 4  ;;  %v2499_v55 = vrot.slane %v2497_v20, 5  ;;  %v8408_v43 = vrot.slane %v699_v54, 9  ;;  %v843_v58 = vld [vmem:[#allocation2 + $0x4c] sm:$0x8]  ;;  %v1303_v40 = vrot.slane %v1301_v18, 5 }
  0xf0   : > { %v2515_v14 = vrot.slane %v2513_v46, 5  ;;  %v2777_v10 = vsel %vm9372_vm11, %v2775_v15, %v2776_v53  ;;  %3377 = vrot.lane.b32.xlu2 %v9048_v50, %s9218_s19  ;;  %v8426_v1 = vrot.slane %v843_v58, 11  ;;  %v10064_v5 = vld [vmem:[#allocation2 + $0x4c] sm:$0xf]  ;;  %v2641_v45 = vld [vmem:[#allocation2 + $0x48] sm:$0xe] }
  0xf1   : > { %v2500_v47 = vor.u32 %v2499_v55, %v2496_v52  ;;  %v3490_v61 = vunpack.c.l.b16 %v2777_v10  ;;  %v802_v3 = vsel %vm9283_vm7, %v8408_v43, %v801_v26  ;;  %v8474_v51 = vrot.slane %v2641_v45, 9  ;;  %v946_v0 = vld [vmem:[#allocation2 + $0x50] sm:$0x1]  ;;  %v1421_v7 = vld [vmem:[#allocation2 + $0x30] sm:$0xe]  ;;  %v9008_v50 = vld [vmem:[#allocation2 + $0x18] sm:$0xff]  ;;  %v3454_v52 = vpop.permute.xlu2 %3453 }
  0xf2   : > { %v2516_v15 = vsel %vm9481_vm14, %v10023_v28, %v2515_v14  ;;  %803 = vst [vmem:[#allocation2 + $0x48] sm:$0x1] %v802_v3  ;;  %v2731_v60 = vrot.slane %v10064_v5, 5  ;;  %v947_v28 = vsel %vm9331_vm10, %v8426_v1, %v946_v0  ;;  %v1309_v21 = vrot.slane %v1307_v8, 5  ;;  %v1618_v53 = vld [vmem:[#allocation2 + $0x90] sm:$0xf] }
  0xf3   : > { %v2501_v22 = vrot.slane %v2500_v47, 4  ;;  %v3511_v27 = vpack.c.b16 %v3490_v61, %v3489_v63  ;;  %v3410_v59 = vunpack.c.l.b16 %v2516_v15  ;;  %948 = vst [vmem:[#allocation2 + $0x50] sm:$0x1] %v947_v28  ;;  %v1313_v23 = vrot.slane %v1311_v11, 4  ;;  %v2930_v48 = vpop.permute.xlu1 %2929  ;;  %v10097_v55 = vld [vmem:[#allocation2 + $0x94] sm:$0xf] }
  0xf4   : > { %v10086_v34 = vsel %vm9372_vm11, %v8474_v51, %v2731_v60  ;;  %v2733_v17 = vrot.slane %v2731_v60, 4  ;;  %v1304_v32 = vor.u32 %v1303_v40, %v1300_v35  ;;  %v8442_v19 = vrot.slane %v1421_v7, 9  ;;  %v10105_v10 = vld [vmem:[#allocation2 + $0x98] sm:$0x1]  ;;  %v1604_v51 = vld [vmem:[#allocation2 + $0x3c] sm:$0xf] }
  0xf5   : > { %v2506_v36 = vsel %vm9481_vm14, %v2501_v22, %v9995_v12  ;;  %3537 = vrot.lane.b32.xlu0 %v3511_v27, %s9221_s22  ;;  %v3374_v63 = vpop.permute.xlu0 %3373  ;;  %v3477_v20 = vunpack.c.l.b16 %v10086_v34  ;;  %v1314_v56 = vor.u32 %v1313_v23, %v1309_v21  ;;  %v1514_v46 = vrot.slane %v9920_v29, 5 }
  0xf6   : > { %v3409_v42 = vunpack.c.l.b16 %v2506_v36  ;;  %v1517_v12 = vrot.slane %v9926_v4, 5  ;;  %v1305_v26 = vrot.slane %v1304_v32, 4  ;;  %v1319_v24 = vrot.slane %v1317_v57, 5 }
  0xf7   : > { %v3748_v39 = vsel %vm3730_vm8, %v3715_v44, %v3374_v63  ;;  %v1315_v43 = vrot.slane %v1314_v56, 4  ;;  %v1515_v58 = vsel %vm9372_vm11, %v8442_v19, %v1514_v46  ;;  %v1516_v35 = vrot.slane %v1514_v46, 4 }
  0xf8   : > { %v3431_v54 = vpack.c.b16 %v3410_v59, %v3409_v42  ;;  %v3558_v14 = vsel %vm3549_vm15, %v9008_v50, %v2930_v48  ;;  %v1310_v29 = vsel %vm9481_vm14, %v1305_v26, %v1309_v21  ;;  %v2965_v4 = vunpack.c.l.b16 %v1515_v58  ;;  %v9026_v59 = vld [vmem:[#allocation2 + $0x3c] sm:$0xff] }
  0xf9   : > { %v1909_v1 = vshrl.u32 %v1618_v53, 16  ;;  %v1912_v45 = vshll.u32 %v1618_v53, 16  ;;  %v1320_v44 = vsel %vm9481_vm14, %v1315_v43, %v1319_v24  ;;  %v1518_v47 = vsel %vm9372_vm11, %v1516_v35, %v1517_v12 }
  0xfa   : > { %3457 = vrot.lane.b32.xlu1 %v3431_v54, %s9224_s25  ;;  %v3781_v61 = vsel %vm13500_vm9, %v3748_v39, %v3454_v52  ;;  %v1918_v3 = vshll.u32 %v10097_v55, 16  ;;  %v10113_v15 = vld [vmem:[#allocation2 + $0x50] sm:$0x1]  ;;  %v10115_v60 = vunpack.c.l.b16 %v1310_v29  ;;  %v2966_v18 = vunpack.c.l.b16 %v1518_v47 }
  0xfb   : > { %v1911_v8 = vrot.slane %v1909_v1, 4  ;;  %v1914_v22 = vrot.slane %v1912_v45, 5  ;;  %v2734_v27 = vrot.slane %v10113_v15, 5  ;;  %v1922_v11 = vshrl.u32 %v10097_v55, 16 }
  0xfc   : > { %v1920_v0 = vrot.slane %v1918_v3, 5  ;;  %v1928_v7 = vshll.u32 %v10105_v10, 16  ;;  %v10122_v28 = vunpack.c.l.b16 %v1320_v44  ;;  %v2993_v34 = vpack.c.b16 %v2966_v18, %v2965_v4  ;;  %v992_v4 = vld [vmem:[#allocation2 + $0x3c] sm:$0xf]  ;;  %v9042_v44 = vld [vmem:[#allocation2 + $0x48] sm:$0xff] }
  0xfd   : > { %3269 = vrot.lane.b32.xlu0 %v10056_v41, %s9219_s20  ;;  %v1915_v40 = vor.u32 %v1914_v22, %v1911_v8  ;;  %v1741_v36 = vshrl.u32 %v1604_v51, 16  ;;  %v2735_v21 = vsel %vm9372_vm11, %v2733_v17, %v2734_v27  ;;  %v1924_v23 = vrot.slane %v1922_v11, 4  ;;  %v3010_v19 = vpop.permute.xlu0 %3009  ;;  %v3534_v53 = vpop.permute.xlu1 %3533  ;;  %8687 = vmatmul.msk.bf16.gmra.mxu0 %vm13498_vm13, %v10009_v62  ;;  %v650_v18 = vld [vmem:[#allocation2 + $0x9c] sm:$0xf]  ;;  %v10152_v27 = vld [vmem:[#allocation2 + $0x40] sm:$0xf] }
  0xfe   : > { %v1930_v63 = vrot.slane %v1928_v7, 5  ;;  %v1744_v50 = vshll.u32 %v1604_v51, 16  ;;  %v3478_v41 = vunpack.c.l.b16 %v2735_v21  ;;  %3013 = vrot.lane.b32.xlu2 %v2993_v34, %s9220_s21  ;;  %v1750_v57 = vshll.u32 %v9983_v9, 16 }
  0xff   : > { %v1916_v42 = vrot.slane %v1915_v40, 4  ;;  %v1743_v32 = vrot.slane %v1741_v36, 4  ;;  %v1925_v48 = vor.u32 %v1924_v23, %v1920_v0  ;;  %v1754_v46 = vshrl.u32 %v9983_v9, 16  ;;  %v10156_v40 = vld [vmem:[#allocation2 + $0x44] sm:$0x1]  ;;  %v9033_v36 = vld [vmem:[#allocation2 + $0x90] sm:$0xff] }
 0x100   : > { %v1746_v56 = vrot.slane %v1744_v50, 5  ;;  %v1760_v12 = vshll.u32 %v10005_v13, 16  ;;  %v3505_v17 = vpack.c.b16 %v3478_v41, %v3477_v20  ;;  %v2920_v54 = vpack.c.b16 %v10122_v28, %v10115_v60  ;;  %v3106_v13 = vpop.permute.xlu2 %3105  ;;  %v2213_v50 = vld [vmem:[#allocation2 + $0x48] sm:$0xf] }
 0x101   : > { %v1921_v26 = vsel %vm9481_vm14, %v1916_v42, %v1920_v0  ;;  %v1752_v24 = vrot.slane %v1750_v57, 5  ;;  %v1926_v39 = vrot.slane %v1925_v48, 4  ;;  %v1756_v43 = vrot.slane %v1754_v46, 4 }
 0x102   : > { %3109 = vrot.lane.b32.xlu1 %v9026_v59, %s9217_s18  ;;  %v1747_v52 = vor.u32 %v1746_v56, %v1743_v32  ;;  %v3604_v9 = vsel %vm3598_vm0, %v3558_v14, %v3010_v19  ;;  %v10138_v58 = vunpack.c.l.b16 %v1921_v26  ;;  %v1762_v35 = vrot.slane %v1760_v12, 5  ;;  %v654_v32 = vld [vmem:[#allocation2 + $0xa4] sm:$0x1] }
 0x103   : > { %v3814_v20 = vsel %vm13499_vm12, %v3781_v61, %v3534_v53  ;;  %v444_v29 = vshrl.u32 %v10054_v6, 16  ;;  %v1931_v1 = vsel %vm9481_vm14, %v1926_v39, %v1930_v63  ;;  %v1757_v45 = vor.u32 %v1756_v43, %v1752_v24 }
 0x104   : > { %v1748_v62 = vrot.slane %v1747_v52, 4  ;;  %8694 = vmatmul.msk.bf16.vlgmr.msra.gmra.mxu2 %vm13498_vm13, %v3814_v20  ;;  %v447_v14 = vshll.u32 %v10054_v6, 16  ;;  %v3637_v47 = vsel %vm3631_vm1, %v3604_v9, %v3106_v13  ;;  %v452_v61 = vshrl.u32 %v10080_v49, 16 }
 0x105   : > { %3525 = vrot.lane.b32.xlu0 %v3505_v17, %s9221_s22  ;;  %v446_v3 = vrot.slane %v444_v29, 7  ;;  %v455_v51 = vshll.u32 %v10080_v49, 16  ;;  %v1758_v22 = vrot.slane %v1757_v45, 4  ;;  %v1154_v0 = vshrl.u32 %v992_v4, 16  ;;  %v3186_v39 = vpop.permute.xlu0 %3185 }
 0x106   : > { %v1753_v8 = vsel %vm9481_vm14, %v1748_v62, %v1752_v24  ;;  %v1157_v11 = vshll.u32 %v992_v4, 16  ;;  %v10154_v7 = vunpack.c.l.b16 %v1931_v1  ;;  %v454_v21 = vrot.slane %v452_v61, 7  ;;  %v3266_v62 = vpop.permute.xlu1 %3265 }
 0x107   : > { %v3141_v6 = vunpack.c.l.b16 %v1753_v8  ;;  %v449_v59 = vor.u32 %v447_v14, %v446_v3  ;;  %v450_v34 = vrot.slane %v446_v3, 4  ;;  %v1763_v49 = vsel %vm9481_vm14, %v1758_v22, %v1762_v35  ;;  %v1422_v35 = vld [vmem:[#allocation2 + $0x3c] sm:$0xe] }
 0x108   : > { %v1156_v23 = vrot.slane %v1154_v0, 4  ;;  %v1159_v63 = vrot.slane %v1157_v11, 5  ;;  %v3142_v41 = vunpack.c.l.b16 %v1763_v49  ;;  %v1163_v57 = vshll.u32 %v10152_v27, 16 }
 0x109   : > { %v651_v42 = vsel %vm9271_vm5, %v449_v59, %v650_v18  ;;  %v1167_v19 = vshrl.u32 %v10152_v27, 16  ;;  %v457_v48 = vor.u32 %v455_v51, %v454_v21  ;;  %v459_v56 = vrot.slane %v454_v21, 4 }
 0x10a   : > { %3365 = vrot.lane.b32.xlu1 %v9042_v44, %s9218_s19  ;;  %652 = vst [vmem:[#allocation2 + $0x9c] sm:$0xf] %v651_v42  ;;  %v1160_v46 = vor.u32 %v1159_v63, %v1156_v23  ;;  %v1173_v12 = vshll.u32 %v10156_v40, 16  ;;  %v3169_v53 = vpack.c.b16 %v3142_v41, %v3141_v6  ;;  %v1165_v17 = vrot.slane %v1163_v57, 5  ;;  %v1428_v41 = vld [vmem:[#allocation2 + $0x84] sm:$0xe] }
 0x10b   : > { %v1169_v26 = vrot.slane %v1167_v19, 4  ;;  %v2350_v24 = vshrl.u32 %v2213_v50, 16  ;;  %v458_v52 = vsel %vm9277_vm6, %v450_v34, %v457_v48  ;;  %v655_v43 = vsel %vm9283_vm7, %v459_v56, %v654_v32 }
 0x10c   : > { %v1161_v9 = vrot.slane %v1160_v46, 4  ;;  %v1175_v13 = vrot.slane %v1173_v12, 5  ;;  %3189 = vrot.lane.b32.xlu2 %v3169_v53, %s9222_s23  ;;  %653 = vst.msk [vmem:[#allocation2 + $0xa0] sm:$0xf] %vm560_vm2, %v458_v52  ;;  %v2353_v4 = vshll.u32 %v2213_v50, 16  ;;  %v2359_v1 = vshll.u32 %v10064_v5, 16 }
 0x10d   : > { %3123 = vrot.lane.b32.xlu0 %v9033_v36, %s9217_s18  ;;  %v1170_v20 = vor.u32 %v1169_v26, %v1165_v17  ;;  %v2352_v29 = vrot.slane %v2350_v24, 4  ;;  %656 = vst [vmem:[#allocation2 + $0xa4] sm:$0x1] %v655_v43  ;;  %v2363_v14 = vshrl.u32 %v10064_v5, 16  ;;  %v2369_v44 = vshll.u32 %v10113_v15, 16 }
 0x10e   : > { %v1166_v45 = vsel %vm9481_vm14, %v1161_v9, %v1165_v17  ;;  %v3670_v3 = vsel %vm3664_vm3, %v3637_v47, %v3186_v39  ;;  %v3176_v61 = vpack.c.b16 %v10154_v7, %v10138_v58  ;;  %v2355_v18 = vrot.slane %v2353_v4, 5  ;;  %v3362_v7 = vpop.permute.xlu2 %3361  ;;  %v1606_v43 = vld [vmem:[#allocation2 + $0x48] sm:$0xf]  ;;  %v1607_v4 = vld [vmem:[#allocation2 + $0x4c] sm:$0xf] }
 0x10f   : > { %v1171_v51 = vrot.slane %v1170_v20, 4  ;;  %v2361_v8 = vrot.slane %v2359_v1, 5  ;;  %v10181_v22 = vunpack.c.l.b16 %v1166_v45  ;;  %v2365_v0 = vrot.slane %v2363_v14, 4 }
 0x110   : > { %v2371_v11 = vrot.slane %v2369_v44, 5  ;;  %v8443_v6 = vrot.slane %v1422_v35, 9  ;;  %v2356_v59 = vor.u32 %v2355_v18, %v2352_v29  ;;  %v3703_v58 = vsel %vm3697_vm4, %v3670_v3, %v3266_v62  ;;  %v3522_v29 = vpop.permute.xlu1 %3521  ;;  %v1633_v18 = vld [vmem:[#allocation2 + $0x50] sm:$0x1] }
 0x111   : > { %v706_v5 = vld [vmem:[#allocation2 + $0x9c] sm:$0x2]  ;;  %v822_v15 = vld [vmem:[#allocation2 + $0x9c] sm:$0x1]  ;;  %v1176_v47 = vsel %vm9481_vm14, %v1171_v51, %v1175_v13  ;;  %v1521_v34 = vrot.slane %v10152_v27, 5  ;;  %v2366_v21 = vor.u32 %v2365_v0, %v2361_v8  ;;  %v1524_v23 = vrot.slane %v10156_v40, 5 }
 0x112   : > { %2947 = vrot.lane.b32.xlu1 %v2920_v54, %s9223_s24  ;;  %v8415_v36 = vrot.slane %v706_v5, 9  ;;  %v10191_v49 = vunpack.c.l.b16 %v1176_v47  ;;  %v2648_v63 = vld [vmem:[#allocation2 + $0x9c] sm:$0xe]  ;;  %v2357_v60 = vrot.slane %v2356_v59, 4  ;;  %v3736_v27 = vsel %vm3730_vm8, %v3703_v58, %v3362_v7  ;;  %v2039_v59 = vld [vmem:[#allocation2 + $0x90] sm:$0xe] }
 0x113   : > { %v1522_v28 = vsel %vm9372_vm11, %v8443_v6, %v1521_v34  ;;  %v1523_v54 = vrot.slane %v1521_v34, 4  ;;  %v8481_v50 = vrot.slane %v2648_v63, 9  ;;  %v2367_v32 = vrot.slane %v2366_v21, 4  ;;  %v850_v19 = vld [vmem:[#allocation2 + $0xa0] sm:$0x8]  ;;  %v9015_v34 = vld [vmem:[#allocation2 + $0x6c] sm:$0xff] }
 0x114   : > { %v823_v42 = vsel %vm9283_vm7, %v8415_v36, %v822_v15  ;;  %v2967_v57 = vunpack.c.l.b16 %v1522_v28  ;;  %v10199_v48 = vld [vmem:[#allocation2 + $0xa0] sm:$0xf]  ;;  %v2362_v40 = vsel %vm9481_vm14, %v2357_v60, %v2361_v8  ;;  %v8433_v46 = vrot.slane %v850_v19, 11  ;;  %v967_v12 = vld [vmem:[#allocation2 + $0xa4] sm:$0x1] }
 0x115   : > { %824 = vst [vmem:[#allocation2 + $0x9c] sm:$0x1] %v823_v42  ;;  %v1525_v56 = vsel %vm9372_vm11, %v1523_v54, %v1524_v23  ;;  %v2780_v53 = vrot.slane %v10199_v48, 5  ;;  %v2372_v17 = vsel %vm9481_vm14, %v2367_v32, %v2371_v11  ;;  %v3397_v26 = vunpack.c.l.b16 %v2362_v40  ;;  %v3442_v52 = vpop.permute.xlu0 %3441 }
 0x116   : > { %v2968_v24 = vunpack.c.l.b16 %v1525_v56  ;;  %v8449_v39 = vrot.slane %v1428_v41, 9  ;;  %v2914_v9 = vpack.c.b16 %v10191_v49, %v10181_v22  ;;  %v3398_v13 = vunpack.c.l.b16 %v2372_v17  ;;  %v2033_v22 = vld [vmem:[#allocation2 + $0x48] sm:$0xe] }
 0x117   : > { %v968_v35 = vsel %vm9331_vm10, %v8433_v46, %v967_v12  ;;  %v10214_v20 = vsel %vm9372_vm11, %v8481_v50, %v2780_v53  ;;  %v2782_v62 = vrot.slane %v2780_v53, 4  ;;  %v1563_v45 = vrot.slane %v10052_v30, 5 }
 0x118   : > { %v10216_v1 = vpack.c.b16 %v2968_v24, %v2967_v57  ;;  %969 = vst [vmem:[#allocation2 + $0xa4] sm:$0x1] %v968_v35  ;;  %v1566_v14 = vrot.slane %v10070_v2, 5  ;;  %v3425_v44 = vpack.c.b16 %v3398_v13, %v3397_v26  ;;  %v3491_v3 = vunpack.c.l.b16 %v10214_v20  ;;  %v2944_v2 = vpop.permute.xlu2 %2943 }
 0x119   : > { %v3769_v51 = vsel %vm13500_vm9, %v3736_v27, %v3442_v52  ;;  %v1765_v8 = vshrl.u32 %v1606_v43, 16  ;;  %v1564_v0 = vsel %vm9372_vm11, %v8449_v39, %v1563_v45  ;;  %v1565_v11 = vrot.slane %v1563_v45, 4 }
 0x11a   : > { %3203 = vrot.lane.b32.xlu1 %v3176_v61, %s9222_s23  ;;  %v3802_v6 = vsel %vm13499_vm12, %v3769_v51, %v3522_v29  ;;  %v1768_v5 = vshll.u32 %v1606_v43, 16  ;;  %3445 = vrot.lane.b32.xlu2 %v3425_v44, %s9224_s25  ;;  %v2979_v30 = vunpack.c.l.b16 %v1564_v0  ;;  %v1774_v15 = vshll.u32 %v1607_v4, 16  ;;  %v184_v29 = vld [vmem:[%s9261_s17 + $0x60] sm:$0xff]  ;;  %v185_v44 = vld [vmem:[%s9261_s17 + $0x68] sm:$0xff] }
 0x11b   : > { %8688 = vmatmul.msk.bf16.gmra.mxu0 %vm13498_vm13, %v3802_v6  ;;  %v1767_v61 = vrot.slane %v1765_v8, 4  ;;  %v1778_v47 = vshrl.u32 %v1607_v4, 16  ;;  %v1567_v7 = vsel %vm9372_vm11, %v1565_v11, %v1566_v14  ;;  %v1784_v49 = vshll.u32 %v1633_v18, 16  ;;  %v3120_v14 = vpop.permute.xlu1 %3119 }
 0x11c   : > { %v9049_v58 = vld [vmem:[#allocation2 + $0x9c] sm:$0xff]  ;;  %v1770_v36 = vrot.slane %v1768_v5, 5  ;;  %v8459_v21 = vrot.slane %v2033_v22, 9  ;;  %v2980_v23 = vunpack.c.l.b16 %v1567_v7  ;;  %v1776_v63 = vrot.slane %v1774_v15, 5 }
 0x11d   : > { %v1780_v60 = vrot.slane %v1778_v47, 4  ;;  %v2129_v28 = vrot.slane %v1607_v4, 5  ;;  %3379 = vrot.lane.b32.xlu0 %v9049_v58, %s9218_s19  ;;  %v1786_v50 = vrot.slane %v1784_v49, 5  ;;  %v2132_v41 = vrot.slane %v1633_v18, 5  ;;  %v3024_v17 = vpop.permute.xlu0 %3023 }
 0x11e   : > { %v1771_v54 = vor.u32 %v1770_v36, %v1767_v61  ;;  %v8465_v42 = vrot.slane %v2039_v59, 9  ;;  %v3000_v27 = vpack.c.b16 %v2980_v23, %v2979_v30  ;;  %v3579_v46 = vsel %vm3549_vm15, %v9015_v34, %v2944_v2 }
 0x11f   : > { %v10231_v32 = vld [vmem:[#allocation2 + $0xa4] sm:$0x1]  ;;  %v1781_v57 = vor.u32 %v1780_v60, %v1776_v63  ;;  %v2130_v19 = vsel %vm9372_vm11, %v8459_v21, %v2129_v28  ;;  %v2131_v40 = vrot.slane %v2129_v28, 4  ;;  %v2171_v53 = vrot.slane %v10097_v55, 5 }
 0x120   : > { %v2783_v56 = vrot.slane %v10231_v32, 5  ;;  %v1772_v12 = vrot.slane %v1771_v54, 4  ;;  %v3223_v39 = vunpack.c.l.b16 %v2130_v19  ;;  %v2174_v52 = vrot.slane %v10105_v10, 5  ;;  %v3200_v6 = vpop.permute.xlu2 %3199  ;;  %v608_v54 = vld [vmem:[#allocation2 + $0x54] sm:$0xf] }
 0x121   : > { %v1782_v26 = vrot.slane %v1781_v57, 4  ;;  %v2133_v24 = vsel %vm9372_vm11, %v2131_v40, %v2132_v41  ;;  %v2172_v55 = vsel %vm9372_vm11, %v8465_v42, %v2171_v53  ;;  %v2173_v45 = vrot.slane %v2171_v53, 4  ;;  %v612_v57 = vld [vmem:[#allocation2 + $0x5c] sm:$0x1] }
 0x122   : > { %2935 = vrot.lane.b32.xlu1 %v2914_v9, %s9223_s24  ;;  %v2784_v43 = vsel %vm9372_vm11, %v2782_v62, %v2783_v56  ;;  %v1777_v13 = vsel %vm9481_vm14, %v1772_v12, %v1776_v63  ;;  %v3224_v35 = vunpack.c.l.b16 %v2133_v24  ;;  %3027 = vrot.lane.b32.xlu2 %v3000_v27, %s9220_s21  ;;  %v3618_v10 = vsel %vm3598_vm0, %v3579_v46, %v3024_v17  ;;  %v2227_v62 = vld [vmem:[#allocation2 + $0x9c] sm:$0xf]  ;;  %v10268_v17 = vld [vmem:[#allocation2 + $0x94] sm:$0xf] }
 0x123   : > { %v3492_v9 = vunpack.c.l.b16 %v2784_v43  ;;  %v1787_v4 = vsel %vm9481_vm14, %v1782_v26, %v1786_v50  ;;  %v3143_v51 = vunpack.c.l.b16 %v1777_v13  ;;  %v3235_v8 = vunpack.c.l.b16 %v2172_v55  ;;  %v199_v56 = vld [vmem:[%s9261_s17 + $0xd8] sm:$0xff] }
 0x124   : > { %v3144_v18 = vunpack.c.l.b16 %v1787_v4  ;;  %v3250_v0 = vpack.c.b16 %v3224_v35, %v3223_v39  ;;  %v2175_v11 = vsel %vm9372_vm11, %v2173_v45, %v2174_v52  ;;  %v216_v5 = vpack.c.bf16 %v184_v29, %v184_v29  ;;  %v3376_v35 = vpop.permute.xlu1 %3375  ;;  %v10278_v55 = vld [vmem:[#allocation2 + $0x98] sm:$0x1] }
 0x125   : > { %v3512_v22 = vpack.c.b16 %v3492_v9, %v3491_v3  ;;  %3015 = vrot.lane.b32.xlu0 %v10216_v1, %s9220_s21  ;;  %v3236_v30 = vunpack.c.l.b16 %v2175_v11  ;;  %v3651_v2 = vsel %vm3631_vm1, %v3618_v10, %v3120_v14  ;;  %v217_v61 = vpack.c.bf16 %v185_v44, %v185_v44  ;;  %v198_v3 = vld [vmem:[%s9261_s17 + $0xd0] sm:$0xff]  ;;  %v3280_v13 = vpop.permute.xlu0 %3279 }
 0x126   : > { %v2518_v15 = vshrl.u32 %v2227_v62, 16  ;;  %v342_v47 = vshrl.u32 %v216_v5, 16  ;;  %v345_v59 = vshll.u32 %v216_v5, 16  ;;  %v2521_v58 = vshll.u32 %v2227_v62, 16  ;;  %v1429_v14 = vld [vmem:[#allocation2 + $0x90] sm:$0xe] }
 0x127   : > { %v2527_v20 = vshll.u32 %v10199_v48, 16  ;;  %v3256_v7 = vpack.c.b16 %v3236_v30, %v3235_v8  ;;  %v350_v34 = vshrl.u32 %v217_v61, 16  ;;  %v353_v36 = vshll.u32 %v217_v61, 16 }
 0x128   : > { %v2520_v49 = vrot.slane %v2518_v15, 4  ;;  %v344_v21 = vrot.slane %v342_v47, 7  ;;  %v2523_v1 = vrot.slane %v2521_v58, 5  ;;  %v2531_v63 = vshrl.u32 %v10199_v48, 16  ;;  %v2932_v10 = vpop.permute.xlu2 %2931  ;;  %v9009_v58 = vld [vmem:[#allocation2 + $0x24] sm:$0xff] }
 0x129   : > { %v2529_v23 = vrot.slane %v2527_v20, 5  ;;  %v3170_v60 = vpack.c.b16 %v3144_v18, %v3143_v51  ;;  %v352_v28 = vrot.slane %v350_v34, 7  ;;  %v2537_v50 = vshll.u32 %v10231_v32, 16  ;;  %v10296_v20 = vld [vmem:[#allocation2 + $0xa0] sm:$0xf] }
 0x12a   : > { %3539 = vrot.lane.b32.xlu1 %v3512_v22, %s9221_s22  ;;  %v230_v41 = vpack.c.bf16 %v198_v3, %v198_v3  ;;  %3283 = vrot.lane.b32.xlu2 %v3256_v7, %s9219_s20  ;;  %v347_v42 = vor.u32 %v345_v59, %v344_v21  ;;  %v348_v27 = vrot.slane %v344_v21, 4  ;;  %v2524_v19 = vor.u32 %v2523_v1, %v2520_v49 }
 0x12b   : > { %v2533_v40 = vrot.slane %v2531_v63, 4  ;;  %v355_v46 = vor.u32 %v353_v36, %v352_v28  ;;  %v357_v12 = vrot.slane %v352_v28, 4  ;;  %v2539_v53 = vrot.slane %v2537_v50, 5 }
 0x12c   : > { %v461_v48 = vshrl.u32 %v230_v41, 16  ;;  %v609_v26 = vsel %vm9271_vm5, %v347_v42, %v608_v54  ;;  %v2525_v24 = vrot.slane %v2524_v19, 4  ;;  %v1570_v39 = vrot.slane %v10268_v17, 5 }
 0x12d   : > { %v2534_v32 = vor.u32 %v2533_v40, %v2529_v23  ;;  %3191 = vrot.lane.b32.xlu0 %v3170_v60, %s9222_s23  ;;  %v356_v52 = vsel %vm9277_vm6, %v348_v27, %v355_v46  ;;  %610 = vst [vmem:[#allocation2 + $0x54] sm:$0xf] %v609_v26  ;;  %v613_v43 = vsel %vm9283_vm7, %v357_v12, %v612_v57  ;;  %v8450_v51 = vrot.slane %v1429_v14, 9  ;;  %v3456_v50 = vpop.permute.xlu0 %3455  ;;  %v10306_v26 = vld [vmem:[#allocation2 + $0xa4] sm:$0x1] }
 0x12e   : > { %v231_v29 = vpack.c.bf16 %v199_v56, %v199_v56  ;;  %v10280_v9 = vrot.slane %v461_v48, 7  ;;  %611 = vst.msk [vmem:[#allocation2 + $0x58] sm:$0xf] %vm560_vm2, %v356_v52  ;;  %v2530_v4 = vsel %vm9481_vm14, %v2525_v24, %v2529_v23  ;;  %v1572_v44 = vrot.slane %v1570_v39, 4  ;;  %v2040_v24 = vld [vmem:[#allocation2 + $0x9c] sm:$0xe] }
 0x12f   : > { %v2535_v45 = vrot.slane %v2534_v32, 4  ;;  %614 = vst [vmem:[#allocation2 + $0x5c] sm:$0x1] %v613_v43  ;;  %v3411_v62 = vunpack.c.l.b16 %v2530_v4  ;;  %v3684_v18 = vsel %vm3664_vm3, %v3651_v2, %v3200_v6  ;;  %v1573_v22 = vrot.slane %v10278_v55, 5  ;;  %v657_v6 = vld [vmem:[#allocation2 + $0xa8] sm:$0xf] }
 0x130   : > { %v464_v11 = vshll.u32 %v230_v41, 16  ;;  %v3717_v30 = vsel %vm3697_vm4, %v3684_v18, %v3280_v13  ;;  %v1571_v61 = vsel %vm9372_vm11, %v8450_v51, %v1570_v39  ;;  %v469_v15 = vshrl.u32 %v231_v29, 16  ;;  %v3012_v41 = vpop.permute.xlu1 %3011  ;;  %v3536_v56 = vpop.permute.xlu2 %3535  ;;  %v661_v51 = vld [vmem:[#allocation2 + $0xb0] sm:$0x1] }
 0x131   : > { %v2540_v8 = vsel %vm9481_vm14, %v2535_v45, %v2539_v53  ;;  %v1574_v47 = vsel %vm9372_vm11, %v1572_v44, %v1573_v22  ;;  %v472_v59 = vshll.u32 %v231_v29, 16  ;;  %v467_v3 = vrot.slane %v10280_v9, 4 }
 0x132   : > { %3271 = vrot.lane.b32.xlu1 %v3250_v0, %s9219_s20  ;;  %v3412_v5 = vunpack.c.l.b16 %v2540_v8  ;;  %v466_v0 = vor.u32 %v464_v11, %v10280_v9  ;;  %v471_v7 = vrot.slane %v469_v15, 7  ;;  %v3750_v21 = vsel %vm3730_vm8, %v3717_v30, %v3376_v35  ;;  %v1006_v35 = vld [vmem:[#allocation2 + $0x90] sm:$0xf]  ;;  %v9027_v9 = vld [vmem:[#allocation2 + $0x48] sm:$0xff] }
 0x133   : > { %v2981_v1 = vunpack.c.l.b16 %v1571_v61  ;;  %v2982_v54 = vunpack.c.l.b16 %v1574_v47  ;;  %v3783_v48 = vsel %vm13500_vm9, %v3750_v21, %v3456_v50  ;;  %v2178_v32 = vrot.slane %v10296_v20, 5  ;;  %v10328_v11 = vld [vmem:[#allocation2 + $0x4c] sm:$0xf] }
 0x134   : > { %v3432_v2 = vpack.c.b16 %v3412_v5, %v3411_v62  ;;  %v700_v34 = vld [vmem:[#allocation2 + $0x54] sm:$0x2]  ;;  %v804_v36 = vld [vmem:[#allocation2 + $0x54] sm:$0x1]  ;;  %v658_v42 = vsel %vm9271_vm5, %v466_v0, %v657_v6  ;;  %v474_v46 = vor.u32 %v472_v59, %v471_v7  ;;  %v3561_v13 = vsel %vm3549_vm15, %v9009_v58, %v2932_v10 }
 0x135   : > { %v2642_v49 = vld [vmem:[#allocation2 + $0x54] sm:$0xe]  ;;  %v8409_v23 = vrot.slane %v700_v34, 9  ;;  %v844_v63 = vld [vmem:[#allocation2 + $0x58] sm:$0x8]  ;;  %v3816_v4 = vsel %vm13499_vm12, %v3783_v48, %v3536_v56  ;;  %v8466_v45 = vrot.slane %v2040_v24, 9  ;;  %v10324_v18 = vpack.c.b16 %v2982_v54, %v2981_v1 }
 0x136   : > { %v2216_v60 = vld [vmem:[#allocation2 + $0x58] sm:$0xf]  ;;  %v8475_v28 = vrot.slane %v2642_v49, 9  ;;  %3459 = vrot.lane.b32.xlu2 %v3432_v2, %s9224_s25  ;;  %v8427_v27 = vrot.slane %v844_v63, 11  ;;  %v949_v57 = vld [vmem:[#allocation2 + $0x5c] sm:$0x1]  ;;  %8695 = vmatmul.msk.bf16.gmra.mxu2 %vm13498_vm13, %v3816_v4  ;;  %v475_v10 = vsel %vm9277_vm6, %v467_v3, %v474_v46  ;;  %v3606_v8 = vsel %vm3598_vm0, %v3561_v13, %v3012_v41  ;;  %v3108_v2 = vpop.permute.xlu0 %3107 }
 0x137   : > { %v2383_v19 = vshll.u32 %v2216_v60, 16  ;;  %v2387_v40 = vshrl.u32 %v2216_v60, 16  ;;  %v805_v12 = vsel %vm9283_vm7, %v8409_v23, %v804_v36  ;;  %v2738_v53 = vrot.slane %v2216_v60, 5  ;;  %659 = vst [vmem:[#allocation2 + $0xa8] sm:$0xf] %v658_v42 }
 0x138   : > { %806 = vst [vmem:[#allocation2 + $0x54] sm:$0x1] %v805_v12  ;;  %v950_v39 = vsel %vm9331_vm10, %v8427_v27, %v949_v57  ;;  %v2180_v44 = vrot.slane %v2178_v32, 4  ;;  %v2181_v62 = vrot.slane %v10306_v26, 5  ;;  %v476_v22 = vrot.slane %v471_v7, 4  ;;  %v3188_v58 = vpop.permute.xlu1 %3187  ;;  %v3268_v49 = vpop.permute.xlu2 %3267 }
 0x139   : > { %v10311_v52 = vrot.slane %v2383_v19, 5  ;;  %v2389_v43 = vrot.slane %v2387_v40, 4  ;;  %951 = vst [vmem:[#allocation2 + $0x5c] sm:$0x1] %v950_v39  ;;  %v10316_v29 = vsel %vm9372_vm11, %v8475_v28, %v2738_v53  ;;  %v1322_v5 = vshrl.u32 %v1006_v35, 16 }
 0x13a   : > { %660 = vst.msk [vmem:[#allocation2 + $0xac] sm:$0xf] %vm560_vm2, %v475_v10  ;;  %v2740_v30 = vrot.slane %v2738_v53, 4  ;;  %v3479_v61 = vunpack.c.l.b16 %v10316_v29  ;;  %v10333_v15 = vsel %vm9372_vm11, %v8466_v45, %v2178_v32  ;;  %v1528_v47 = vrot.slane %v10328_v11, 5  ;;  %v10343_v3 = vld [vmem:[#allocation2 + $0x50] sm:$0x1] }
 0x13b   : > { %v2390_v14 = vor.u32 %v2389_v43, %v10311_v52  ;;  %v10339_v59 = vsel %vm9372_vm11, %v2180_v44, %v2181_v62  ;;  %v662_v6 = vsel %vm9283_vm7, %v476_v22, %v661_v51  ;;  %v1423_v7 = vld [vmem:[#allocation2 + $0x48] sm:$0xe]  ;;  %v1325_v34 = vshll.u32 %v1006_v35, 16 }
 0x13c   : > { %663 = vst [vmem:[#allocation2 + $0xb0] sm:$0x1] %v662_v6  ;;  %v3639_v36 = vsel %vm3631_vm1, %v3606_v8, %v3108_v2  ;;  %v8444_v21 = vrot.slane %v1423_v7, 9  ;;  %v1530_v1 = vrot.slane %v1528_v47, 4  ;;  %v1531_v23 = vrot.slane %v10343_v3, 5 }
 0x13d   : > { %v2391_v0 = vrot.slane %v2390_v14, 4  ;;  %v3237_v60 = vunpack.c.l.b16 %v10333_v15  ;;  %v3672_v28 = vsel %vm3664_vm3, %v3639_v36, %v3188_v58  ;;  %v1324_v54 = vrot.slane %v1322_v5, 4 }
 0x13e   : > { %3111 = vrot.lane.b32.xlu2 %v9027_v9, %s9217_s18  ;;  %v1327_v50 = vrot.slane %v1325_v34, 5  ;;  %v3238_v57 = vunpack.c.l.b16 %v10339_v59  ;;  %v1331_v40 = vshll.u32 %v10268_v17, 16  ;;  %v707_v12 = vld [vmem:[#allocation2 + $0xa8] sm:$0x2]  ;;  %v825_v53 = vld [vmem:[#allocation2 + $0xa8] sm:$0x1]  ;;  %v3705_v48 = vsel %vm3697_vm4, %v3672_v28, %v3268_v49  ;;  %v3364_v2 = vpop.permute.xlu0 %3363 }
 0x13f   : > { %v2215_v63 = vld [vmem:[#allocation2 + $0x54] sm:$0xf]  ;;  %v10354_v24 = vsel %vm9372_vm11, %v8444_v21, %v1528_v47  ;;  %v8416_v43 = vrot.slane %v707_v12, 9  ;;  %v10358_v35 = vsel %vm9372_vm11, %v1530_v1, %v1531_v23  ;;  %v1335_v1 = vshrl.u32 %v10268_v17, 16 }
 0x140   : > { %v2242_v41 = vld [vmem:[#allocation2 + $0x5c] sm:$0x1]  ;;  %v2374_v42 = vshrl.u32 %v2215_v63, 16  ;;  %v2377_v27 = vshll.u32 %v2215_v63, 16  ;;  %v9043_v19 = vld [vmem:[#allocation2 + $0x54] sm:$0xff]  ;;  %v1328_v14 = vor.u32 %v1327_v50, %v1324_v54  ;;  %v2969_v47 = vunpack.c.l.b16 %v10354_v24  ;;  %v3524_v54 = vpop.permute.xlu2 %3523 }
 0x141   : > { %v2393_v56 = vshll.u32 %v2242_v41, 16  ;;  %v2741_v46 = vrot.slane %v2242_v41, 5  ;;  %v851_v13 = vld [vmem:[#allocation2 + $0xac] sm:$0x8]  ;;  %v826_v10 = vsel %vm9283_vm7, %v8416_v43, %v825_v53  ;;  %v1608_v8 = vld [vmem:[#allocation2 + $0x54] sm:$0xf] }
 0x142   : > { %v2376_v32 = vrot.slane %v2374_v42, 4  ;;  %v2379_v39 = vrot.slane %v2377_v27, 5  ;;  %v8434_v4 = vrot.slane %v851_v13, 11  ;;  %v10362_v45 = vld [vmem:[#allocation2 + $0xac] sm:$0xf]  ;;  %v1329_v6 = vrot.slane %v1328_v14, 4 }
 0x143   : > { %v2395_v29 = vrot.slane %v2393_v56, 5  ;;  %v2742_v9 = vsel %vm9372_vm11, %v2740_v30, %v2741_v46  ;;  %v2551_v51 = vshll.u32 %v10362_v45, 16  ;;  %827 = vst [vmem:[#allocation2 + $0xa8] sm:$0x1] %v826_v10  ;;  %v970_v5 = vld [vmem:[#allocation2 + $0xb0] sm:$0x1] }
 0x144   : > { %v2380_v44 = vor.u32 %v2379_v39, %v2376_v32  ;;  %v3480_v62 = vunpack.c.l.b16 %v2742_v9  ;;  %v2555_v30 = vshrl.u32 %v10362_v45, 16  ;;  %v971_v36 = vsel %vm9331_vm10, %v8434_v4, %v970_v5  ;;  %v9034_v53 = vld [vmem:[#allocation2 + $0x9c] sm:$0xff] }
 0x145   : > { %v2396_v22 = vsel %vm9481_vm14, %v2391_v0, %v2395_v29  ;;  %972 = vst [vmem:[#allocation2 + $0xb0] sm:$0x1] %v971_v36  ;;  %v10374_v49 = vrot.slane %v2551_v51, 5  ;;  %v1333_v21 = vrot.slane %v1331_v40, 5  ;;  %v3444_v23 = vpop.permute.xlu1 %3443  ;;  %v1341_v28 = vshll.u32 %v10278_v55, 16 }
 0x146   : > { %3367 = vrot.lane.b32.xlu2 %v9043_v19, %s9218_s19  ;;  %v2381_v58 = vrot.slane %v2380_v44, 4  ;;  %v3400_v7 = vunpack.c.l.b16 %v2396_v22  ;;  %v3506_v34 = vpack.c.b16 %v3480_v62, %v3479_v61  ;;  %v2557_v0 = vrot.slane %v2555_v30, 4  ;;  %v10386_v19 = vld [vmem:[#allocation2 + $0x58] sm:$0xf]  ;;  %v10390_v55 = vld [vmem:[#allocation2 + $0x5c] sm:$0x1] }
 0x147   : > { %v3738_v61 = vsel %vm3730_vm8, %v3705_v48, %v3364_v2  ;;  %v1789_v50 = vshrl.u32 %v1608_v8, 16  ;;  %v1334_v27 = vsel %vm9481_vm14, %v1329_v6, %v1333_v21  ;;  %v1337_v17 = vrot.slane %v1335_v1, 4  ;;  %v1620_v43 = vld [vmem:[#allocation2 + $0x9c] sm:$0xf] }
 0x148   : > { %v2386_v63 = vsel %vm9481_vm14, %v2381_v58, %v10311_v52  ;;  %3527 = vrot.lane.b32.xlu1 %v3506_v34, %s9221_s22  ;;  %v2558_v42 = vor.u32 %v2557_v0, %v10374_v49  ;;  %v2970_v40 = vunpack.c.l.b16 %v10358_v35  ;;  %v1343_v52 = vrot.slane %v1341_v28, 5 }
 0x149   : > { %v3399_v41 = vunpack.c.l.b16 %v2386_v63  ;;  %v2901_v56 = vunpack.c.l.b16 %v1334_v27  ;;  %v3771_v46 = vsel %vm13500_vm9, %v3738_v61, %v3444_v23  ;;  %v1338_v48 = vor.u32 %v1337_v17, %v1333_v21  ;;  %v2946_v27 = vpop.permute.xlu0 %2945 }
 0x14a   : > { %v3804_v32 = vsel %vm13499_vm12, %v3771_v46, %v3524_v54  ;;  %v1791_v39 = vrot.slane %v1789_v50, 4  ;;  %v2229_v13 = vld [vmem:[#allocation2 + $0xa8] sm:$0xf]  ;;  %v2559_v29 = vrot.slane %v2558_v42, 4  ;;  %v1792_v9 = vshll.u32 %v1608_v8, 16  ;;  %v9016_v42 = vld [vmem:[#allocation2 + $0x78] sm:$0xff] }
 0x14b   : > { %v3426_v12 = vpack.c.b16 %v3400_v7, %v3399_v41  ;;  %8689 = vmatmul.msk.bf16.gmra.mxu0 %vm13498_vm13, %v3804_v32  ;;  %v1798_v35 = vshll.u32 %v10386_v19, 16  ;;  %v1802_v4 = vshrl.u32 %v10386_v19, 16  ;;  %v2542_v14 = vshrl.u32 %v2229_v13, 16 }
 0x14c   : > { %v2545_v44 = vshll.u32 %v2229_v13, 16  ;;  %v1339_v62 = vrot.slane %v1338_v48, 4  ;;  %v1808_v10 = vshll.u32 %v10390_v55, 16  ;;  %v10398_v51 = vld [vmem:[#allocation2 + $0xb0] sm:$0x1]  ;;  %v1794_v22 = vrot.slane %v1792_v9, 5 }
 0x14d   : > { %3447 = vrot.lane.b32.xlu0 %v3426_v12, %s9224_s25  ;;  %v1800_v5 = vrot.slane %v1798_v35, 5  ;;  %v1804_v30 = vrot.slane %v1802_v4, 4  ;;  %v1933_v6 = vshrl.u32 %v1620_v43, 16  ;;  %v2544_v2 = vrot.slane %v2542_v14, 4  ;;  %v9050_v48 = vld [vmem:[#allocation2 + $0xa8] sm:$0xff] }
 0x14e   : > { %v2547_v58 = vrot.slane %v2545_v44, 5  ;;  %v2561_v8 = vshll.u32 %v10398_v51, 16  ;;  %v1344_v7 = vsel %vm9481_vm14, %v1339_v62, %v1343_v52  ;;  %v1795_v36 = vor.u32 %v1794_v22, %v1791_v39  ;;  %v2217_v13 = vld [vmem:[#allocation2 + $0x60] sm:$0xf]  ;;  %v10430_v14 = vld [vmem:[#allocation2 + $0x64] sm:$0xf] }
 0x14f   : > { %v2902_v34 = vunpack.c.l.b16 %v1344_v7  ;;  %v1805_v0 = vor.u32 %v1804_v30, %v1800_v5  ;;  %v1810_v21 = vrot.slane %v1808_v10, 5  ;;  %v1935_v63 = vrot.slane %v1933_v6, 4  ;;  %v10435_v62 = vld [vmem:[#allocation2 + $0x68] sm:$0x1] }
 0x150   : > { %3125 = vrot.lane.b32.xlu1 %v9034_v53, %s9217_s18  ;;  %v2548_v1 = vor.u32 %v2547_v58, %v2544_v2  ;;  %v2563_v23 = vrot.slane %v2561_v8, 5  ;;  %v1936_v28 = vshll.u32 %v1620_v43, 16  ;;  %v1796_v54 = vrot.slane %v1795_v36, 4  ;;  %v3026_v43 = vpop.permute.xlu1 %3025  ;;  %v994_v22 = vld [vmem:[#allocation2 + $0x48] sm:$0xf] }
 0x151   : > { %v2921_v61 = vpack.c.b16 %v2902_v34, %v2901_v56  ;;  %v1806_v50 = vrot.slane %v1805_v0, 4  ;;  %v1942_v41 = vshll.u32 %v10296_v20, 16  ;;  %v1946_v12 = vshrl.u32 %v10296_v20, 16 }
 0x152   : > { %v2549_v17 = vrot.slane %v2548_v1, 4  ;;  %v2564_v52 = vsel %vm9481_vm14, %v2559_v29, %v2563_v23  ;;  %v1938_v46 = vrot.slane %v1936_v28, 5  ;;  %v3257_v53 = vpack.c.b16 %v3238_v57, %v3237_v60  ;;  %v3122_v57 = vpop.permute.xlu2 %3121 }
 0x153   : > { %2949 = vrot.lane.b32.xlu2 %v2921_v61, %s9223_s24  ;;  %v1801_v56 = vsel %vm9481_vm14, %v1796_v54, %v1800_v5  ;;  %v1811_v32 = vsel %vm9481_vm14, %v1806_v50, %v1810_v21  ;;  %v1944_v39 = vrot.slane %v1942_v41, 5  ;;  %v10422_v15 = vunpack.c.l.b16 %v2564_v52  ;;  %v3202_v54 = vpop.permute.xlu0 %3201 }
 0x154   : > { %v2554_v20 = vsel %vm9481_vm14, %v2549_v17, %v10374_v49  ;;  %v2995_v59 = vpack.c.b16 %v2970_v40, %v2969_v47  ;;  %v1939_v60 = vor.u32 %v1938_v46, %v1935_v63  ;;  %v10426_v29 = vunpack.c.l.b16 %v1801_v56  ;;  %v200_v17 = vld [vmem:[%s9261_s17 + $0xe0] sm:$0xff]  ;;  %v1008_v56 = vld [vmem:[#allocation2 + $0x9c] sm:$0xf] }
 0x155   : > { %3029 = vrot.lane.b32.xlu0 %v10324_v18, %s9220_s21  ;;  %v1948_v9 = vrot.slane %v1946_v12, 4  ;;  %v1952_v35 = vshll.u32 %v10306_v26, 16  ;;  %v3582_v4 = vsel %vm3549_vm15, %v9016_v42, %v2946_v27  ;;  %v10432_v18 = vunpack.c.l.b16 %v1811_v32 }
 0x156   : > { %v1940_v44 = vrot.slane %v1939_v60, 4  ;;  %v3620_v49 = vsel %vm3598_vm0, %v3582_v4, %v3026_v43  ;;  %v2398_v24 = vshrl.u32 %v2217_v13, 16  ;;  %v10438_v47 = vunpack.c.l.b16 %v2554_v20 }
 0x157   : > { %v1949_v40 = vor.u32 %v1948_v9, %v1944_v39  ;;  %v1954_v10 = vrot.slane %v1952_v35, 5  ;;  %v3653_v26 = vsel %vm3631_vm1, %v3620_v49, %v3122_v57  ;;  %v2401_v6 = vshll.u32 %v2217_v13, 16  ;;  %v1009_v9 = vld [vmem:[#allocation2 + $0xa0] sm:$0xf] }
 0x158   : > { %3381 = vrot.lane.b32.xlu1 %v9050_v48, %s9218_s19  ;;  %v1945_v5 = vsel %vm9481_vm14, %v1940_v44, %v1944_v39  ;;  %v2400_v30 = vrot.slane %v2398_v24, 4  ;;  %v2407_v2 = vshll.u32 %v10430_v14, 16  ;;  %v2411_v7 = vshrl.u32 %v10430_v14, 16  ;;  %v3282_v20 = vpop.permute.xlu1 %3281 }
 0x159   : > { %v1950_v58 = vrot.slane %v1949_v40, 4  ;;  %v3157_v8 = vunpack.c.l.b16 %v1945_v5  ;;  %v2417_v34 = vshll.u32 %v10435_v62, 16  ;;  %v2403_v36 = vrot.slane %v2401_v6, 5 }
 0x15a   : > { %v2409_v0 = vrot.slane %v2407_v2, 5  ;;  %v1178_v21 = vshrl.u32 %v994_v22, 16  ;;  %v1181_v1 = vshll.u32 %v994_v22, 16  ;;  %v2413_v63 = vrot.slane %v2411_v7, 4 }
 0x15b   : > { %v1955_v23 = vsel %vm9481_vm14, %v1950_v58, %v1954_v10  ;;  %v2419_v28 = vrot.slane %v2417_v34, 5  ;;  %v1187_v61 = vshll.u32 %v10328_v11, 16  ;;  %v2404_v41 = vor.u32 %v2403_v36, %v2400_v30  ;;  %v1430_v10 = vld [vmem:[#allocation2 + $0x9c] sm:$0xe]  ;;  %v2649_v58 = vld [vmem:[#allocation2 + $0xa8] sm:$0xe] }
 0x15c   : > { %v3158_v50 = vunpack.c.l.b16 %v1955_v23  ;;  %v1180_v42 = vrot.slane %v1178_v21, 4  ;;  %v1183_v27 = vrot.slane %v1181_v1, 5  ;;  %v2414_v52 = vor.u32 %v2413_v63, %v2409_v0  ;;  %v2934_v63 = vpop.permute.xlu0 %2933 }
 0x15d   : > { %3285 = vrot.lane.b32.xlu0 %v3257_v53, %s9219_s20  ;;  %v1189_v46 = vrot.slane %v1187_v61, 5  ;;  %v1191_v12 = vshrl.u32 %v10328_v11, 16  ;;  %v1197_v48 = vshll.u32 %v10343_v3, 16  ;;  %v2405_v39 = vrot.slane %v2404_v41, 4 }
 0x15e   : > { %v3177_v32 = vpack.c.b16 %v3158_v50, %v3157_v8  ;;  %v1184_v43 = vor.u32 %v1183_v27, %v1180_v42  ;;  %v3686_v13 = vsel %vm3664_vm3, %v3653_v26, %v3202_v54  ;;  %v3171_v53 = vpack.c.b16 %v10432_v18, %v10426_v29  ;;  %v3378_v29 = vpop.permute.xlu2 %3377  ;;  %v1027_v18 = vld [vmem:[#allocation2 + $0xa4] sm:$0x1] }
 0x15f   : > { %v2415_v60 = vrot.slane %v2414_v52, 4  ;;  %v1193_v57 = vrot.slane %v1191_v12, 4  ;;  %v10457_v35 = vpack.c.bf16 %v200_v17, %v200_v17  ;;  %v3433_v11 = vpack.c.b16 %v10422_v15, %v10438_v47  ;;  %v9010_v52 = vld [vmem:[#allocation2 + $0x30] sm:$0xff] }
 0x160   : > { %3017 = vrot.lane.b32.xlu1 %v2995_v59, %s9220_s21  ;;  %3205 = vrot.lane.b32.xlu2 %v3177_v32, %s9222_s23  ;;  %v2410_v3 = vsel %vm9481_vm14, %v2405_v39, %v2409_v0  ;;  %v1185_v4 = vrot.slane %v1184_v43, 4  ;;  %v1346_v44 = vshrl.u32 %v1008_v56, 16  ;;  %v1199_v59 = vrot.slane %v1197_v48, 5 }
 0x161   : > { %v1194_v49 = vor.u32 %v1193_v57, %v1189_v46  ;;  %v3719_v24 = vsel %vm3697_vm4, %v3686_v13, %v3282_v20  ;;  %v1349_v40 = vshll.u32 %v1008_v56, 16  ;;  %v2420_v26 = vsel %vm9481_vm14, %v2415_v60, %v2419_v28  ;;  %v1622_v60 = vld [vmem:[#allocation2 + $0xa8] sm:$0xf] }
 0x162   : > { %v1190_v15 = vsel %vm9481_vm14, %v1185_v4, %v1189_v46  ;;  %v1348_v47 = vrot.slane %v1346_v44, 4  ;;  %v1355_v22 = vshll.u32 %v1009_v9, 16  ;;  %v10469_v5 = vunpack.c.l.b16 %v2410_v3  ;;  %v9028_v46 = vld [vmem:[#allocation2 + $0x54] sm:$0xff] }
 0x163   : > { %v1195_v30 = vrot.slane %v1194_v49, 4  ;;  %v1351_v6 = vrot.slane %v1349_v40, 5  ;;  %v1359_v2 = vshrl.u32 %v1009_v9, 16  ;;  %v2889_v8 = vunpack.c.l.b16 %v1190_v15 }
 0x164   : > { %v1357_v7 = vrot.slane %v1355_v22, 5  ;;  %v1365_v34 = vshll.u32 %v1027_v18, 16  ;;  %v8451_v36 = vrot.slane %v1430_v10, 9  ;;  %v1577_v23 = vrot.slane %v1009_v9, 5 }
 0x165   : > { %3461 = vrot.lane.b32.xlu0 %v3433_v11, %s9224_s25  ;;  %v1200_v0 = vsel %vm9481_vm14, %v1195_v30, %v1199_v59  ;;  %v1352_v21 = vor.u32 %v1351_v6, %v1348_v47  ;;  %v1361_v1 = vrot.slane %v1359_v2, 4  ;;  %v3402_v28 = vunpack.c.l.b16 %v2420_v26  ;;  %v1623_v11 = vld [vmem:[#allocation2 + $0xac] sm:$0xf]  ;;  %v2034_v30 = vld [vmem:[#allocation2 + $0x54] sm:$0xe] }
 0x166   : > { %v2890_v61 = vunpack.c.l.b16 %v1200_v0  ;;  %v1580_v54 = vrot.slane %v1027_v18, 5  ;;  %v8482_v50 = vrot.slane %v2649_v58, 9  ;;  %v1578_v27 = vsel %vm9372_vm11, %v8451_v36, %v1577_v23  ;;  %v3014_v59 = vpop.permute.xlu2 %3013 }
 0x167   : > { %v1353_v41 = vrot.slane %v1352_v21, 4  ;;  %v1362_v42 = vor.u32 %v1361_v1, %v1357_v7  ;;  %v1579_v17 = vrot.slane %v1577_v23, 4  ;;  %v1367_v48 = vrot.slane %v1365_v34, 5  ;;  %v3538_v21 = vpop.permute.xlu0 %3537  ;;  %v9044_v1 = vld [vmem:[#allocation2 + $0x60] sm:$0xff] }
 0x168   : > { %3193 = vrot.lane.b32.xlu1 %v3171_v53, %s9222_s23  ;;  %v2915_v12 = vpack.c.b16 %v2890_v61, %v2889_v8  ;;  %v2787_v56 = vrot.slane %v10362_v45, 5  ;;  %v2790_v32 = vrot.slane %v10398_v51, 5  ;;  %v3752_v39 = vsel %vm3730_vm8, %v3719_v24, %v3378_v29  ;;  %v1641_v24 = vld [vmem:[#allocation2 + $0xb0] sm:$0x1]  ;;  %v2041_v29 = vld [vmem:[#allocation2 + $0xa8] sm:$0xe] }
 0x169   : > { %v1358_v43 = vsel %vm9481_vm14, %v1353_v41, %v1357_v7  ;;  %v1363_v13 = vrot.slane %v1362_v42, 4  ;;  %v1581_v20 = vsel %vm9372_vm11, %v1579_v17, %v1580_v54  ;;  %v3427_v57 = vpack.c.b16 %v3402_v28, %v10469_v5 }
 0x16a   : > { %2937 = vrot.lane.b32.xlu2 %v2915_v12, %s9223_s24  ;;  %v2983_v9 = vunpack.c.l.b16 %v1578_v27  ;;  %v2788_v45 = vsel %vm9372_vm11, %v8482_v50, %v2787_v56  ;;  %v2789_v51 = vrot.slane %v2787_v56, 4  ;;  %v10488_v3 = vunpack.c.l.b16 %v1358_v43 }
 0x16b   : > { %v2984_v4 = vunpack.c.l.b16 %v1581_v20  ;;  %v3493_v44 = vunpack.c.l.b16 %v2788_v45  ;;  %v3564_v49 = vsel %vm3549_vm15, %v9010_v52, %v2934_v63  ;;  %v1368_v18 = vsel %vm9481_vm14, %v1363_v13, %v1367_v48  ;;  %v996_v48 = vld [vmem:[#allocation2 + $0x54] sm:$0xf]  ;;  %v10519_v45 = vld [vmem:[#allocation2 + $0x5c] sm:$0x1] }
 0x16c   : > { %v3458_v53 = vpop.permute.xlu1 %3457  ;;  %v2791_v40 = vsel %vm9372_vm11, %v2789_v51, %v2790_v32  ;;  %v1957_v26 = vshrl.u32 %v1622_v60, 16  ;;  %v1960_v47 = vshll.u32 %v1622_v60, 16  ;;  %v1966_v22 = vshll.u32 %v1623_v11, 16 }
 0x16d   : > { %3113 = vrot.lane.b32.xlu0 %v9028_v46, %s9217_s18  ;;  %v3785_v10 = vsel %vm13500_vm9, %v3752_v39, %v3458_v53  ;;  %v3494_v15 = vunpack.c.l.b16 %v2791_v40  ;;  %v1970_v5 = vshrl.u32 %v1623_v11, 16  ;;  %v3608_v6 = vsel %vm3598_vm0, %v3564_v49, %v3014_v59  ;;  %v10513_v53 = vld [vmem:[#allocation2 + $0x58] sm:$0xf]  ;;  %v201_v49 = vld [vmem:[%s9261_s17 + $0xe8] sm:$0xff] }
 0x16e   : > { %v1959_v2 = vrot.slane %v1957_v26, 4  ;;  %v1976_v58 = vshll.u32 %v1641_v24, 16  ;;  %v8467_v8 = vrot.slane %v2041_v29, 9  ;;  %v1962_v34 = vrot.slane %v1960_v47, 5  ;;  %v3190_v29 = vpop.permute.xlu2 %3189 }
 0x16f   : > { %v3513_v7 = vpack.c.b16 %v3494_v15, %v3493_v44  ;;  %v1968_v36 = vrot.slane %v1966_v22, 5  ;;  %v1972_v0 = vrot.slane %v1970_v5, 4  ;;  %v2904_v23 = vunpack.c.l.b16 %v1368_v18 }
 0x170   : > { %3449 = vrot.lane.b32.xlu1 %v3427_v57, %s9224_s25  ;;  %v2185_v63 = vrot.slane %v1623_v11, 5  ;;  %v2188_v28 = vrot.slane %v1641_v24, 5  ;;  %v8460_v61 = vrot.slane %v2034_v30, 9  ;;  %v1963_v54 = vor.u32 %v1962_v34, %v1959_v2  ;;  %v2643_v2 = vld [vmem:[#allocation2 + $0x60] sm:$0xe] }
 0x171   : > { %v1973_v50 = vor.u32 %v1972_v0, %v1968_v36  ;;  %v1978_v41 = vrot.slane %v1976_v58, 5  ;;  %v2136_v42 = vrot.slane %v10386_v19, 5  ;;  %v3002_v17 = vpack.c.b16 %v2984_v4, %v2983_v9 }
 0x172   : > { %3541 = vrot.lane.b32.xlu2 %v3513_v7, %s9221_s22  ;;  %v2187_v52 = vrot.slane %v2185_v63, 4  ;;  %v2139_v46 = vrot.slane %v10390_v55, 5  ;;  %v3818_v12 = vsel %vm13499_vm12, %v3785_v10, %v3538_v21  ;;  %v1964_v56 = vrot.slane %v1963_v54, 4 }
 0x173   : > { %v1974_v32 = vrot.slane %v1973_v50, 4  ;;  %v2186_v39 = vsel %vm9372_vm11, %v8467_v8, %v2185_v63  ;;  %v2137_v43 = vsel %vm9372_vm11, %v8460_v61, %v2136_v42  ;;  %8696 = vmatmul.msk.bf16.gmra.mxu2 %vm13498_vm13, %v3818_v12  ;;  %v2922_v19 = vpack.c.b16 %v2904_v23, %v10488_v3 }
 0x174   : > { %v3110_v27 = vpop.permute.xlu1 %3109  ;;  %v2189_v55 = vsel %vm9372_vm11, %v2187_v52, %v2188_v28  ;;  %v2138_v13 = vrot.slane %v2136_v42, 4  ;;  %v1969_v60 = vsel %vm9481_vm14, %v1964_v56, %v1968_v36  ;;  %v3225_v9 = vunpack.c.l.b16 %v2137_v43  ;;  %v664_v28 = vld [vmem:[#allocation2 + $0xb4] sm:$0xf]  ;;  %v668_v52 = vld [vmem:[#allocation2 + $0xbc] sm:$0x1] }
 0x175   : > { %3369 = vrot.lane.b32.xlu0 %v9044_v1, %s9218_s19  ;;  %v3641_v20 = vsel %vm3631_vm1, %v3608_v6, %v3110_v27  ;;  %v1979_v57 = vsel %vm9481_vm14, %v1974_v32, %v1978_v41  ;;  %v1202_v51 = vshrl.u32 %v996_v48, 16  ;;  %v3239_v11 = vunpack.c.l.b16 %v2186_v39  ;;  %v202_v32 = vld [vmem:[%s9261_s17 + $0xf0] sm:$0xff] }
 0x176   : > { %v3240_v3 = vunpack.c.l.b16 %v2189_v55  ;;  %v2140_v4 = vsel %vm9372_vm11, %v2138_v13, %v2139_v46  ;;  %v1205_v44 = vshll.u32 %v996_v48, 16  ;;  %v3159_v59 = vunpack.c.l.b16 %v1969_v60  ;;  %v3270_v55 = vpop.permute.xlu0 %3269 }
 0x177   : > { %v3226_v24 = vunpack.c.l.b16 %v2140_v4  ;;  %v1204_v18 = vrot.slane %v1202_v51, 4  ;;  %v1211_v40 = vshll.u32 %v10513_v53, 16  ;;  %v3160_v10 = vunpack.c.l.b16 %v1979_v57 }
 0x178   : > { %3031 = vrot.lane.b32.xlu1 %v3002_v17, %s9220_s21  ;;  %v1207_v26 = vrot.slane %v1205_v44, 5  ;;  %v1215_v15 = vshrl.u32 %v10513_v53, 16  ;;  %v1221_v47 = vshll.u32 %v10519_v45, 16  ;;  %v233_v30 = vpack.c.bf16 %v201_v49, %v201_v49 }
 0x179   : > { %v3251_v22 = vpack.c.b16 %v3226_v24, %v3225_v9  ;;  %v1213_v5 = vrot.slane %v1211_v40, 5  ;;  %v478_v6 = vshrl.u32 %v10457_v35, 16  ;;  %v3258_v58 = vpack.c.b16 %v3240_v3, %v3239_v11  ;;  %v3446_v11 = vpop.permute.xlu2 %3445 }
 0x17a   : > { %v1208_v8 = vor.u32 %v1207_v26, %v1204_v18  ;;  %v1217_v7 = vrot.slane %v1215_v15, 4  ;;  %v481_v34 = vshll.u32 %v10457_v35, 16  ;;  %v486_v0 = vshrl.u32 %v233_v30, 16 }
 0x17b   : > { %3273 = vrot.lane.b32.xlu2 %v3251_v22, %s9219_s20  ;;  %v480_v36 = vrot.slane %v478_v6, 7  ;;  %v489_v21 = vshll.u32 %v233_v30, 16  ;;  %v8476_v1 = vrot.slane %v2643_v2, 9  ;;  %v2745_v61 = vrot.slane %v10430_v14, 5  ;;  %v10569_v6 = vld [vmem:[#allocation2 + $0x64] sm:$0xf] }
 0x17c   : > { %v1209_v23 = vrot.slane %v1208_v8, 4  ;;  %v1218_v63 = vor.u32 %v1217_v7, %v1213_v5  ;;  %v2748_v54 = vrot.slane %v10435_v62, 5  ;;  %v1223_v50 = vrot.slane %v1221_v47, 5  ;;  %v3366_v13 = vpop.permute.xlu1 %3365  ;;  %v9035_v8 = vld [vmem:[#allocation2 + $0xa8] sm:$0xff] }
 0x17d   : > { %2951 = vrot.lane.b32.xlu0 %v2922_v19, %s9223_s24  ;;  %v10534_v41 = vor.u32 %v481_v34, %v480_v36  ;;  %v484_v35 = vrot.slane %v480_v36, 4  ;;  %v10536_v42 = vrot.slane %v486_v0, 7  ;;  %v3674_v27 = vsel %vm3664_vm3, %v3641_v20, %v3190_v29 }
 0x17e   : > { %v1219_v17 = vrot.slane %v1218_v63, 4  ;;  %v2746_v46 = vsel %vm9372_vm11, %v8476_v1, %v2745_v61  ;;  %v2747_v12 = vrot.slane %v2745_v61, 4  ;;  %v3178_v48 = vpack.c.b16 %v3160_v10, %v3159_v59  ;;  %v9017_v63 = vld [vmem:[#allocation2 + $0x84] sm:$0xff]  ;;  %v2035_v61 = vld [vmem:[#allocation2 + $0x60] sm:$0xe] }
 0x17f   : > { %v491_v14 = vor.u32 %v489_v21, %v10536_v42  ;;  %v493_v62 = vrot.slane %v10536_v42, 4  ;;  %v665_v56 = vsel %vm9271_vm5, %v10534_v41, %v664_v28  ;;  %v1214_v39 = vsel %vm9481_vm14, %v1209_v23, %v1213_v5  ;;  %v3526_v5 = vpop.permute.xlu0 %3525 }
 0x180   : > { %3287 = vrot.lane.b32.xlu1 %v3258_v58, %s9219_s20  ;;  %666 = vst [vmem:[#allocation2 + $0xb4] sm:$0xf] %v665_v56  ;;  %v2749_v43 = vsel %vm9372_vm11, %v2747_v12, %v2748_v54  ;;  %v3481_v19 = vunpack.c.l.b16 %v2746_v46  ;;  %v234_v20 = vpack.c.bf16 %v202_v32, %v202_v32  ;;  %v1224_v60 = vsel %vm9481_vm14, %v1219_v17, %v1223_v50  ;;  %v10582_v46 = vld [vmem:[#allocation2 + $0x68] sm:$0x1] }
 0x181   : > { %v492_v57 = vsel %vm9277_vm6, %v484_v35, %v491_v14  ;;  %v669_v9 = vsel %vm9283_vm7, %v493_v62, %v668_v52  ;;  %v3482_v51 = vunpack.c.l.b16 %v2749_v43  ;;  %v3707_v3 = vsel %vm3697_vm4, %v3674_v27, %v3270_v55  ;;  %v3028_v7 = vpop.permute.xlu2 %3027  ;;  %v1010_v12 = vld [vmem:[#allocation2 + $0xa8] sm:$0xf]  ;;  %v10590_v55 = vld [vmem:[#allocation2 + $0xac] sm:$0xf] }
 0x182   : > { %667 = vst.msk [vmem:[#allocation2 + $0xb8] sm:$0xf] %vm560_vm2, %v492_v57  ;;  %v495_v44 = vshrl.u32 %v234_v20, 16  ;;  %v2891_v49 = vunpack.c.l.b16 %v1214_v39  ;;  %v2892_v59 = vunpack.c.l.b16 %v1224_v60  ;;  %v3740_v24 = vsel %vm3730_vm8, %v3707_v3, %v3366_v13 }
 0x183   : > { %670 = vst [vmem:[#allocation2 + $0xbc] sm:$0x1] %v669_v9  ;;  %v3507_v4 = vpack.c.b16 %v3482_v51, %v3481_v19  ;;  %v498_v10 = vshll.u32 %v234_v20, 16  ;;  %v3773_v47 = vsel %vm13500_vm9, %v3740_v24, %v3446_v11  ;;  %v2143_v54 = vrot.slane %v10569_v6, 5  ;;  %v10588_v19 = vld [vmem:[#allocation2 + $0x70] sm:$0xf] }
 0x184   : > { %689 = vst.msk [vmem:[#allocation2 + $0xd0] sm:$0xf] %vm560_vm2, %v492_v57  ;;  %v10566_v40 = vrot.slane %v495_v44, 7  ;;  %v2916_v26 = vpack.c.b16 %v2892_v59, %v2891_v49  ;;  %v2948_v30 = vpop.permute.xlu1 %2947  ;;  %v3806_v34 = vsel %vm13499_vm12, %v3773_v47, %v3526_v5  ;;  %v8461_v56 = vrot.slane %v2035_v61, 9  ;;  %v1424_v61 = vld [vmem:[#allocation2 + $0x54] sm:$0xe] }
 0x185   : > { %3207 = vrot.lane.b32.xlu0 %v3178_v48, %s9222_s23  ;;  %3529 = vrot.lane.b32.xlu2 %v3507_v4, %s9221_s22  ;;  %v671_v48 = vld [vmem:[#allocation2 + $0xc0] sm:$0xf]  ;;  %v3585_v14 = vsel %vm3549_vm15, %v9017_v63, %v2948_v30  ;;  %v2145_v39 = vrot.slane %v2143_v54, 4  ;;  %v2146_v43 = vrot.slane %v10582_v46, 5  ;;  %v1370_v13 = vshrl.u32 %v1010_v12, 16 }
 0x186   : > { %8690 = vmatmul.msk.bf16.gmra.mxu0 %vm13498_vm13, %v3806_v34  ;;  %v500_v50 = vor.u32 %v498_v10, %v10566_v40  ;;  %v1373_v20 = vshll.u32 %v1010_v12, 16  ;;  %v3622_v51 = vsel %vm3598_vm0, %v3585_v14, %v3028_v7  ;;  %v2144_v44 = vsel %vm9372_vm11, %v8461_v56, %v2143_v54 }
 0x187   : > { %v708_v29 = vld [vmem:[#allocation2 + $0xb4] sm:$0x2]  ;;  %v828_v18 = vld [vmem:[#allocation2 + $0xb4] sm:$0x1]  ;;  %v3124_v11 = vpop.permute.xlu0 %3123  ;;  %v2752_v59 = vrot.slane %v10588_v19, 5  ;;  %v1379_v24 = vshll.u32 %v10590_v55, 16 }
 0x188   : > { %v8417_v15 = vrot.slane %v708_v29, 9  ;;  %v2650_v22 = vld [vmem:[#allocation2 + $0xb4] sm:$0xe]  ;;  %v672_v60 = vsel %vm9271_vm5, %v500_v50, %v671_v48  ;;  %v1383_v29 = vshrl.u32 %v10590_v55, 16  ;;  %v3655_v30 = vsel %vm3631_vm1, %v3622_v51, %v3124_v11 }
 0x189   : > { %v852_v2 = vld [vmem:[#allocation2 + $0xb8] sm:$0x8]  ;;  %v8483_v28 = vrot.slane %v2650_v22, 9  ;;  %673 = vst [vmem:[#allocation2 + $0xc0] sm:$0xf] %v672_v60  ;;  %v3284_v47 = vpop.permute.xlu2 %3283  ;;  %v10608_v63 = vrot.slane %v1379_v24, 5 }
 0x18a   : > { %v2232_v58 = vld [vmem:[#allocation2 + $0xb8] sm:$0xf]  ;;  %v829_v36 = vsel %vm9283_vm7, %v8417_v15, %v828_v18  ;;  %v8435_v0 = vrot.slane %v852_v2, 11  ;;  %v973_v21 = vld [vmem:[#allocation2 + $0xbc] sm:$0x1]  ;;  %v2147_v15 = vsel %vm9372_vm11, %v2145_v39, %v2146_v43  ;;  %v2754_v14 = vrot.slane %v2752_v59, 4 }
 0x18b   : > { %v2575_v1 = vshll.u32 %v2232_v58, 16  ;;  %v2579_v23 = vshrl.u32 %v2232_v58, 16  ;;  %830 = vst [vmem:[#allocation2 + $0xb4] sm:$0x1] %v829_v36  ;;  %v2794_v52 = vrot.slane %v2232_v58, 5  ;;  %v1372_v58 = vrot.slane %v1370_v13, 4 }
 0x18c   : > { %v974_v35 = vsel %vm9331_vm10, %v8435_v0, %v973_v21  ;;  %v3204_v3 = vpop.permute.xlu1 %3203  ;;  %v2644_v2 = vld [vmem:[#allocation2 + $0x6c] sm:$0xe]  ;;  %v10606_v21 = vld [vmem:[#allocation2 + $0x74] sm:$0x1] }
 0x18d   : > { %2939 = vrot.lane.b32.xlu0 %v2916_v26, %s9223_s24  ;;  %v10580_v27 = vrot.slane %v2575_v1, 5  ;;  %v2581_v17 = vrot.slane %v2579_v23, 4  ;;  %975 = vst [vmem:[#allocation2 + $0xbc] sm:$0x1] %v974_v35  ;;  %3127 = vrot.lane.b32.xlu2 %v9035_v8, %s9217_s18  ;;  %v2795_v57 = vsel %vm9372_vm11, %v8483_v28, %v2794_v52  ;;  %v2796_v9 = vrot.slane %v2794_v52, 4 }
 0x18e   : > { %v3495_v5 = vunpack.c.l.b16 %v2795_v57  ;;  %v1375_v8 = vrot.slane %v1373_v20, 5  ;;  %v3227_v1 = vunpack.c.l.b16 %v2144_v44  ;;  %v3228_v23 = vunpack.c.l.b16 %v2147_v15  ;;  %v10612_v52 = vld [vmem:[#allocation2 + $0xb0] sm:$0x1] }
 0x18f   : > { %v2582_v32 = vor.u32 %v2581_v17, %v10580_v27  ;;  %v1385_v28 = vrot.slane %v1383_v29, 4  ;;  %v8477_v17 = vrot.slane %v2644_v2, 9  ;;  %v3688_v48 = vsel %vm3664_vm3, %v3655_v30, %v3204_v3  ;;  %v10638_v30 = vld [vmem:[#allocation2 + $0xb8] sm:$0xf] }
 0x190   : > { %v2755_v56 = vrot.slane %v10606_v21, 5  ;;  %v1376_v13 = vor.u32 %v1375_v8, %v1372_v58  ;;  %v8445_v20 = vrot.slane %v1424_v61, 9  ;;  %v1389_v51 = vshll.u32 %v10612_v52, 16 }
 0x191   : > { %v2583_v26 = vrot.slane %v2582_v32, 4  ;;  %v203_v32 = vld [vmem:[%s9261_s17 + $0xf8] sm:$0xff]  ;;  %v1538_v44 = vrot.slane %v10519_v45, 5  ;;  %v3252_v29 = vpack.c.b16 %v3228_v23, %v3227_v1  ;;  %v1990_v61 = vshll.u32 %v10638_v30, 16 }
 0x192   : > { %v2231_v4 = vld [vmem:[#allocation2 + $0xb4] sm:$0xf]  ;;  %v1391_v8 = vrot.slane %v1389_v51, 5  ;;  %v1826_v51 = vshrl.u32 %v10569_v6, 16 }
 0x193   : > { %v9051_v49 = vld [vmem:[#allocation2 + $0xb4] sm:$0xff]  ;;  %v2566_v18 = vshrl.u32 %v2231_v4, 16  ;;  %v2569_v10 = vshll.u32 %v2231_v4, 16  ;;  %v1535_v4 = vrot.slane %v10513_v53, 5 }
 0x194   : > { %v2250_v22 = vld [vmem:[#allocation2 + $0xbc] sm:$0x1]  ;;  %v10621_v11 = vpop.permute.xlu1 %2935  ;;  %v1624_v15 = vld [vmem:[#allocation2 + $0xb4] sm:$0xf] }
 0x195   : > { %v2568_v7 = vrot.slane %v2566_v18, 4  ;;  %v2571_v34 = vrot.slane %v2569_v10, 5  ;;  %v2585_v36 = vshll.u32 %v2250_v22, 16  ;;  %v2797_v0 = vrot.slane %v2250_v22, 5  ;;  %3383 = vrot.lane.b32.xlu2 %v9051_v49, %s9218_s19 }
 0x196   : > { %v10628_v49 = vpack.c.bf16 %v203_v32, %v203_v32  ;;  %v3721_v18 = vsel %vm3697_vm4, %v3688_v48, %v3284_v47  ;;  %v2753_v10 = vsel %vm9372_vm11, %v8477_v17, %v2752_v59  ;;  %v1377_v22 = vrot.slane %v1376_v13, 4 }
 0x197   : > { %v2572_v54 = vor.u32 %v2571_v34, %v2568_v7  ;;  %v2587_v50 = vrot.slane %v2585_v36, 5  ;;  %v2798_v35 = vsel %vm9372_vm11, %v2796_v9, %v2797_v0  ;;  %v1386_v9 = vor.u32 %v1385_v28, %v10608_v63  ;;  %v1610_v7 = vld [vmem:[#allocation2 + $0x60] sm:$0xf]  ;;  %v10643_v28 = vld [vmem:[#allocation2 + $0xbc] sm:$0x1] }
 0x198   : > { %v3496_v12 = vunpack.c.l.b16 %v2798_v35  ;;  %v1536_v53 = vsel %vm9372_vm11, %v8445_v20, %v1535_v4  ;;  %v1537_v45 = vrot.slane %v1535_v4, 4  ;;  %v3483_v34 = vunpack.c.l.b16 %v2753_v10 }
 0x199   : > { %v2573_v39 = vrot.slane %v2572_v54, 4  ;;  %v2588_v43 = vsel %vm9481_vm14, %v2583_v26, %v2587_v50  ;;  %v3380_v26 = vpop.permute.xlu0 %3379  ;;  %v1387_v58 = vrot.slane %v1386_v9, 4  ;;  %v2971_v47 = vunpack.c.l.b16 %v1536_v53 }
 0x19a   : > { %v3416_v60 = vunpack.c.l.b16 %v2588_v43  ;;  %v3514_v57 = vpack.c.b16 %v3496_v12, %v3495_v5  ;;  %v3460_v5 = vpop.permute.xlu2 %3459  ;;  %v1539_v59 = vsel %vm9372_vm11, %v1537_v45, %v1538_v44  ;;  %v1981_v36 = vshrl.u32 %v1624_v15, 16 }
 0x19b   : > { %v2578_v3 = vsel %vm9481_vm14, %v2573_v39, %v10580_v27  ;;  %v2756_v27 = vsel %vm9372_vm11, %v2754_v14, %v2755_v56  ;;  %v1984_v0 = vshll.u32 %v1624_v15, 16  ;;  %v2972_v23 = vunpack.c.l.b16 %v1539_v59  ;;  %v9011_v39 = vld [vmem:[#allocation2 + $0x3c] sm:$0xff] }
 0x19c   : > { %v3415_v24 = vunpack.c.l.b16 %v2578_v3  ;;  %3543 = vrot.lane.b32.xlu0 %v3514_v57, %s9221_s22  ;;  %v3484_v1 = vunpack.c.l.b16 %v2756_v27  ;;  %v1994_v54 = vshrl.u32 %v10638_v30, 16  ;;  %v1983_v50 = vrot.slane %v1981_v36, 4  ;;  %v9029_v57 = vld [vmem:[#allocation2 + $0x60] sm:$0xff]  ;;  %v3540_v4 = vpop.permute.xlu1 %3539 }
 0x19d   : > { %v1986_v35 = vrot.slane %v1984_v0, 5  ;;  %v1813_v17 = vshrl.u32 %v1610_v7, 16  ;;  %v1816_v12 = vshll.u32 %v1610_v7, 16  ;;  %v1382_v48 = vsel %vm9481_vm14, %v1377_v22, %v10608_v63 }
 0x19e   : > { %v3434_v2 = vpack.c.b16 %v3416_v60, %v3415_v24  ;;  %v1392_v14 = vsel %vm9481_vm14, %v1387_v58, %v1391_v8  ;;  %v2996_v56 = vpack.c.b16 %v2972_v23, %v2971_v47  ;;  %v3754_v32 = vsel %vm3730_vm8, %v3721_v18, %v3380_v26  ;;  %v709_v58 = vld [vmem:[#allocation2 + $0xc0] sm:$0x2] }
 0x19f   : > { %v2000_v43 = vshll.u32 %v10643_v28, 16  ;;  %v1815_v13 = vrot.slane %v1813_v17, 4  ;;  %v1818_v20 = vrot.slane %v1816_v12, 5  ;;  %v1822_v60 = vshll.u32 %v10569_v6, 16 }
 0x1a0   : > { %3463 = vrot.lane.b32.xlu1 %v3434_v2, %s9224_s25  ;;  %3019 = vrot.lane.b32.xlu2 %v2996_v56, %s9220_s21  ;;  %v10657_v9 = vrot.slane %v1990_v61, 5  ;;  %v1996_v63 = vrot.slane %v1994_v54, 4  ;;  %v1832_v3 = vshll.u32 %v10582_v46, 16  ;;  %v1987_v44 = vor.u32 %v1986_v35, %v1983_v50  ;;  %v675_v50 = vld [vmem:[#allocation2 + $0xc8] sm:$0x1]  ;;  %v9045_v56 = vld [vmem:[#allocation2 + $0x6c] sm:$0xff] }
 0x1a1   : > { %v1819_v24 = vor.u32 %v1818_v20, %v1815_v13  ;;  %v1824_v18 = vrot.slane %v1822_v60, 5  ;;  %v503_v10 = vshrl.u32 %v10628_v49, 16  ;;  %v3508_v26 = vpack.c.b16 %v3484_v1, %v3483_v34  ;;  %v3016_v22 = vpop.permute.xlu0 %3015  ;;  %v831_v1 = vld [vmem:[#allocation2 + $0xc0] sm:$0x1] }
 0x1a2   : > { %v10662_v15 = vunpack.c.l.b16 %v1382_v48  ;;  %v1828_v27 = vrot.slane %v1826_v51, 4  ;;  %v10665_v53 = vunpack.c.l.b16 %v1392_v14  ;;  %v3567_v6 = vsel %vm3549_vm15, %v9011_v39, %v10621_v11  ;;  %v3112_v46 = vpop.permute.xlu2 %3111 }
 0x1a3   : > { %v1820_v45 = vrot.slane %v1819_v24, 4  ;;  %v1997_v8 = vor.u32 %v1996_v63, %v10657_v9  ;;  %v2002_v47 = vrot.slane %v2000_v43, 5  ;;  %v1834_v34 = vrot.slane %v1832_v3, 5 }
 0x1a4   : > { %3275 = vrot.lane.b32.xlu0 %v3252_v29, %s9219_s20  ;;  %v3787_v29 = vsel %vm13500_vm9, %v3754_v32, %v3460_v5  ;;  %v1829_v7 = vor.u32 %v1828_v27, %v1824_v18  ;;  %v2219_v5 = vld [vmem:[#allocation2 + $0x6c] sm:$0xf]  ;;  %v1988_v59 = vrot.slane %v1987_v44, 4  ;;  %v3610_v11 = vsel %vm3598_vm0, %v3567_v6, %v3016_v22  ;;  %v3272_v27 = vpop.permute.xlu1 %3271 }
 0x1a5   : > { %v3820_v2 = vsel %vm13499_vm12, %v3787_v29, %v3540_v4  ;;  %v1825_v36 = vsel %vm9481_vm14, %v1820_v45, %v1824_v18  ;;  %v505_v0 = vrot.slane %v503_v10, 7  ;;  %v501_v61 = vrot.slane %v10566_v40, 4  ;;  %v10697_v10 = vld [vmem:[#allocation2 + $0xb8] sm:$0xf] }
 0x1a6   : > { %8697 = vmatmul.msk.bf16.gmra.mxu2 %vm13498_vm13, %v3820_v2  ;;  %v1830_v23 = vrot.slane %v1829_v7, 4  ;;  %v506_v54 = vshll.u32 %v10628_v49, 16  ;;  %v8418_v35 = vrot.slane %v709_v58, 9  ;;  %v3147_v17 = vunpack.c.l.b16 %v1825_v36 }
 0x1a7   : > { %v510_v12 = vrot.slane %v505_v0, 4  ;;  %v2422_v48 = vshrl.u32 %v2219_v5, 16  ;;  %v2425_v14 = vshll.u32 %v2219_v5, 16  ;;  %v1998_v32 = vrot.slane %v1997_v8, 4 }
 0x1a8   : > { %3115 = vrot.lane.b32.xlu1 %v9029_v57, %s9217_s18  ;;  %v1835_v39 = vsel %vm9481_vm14, %v1830_v23, %v1834_v34  ;;  %v508_v43 = vor.u32 %v506_v54, %v505_v0  ;;  %v832_v13 = vsel %vm9283_vm7, %v8418_v35, %v831_v1  ;;  %v1993_v40 = vsel %vm9481_vm14, %v1988_v59, %v10657_v9  ;;  %v1012_v57 = vld [vmem:[#allocation2 + $0xb4] sm:$0xf] }
 0x1a9   : > { %v3148_v49 = vunpack.c.l.b16 %v1835_v39  ;;  %v676_v20 = vsel %vm9283_vm7, %v510_v12, %v675_v50  ;;  %833 = vst [vmem:[#allocation2 + $0xc0] sm:$0x1] %v832_v13  ;;  %v2424_v60 = vrot.slane %v2422_v48, 4  ;;  %v2427_v51 = vrot.slane %v2425_v14, 5  ;;  %v3192_v58 = vpop.permute.xlu0 %3191 }
 0x1aa   : > { %v509_v63 = vsel %vm9277_vm6, %v501_v61, %v508_v43  ;;  %677 = vst [vmem:[#allocation2 + $0xc8] sm:$0x1] %v676_v20  ;;  %v2431_v3 = vshll.u32 %v10588_v19, 16  ;;  %v2435_v4 = vshrl.u32 %v10588_v19, 16  ;;  %v2923_v44 = vpack.c.b16 %v10665_v53, %v10662_v15  ;;  %v10702_v15 = vld [vmem:[#allocation2 + $0xbc] sm:$0x1] }
 0x1ab   : > { %v3172_v9 = vpack.c.b16 %v3148_v49, %v3147_v17  ;;  %v3643_v24 = vsel %vm3631_vm1, %v3610_v11, %v3112_v46  ;;  %674 = vst.msk [vmem:[#allocation2 + $0xc4] sm:$0xf] %vm560_vm2, %v509_v63  ;;  %v2441_v18 = vshll.u32 %v10606_v21, 16  ;;  %v2003_v29 = vsel %vm9481_vm14, %v1998_v32, %v2002_v47  ;;  %v10707_v21 = vpop.permute.xlu2 %3367 }
 0x1ac   : > { %3531 = vrot.lane.b32.xlu0 %v3508_v26, %s9221_s22  ;;  %v9036_v26 = vld [vmem:[#allocation2 + $0xb4] sm:$0xff]  ;;  %v2428_v19 = vor.u32 %v2427_v51, %v2424_v60  ;;  %v2433_v22 = vrot.slane %v2431_v3, 5  ;;  %v2437_v6 = vrot.slane %v2435_v4, 4  ;;  %v10704_v53 = vunpack.c.l.b16 %v1993_v40 }
 0x1ad   : > { %3195 = vrot.lane.b32.xlu2 %v3172_v9, %s9222_s23  ;;  %v2443_v45 = vrot.slane %v2441_v18, 5  ;;  %v1394_v46 = vshrl.u32 %v1012_v57, 16  ;;  %v1397_v2 = vshll.u32 %v1012_v57, 16  ;;  %v1403_v47 = vshll.u32 %v10697_v10, 16 }
 0x1ae   : > { %v2429_v8 = vrot.slane %v2428_v19, 4  ;;  %v2438_v7 = vor.u32 %v2437_v6, %v2433_v22  ;;  %v1407_v34 = vshrl.u32 %v10697_v10, 16  ;;  %v10711_v5 = vunpack.c.l.b16 %v2003_v29 }
 0x1af   : > { %v1396_v59 = vrot.slane %v1394_v46, 4  ;;  %v1399_v36 = vrot.slane %v1397_v2, 5  ;;  %v1413_v11 = vshll.u32 %v10702_v15, 16  ;;  %v1405_v61 = vrot.slane %v1403_v47, 5  ;;  %v1432_v2 = vld [vmem:[#allocation2 + $0xb4] sm:$0xe] }
 0x1b0   : > { %3371 = vrot.lane.b32.xlu1 %v9045_v56, %s9218_s19  ;;  %v2233_v0 = vld [vmem:[#allocation2 + $0xc0] sm:$0xf]  ;;  %v2434_v1 = vsel %vm9481_vm14, %v2429_v8, %v2433_v22  ;;  %v2439_v23 = vrot.slane %v2438_v7, 4  ;;  %v1409_v54 = vrot.slane %v1407_v34, 4  ;;  %v3676_v12 = vsel %vm3664_vm3, %v3643_v24, %v3192_v58 }
 0x1b1   : > { %v976_v50 = vld [vmem:[#allocation2 + $0xc8] sm:$0x1]  ;;  %v2590_v35 = vshrl.u32 %v2233_v0, 16  ;;  %v2593_v17 = vshll.u32 %v2233_v0, 16  ;;  %v1400_v48 = vor.u32 %v1399_v36, %v1396_v59  ;;  %v3403_v39 = vunpack.c.l.b16 %v2434_v1 }
 0x1b2   : > { %v853_v14 = vld [vmem:[#allocation2 + $0xc4] sm:$0x8]  ;;  %v2444_v32 = vsel %vm9481_vm14, %v2439_v23, %v2443_v45  ;;  %v1410_v43 = vor.u32 %v1409_v54, %v1405_v61  ;;  %v1415_v13 = vrot.slane %v1413_v11, 5  ;;  %v1431_v45 = vld [vmem:[#allocation2 + $0xa8] sm:$0xe]  ;;  %v3709_v46 = vsel %vm3697_vm4, %v3676_v12, %v3272_v27 }
 0x1b3   : > { %v10718_v56 = vld [vmem:[#allocation2 + $0xc4] sm:$0xf]  ;;  %v8436_v40 = vrot.slane %v853_v14, 11  ;;  %v2592_v49 = vrot.slane %v2590_v35, 4  ;;  %v2595_v20 = vrot.slane %v2593_v17, 5  ;;  %v3404_v51 = vunpack.c.l.b16 %v2444_v32  ;;  %v2950_v58 = vpop.permute.xlu2 %2949 }
 0x1b4   : > { %3129 = vrot.lane.b32.xlu0 %v9036_v26, %s9217_s18  ;;  %v2599_v60 = vshll.u32 %v10718_v56, 16  ;;  %v9052_v57 = vld [vmem:[#allocation2 + $0xc0] sm:$0xff]  ;;  %v2603_v63 = vshrl.u32 %v10718_v56, 16  ;;  %v1401_v3 = vrot.slane %v1400_v48, 4  ;;  %v1411_v4 = vrot.slane %v1410_v43, 4 }
 0x1b5   : > { %v977_v9 = vsel %vm9331_vm10, %v8436_v40, %v976_v50  ;;  %v2596_v24 = vor.u32 %v2595_v20, %v2592_v49  ;;  %v1591_v26 = vrot.slane %v10697_v10, 5  ;;  %v3428_v19 = vpack.c.b16 %v3404_v51, %v3403_v39  ;;  %v1626_v11 = vld [vmem:[#allocation2 + $0xc0] sm:$0xf]  ;;  %v10745_v35 = vld [vmem:[#allocation2 + $0xc4] sm:$0xf]  ;;  %v9018_v40 = vld [vmem:[#allocation2 + $0x90] sm:$0xff] }
 0x1b6   : > { %v2601_v18 = vrot.slane %v2599_v60, 5  ;;  %978 = vst [vmem:[#allocation2 + $0xc8] sm:$0x1] %v977_v9  ;;  %v2605_v29 = vrot.slane %v2603_v63, 4  ;;  %v1406_v22 = vsel %vm9481_vm14, %v1401_v3, %v1405_v61  ;;  %v3179_v8 = vpack.c.b16 %v10711_v5, %v10704_v53  ;;  %v2042_v51 = vld [vmem:[#allocation2 + $0xb4] sm:$0xe] }
 0x1b7   : > { %3451 = vrot.lane.b32.xlu2 %v3428_v19, %s9224_s25  ;;  %v2907_v10 = vunpack.c.l.b16 %v1406_v22  ;;  %v2597_v47 = vrot.slane %v2596_v24, 4  ;;  %v8452_v59 = vrot.slane %v1431_v45, 9  ;;  %v1584_v36 = vrot.slane %v10590_v55, 5 }
 0x1b8   : > { %2953 = vrot.lane.b32.xlu1 %v2923_v44, %s9223_s24  ;;  %v1416_v44 = vsel %vm9481_vm14, %v1411_v4, %v1415_v13  ;;  %v2606_v34 = vor.u32 %v2605_v29, %v2601_v18  ;;  %v3742_v27 = vsel %vm3730_vm8, %v3709_v46, %v10707_v21  ;;  %v8453_v0 = vrot.slane %v1432_v2, 9 }
 0x1b9   : > { %v2908_v7 = vunpack.c.l.b16 %v1416_v44  ;;  %v1593_v1 = vrot.slane %v1591_v26, 4  ;;  %v1587_v53 = vrot.slane %v10612_v52, 5  ;;  %v1594_v5 = vrot.slane %v10702_v15, 5 }
 0x1ba   : > { %v3528_v6 = vpop.permute.xlu1 %3527  ;;  %v1585_v54 = vsel %vm9372_vm11, %v8452_v59, %v1584_v36  ;;  %v1586_v50 = vrot.slane %v1584_v36, 4  ;;  %v2005_v12 = vshrl.u32 %v1626_v11, 16  ;;  %v2602_v52 = vsel %vm9481_vm14, %v2597_v47, %v2601_v18 }
 0x1bb   : > { %v2924_v55 = vpack.c.b16 %v2908_v7, %v2907_v10  ;;  %v2985_v17 = vunpack.c.l.b16 %v1585_v54  ;;  %v2607_v15 = vrot.slane %v2606_v34, 4  ;;  %v2008_v39 = vshll.u32 %v1626_v11, 16  ;;  %v3206_v44 = vpop.permute.xlu2 %3205 }
 0x1bc   : > { %3385 = vrot.lane.b32.xlu0 %v9052_v57, %s9218_s19  ;;  %v1588_v14 = vsel %vm9372_vm11, %v1586_v50, %v1587_v53  ;;  %v2007_v49 = vrot.slane %v2005_v12, 4  ;;  %v2014_v20 = vshll.u32 %v10745_v35, 16  ;;  %v2018_v57 = vshrl.u32 %v10745_v35, 16  ;;  %v686_v50 = vld [vmem:[#allocation2 + $0xcc] sm:$0xf] }
 0x1bd   : > { %v10749_v48 = vld [vmem:[#allocation2 + $0xc8] sm:$0x1]  ;;  %v2986_v13 = vunpack.c.l.b16 %v1588_v14  ;;  %v2010_v60 = vrot.slane %v2008_v39, 5  ;;  %v3417_v18 = vunpack.c.l.b16 %v2602_v52  ;;  %v1592_v29 = vsel %vm9372_vm11, %v8453_v0, %v1591_v26  ;;  %v2043_v26 = vld [vmem:[#allocation2 + $0xc0] sm:$0xe] }
 0x1be   : > { %v10756_v32 = vld [vmem:[#allocation2 + $0xc8] sm:$0x1]  ;;  %v2609_v43 = vshll.u32 %v10749_v48, 16  ;;  %v2016_v9 = vrot.slane %v2014_v20, 5  ;;  %v2020_v22 = vrot.slane %v2018_v57, 4  ;;  %v1595_v45 = vsel %vm9372_vm11, %v1593_v1, %v1594_v5 }
 0x1bf   : > { %v3448_v23 = vpop.permute.xlu0 %3447  ;;  %v2024_v63 = vshll.u32 %v10756_v32, 16  ;;  %v3003_v4 = vpack.c.b16 %v2986_v13, %v2985_v17  ;;  %v2011_v19 = vor.u32 %v2010_v60, %v2007_v49  ;;  %v3588_v46 = vsel %vm3549_vm15, %v9018_v40, %v2950_v58 }
 0x1c0   : > { %v3775_v61 = vsel %vm13500_vm9, %v3742_v27, %v3448_v23  ;;  %3209 = vrot.lane.b32.xlu1 %v3179_v8, %s9222_s23  ;;  %v2611_v3 = vrot.slane %v2609_v43, 5  ;;  %v8468_v8 = vrot.slane %v2042_v51, 9  ;;  %v2021_v47 = vor.u32 %v2020_v22, %v2016_v9 }
 0x1c1   : > { %v3808_v21 = vsel %vm13499_vm12, %v3775_v61, %v3528_v6  ;;  %3033 = vrot.lane.b32.xlu2 %v3003_v4, %s9220_s21  ;;  %v2012_v7 = vrot.slane %v2011_v19, 4  ;;  %v2026_v34 = vrot.slane %v2024_v63, 5  ;;  %v2987_v59 = vunpack.c.l.b16 %v1592_v29  ;;  %v2236_v29 = vld [vmem:[#allocation2 + $0xd0] sm:$0xf] }
 0x1c2   : > { %8691 = vmatmul.msk.bf16.gmra.mxu0 %vm13498_vm13, %v3808_v21  ;;  %v3126_v24 = vpop.permute.xlu1 %3125  ;;  %v2612_v6 = vsel %vm9481_vm14, %v2607_v15, %v2611_v3  ;;  %v2199_v36 = vrot.slane %v10745_v35, 5  ;;  %v2192_v11 = vrot.slane %v10638_v30, 5  ;;  %v2195_v27 = vrot.slane %v10643_v28, 5  ;;  %v2651_v15 = vld [vmem:[#allocation2 + $0xc0] sm:$0xe] }
 0x1c3   : > { %v3418_v10 = vunpack.c.l.b16 %v2612_v6  ;;  %v2988_v1 = vunpack.c.l.b16 %v1595_v45  ;;  %v2017_v23 = vsel %vm9481_vm14, %v2012_v7, %v2016_v9  ;;  %v2022_v58 = vrot.slane %v2021_v47, 4 }
 0x1c4   : > { %2955 = vrot.lane.b32.xlu0 %v2924_v55, %s9223_s24  ;;  %v3163_v53 = vunpack.c.l.b16 %v2017_v23  ;;  %v8469_v5 = vrot.slane %v2043_v26, 9  ;;  %v2193_v61 = vsel %vm9372_vm11, %v8468_v8, %v2192_v11  ;;  %v2194_v54 = vrot.slane %v2192_v11, 4  ;;  %v690_v55 = vld [vmem:[#allocation2 + $0xd4] sm:$0x1]  ;;  %v2938_v51 = vpop.permute.xlu2 %2937 }
 0x1c5   : > { %v3435_v0 = vpack.c.b16 %v3418_v10, %v3417_v18  ;;  %v2027_v30 = vsel %vm9481_vm14, %v2022_v58, %v2026_v34  ;;  %v2202_v28 = vrot.slane %v10756_v32, 5  ;;  %v3241_v35 = vunpack.c.l.b16 %v2193_v61  ;;  %v9012_v58 = vld [vmem:[#allocation2 + $0x48] sm:$0xff] }
 0x1c6   : > { %v3164_v17 = vunpack.c.l.b16 %v2027_v30  ;;  %v2201_v21 = vrot.slane %v2199_v36, 4  ;;  %v2196_v52 = vsel %vm9372_vm11, %v2194_v54, %v2195_v27  ;;  %v687_v39 = vsel %vm9271_vm5, %v10534_v41, %v686_v50 }
 0x1c7   : > { %v3030_v2 = vpop.permute.xlu0 %3029  ;;  %v3242_v14 = vunpack.c.l.b16 %v2196_v52  ;;  %v691_v43 = vsel %vm9283_vm7, %v493_v62, %v690_v55  ;;  %v3004_v32 = vpack.c.b16 %v2988_v1, %v2987_v59  ;;  %v2200_v40 = vsel %vm9372_vm11, %v8469_v5, %v2199_v36  ;;  %688 = vst [vmem:[#allocation2 + $0xcc] sm:$0xf] %v687_v39  ;;  %v854_v62 = vld [vmem:[#allocation2 + $0xd0] sm:$0x8] }
 0x1c8   : > { %3465 = vrot.lane.b32.xlu1 %v3435_v0, %s9224_s25  ;;  %v3624_v12 = vsel %vm3598_vm0, %v3588_v46, %v3030_v2  ;;  %v3180_v13 = vpack.c.b16 %v3164_v17, %v3163_v53  ;;  %692 = vst [vmem:[#allocation2 + $0xd4] sm:$0x1] %v691_v43  ;;  %v8484_v63 = vrot.slane %v2651_v15, 9  ;;  %v2801_v41 = vrot.slane %v10718_v56, 5 }
 0x1c9   : > { %v3657_v60 = vsel %vm3631_vm1, %v3624_v12, %v3126_v24  ;;  %v3259_v57 = vpack.c.b16 %v3242_v14, %v3241_v35  ;;  %v2203_v42 = vsel %vm9372_vm11, %v2201_v21, %v2202_v28  ;;  %v2804_v9 = vrot.slane %v10749_v48, 5  ;;  %v9037_v28 = vld [vmem:[#allocation2 + $0xc0] sm:$0xff] }
 0x1ca   : > { %v3382_v20 = vpop.permute.xlu1 %3381  ;;  %v2802_v3 = vsel %vm9372_vm11, %v8484_v63, %v2801_v41  ;;  %v2803_v4 = vrot.slane %v2801_v41, 4  ;;  %v3243_v24 = vunpack.c.l.b16 %v2200_v40  ;;  %v3690_v18 = vsel %vm3664_vm3, %v3657_v60, %v3206_v44 }
 0x1cb   : > { %3289 = vrot.lane.b32.xlu2 %v3259_v57, %s9219_s20  ;;  %v3497_v56 = vunpack.c.l.b16 %v2802_v3  ;;  %v3244_v19 = vunpack.c.l.b16 %v2203_v42  ;;  %v8437_v22 = vrot.slane %v854_v62, 11  ;;  %v2623_v10 = vshll.u32 %v2236_v29, 16 }
 0x1cc   : > { %3211 = vrot.lane.b32.xlu0 %v3180_v13, %s9222_s23  ;;  %v2805_v45 = vsel %vm9372_vm11, %v2803_v4, %v2804_v9  ;;  %v2627_v7 = vshrl.u32 %v2236_v29, 16  ;;  %v3542_v1 = vpop.permute.xlu2 %3541  ;;  %v2808_v50 = vrot.slane %v2236_v29, 5  ;;  %v3570_v55 = vsel %vm3549_vm15, %v9012_v58, %v2938_v51 }
 0x1cd   : > { %v3498_v46 = vunpack.c.l.b16 %v2805_v45  ;;  %v3260_v36 = vpack.c.b16 %v3244_v19, %v3243_v24  ;;  %v2625_v5 = vrot.slane %v2623_v10, 5 }
 0x1ce   : > { %v710_v2 = vld [vmem:[#allocation2 + $0xcc] sm:$0x2]  ;;  %v834_v8 = vld [vmem:[#allocation2 + $0xcc] sm:$0x1]  ;;  %v2629_v61 = vrot.slane %v2627_v7, 4  ;;  %v2810_v17 = vrot.slane %v2808_v50, 4 }
 0x1cf   : > { %v3286_v49 = vpop.permute.xlu0 %3285  ;;  %v8419_v48 = vrot.slane %v710_v2, 9  ;;  %v979_v47 = vld [vmem:[#allocation2 + $0xd4] sm:$0x1]  ;;  %v3515_v34 = vpack.c.b16 %v3498_v46, %v3497_v56  ;;  %v2652_v27 = vld [vmem:[#allocation2 + $0xcc] sm:$0xe] }
 0x1d0   : > { %3035 = vrot.lane.b32.xlu1 %v3004_v32, %s9220_s21  ;;  %v3723_v6 = vsel %vm3697_vm4, %v3690_v18, %v3286_v49  ;;  %v980_v11 = vsel %vm9331_vm10, %v8437_v22, %v979_v47  ;;  %v8485_v54 = vrot.slane %v2652_v27, 9  ;;  %v2630_v30 = vor.u32 %v2629_v61, %v2625_v5 }
 0x1d1   : > { %v3756_v44 = vsel %vm3730_vm8, %v3723_v6, %v3382_v20  ;;  %v835_v23 = vsel %vm9283_vm7, %v8419_v48, %v834_v8  ;;  %981 = vst [vmem:[#allocation2 + $0xd4] sm:$0x1] %v980_v11 }
 0x1d2   : > { %v3018_v59 = vpop.permute.xlu1 %3017  ;;  %836 = vst [vmem:[#allocation2 + $0xcc] sm:$0x1] %v835_v23  ;;  %v2809_v35 = vsel %vm9372_vm11, %v8485_v54, %v2808_v50  ;;  %v2631_v20 = vrot.slane %v2630_v30, 4 }
 0x1d3   : > { %3545 = vrot.lane.b32.xlu2 %v3515_v34, %s9221_s22  ;;  %v3612_v15 = vsel %vm3598_vm0, %v3570_v55, %v3018_v59  ;;  %v3499_v60 = vunpack.c.l.b16 %v2809_v35  ;;  %v9019_v59 = vld [vmem:[#allocation2 + $0x9c] sm:$0xff]  ;;  %v9013_v55 = vld [vmem:[#allocation2 + $0x54] sm:$0xff] }
 0x1d5   : > { %v3274_v14 = vpop.permute.xlu2 %3273 }
 0x1d7   : > { %v3462_v26 = vpop.permute.xlu0 %3461 }
 0x1d8   : > { %v3789_v0 = vsel %vm13500_vm9, %v3756_v44, %v3462_v26  ;;  %3291 = vrot.lane.b32.xlu1 %v3260_v36, %s9219_s20  ;;  %v2252_v52 = vld [vmem:[#allocation2 + $0xd4] sm:$0x1] }
 0x1d9   : > { %v3822_v53 = vsel %vm13499_vm12, %v3789_v0, %v3542_v1  ;;  %v2235_v39 = vld [vmem:[#allocation2 + $0xcc] sm:$0xf]  ;;  %v2633_v43 = vshll.u32 %v2252_v52, 16  ;;  %v2811_v32 = vrot.slane %v2252_v52, 5 }
 0x1da   : > { %8698 = vmatmul.msk.bf16.gmra.mxu2 %vm13498_vm13, %v3822_v53  ;;  %v3194_v12 = vpop.permute.xlu1 %3193  ;;  %v2614_v40 = vshrl.u32 %v2235_v39, 16  ;;  %v2617_v49 = vshll.u32 %v2235_v39, 16  ;;  %v9053_v24 = vld [vmem:[#allocation2 + $0xcc] sm:$0xff] }
 0x1db   : > { %3131 = vrot.lane.b32.xlu2 %v9037_v28, %s9217_s18  ;;  %v2635_v57 = vrot.slane %v2633_v43, 5  ;;  %v2812_v63 = vsel %vm9372_vm11, %v2810_v17, %v2811_v32  ;;  %v10853_v43 = vpop.f32.mrf.mxu0 }
 0x1dc   : > { %v2616_v41 = vrot.slane %v2614_v40, 4  ;;  %v2619_v51 = vrot.slane %v2617_v49, 5  ;;  %v3500_v42 = vunpack.c.l.b16 %v2812_v63 }
 0x1dd   : > { %v2636_v4 = vsel %vm9481_vm14, %v2631_v20, %v2635_v57 }
 0x1de   : > { %v2620_v3 = vor.u32 %v2619_v51, %v2616_v41  ;;  %v3516_v9 = vpack.c.b16 %v3500_v42, %v3499_v60  ;;  %v3420_v45 = vunpack.c.l.b16 %v2636_v4  ;;  %v9020_v41 = vld [vmem:[#allocation2 + $0xa8] sm:$0xff] }
 0x1df   : > { %v3114_v21 = vpop.permute.xlu0 %3113  ;;  %v3530_v6 = vpop.permute.xlu2 %3529 }
 0x1e0   : > { %v3645_v13 = vsel %vm3631_vm1, %v3612_v15, %v3114_v21  ;;  %v2621_v19 = vrot.slane %v2620_v3, 4  ;;  %3547 = vrot.lane.b32.xlu1 %v3516_v9, %s9221_s22 }
 0x1e1   : > { %v3678_v62 = vsel %vm3664_vm3, %v3645_v13, %v3194_v12 }
 0x1e2   : > { %v3711_v18 = vsel %vm3697_vm4, %v3678_v62, %v3274_v14  ;;  %v3450_v56 = vpop.permute.xlu1 %3449  ;;  %v2626_v2 = vsel %vm9481_vm14, %v2621_v19, %v2625_v5 }
 0x1e3   : > { %3387 = vrot.lane.b32.xlu2 %v9053_v24, %s9218_s19  ;;  %v3419_v10 = vunpack.c.l.b16 %v2626_v2  ;;  %v10859_v63 = vpop.f32.mrf.mxu0 }
 0x1e5   : > { %v3436_v7 = vpack.c.b16 %v3420_v45, %v3419_v10 }
 0x1e7   : > { %v3370_v29 = vpop.permute.xlu0 %3369  ;;  %3467 = vrot.lane.b32.xlu0 %v3436_v7, %s9224_s25  ;;  %v3128_v47 = vpop.permute.xlu2 %3127 }
 0x1e8   : > { %v3744_v22 = vsel %vm3730_vm8, %v3711_v18, %v3370_v29 }
 0x1e9   : > { %v3777_v46 = vsel %vm13500_vm9, %v3744_v22, %v3450_v56 }
 0x1ea   : > { %v3810_v8 = vsel %vm13499_vm12, %v3777_v46, %v3530_v6  ;;  %v3032_v34 = vpop.permute.xlu1 %3031 }
 0x1eb   : > { %8692 = vmatmul.msk.bf16.gmra.mxu0 %vm13498_vm13, %v3810_v8  ;;  %v10864_v24 = vpop.f32.mrf.mxu0 }
 0x1ef   : > { %v2952_v48 = vpop.permute.xlu0 %2951  ;;  %v3384_v26 = vpop.permute.xlu2 %3383 }
 0x1f0   : > { %v3591_v11 = vsel %vm3549_vm15, %v9019_v59, %v2952_v48  ;;  %v9021_v48 = vld [vmem:[#allocation2 + $0xb4] sm:$0xff] }
 0x1f1   : > { %v3626_v27 = vsel %vm3598_vm0, %v3591_v11, %v3032_v34 }
 0x1f2   : > { %v3288_v0 = vpop.permute.xlu1 %3287  ;;  %v3659_v23 = vsel %vm3631_vm1, %v3626_v27, %v3128_v47 }
 0x1f3   : > { %v10871_v2 = vpop.f32.mrf.mxu0 }
 0x1f7   : > { %v3208_v44 = vpop.permute.xlu0 %3207 }
 0x1f8   : > { %v3692_v58 = vsel %vm3664_vm3, %v3659_v23, %v3208_v44 }
 0x1f9   : > { %v3725_v5 = vsel %vm3697_vm4, %v3692_v58, %v3288_v0 }
 0x1fa   : > { %v3020_v1 = vpop.permute.xlu2 %3019  ;;  %v3758_v61 = vsel %vm3730_vm8, %v3725_v5, %v3384_v26 }
 0x1fb   : > { %v10874_v8 = vpop.f32.mrf.mxu0 }
 0x1ff   : > { %v2940_v36 = vpop.permute.xlu0 %2939 }
 0x200   : > { %v3573_v35 = vsel %vm3549_vm15, %v9013_v55, %v2940_v36  ;;  %v10891_v55 = vpop.f32.mrf.mxu2 }
 0x201   : > { %v3614_v12 = vsel %vm3598_vm0, %v3573_v35, %v3020_v1 }
 0x203   : > { %v10877_v34 = vpop.f32.mrf.mxu0 }
 0x207   : > { %v3196_v30 = vpop.permute.xlu2 %3195 }
 0x20b   : > { %v10882_v0 = vpop.f32.mrf.mxu0 }
 0x20e   : > { %v3544_v53 = vpop.permute.xlu0 %3543 }
 0x211   : > { %v3452_v15 = vpop.permute.xlu2 %3451 }
 0x212   : > { %v3464_v54 = vpop.permute.xlu1 %3463 }
 0x213   : > { %v3791_v50 = vsel %vm13500_vm9, %v3758_v61, %v3464_v54 }
 0x214   : > { %v3824_v28 = vsel %vm13499_vm12, %v3791_v50, %v3544_v53  ;;  %v10889_v50 = vpop.f32.mrf.mxu0 }
 0x215   : > { %8699 = vmatmul.msk.bf16.gmra.mxu2 %vm13498_vm13, %v3824_v28  ;;  %v10895_v28 = vpop.f32.mrf.mxu2 }
 0x216   : > { %v3276_v17 = vpop.permute.xlu0 %3275 }
 0x21a   : > { %v3116_v21 = vpop.permute.xlu1 %3115 }
 0x21b   : > { %v3647_v52 = vsel %vm3631_vm1, %v3614_v12, %v3116_v21  ;;  %v3034_v60 = vpop.permute.xlu2 %3033 }
 0x21c   : > { %v3680_v14 = vsel %vm3664_vm3, %v3647_v52, %v3196_v30  ;;  %v10893_v30 = vpop.f32.mrf.mxu0 }
 0x21d   : > { %v3713_v39 = vsel %vm3697_vm4, %v3680_v14, %v3276_v17  ;;  %v10899_v17 = vpop.f32.mrf.mxu2 }
 0x21e   : > { %v3532_v13 = vpop.permute.xlu0 %3531 }
 0x222   : > { %v3372_v32 = vpop.permute.xlu1 %3371 }
 0x223   : > { %v3746_v40 = vsel %vm3730_vm8, %v3713_v39, %v3372_v32  ;;  %v3976_v39 = vsel %vm3549_vm15, %v10859_v63, 0.0 }
 0x224   : > { %v3779_v49 = vsel %vm13500_vm9, %v3746_v40, %v3452_v15  ;;  %v10897_v35 = vpop.f32.mrf.mxu0  ;;  %v3978_v40 = vsel %vm3549_vm15, %v10864_v24, 0.0 }
 0x225   : > { %v3812_v20 = vsel %vm13499_vm12, %v3779_v49, %v3532_v13  ;;  %v3290_v62 = vpop.permute.xlu2 %3289  ;;  %v10903_v12 = vpop.f32.mrf.mxu2  ;;  %v3975_v13 = vsel %vm3549_vm15, %v10853_v43, 0.0 }
 0x226   : > { %8693 = vmatmul.msk.bf16.gmra.mxu0 %vm13498_vm13, %v3812_v20  ;;  %v3130_v51 = vpop.permute.xlu0 %3129  ;;  %v3977_v49 = vadd.f32 %v3976_v39, %v3975_v13  ;;  %v3980_v20 = vsel %vm3549_vm15, %v10871_v2, 0.0  ;;  %v4008_v13 = vsel %vm3549_vm15, %v10895_v28, 0.0 }
 0x22a   : > { %v2954_v57 = vpop.permute.xlu1 %2953 }
 0x22b   : > { %v3594_v42 = vsel %vm3549_vm15, %v9020_v41, %v2954_v57  ;;  %v3982_v57 = vsel %vm3549_vm15, %v10874_v8, 0.0 }
 0x22c   : > { %v3628_v3 = vsel %vm3598_vm0, %v3594_v42, %v3034_v60  ;;  %v3979_v60 = vadd.f32 %v3978_v40, %v3977_v49  ;;  %v3984_v42 = vsel %vm3549_vm15, %v10877_v34, 0.0  ;;  %v4010_v49 = vsel %vm3549_vm15, %v10899_v17, 0.0 }
 0x22d   : > { %v3661_v9 = vsel %vm3631_vm1, %v3628_v3, %v3130_v51  ;;  %v3546_v22 = vpop.permute.xlu2 %3545  ;;  %v10907_v15 = vpop.f32.mrf.mxu2 }
 0x22e   : > { %v3386_v29 = vpop.permute.xlu0 %3385  ;;  %v3981_v41 = vadd.f32 %v3980_v20, %v3979_v60 }
 0x232   : > { %v3210_v4 = vpop.permute.xlu1 %3209 }
 0x233   : > { %v3694_v18 = vsel %vm3664_vm3, %v3661_v9, %v3210_v4  ;;  %v3986_v4 = vsel %vm3549_vm15, %v10882_v0, 0.0 }
 0x234   : > { %v3727_v56 = vsel %vm3697_vm4, %v3694_v18, %v3290_v62  ;;  %v3983_v62 = vadd.f32 %v3982_v57, %v3981_v41  ;;  %v3988_v18 = vsel %vm3549_vm15, %v10889_v50, 0.0  ;;  %v4012_v57 = vsel %vm3549_vm15, %v10903_v12, 0.0 }
 0x235   : > { %v3760_v19 = vsel %vm3730_vm8, %v3727_v56, %v3386_v29  ;;  %v3132_v44 = vpop.permute.xlu2 %3131  ;;  %v10913_v32 = vpop.f32.mrf.mxu2  ;;  %v3990_v56 = vsel %vm3549_vm15, %v10893_v30, 0.0 }
 0x236   : > { %v2956_v7 = vpop.permute.xlu0 %2955  ;;  %v3985_v9 = vadd.f32 %v3984_v42, %v3983_v62  ;;  %v4014_v42 = vsel %vm3549_vm15, %v10907_v15, 0.0 }
 0x237   : > { %v3597_v47 = vsel %vm3549_vm15, %v9021_v48, %v2956_v7 }
 0x238   : > { %v3987_v29 = vadd.f32 %v3986_v4, %v3985_v9  ;;  %v4016_v4 = vsel %vm3549_vm15, %v10913_v32, 0.0 }
 0x23a   : > { %v3466_v6 = vpop.permute.xlu1 %3465 }
 0x23b   : > { %v3793_v45 = vsel %vm13500_vm9, %v3760_v19, %v3466_v6  ;;  %v3989_v19 = vadd.f32 %v3988_v18, %v3987_v29  ;;  %v3992_v6 = vsel %vm3549_vm15, %v10897_v35, 0.0 }
 0x23c   : > { %v3826_v46 = vsel %vm13499_vm12, %v3793_v45, %v3546_v22 }
 0x23d   : > { %8700 = vmatmul.msk.bf16.gmra.mxu2 %vm13498_vm13, %v3826_v46  ;;  %v3388_v23 = vpop.permute.xlu2 %3387  ;;  %v10927_v3 = vpop.f32.mrf.mxu2  ;;  %v3991_v45 = vadd.f32 %v3990_v56, %v3989_v19 }
 0x23e   : > { %v3212_v36 = vpop.permute.xlu0 %3211  ;;  %v4018_v29 = vsel %vm3549_vm15, %v10927_v3, 0.0 }
 0x23f   : > { %v10901_v21 = vpop.f32.mrf.mxu0 }
 0x240   : > { %v3994_v46 = vsel %vm3549_vm15, %v10901_v21, 0.0 }
 0x242   : > { %v3036_v10 = vpop.permute.xlu1 %3035 }
 0x243   : > { %v3630_v59 = vsel %vm3598_vm0, %v3597_v47, %v3036_v10  ;;  %v3993_v10 = vadd.f32 %v3992_v6, %v3991_v45 }
 0x244   : > { %v3663_v11 = vsel %vm3631_vm1, %v3630_v59, %v3132_v44 }
 0x245   : > { %v3696_v27 = vsel %vm3664_vm3, %v3663_v11, %v3212_v36  ;;  %v10941_v7 = vpop.f32.mrf.mxu2  ;;  %v3995_v47 = vadd.f32 %v3994_v46, %v3993_v10 }
 0x246   : > { %v4020_v19 = vsel %vm3549_vm15, %v10941_v7, 0.0 }
 0x247   : > { %v10905_v52 = vpop.f32.mrf.mxu0 }
 0x248   : > { %v3996_v48 = vsel %vm3549_vm15, %v10905_v52, 0.0 }
 0x24a   : > { %v3292_v26 = vpop.permute.xlu1 %3291 }
 0x24b   : > { %v3729_v1 = vsel %vm3697_vm4, %v3696_v27, %v3292_v26  ;;  %v3997_v26 = vadd.f32 %v3996_v48, %v3995_v47 }
 0x24c   : > { %v3762_v53 = vsel %vm3730_vm8, %v3729_v1, %v3388_v23 }
 0x252   : > { %v3548_v58 = vpop.permute.xlu1 %3547 }
 0x259   : > { %v3468_v5 = vpop.permute.xlu0 %3467 }
 0x25a   : > { %v3795_v61 = vsel %vm13500_vm9, %v3762_v53, %v3468_v5 }
 0x25b   : > { %v3828_v54 = vsel %vm13499_vm12, %v3795_v61, %v3548_v58  ;;  %v4006_v61 = vsel %vm3549_vm15, %v10891_v55, 0.0 }
 0x25c   : > { %8701 = vmatmul.msk.bf16.gmra.mxu2 %vm13498_vm13, %v3828_v54 }
 0x25d   : > { %v10953_v1 = vpop.f32.mrf.mxu2 }
 0x25e   : > { %v4022_v46 = vsel %vm3549_vm15, %v10953_v1, 0.0 }
 0x265   : > { %v10959_v39 = vpop.f32.mrf.mxu2 }
 0x266   : > { %v4024_v48 = vsel %vm3549_vm15, %v10959_v39, 0.0 }
 0x268   : > { %v10909_v14 = vpop.f32.mrf.mxu0 }
 0x269   : > { %v3998_v44 = vsel %vm3549_vm15, %v10909_v14, 0.0 }
 0x26a   : > { %v3999_v36 = vadd.f32 %v3998_v44, %v3997_v26 }
 0x270   : > { %v10923_v51 = vpop.f32.mrf.mxu0 }
 0x271   : > { %v4000_v59 = vsel %vm3549_vm15, %v10923_v51, 0.0 }
 0x272   : > { %v4001_v23 = vadd.f32 %v4000_v59, %v3999_v36 }
 0x298   : > { %v10965_v60 = vpop.f32.mrf.mxu2 }
 0x299   : > { %v4026_v26 = vsel %vm3549_vm15, %v10965_v60, 0.0 }
 0x2a0   : > { %v10973_v9 = vpop.f32.mrf.mxu2 }
 0x2a1   : > { %v4028_v36 = vsel %vm3549_vm15, %v10973_v9, 0.0 }
 0x2a3   : > { %v10935_v22 = vpop.f32.mrf.mxu0 }
 0x2a4   : > { %v4002_v27 = vsel %vm3549_vm15, %v10935_v22, 0.0 }
 0x2a5   : > { %v4003_v53 = vadd.f32 %v4002_v27, %v4001_v23 }
 0x2ab   : > { %v10949_v11 = vpop.f32.mrf.mxu0 }
 0x2ac   : > { %v4004_v58 = vsel %vm3549_vm15, %v10949_v11, 0.0 }
 0x2ad   : > { %v4005_v5 = vadd.f32 %v4004_v58, %v4003_v53 }
 0x2af   : > { %v4007_v54 = vadd.f32 %v4006_v61, %v4005_v5 }
 0x2b1   : > { %v4009_v40 = vadd.f32 %v4008_v13, %v4007_v54 }
 0x2b3   : > { %v4011_v20 = vadd.f32 %v4010_v49, %v4009_v40 }
 0x2b5   : > { %v4013_v41 = vadd.f32 %v4012_v57, %v4011_v20 }
 0x2b7   : > { %v4015_v62 = vadd.f32 %v4014_v42, %v4013_v41 }
 0x2b9   : > { %v4017_v18 = vadd.f32 %v4016_v4, %v4015_v62 }
 0x2bb   : > { %v4019_v56 = vadd.f32 %v4018_v29, %v4017_v18 }
 0x2bd   : > { %v4021_v45 = vadd.f32 %v4020_v19, %v4019_v56 }
 0x2bf   : > { %v4023_v10 = vadd.f32 %v4022_v46, %v4021_v45 }
 0x2c0   : > { %v10979_v6 = vpop.f32.mrf.mxu2 }
 0x2c1   : > { %v4025_v47 = vadd.f32 %v4024_v48, %v4023_v10  ;;  %v4030_v58 = vsel %vm3549_vm15, %v10979_v6, 0.0 }
 0x2c3   : > { %v4027_v59 = vadd.f32 %v4026_v26, %v4025_v47 }
 0x2c5   : > { %v4029_v27 = vadd.f32 %v4028_v36, %v4027_v59 }
 0x2c7   : > { %v4031_v53 = vadd.f32 %v4030_v58, %v4029_v27 }
 0x2c8   : > { %v10985_v44 = vpop.f32.mrf.mxu2 }
 0x2c9   : > { %v4032_v5 = vsel %vm3549_vm15, %v10985_v44, 0.0 }
 0x2ca   : > { %v4033_v54 = vadd.f32 %v4032_v5, %v4031_v53 }
 0x2df   : > { %v10991_v23 = vpop.f32.mrf.mxu2 }
 0x2e0   : > { %v4034_v61 = vsel %vm3549_vm15, %v10991_v23, 0.0 }
 0x2e1   : > { %v4035_v13 = vadd.f32 %v4034_v61, %v4033_v54 }
 0x2e7   : > { %v10999_v40 = vpop.f32.mrf.mxu2 }
 0x2e8   : > { %v4036_v49 = vsel %vm3549_vm15, %v10999_v40, 0.0 }
 0x2e9   : > { %v4037_v20 = vadd.f32 %v4036_v49, %v4035_v13 }
 0x2eb   : > { %v4038_v57 = vrot.slane %v4037_v20, 4 }
 0x2ed   : > { %v4039_v41 = vadd.f32 %v4038_v57, %v4037_v20 }
 0x2ef   : > { %v4040_v42 = vrot.slane %v4039_v41, 2 }
 0x2f1   : > { %v4041_v62 = vadd.f32 %v4040_v42, %v4039_v41 }
 0x2f3   : > { %v4042_v4 = vrot.slane %v4041_v62, 1 }
 0x2f5   : > { %v4043_v18 = vadd.f32 %v4042_v4, %v4041_v62 }
 0x2f7   : > { %v11003_v29 = vmul.f32 0.00390625, %v4043_v18 }
 0x2f9   : > { %v11007_v56 = vsub.f32 %v10853_v43, %v11003_v29  ;;  %v11011_v19 = vsub.f32 %v10859_v63, %v11003_v29  ;;  %v11015_v45 = vsub.f32 %v10864_v24, %v11003_v29  ;;  %v11019_v46 = vsub.f32 %v10871_v2, %v11003_v29 }
 0x2fa   : > { %v11027_v43 = vsub.f32 %v10874_v8, %v11003_v29  ;;  %v11033_v24 = vsub.f32 %v10877_v34, %v11003_v29  ;;  %v11041_v36 = vsub.f32 %v10882_v0, %v11003_v29  ;;  %v11048_v34 = vsub.f32 %v10889_v50, %v11003_v29 }
 0x2fb   : > { %v4077_v10 = vmul.f32 %v11007_v56, %v11007_v56  ;;  %v4078_v48 = vmul.f32 %v11011_v19, %v11011_v19  ;;  %v4079_v63 = vmul.f32 %v11015_v45, %v11015_v45  ;;  %v4080_v2 = vmul.f32 %v11019_v46, %v11019_v46 }
 0x2fc   : > { %v4081_v8 = vmul.f32 %v11027_v43, %v11027_v43  ;;  %v4082_v53 = vmul.f32 %v11033_v24, %v11033_v24  ;;  %v11055_v0 = vsub.f32 %v10893_v30, %v11003_v29  ;;  %v4083_v54 = vmul.f32 %v11041_v36, %v11041_v36 }
 0x2fd   : > { %v4109_v47 = vsel %vm3549_vm15, %v4077_v10, 0.0  ;;  %v4110_v26 = vsel %vm3549_vm15, %v4078_v48, 0.0  ;;  %v4112_v27 = vsel %vm3549_vm15, %v4079_v63, 0.0  ;;  %v4114_v5 = vsel %vm3549_vm15, %v4080_v2, 0.0 }
 0x2fe   : > { %v4111_v59 = vadd.f32 %v4110_v26, %v4109_v47  ;;  %v4116_v13 = vsel %vm3549_vm15, %v4081_v8, 0.0  ;;  %v11062_v50 = vsub.f32 %v10897_v35, %v11003_v29  ;;  %v4084_v20 = vmul.f32 %v11048_v34, %v11048_v34 }
 0x2ff   : > { %v4118_v57 = vsel %vm3549_vm15, %v4082_v53, 0.0  ;;  %v11069_v30 = vsub.f32 %v10901_v21, %v11003_v29  ;;  %v4085_v42 = vmul.f32 %v11055_v0, %v11055_v0  ;;  %v4120_v62 = vsel %vm3549_vm15, %v4083_v54, 0.0 }
 0x300   : > { %v4113_v58 = vadd.f32 %v4112_v27, %v4111_v59  ;;  %v11076_v35 = vsub.f32 %v10905_v52, %v11003_v29  ;;  %v4086_v18 = vmul.f32 %v11062_v50, %v11062_v50  ;;  %v4122_v10 = vsel %vm3549_vm15, %v4084_v20, 0.0 }
 0x301   : > { %v11083_v21 = vsub.f32 %v10909_v14, %v11003_v29  ;;  %v4087_v63 = vmul.f32 %v11069_v30, %v11069_v30  ;;  %v4124_v2 = vsel %vm3549_vm15, %v4085_v42, 0.0  ;;  %v11090_v52 = vsub.f32 %v10923_v51, %v11003_v29 }
 0x302   : > { %v4115_v61 = vadd.f32 %v4114_v5, %v4113_v58  ;;  %v4088_v26 = vmul.f32 %v11076_v35, %v11076_v35  ;;  %v4126_v59 = vsel %vm3549_vm15, %v4086_v18, 0.0  ;;  %v11097_v14 = vsub.f32 %v10935_v22, %v11003_v29 }
 0x303   : > { %v4089_v27 = vmul.f32 %v11083_v21, %v11083_v21  ;;  %v4128_v58 = vsel %vm3549_vm15, %v4087_v63, 0.0  ;;  %v11104_v51 = vsub.f32 %v10949_v11, %v11003_v29  ;;  %v4090_v5 = vmul.f32 %v11090_v52, %v11090_v52 }
 0x304   : > { %v4117_v49 = vadd.f32 %v4116_v13, %v4115_v61  ;;  %v4130_v61 = vsel %vm3549_vm15, %v4088_v26, 0.0  ;;  %v11111_v22 = vsub.f32 %v10891_v55, %v11003_v29  ;;  %v4091_v13 = vmul.f32 %v11097_v14, %v11097_v14 }
 0x305   : > { %v11118_v11 = vsub.f32 %v10895_v28, %v11003_v29  ;;  %v11125_v55 = vsub.f32 %v10899_v17, %v11003_v29  ;;  %v11132_v28 = vsub.f32 %v10903_v12, %v11003_v29  ;;  %v11139_v17 = vsub.f32 %v10907_v15, %v11003_v29 }
 0x306   : > { %v4119_v41 = vadd.f32 %v4118_v57, %v4117_v49  ;;  %v4132_v49 = vsel %vm3549_vm15, %v4089_v27, 0.0  ;;  %v4092_v57 = vmul.f32 %v11104_v51, %v11104_v51  ;;  %v11146_v12 = vsub.f32 %v10913_v32, %v11003_v29 }
 0x307   : > { %v11153_v15 = vsub.f32 %v10927_v3, %v11003_v29  ;;  %v11160_v32 = vsub.f32 %v10941_v7, %v11003_v29  ;;  %v11167_v3 = vsub.f32 %v10953_v1, %v11003_v29  ;;  %v11174_v7 = vsub.f32 %v10959_v39, %v11003_v29 }
 0x308   : > { %v4121_v4 = vadd.f32 %v4120_v62, %v4119_v41  ;;  %v4134_v41 = vsel %vm3549_vm15, %v4090_v5, 0.0  ;;  %v4093_v62 = vmul.f32 %v11111_v22, %v11111_v22  ;;  %v11181_v1 = vsub.f32 %v10965_v60, %v11003_v29 }
 0x309   : > { %v11188_v39 = vsub.f32 %v10973_v9, %v11003_v29  ;;  %v11195_v60 = vsub.f32 %v10979_v6, %v11003_v29  ;;  %v11202_v9 = vsub.f32 %v10985_v44, %v11003_v29  ;;  %v4075_v6 = vsub.f32 %v10991_v23, %v11003_v29 }
 0x30a   : > { %v4123_v48 = vadd.f32 %v4122_v10, %v4121_v4  ;;  %v4136_v4 = vsel %vm3549_vm15, %v4091_v13, 0.0  ;;  %v4094_v10 = vmul.f32 %v11118_v11, %v11118_v11 }
 0x30b   : > { %v4106_v44 = vmul.f32 %v11202_v9, %v11202_v9 }
 0x30c   : > { %v4125_v47 = vadd.f32 %v4124_v2, %v4123_v48  ;;  %v4138_v48 = vsel %vm3549_vm15, %v4092_v57, 0.0  ;;  %v4095_v2 = vmul.f32 %v11125_v55, %v11125_v55 }
 0x30e   : > { %v4127_v8 = vadd.f32 %v4126_v59, %v4125_v47  ;;  %v4140_v47 = vsel %vm3549_vm15, %v4093_v62, 0.0  ;;  %v4096_v59 = vmul.f32 %v11132_v28, %v11132_v28 }
 0x310   : > { %v4129_v53 = vadd.f32 %v4128_v58, %v4127_v8  ;;  %v4142_v8 = vsel %vm3549_vm15, %v4094_v10, 0.0  ;;  %v4097_v58 = vmul.f32 %v11139_v17, %v11139_v17 }
 0x312   : > { %v4131_v54 = vadd.f32 %v4130_v61, %v4129_v53  ;;  %v4144_v53 = vsel %vm3549_vm15, %v4095_v2, 0.0  ;;  %v4098_v61 = vmul.f32 %v11146_v12, %v11146_v12 }
 0x314   : > { %v4133_v20 = vadd.f32 %v4132_v49, %v4131_v54  ;;  %v4146_v54 = vsel %vm3549_vm15, %v4096_v59, 0.0  ;;  %v4099_v49 = vmul.f32 %v11153_v15, %v11153_v15 }
 0x316   : > { %v4135_v42 = vadd.f32 %v4134_v41, %v4133_v20  ;;  %v4148_v20 = vsel %vm3549_vm15, %v4097_v58, 0.0  ;;  %v4100_v41 = vmul.f32 %v11160_v32, %v11160_v32 }
 0x318   : > { %v4137_v18 = vadd.f32 %v4136_v4, %v4135_v42  ;;  %v4150_v42 = vsel %vm3549_vm15, %v4098_v61, 0.0  ;;  %v4101_v4 = vmul.f32 %v11167_v3, %v11167_v3 }
 0x31a   : > { %v4139_v63 = vadd.f32 %v4138_v48, %v4137_v18  ;;  %v4152_v18 = vsel %vm3549_vm15, %v4099_v49, 0.0  ;;  %v4102_v48 = vmul.f32 %v11174_v7, %v11174_v7 }
 0x31c   : > { %v4141_v26 = vadd.f32 %v4140_v47, %v4139_v63  ;;  %v4154_v63 = vsel %vm3549_vm15, %v4100_v41, 0.0  ;;  %v4103_v47 = vmul.f32 %v11181_v1, %v11181_v1 }
 0x31e   : > { %v4143_v27 = vadd.f32 %v4142_v8, %v4141_v26  ;;  %v4156_v26 = vsel %vm3549_vm15, %v4101_v4, 0.0  ;;  %v4104_v8 = vmul.f32 %v11188_v39, %v11188_v39 }
 0x320   : > { %v4145_v5 = vadd.f32 %v4144_v53, %v4143_v27  ;;  %v4158_v27 = vsel %vm3549_vm15, %v4102_v48, 0.0  ;;  %v4105_v53 = vmul.f32 %v11195_v60, %v11195_v60 }
 0x322   : > { %v4147_v13 = vadd.f32 %v4146_v54, %v4145_v5  ;;  %v4160_v5 = vsel %vm3549_vm15, %v4103_v47, 0.0  ;;  %v4076_v54 = vsub.f32 %v10999_v40, %v11003_v29 }
 0x324   : > { %v4149_v57 = vadd.f32 %v4148_v20, %v4147_v13  ;;  %v4162_v13 = vsel %vm3549_vm15, %v4104_v8, 0.0  ;;  %v4107_v20 = vmul.f32 %v4075_v6, %v4075_v6  ;;  %v4108_v23 = vmul.f32 %v4076_v54, %v4076_v54 }
 0x326   : > { %v4151_v62 = vadd.f32 %v4150_v42, %v4149_v57  ;;  %v4164_v57 = vsel %vm3549_vm15, %v4105_v53, 0.0  ;;  %v4166_v42 = vsel %vm3549_vm15, %v4106_v44, 0.0  ;;  %v4168_v4 = vsel %vm3549_vm15, %v4107_v20, 0.0 }
 0x328   : > { %v4153_v10 = vadd.f32 %v4152_v18, %v4151_v62 }
 0x32a   : > { %v4155_v2 = vadd.f32 %v4154_v63, %v4153_v10  ;;  %v4170_v10 = vsel %vm3549_vm15, %v4108_v23, 0.0 }
 0x32c   : > { %v4157_v59 = vadd.f32 %v4156_v26, %v4155_v2 }
 0x32e   : > { %v4159_v58 = vadd.f32 %v4158_v27, %v4157_v59 }
 0x330   : > { %v4161_v61 = vadd.f32 %v4160_v5, %v4159_v58 }
 0x332   : > { %v4163_v49 = vadd.f32 %v4162_v13, %v4161_v61 }
 0x334   : > { %v4165_v41 = vadd.f32 %v4164_v57, %v4163_v49 }
 0x336   : > { %v4167_v62 = vadd.f32 %v4166_v42, %v4165_v41 }
 0x338   : > { %v4169_v18 = vadd.f32 %v4168_v4, %v4167_v62 }
 0x33a   : > { %v4171_v40 = vadd.f32 %v4170_v10, %v4169_v18 }
 0x33c   : > { %v4172_v29 = vrot.slane %v4171_v40, 4 }
 0x33e   : > { %v4173_v48 = vadd.f32 %v4172_v29, %v4171_v40 }
 0x340   : > { %v4174_v63 = vrot.slane %v4173_v48, 2 }
 0x342   : > { %v4175_v2 = vadd.f32 %v4174_v63, %v4173_v48 }
 0x344   : > { %v4176_v47 = vrot.slane %v4175_v2, 1 }
 0x346   : > { %v4177_v26 = vadd.f32 %v4176_v47, %v4175_v2 }
 0x348   : > { %v4178_v59 = vmul.f32 0.00390625, %v4177_v26 }
 0x34a   : > { %v4179_v8 = vadd.f32 1e-05, %v4178_v59 }
 0x34c   : > { %9128 = vrsqrt.f32 %v4179_v8  ;;  %vm4186_vm12 = vweird.f32 %v4179_v8 }
 0x352   : > { %v9129_v27 = vpop.eup %9128 }
 0x353   : > { %v4181_v58 = vmul.f32 %v9129_v27, %v4179_v8  ;;  %vm4187_vm13 = vweird.f32 %v9129_v27 }
 0x354   : > { %vm4188_vm9 = vmor %vm4186_vm12, %vm4187_vm13 }
 0x355   : > { %v4182_v53 = vmul.f32 %v9129_v27, %v4181_v58 }
 0x357   : > { %v4183_v5 = vmul.f32 0.5, %v4182_v53 }
 0x359   : > { %v4184_v61 = vsub.f32 1.5, %v4183_v5 }
 0x35b   : > { %v4185_v44 = vmul.f32 %v9129_v27, %v4184_v61 }
 0x35d   : > { %v11221_v13 = vsel %vm4188_vm9, %v9129_v27, %v4185_v44 }
 0x35e   : > { %v4220_v49 = vmul.f32 %v11221_v13, %v4075_v6  ;;  %v4221_v20 = vmul.f32 %v11221_v13, %v4076_v54  ;;  %v4206_v18 = vmul.f32 %v11221_v13, %v11111_v22  ;;  %v4207_v10 = vmul.f32 %v11221_v13, %v11118_v11  ;;  %v4714_v6 = vld [vmem:[#allocation2 + $0xc8] sm:$0x1] }
 0x35f   : > { %v4192_v11 = vmul.f32 %v11221_v13, %v11015_v45  ;;  %v4193_v58 = vmul.f32 %v11221_v13, %v11019_v46 }
 0x360   : > { %v4252_v57 = vmax.f32 %v4220_v49, 0.0  ;;  %v4253_v41 = vmax.f32 %v4221_v20, 0.0  ;;  %v4238_v47 = vmax.f32 %v4206_v18, 0.0  ;;  %v4239_v26 = vmax.f32 %v4207_v10, 0.0 }
 0x361   : > { %v4225_v18 = vmax.f32 %v4193_v58, 0.0 }
 0x362   : > { %v11225_v23 = vpack.c.bf16 %v4252_v57, %v4252_v57  ;;  %v4285_v42 = vpack.c.bf16 %v4253_v41, %v4253_v41  ;;  %v4270_v22 = vpack.c.bf16 %v4238_v47, %v4238_v47  ;;  %v4271_v27 = vpack.c.bf16 %v4239_v26, %v4239_v26  ;;  %v4661_v57 = vld [vmem:[#allocation2 + $0x6c] sm:$0xf] }
 0x363   : > { %v4224_v41 = vmax.f32 %v4192_v11, 0.0  ;;  %v4257_v47 = vpack.c.bf16 %v4225_v18, %v4225_v18 }
 0x364   : > { %v4542_v62 = vshrl.u32 %v11225_v23, 16  ;;  %v4550_v4 = vshrl.u32 %v4285_v42, 16  ;;  %v4553_v48 = vshll.u32 %v4285_v42, 16  ;;  %v4423_v53 = vshrl.u32 %v4270_v22, 16 }
 0x365   : > { %v4431_v5 = vshrl.u32 %v4271_v27, 16  ;;  %v4426_v44 = vshll.u32 %v4270_v22, 16  ;;  %v4434_v20 = vshll.u32 %v4271_v27, 16 }
 0x366   : > { %v4544_v40 = vrot.slane %v4542_v62, 7  ;;  %v4552_v29 = vrot.slane %v4550_v4, 7  ;;  %v4425_v61 = vrot.slane %v4423_v53, 7  ;;  %v4612_v53 = vld [vmem:[#allocation2 + $0x18] sm:$0xf] }
 0x367   : > { %v4433_v49 = vrot.slane %v4431_v5, 7 }
 0x368   : > { %v4548_v63 = vrot.slane %v4544_v40, 4  ;;  %v4555_v54 = vor.u32 %v4553_v48, %v4552_v29  ;;  %v4557_v2 = vrot.slane %v4552_v29, 4  ;;  %v4428_v42 = vor.u32 %v4426_v44, %v4425_v61 }
 0x369   : > { %v4429_v62 = vrot.slane %v4425_v61, 4  ;;  %v4436_v4 = vor.u32 %v4434_v20, %v4433_v49 }
 0x36a   : > { %v4556_v59 = vsel %vm9277_vm6, %v4548_v63, %v4555_v54  ;;  %v4715_v8 = vsel %vm9283_vm7, %v4557_v2, %v4714_v6  ;;  %v4662_v46 = vsel %vm9271_vm5, %v4428_v42, %v4661_v57  ;;  %v4190_v6 = vmul.f32 %v11221_v13, %v11007_v56 }
 0x36b   : > { %4713 = vst.msk [vmem:[#allocation2 + $0xc4] sm:$0xf] %vm560_vm2, %v4556_v59  ;;  %v4437_v45 = vsel %vm9277_vm6, %v4429_v62, %v4436_v4  ;;  %v4191_v63 = vmul.f32 %v11221_v13, %v11011_v19  ;;  %v4256_v2 = vpack.c.bf16 %v4224_v41, %v4224_v41  ;;  %v4312_v59 = vshrl.u32 %v4257_v47, 16  ;;  %v4665_v62 = vld [vmem:[#allocation2 + $0x74] sm:$0x1] }
 0x36c   : > { %4716 = vst [vmem:[#allocation2 + $0xc8] sm:$0x1] %v4715_v8  ;;  %v4222_v8 = vmax.f32 %v4190_v6, 0.0  ;;  %v4315_v56 = vshll.u32 %v4257_v47, 16  ;;  %v4545_v19 = vshll.u32 %v11225_v23, 16  ;;  %v4438_v41 = vrot.slane %v4433_v49, 4 }
 0x36d   : > { %4663 = vst [vmem:[#allocation2 + $0x6c] sm:$0xf] %v4662_v46  ;;  %v4304_v26 = vshrl.u32 %v4256_v2, 16  ;;  %v4223_v22 = vmax.f32 %v4191_v63, 0.0  ;;  %v4307_v11 = vshll.u32 %v4256_v2, 16  ;;  %v11252_v58 = vrot.slane %v4312_v59, 7 }
 0x36e   : > { %4664 = vst.msk [vmem:[#allocation2 + $0x70] sm:$0xf] %vm560_vm2, %v4437_v45  ;;  %v4547_v42 = vor.u32 %v4545_v19, %v4544_v40  ;;  %v4710_v4 = vld [vmem:[#allocation2 + $0xc0] sm:$0xf]  ;;  %v4254_v45 = vpack.c.bf16 %v4222_v8, %v4222_v8  ;;  %v4208_v40 = vmul.f32 %v11221_v13, %v11125_v55  ;;  %v4666_v49 = vsel %vm9283_vm7, %v4438_v41, %v4665_v62  ;;  %v9132_v62 = vld [vmem:[#allocation2 + $0xc] sm:$0xf] }
 0x36f   : > { %v4306_v27 = vrot.slane %v4304_v26, 7  ;;  %v4317_v20 = vor.u32 %v4315_v56, %v11252_v58  ;;  %v4255_v46 = vpack.c.bf16 %v4223_v22, %v4223_v22  ;;  %v4717_v23 = vld [vmem:[#allocation2] sm:$0xf]  ;;  %v4209_v63 = vmul.f32 %v11221_v13, %v11132_v28  ;;  %4667 = vst [vmem:[#allocation2 + $0x74] sm:$0x1] %v4666_v49 }
 0x370   : > { %v4711_v6 = vsel %vm9271_vm5, %v4547_v42, %v4710_v4  ;;  %v4287_v2 = vshrl.u32 %v4254_v45, 16  ;;  %v4290_v26 = vshll.u32 %v4254_v45, 16  ;;  %v4240_v22 = vmax.f32 %v4208_v40, 0.0 }
 0x371   : > { %v4309_v61 = vor.u32 %v4307_v11, %v4306_v27  ;;  %v4310_v44 = vrot.slane %v4306_v27, 4  ;;  %v4295_v47 = vshrl.u32 %v4255_v46, 16  ;;  %v4298_v8 = vshll.u32 %v4255_v46, 16  ;;  %4712 = vst [vmem:[#allocation2 + $0xc0] sm:$0xf] %v4711_v6 }
 0x372   : > { %v4891_v10 = vld [vmem:[#allocation2 + $0xc4] sm:$0x8]  ;;  %v4289_v55 = vrot.slane %v4287_v2, 7  ;;  %v4241_v27 = vmax.f32 %v4209_v63, 0.0  ;;  %v4194_v19 = vmul.f32 %v11221_v13, %v11027_v43  ;;  %v11291_v41 = vmul.f32 %v11221_v13, %v11055_v0 }
 0x373   : > { %v8736_v29 = vrot.slane %v4891_v10, 11  ;;  %v5013_v48 = vld [vmem:[#allocation2 + $0xc8] sm:$0x1]  ;;  %v4318_v10 = vsel %vm9277_vm6, %v4310_v44, %v4317_v20  ;;  %v11274_v59 = vrot.slane %v4295_v47, 7  ;;  %v11310_v4 = vmul.f32 %v11221_v13, %v11076_v35 }
 0x374   : > { %v4740_v5 = vld [vmem:[#allocation2 + $0x6c] sm:$0x2]  ;;  %v4848_v18 = vld [vmem:[#allocation2 + $0x6c] sm:$0x1]  ;;  %4615 = vst.msk [vmem:[#allocation2 + $0x1c] sm:$0xf] %vm560_vm2, %v4318_v10  ;;  %v4292_v56 = vor.u32 %v4290_v26, %v4289_v55  ;;  %v11327_v35 = vmul.f32 %v11221_v13, %v11104_v51  ;;  %v11344_v40 = vmul.f32 %v11221_v13, %v11160_v32  ;;  %v11348_v51 = vmul.f32 %v11221_v13, %v11167_v3 }
 0x375   : > { %v5014_v54 = vsel %vm9331_vm10, %v8736_v29, %v5013_v48  ;;  %v8711_v57 = vrot.slane %v4740_v5, 9  ;;  %v4613_v29 = vsel %vm9271_vm5, %v4309_v61, %v4612_v53  ;;  %4720 = vst.msk [vmem:[#allocation2 + $0x4] sm:$0xf] %vm560_vm2, %v4318_v10  ;;  %v4293_v28 = vrot.slane %v4289_v55, 4  ;;  %v4721_v32 = vld [vmem:[#allocation2 + $0x8] sm:$0x1] }
 0x376   : > { %5015 = vst [vmem:[#allocation2 + $0xc8] sm:$0x1] %v5014_v54  ;;  %v4718_v54 = vsel %vm9271_vm5, %v4309_v61, %v4717_v23  ;;  %v4300_v53 = vor.u32 %v4298_v8, %v11274_v59  ;;  %v4195_v5 = vmul.f32 %v11221_v13, %v11033_v24  ;;  %v11283_v61 = vmul.f32 %v11221_v13, %v11041_v36  ;;  %v4668_v55 = vld [vmem:[#allocation2 + $0x78] sm:$0xf] }
 0x377   : > { %v4849_v48 = vsel %vm9283_vm7, %v8711_v57, %v4848_v18  ;;  %4614 = vst [vmem:[#allocation2 + $0x18] sm:$0xf] %v4613_v29  ;;  %v11287_v57 = vmul.f32 %v11221_v13, %v11048_v34  ;;  %v4606_v24 = vsel %vm9271_vm5, %v4292_v56, %v9132_v62  ;;  %v11299_v36 = vmul.f32 %v11221_v13, %v11062_v50 }
 0x378   : > { %4850 = vst [vmem:[#allocation2 + $0x6c] sm:$0x1] %v4849_v48  ;;  %v4301_v43 = vsel %vm9277_vm6, %v4293_v28, %v4300_v53  ;;  %v11303_v34 = vmul.f32 %v11221_v13, %v11069_v30  ;;  %v11314_v18 = vmul.f32 %v11221_v13, %v11083_v21  ;;  %v4272_v50 = vpack.c.bf16 %v4240_v22, %v4240_v22 }
 0x379   : > { %4719 = vst [vmem:[#allocation2] sm:$0xf] %v4718_v54  ;;  %v4273_v10 = vpack.c.bf16 %v4241_v27, %v4241_v27  ;;  %v11318_v30 = vmul.f32 %v11221_v13, %v11090_v52  ;;  %v11322_v29 = vmul.f32 %v11221_v13, %v11097_v14  ;;  %v4226_v45 = vmax.f32 %v4194_v19, 0.0  ;;  %v4616_v14 = vld [vmem:[#allocation2 + $0x20] sm:$0x1] }
 0x37a   : > { %4607 = vst [vmem:[#allocation2 + $0xc] sm:$0xf] %v4606_v24  ;;  %v4227_v46 = vmax.f32 %v4195_v5, 0.0  ;;  %v11331_v21 = vmul.f32 %v11221_v13, %v11139_v17  ;;  %v11335_v52 = vmul.f32 %v11221_v13, %v11146_v12  ;;  %v4319_v23 = vrot.slane %v11252_v58, 4 }
 0x37b   : > { %4608 = vst.msk [vmem:[#allocation2 + $0x10] sm:$0xf] %vm560_vm2, %v4301_v43  ;;  %v11340_v48 = vmul.f32 %v11221_v13, %v11153_v15  ;;  %v11352_v17 = vmul.f32 %v11221_v13, %v11174_v7  ;;  %v11356_v12 = vmul.f32 %v11221_v13, %v11181_v1  ;;  %v11360_v15 = vmul.f32 %v11221_v13, %v11188_v39 }
 0x37c   : > { %v4440_v58 = vshrl.u32 %v4272_v50, 16  ;;  %v4448_v49 = vshrl.u32 %v4273_v10, 16  ;;  %v11364_v6 = vmul.f32 %v11221_v13, %v11195_v60  ;;  %v11368_v3 = vmul.f32 %v11221_v13, %v11202_v9 }
 0x37d   : > { %v4258_v7 = vpack.c.bf16 %v4226_v45, %v4226_v45  ;;  %v4259_v63 = vpack.c.bf16 %v4227_v46, %v4227_v46  ;;  %v4228_v1 = vmax.f32 %v11283_v61, 0.0  ;;  %v4229_v54 = vmax.f32 %v11287_v57, 0.0 }
 0x37e   : > { %v4733_v11 = vld [vmem:[#allocation2 + $0x18] sm:$0x2]  ;;  %v4827_v42 = vld [vmem:[#allocation2 + $0x18] sm:$0x1]  ;;  %v4230_v39 = vmax.f32 %v11291_v41, 0.0  ;;  %v4617_v47 = vsel %vm9283_vm7, %v4319_v23, %v4616_v14  ;;  %v4231_v60 = vmax.f32 %v11299_v36, 0.0 }
 0x37f   : > { %v9080_v44 = vld [vmem:[#allocation2 + $0x6c] sm:$0xff]  ;;  %v8704_v20 = vrot.slane %v4733_v11, 9  ;;  %v4232_v26 = vmax.f32 %v11303_v34, 0.0  ;;  %v4443_v13 = vshll.u32 %v4272_v50, 16  ;;  %v4451_v27 = vshll.u32 %v4273_v10, 16 }
 0x380   : > { %7147 = vrot.lane.b32.xlu2 %v9080_v44, %s9217_s18  ;;  %v4722_v11 = vsel %vm9283_vm7, %v4319_v23, %v4721_v32  ;;  %v4442_v56 = vrot.slane %v4440_v58, 7  ;;  %v11379_v28 = vrot.slane %v4448_v49, 7  ;;  %v4233_v53 = vmax.f32 %v11310_v4, 0.0  ;;  %4618 = vst [vmem:[#allocation2 + $0x20] sm:$0x1] %v4617_v47 }
 0x381   : > { %v4828_v0 = vsel %vm9283_vm7, %v8704_v20, %v4827_v42  ;;  %v4732_v2 = vld [vmem:[#allocation2 + $0xc] sm:$0x2]  ;;  %v4824_v22 = vld [vmem:[#allocation2 + $0xc] sm:$0x1]  ;;  %v4321_v5 = vshrl.u32 %v4258_v7, 16  ;;  %v4329_v61 = vshrl.u32 %v4259_v63, 16  ;;  %v11410_v58 = vpack.c.bf16 %v4229_v54, %v4229_v54 }
 0x382   : > { %4829 = vst [vmem:[#allocation2 + $0x18] sm:$0x1] %v4828_v0  ;;  %v8703_v9 = vrot.slane %v4732_v2, 9  ;;  %v4234_v44 = vmax.f32 %v11314_v18, 0.0  ;;  %v4445_v20 = vor.u32 %v4443_v13, %v4442_v56  ;;  %v4446_v57 = vrot.slane %v4442_v56, 4 }
 0x383   : > { %v4453_v41 = vor.u32 %v4451_v27, %v11379_v28  ;;  %v4235_v42 = vmax.f32 %v11318_v30, 0.0  ;;  %v4236_v43 = vmax.f32 %v11322_v29, 0.0  ;;  %v4237_v62 = vmax.f32 %v11327_v35, 0.0  ;;  %4723 = vst [vmem:[#allocation2 + $0x8] sm:$0x1] %v4722_v11 }
 0x384   : > { %v4825_v19 = vsel %vm9283_vm7, %v8703_v9, %v4824_v22  ;;  %v4242_v24 = vmax.f32 %v11331_v21, 0.0  ;;  %v4609_v36 = vld [vmem:[#allocation2 + $0x14] sm:$0x1]  ;;  %v4243_v34 = vmax.f32 %v11335_v52, 0.0  ;;  %v4302_v0 = vrot.slane %v11274_v59, 4 }
 0x385   : > { %4826 = vst [vmem:[#allocation2 + $0xc] sm:$0x1] %v4825_v19  ;;  %v4454_v4 = vsel %vm9277_vm6, %v4446_v57, %v4453_v41  ;;  %v4669_v18 = vsel %vm9271_vm5, %v4445_v20, %v4668_v55  ;;  %v4244_v50 = vmax.f32 %v11340_v48, 0.0  ;;  %v4245_v10 = vmax.f32 %v11344_v40, 0.0  ;;  %v4619_v48 = vld [vmem:[#allocation2 + $0x24] sm:$0xf] }
 0x386   : > { %4670 = vst [vmem:[#allocation2 + $0x78] sm:$0xf] %v4669_v18  ;;  %v4323_v30 = vrot.slane %v4321_v5, 7  ;;  %v11399_v29 = vrot.slane %v4329_v61, 7  ;;  %v4246_v45 = vmax.f32 %v11348_v51, 0.0  ;;  %v4247_v46 = vmax.f32 %v11352_v17, 0.0 }
 0x387   : > { %v4248_v59 = vmax.f32 %v11356_v12, 0.0  ;;  %v4249_v35 = vmax.f32 %v11360_v15, 0.0  ;;  %4671 = vst.msk [vmem:[#allocation2 + $0x7c] sm:$0xf] %vm560_vm2, %v4454_v4  ;;  %v4250_v21 = vmax.f32 %v11364_v6, 0.0  ;;  %v4251_v52 = vmax.f32 %v11368_v3, 0.0 }
 0x388   : > { %v4324_v23 = vshll.u32 %v4258_v7, 16  ;;  %v4332_v14 = vshll.u32 %v4259_v63, 16  ;;  %v11408_v40 = vpack.c.bf16 %v4228_v1, %v4228_v1  ;;  %v11412_v51 = vpack.c.bf16 %v4230_v39, %v4230_v39  ;;  %v11427_v39 = vld [vmem:[#allocation2 + $0x70] sm:$0x8]  ;;  %v4675_v3 = vld [vmem:[#allocation2 + $0x84] sm:$0xf] }
 0x389   : > { %v9073_v8 = vld [vmem:[#allocation2 + $0x18] sm:$0xff]  ;;  %v4610_v17 = vsel %vm9283_vm7, %v4302_v0, %v4609_v36  ;;  %v11416_v12 = vpack.c.bf16 %v4231_v60, %v4231_v60  ;;  %v4327_v32 = vrot.slane %v4323_v30, 4  ;;  %v11419_v7 = vpack.c.bf16 %v4232_v26, %v4232_v26 }
 0x38a   : > { %7133 = vrot.lane.b32.xlu0 %v9073_v8, %s9217_s18  ;;  %v4326_v49 = vor.u32 %v4324_v23, %v4323_v30  ;;  %v4334_v2 = vor.u32 %v4332_v14, %v11399_v29  ;;  %4611 = vst [vmem:[#allocation2 + $0x14] sm:$0x1] %v4610_v17  ;;  %v11421_v63 = vpack.c.bf16 %v4233_v53, %v4233_v53  ;;  %v4338_v13 = vshrl.u32 %v11408_v40, 16  ;;  %v9088_v30 = vld [vmem:[#allocation2 + $0x18] sm:$0xff]  ;;  %v4626_v17 = vld [vmem:[#allocation2 + $0x30] sm:$0xf] }
 0x38b   : > { %v11423_v1 = vpack.c.bf16 %v4234_v44, %v4234_v44  ;;  %v11425_v54 = vpack.c.bf16 %v4235_v42, %v4235_v42  ;;  %v11429_v47 = vpack.c.bf16 %v4236_v43, %v4236_v43  ;;  %v11431_v55 = vpack.c.bf16 %v4237_v62, %v4237_v62 }
 0x38c   : > { %v9072_v15 = vld [vmem:[#allocation2 + $0xc] sm:$0xff]  ;;  %v4335_v60 = vsel %vm9277_vm6, %v4327_v32, %v4334_v2  ;;  %v4620_v26 = vsel %vm9271_vm5, %v4326_v49, %v4619_v48  ;;  %v11438_v8 = vpack.c.bf16 %v4242_v24, %v4242_v24  ;;  %v11440_v9 = vpack.c.bf16 %v4243_v34, %v4243_v34 }
 0x38d   : > { %7131 = vrot.lane.b32.xlu1 %v9072_v15, %s9217_s18  ;;  %v4346_v22 = vshrl.u32 %v11410_v58, 16  ;;  %v4741_v27 = vld [vmem:[#allocation2 + $0x78] sm:$0x2]  ;;  %4621 = vst [vmem:[#allocation2 + $0x24] sm:$0xf] %v4620_v26  ;;  %v11444_v11 = vpack.c.bf16 %v4244_v50, %v4244_v50  ;;  %v11446_v56 = vpack.c.bf16 %v4245_v10, %v4245_v10  ;;  %v11448_v53 = vpack.c.bf16 %v4246_v45, %v4246_v45 }
 0x38e   : > { %v8712_v19 = vrot.slane %v4741_v27, 9  ;;  %4622 = vst.msk [vmem:[#allocation2 + $0x28] sm:$0xf] %vm560_vm2, %v4335_v60  ;;  %v11451_v5 = vpack.c.bf16 %v4247_v46, %v4247_v46  ;;  %v11453_v61 = vpack.c.bf16 %v4248_v59, %v4248_v59  ;;  %v11455_v44 = vpack.c.bf16 %v4249_v35, %v4249_v35  ;;  %v4851_v57 = vld [vmem:[#allocation2 + $0x78] sm:$0x1] }
 0x38f   : > { %v8729_v20 = vrot.slane %v11427_v39, 11  ;;  %v4341_v41 = vshll.u32 %v11408_v40, 16  ;;  %v4349_v42 = vshll.u32 %v11410_v58, 16  ;;  %v4355_v43 = vshrl.u32 %v11412_v51, 16  ;;  %v4672_v45 = vld [vmem:[#allocation2 + $0x80] sm:$0x1] }
 0x390   : > { %v4852_v62 = vsel %vm9283_vm7, %v8712_v19, %v4851_v57  ;;  %v4358_v24 = vshll.u32 %v11412_v51, 16  ;;  %v4363_v36 = vshrl.u32 %v11416_v12, 16  ;;  %v4340_v34 = vrot.slane %v4338_v13, 7  ;;  %v4630_v13 = vld [vmem:[#allocation2 + $0x38] sm:$0x1] }
 0x391   : > { %4853 = vst [vmem:[#allocation2 + $0x78] sm:$0x1] %v4852_v62  ;;  %v4348_v0 = vrot.slane %v4346_v22, 7  ;;  %v4366_v4 = vshll.u32 %v11416_v12, 16  ;;  %v4372_v18 = vshrl.u32 %v11419_v7, 16  ;;  %v4375_v50 = vshll.u32 %v11419_v7, 16 }
 0x392   : > { %v4455_v10 = vrot.slane %v11379_v28, 4  ;;  %v4380_v46 = vshrl.u32 %v11421_v63, 16  ;;  %v4383_v59 = vshll.u32 %v11421_v63, 16  ;;  %v4389_v35 = vshrl.u32 %v11423_v1, 16  ;;  %v4623_v28 = vld [vmem:[#allocation2 + $0x2c] sm:$0x1] }
 0x393   : > { %v4392_v23 = vshll.u32 %v11423_v1, 16  ;;  %v4397_v14 = vshrl.u32 %v11425_v54, 16  ;;  %v4400_v48 = vshll.u32 %v11425_v54, 16  ;;  %v4406_v40 = vshrl.u32 %v11429_v47, 16  ;;  %v4992_v7 = vld [vmem:[#allocation2 + $0x74] sm:$0x1] }
 0x394   : > { %v4357_v58 = vrot.slane %v4355_v43, 7  ;;  %v4734_v51 = vld [vmem:[#allocation2 + $0x24] sm:$0x2]  ;;  %v4365_v12 = vrot.slane %v4363_v36, 7  ;;  %v4344_v49 = vrot.slane %v4340_v34, 4  ;;  %v4351_v32 = vor.u32 %v4349_v42, %v4348_v0 }
 0x395   : > { %7387 = vrot.lane.b32.xlu1 %v9088_v30, %s9218_s19  ;;  %v8705_v15 = vrot.slane %v4734_v51, 9  ;;  %v4409_v2 = vshll.u32 %v11429_v47, 16  ;;  %v4830_v63 = vld [vmem:[#allocation2 + $0x24] sm:$0x1]  ;;  %v4336_v39 = vrot.slane %v11399_v29, 4  ;;  %v4343_v60 = vor.u32 %v4341_v41, %v4340_v34 }
 0x396   : > { %v4673_v26 = vsel %vm9283_vm7, %v4455_v10, %v4672_v45  ;;  %v4374_v22 = vrot.slane %v4372_v18, 7  ;;  %v4353_v19 = vrot.slane %v4348_v0, 4  ;;  %v4993_v57 = vsel %vm9331_vm10, %v8729_v20, %v4992_v7  ;;  %v4633_v36 = vld [vmem:[#allocation2 + $0x3c] sm:$0xf]  ;;  %v4637_v30 = vld [vmem:[#allocation2 + $0x44] sm:$0x1] }
 0x397   : > { %v4831_v27 = vsel %vm9283_vm7, %v8705_v15, %v4830_v63  ;;  %4674 = vst [vmem:[#allocation2 + $0x80] sm:$0x1] %v4673_v26  ;;  %v4414_v42 = vshrl.u32 %v11431_v55, 16  ;;  %v4417_v43 = vshll.u32 %v11431_v55, 16  ;;  %v4382_v29 = vrot.slane %v4380_v46, 7 }
 0x398   : > { %v9096_v62 = vld [vmem:[#allocation2 + $0x78] sm:$0xff]  ;;  %4832 = vst [vmem:[#allocation2 + $0x24] sm:$0x1] %v4831_v27  ;;  %v4360_v41 = vor.u32 %v4358_v24, %v4357_v58  ;;  %v4457_v34 = vshrl.u32 %v11438_v8, 16  ;;  %v4361_v18 = vrot.slane %v4357_v58, 4  ;;  %v4368_v10 = vor.u32 %v4366_v4, %v4365_v12 }
 0x399   : > { %v4352_v0 = vsel %vm9277_vm6, %v4344_v49, %v4351_v32  ;;  %4994 = vst [vmem:[#allocation2 + $0x74] sm:$0x1] %v4993_v57  ;;  %7403 = vrot.lane.b32.xlu2 %v9096_v62, %s9218_s19  ;;  %v4391_v20 = vrot.slane %v4389_v35, 7  ;;  %v4370_v45 = vrot.slane %v4365_v12, 4  ;;  %v4624_v51 = vsel %vm9283_vm7, %v4336_v39, %v4623_v28  ;;  %v4640_v46 = vld [vmem:[#allocation2 + $0x48] sm:$0xf] }
 0x39a   : > { %v4627_v24 = vsel %vm9271_vm5, %v4343_v60, %v4626_v17  ;;  %v4460_v15 = vshll.u32 %v11438_v8, 16  ;;  %v4465_v4 = vshrl.u32 %v11440_v9, 16  ;;  %v4377_v58 = vor.u32 %v4375_v50, %v4374_v22  ;;  %v4644_v32 = vld [vmem:[#allocation2 + $0x50] sm:$0x1]  ;;  %4629 = vst.msk [vmem:[#allocation2 + $0x34] sm:$0xf] %vm560_vm2, %v4352_v0 }
 0x39b   : > { %v4631_v49 = vsel %vm9283_vm7, %v4353_v19, %v4630_v13  ;;  %4628 = vst [vmem:[#allocation2 + $0x30] sm:$0xf] %v4627_v24  ;;  %v4399_v7 = vrot.slane %v4397_v14, 7  ;;  %v4378_v35 = vrot.slane %v4374_v22, 4  ;;  %v4385_v12 = vor.u32 %v4383_v59, %v4382_v29  ;;  %v4647_v39 = vld [vmem:[#allocation2 + $0x54] sm:$0xf] }
 0x39c   : > { %v4634_v28 = vsel %vm9271_vm5, %v4360_v41, %v4633_v36  ;;  %v4468_v17 = vshll.u32 %v11440_v9, 16  ;;  %v4474_v8 = vshrl.u32 %v11444_v11, 16  ;;  %v4387_v63 = vrot.slane %v4382_v29, 4  ;;  %4625 = vst [vmem:[#allocation2 + $0x2c] sm:$0x1] %v4624_v51 }
 0x39d   : > { %v4369_v50 = vsel %vm9277_vm6, %v4361_v18, %v4368_v10  ;;  %v4477_v60 = vshll.u32 %v11444_v11, 16  ;;  %v4408_v14 = vrot.slane %v4406_v40, 7  ;;  %v4394_v59 = vor.u32 %v4392_v23, %v4391_v20  ;;  %4632 = vst [vmem:[#allocation2 + $0x38] sm:$0x1] %v4631_v49  ;;  %v4651_v57 = vld [vmem:[#allocation2 + $0x5c] sm:$0x1] }
 0x39e   : > { %v4638_v26 = vsel %vm9283_vm7, %v4370_v45, %v4637_v30  ;;  %v4482_v9 = vshrl.u32 %v11446_v56, 16  ;;  %v4485_v13 = vshll.u32 %v11446_v56, 16  ;;  %v4416_v22 = vrot.slane %v4414_v42, 7  ;;  %4635 = vst [vmem:[#allocation2 + $0x3c] sm:$0xf] %v4634_v28 }
 0x39f   : > { %v9089_v27 = vld [vmem:[#allocation2 + $0x24] sm:$0xff]  ;;  %v4641_v19 = vsel %vm9271_vm5, %v4377_v58, %v4640_v46  ;;  %v4491_v40 = vshrl.u32 %v11448_v53, 16  ;;  %v4395_v62 = vrot.slane %v4391_v20, 4  ;;  %v4402_v1 = vor.u32 %v4400_v48, %v4399_v7  ;;  %4636 = vst.msk [vmem:[#allocation2 + $0x40] sm:$0xf] %vm560_vm2, %v4369_v50 }
 0x3a0   : > { %v4386_v23 = vsel %vm9277_vm6, %v4378_v35, %v4385_v12  ;;  %v4654_v29 = vld [vmem:[#allocation2 + $0x60] sm:$0xf]  ;;  %v4494_v42 = vshll.u32 %v11448_v53, 16  ;;  %v4459_v41 = vrot.slane %v4457_v34, 7  ;;  %7389 = vrot.lane.b32.xlu0 %v9089_v27, %s9218_s19  ;;  %v4404_v36 = vrot.slane %v4399_v7, 4  ;;  %v9074_v55 = vld [vmem:[#allocation2 + $0x24] sm:$0xff] }
 0x3a1   : > { %v4645_v18 = vsel %vm9283_vm7, %v4387_v63, %v4644_v32  ;;  %4639 = vst [vmem:[#allocation2 + $0x44] sm:$0x1] %v4638_v26  ;;  %v4499_v10 = vshrl.u32 %v11451_v5, 16  ;;  %v4467_v54 = vrot.slane %v4465_v4, 7  ;;  %v4411_v48 = vor.u32 %v4409_v2, %v4408_v14  ;;  %7135 = vrot.lane.b32.xlu1 %v9074_v55, %s9217_s18  ;;  %v9081_v63 = vld [vmem:[#allocation2 + $0x78] sm:$0xff] }
 0x3a2   : > { %v4648_v0 = vsel %vm9271_vm5, %v4394_v59, %v4647_v39  ;;  %v4735_v30 = vld [vmem:[#allocation2 + $0x30] sm:$0x2]  ;;  %4642 = vst [vmem:[#allocation2 + $0x48] sm:$0xf] %v4641_v19  ;;  %v11530_v20 = vrot.slane %v4474_v8, 7  ;;  %v4412_v34 = vrot.slane %v4408_v14, 4  ;;  %v4419_v45 = vor.u32 %v4417_v43, %v4416_v22 }
 0x3a3   : > { %v8706_v51 = vrot.slane %v4735_v30, 9  ;;  %4643 = vst.msk [vmem:[#allocation2 + $0x4c] sm:$0xf] %vm560_vm2, %v4386_v23  ;;  %v11538_v24 = vpack.c.bf16 %v4250_v21, %v4250_v21  ;;  %v11543_v47 = vpack.c.bf16 %v4251_v52, %v4251_v52  ;;  %v4421_v2 = vrot.slane %v4416_v22, 4  ;;  %v4833_v4 = vld [vmem:[#allocation2 + $0x30] sm:$0x1] }
 0x3a4   : > { %v4403_v46 = vsel %vm9277_vm6, %v4395_v62, %v4402_v1  ;;  %4646 = vst [vmem:[#allocation2 + $0x50] sm:$0x1] %v4645_v18  ;;  %v4658_v43 = vld [vmem:[#allocation2 + $0x68] sm:$0x1]  ;;  %v4484_v58 = vrot.slane %v4482_v9, 7  ;;  %v4462_v49 = vor.u32 %v4460_v15, %v4459_v41  ;;  %v4652_v6 = vsel %vm9283_vm7, %v4404_v36, %v4651_v57 }
 0x3a5   : > { %v4834_v21 = vsel %vm9283_vm7, %v8706_v51, %v4833_v4  ;;  %4649 = vst [vmem:[#allocation2 + $0x54] sm:$0xf] %v4648_v0  ;;  %v4508_v52 = vshrl.u32 %v11453_v61, 16  ;;  %v4463_v32 = vrot.slane %v4459_v41, 4  ;;  %v4470_v7 = vor.u32 %v4468_v17, %v4467_v54  ;;  %v4679_v50 = vld [vmem:[#allocation2 + $0x8c] sm:$0x1] }
 0x3a6   : > { %v4655_v35 = vsel %vm9271_vm5, %v4411_v48, %v4654_v29  ;;  %4835 = vst [vmem:[#allocation2 + $0x30] sm:$0x1] %v4834_v21  ;;  %v4516_v15 = vshrl.u32 %v11455_v44, 16  ;;  %v4493_v12 = vrot.slane %v4491_v40, 7  ;;  %v4472_v28 = vrot.slane %v4467_v54, 4 }
 0x3a7   : > { %v4420_v8 = vsel %vm9277_vm6, %v4412_v34, %v4419_v45  ;;  %4650 = vst.msk [vmem:[#allocation2 + $0x58] sm:$0xf] %vm560_vm2, %v4403_v46  ;;  %v4502_v39 = vshll.u32 %v11451_v5, 16  ;;  %v4501_v17 = vrot.slane %v4499_v10, 7  ;;  %v4479_v14 = vor.u32 %v4477_v60, %v11530_v20  ;;  %v4682_v26 = vld [vmem:[#allocation2 + $0x90] sm:$0xf] }
 0x3a8   : > { %v4659_v59 = vsel %vm9283_vm7, %v4421_v2, %v4658_v43  ;;  %4653 = vst [vmem:[#allocation2 + $0x5c] sm:$0x1] %v4652_v6  ;;  %v4525_v9 = vshrl.u32 %v11538_v24, 16  ;;  %v4480_v22 = vrot.slane %v11530_v20, 4  ;;  %v4487_v27 = vor.u32 %v4485_v13, %v4484_v58  ;;  %7149 = vrot.lane.b32.xlu0 %v9081_v63, %s9217_s18  ;;  %v4686_v40 = vld [vmem:[#allocation2 + $0x98] sm:$0x1] }
 0x3a9   : > { %v4676_v5 = vsel %vm9271_vm5, %v4462_v49, %v4675_v3  ;;  %4656 = vst [vmem:[#allocation2 + $0x60] sm:$0xf] %v4655_v35  ;;  %v4533_v11 = vshrl.u32 %v11543_v47, 16  ;;  %v4510_v60 = vrot.slane %v4508_v52, 7  ;;  %v4489_v19 = vrot.slane %v4484_v58, 4 }
 0x3aa   : > { %v4471_v57 = vsel %vm9277_vm6, %v4463_v32, %v4470_v7  ;;  %4657 = vst.msk [vmem:[#allocation2 + $0x64] sm:$0xf] %vm560_vm2, %v4420_v8  ;;  %v4518_v62 = vrot.slane %v4516_v15, 7  ;;  %v4496_v56 = vor.u32 %v4494_v42, %v4493_v12  ;;  %v4680_v13 = vsel %vm9283_vm7, %v4472_v28, %v4679_v50  ;;  %v4689_v1 = vld [vmem:[#allocation2 + $0x9c] sm:$0xf] }
 0x3ab   : > { %4660 = vst [vmem:[#allocation2 + $0x68] sm:$0x1] %v4659_v59  ;;  %v4511_v23 = vshll.u32 %v11453_v61, 16  ;;  %v4497_v29 = vrot.slane %v4493_v12, 4  ;;  %v4504_v41 = vor.u32 %v4502_v39, %v4501_v17  ;;  %v4683_v36 = vsel %vm9271_vm5, %v4479_v14, %v4682_v26  ;;  %v4693_v48 = vld [vmem:[#allocation2 + $0xa4] sm:$0x1] }
 0x3ac   : > { %4677 = vst [vmem:[#allocation2 + $0x84] sm:$0xf] %v4676_v5  ;;  %v4519_v18 = vshll.u32 %v11455_v44, 16  ;;  %v4527_v10 = vrot.slane %v4525_v9, 7  ;;  %v4506_v54 = vrot.slane %v4501_v17, 4  ;;  %v4488_v53 = vsel %vm9277_vm6, %v4480_v22, %v4487_v27 }
 0x3ad   : > { %v9075_v42 = vld [vmem:[#allocation2 + $0x30] sm:$0xff]  ;;  %4678 = vst.msk [vmem:[#allocation2 + $0x88] sm:$0xf] %vm560_vm2, %v4471_v57  ;;  %v11587_v0 = vrot.slane %v4533_v11, 7  ;;  %v4513_v61 = vor.u32 %v4511_v23, %v4510_v60  ;;  %v4687_v30 = vsel %vm9283_vm7, %v4489_v19, %v4686_v40  ;;  %v4696_v20 = vld [vmem:[#allocation2 + $0xa8] sm:$0xf]  ;;  %v4690_v51 = vsel %vm9271_vm5, %v4496_v56, %v4689_v1 }
 0x3ae   : > { %4681 = vst [vmem:[#allocation2 + $0x8c] sm:$0x1] %v4680_v13  ;;  %v4528_v34 = vshll.u32 %v11538_v24, 16  ;;  %v4514_v44 = vrot.slane %v4510_v60, 4  ;;  %v4521_v45 = vor.u32 %v4519_v18, %v4518_v62  ;;  %7137 = vrot.lane.b32.xlu2 %v9075_v42, %s9217_s18  ;;  %v4536_v2 = vshll.u32 %v11543_v47, 16  ;;  %v9090_v3 = vld [vmem:[#allocation2 + $0x30] sm:$0xff] }
 0x3af   : > { %4684 = vst [vmem:[#allocation2 + $0x90] sm:$0xf] %v4683_v36  ;;  %v4523_v46 = vrot.slane %v4518_v62, 4  ;;  %v4505_v4 = vsel %vm9277_vm6, %v4497_v29, %v4504_v41  ;;  %v4700_v55 = vld [vmem:[#allocation2 + $0xb0] sm:$0x1]  ;;  %v4694_v24 = vsel %vm9283_vm7, %v4506_v54, %v4693_v48  ;;  %v4531_v6 = vrot.slane %v4527_v10, 4  ;;  %7391 = vrot.lane.b32.xlu1 %v9090_v3, %s9218_s19 }
 0x3b0   : > { %4685 = vst.msk [vmem:[#allocation2 + $0x94] sm:$0xf] %vm560_vm2, %v4488_v53  ;;  %v4703_v43 = vld [vmem:[#allocation2 + $0xb4] sm:$0xf]  ;;  %v4530_v58 = vor.u32 %v4528_v34, %v4527_v10  ;;  %v4707_v49 = vld [vmem:[#allocation2 + $0xbc] sm:$0x1]  ;;  %v4538_v21 = vor.u32 %v4536_v2, %v11587_v0  ;;  %v4697_v47 = vsel %vm9271_vm5, %v4513_v61, %v4696_v20  ;;  %v4522_v15 = vsel %vm9277_vm6, %v4514_v44, %v4521_v45 }
 0x3b1   : > { %4688 = vst [vmem:[#allocation2 + $0x98] sm:$0x1] %v4687_v30  ;;  %v4724_v52 = vld [vmem:[#allocation2 + $0xcc] sm:$0xf]  ;;  %v4877_v32 = vld [vmem:[#allocation2 + $0x1c] sm:$0x8]  ;;  %v4701_v8 = vsel %vm9283_vm7, %v4523_v46, %v4700_v55 }
 0x3b2   : > { %4691 = vst [vmem:[#allocation2 + $0x9c] sm:$0xf] %v4690_v51  ;;  %v4731_v7 = vld [vmem:[#allocation2] sm:$0x2]  ;;  %v4540_v35 = vrot.slane %v11587_v0, 4  ;;  %v4704_v17 = vsel %vm9271_vm5, %v4530_v58, %v4703_v43  ;;  %v4539_v26 = vsel %vm9277_vm6, %v4531_v6, %v4538_v21  ;;  %v8722_v5 = vrot.slane %v4877_v32, 11 }
 0x3b3   : > { %4692 = vst.msk [vmem:[#allocation2 + $0xa0] sm:$0xf] %vm560_vm2, %v4505_v4  ;;  %v4875_v12 = vld [vmem:[#allocation2 + $0x4] sm:$0x8]  ;;  %v4747_v28 = vld [vmem:[#allocation2 + $0xc0] sm:$0x2]  ;;  %v4725_v19 = vsel %vm9271_vm5, %v4530_v58, %v4724_v52 }
 0x3b4   : > { %4695 = vst [vmem:[#allocation2 + $0xa4] sm:$0x1] %v4694_v24  ;;  %v4728_v63 = vld [vmem:[#allocation2 + $0xd4] sm:$0x1]  ;;  %v4876_v50 = vld [vmem:[#allocation2 + $0x10] sm:$0x8]  ;;  %v4708_v9 = vsel %vm9283_vm7, %v4540_v35, %v4707_v49 }
 0x3b5   : > { %v4885_v39 = vld [vmem:[#allocation2 + $0x7c] sm:$0x8]  ;;  %4698 = vst [vmem:[#allocation2 + $0xa8] sm:$0xf] %v4697_v47  ;;  %v8702_v14 = vrot.slane %v4731_v7, 9  ;;  %v8718_v60 = vrot.slane %v4747_v28, 9  ;;  %v4729_v1 = vsel %vm9283_vm7, %v4540_v35, %v4728_v63 }
 0x3b6   : > { %v11613_v59 = vld [vmem:[#allocation2 + $0x28] sm:$0x8]  ;;  %4699 = vst.msk [vmem:[#allocation2 + $0xac] sm:$0xf] %vm560_vm2, %v4522_v15  ;;  %v11620_v22 = vld [vmem:[#allocation2 + $0x34] sm:$0x8] }
 0x3b7   : > { %4702 = vst [vmem:[#allocation2 + $0xb0] sm:$0x1] %v4701_v8  ;;  %v4736_v27 = vld [vmem:[#allocation2 + $0x3c] sm:$0x2]  ;;  %v4821_v11 = vld [vmem:[#allocation2] sm:$0x1] }
 0x3b8   : > { %4705 = vst [vmem:[#allocation2 + $0xb4] sm:$0xf] %v4704_v17  ;;  %v4869_v57 = vld [vmem:[#allocation2 + $0xc0] sm:$0x1]  ;;  %v8720_v40 = vrot.slane %v4875_v12, 11  ;;  %v8721_v31 = vrot.slane %v4876_v50, 11  ;;  %v4822_v18 = vsel %vm9283_vm7, %v8702_v14, %v4821_v11 }
 0x3b9   : > { %v8730_v62 = vrot.slane %v4885_v39, 11  ;;  %v8723_v56 = vrot.slane %v11613_v59, 11  ;;  %4706 = vst.msk [vmem:[#allocation2 + $0xb8] sm:$0xf] %vm560_vm2, %v4539_v26  ;;  %v4965_v13 = vld [vmem:[#allocation2 + $0x8] sm:$0x1]  ;;  %v4870_v42 = vsel %vm9283_vm7, %v8718_v60, %v4869_v57 }
 0x3ba   : > { %4709 = vst [vmem:[#allocation2 + $0xbc] sm:$0x1] %v4708_v9  ;;  %v11628_v23 = vld [vmem:[#allocation2 + $0x40] sm:$0x8]  ;;  %v11630_v29 = vld [vmem:[#allocation2 + $0x4c] sm:$0x8]  ;;  %v4966_v61 = vsel %vm9331_vm10, %v8720_v40, %v4965_v13 }
 0x3bb   : > { %v8724_v25 = vrot.slane %v11620_v22, 11  ;;  %v8707_v41 = vrot.slane %v4736_v27, 9  ;;  %v4971_v36 = vld [vmem:[#allocation2 + $0x20] sm:$0x1]  ;;  %v4968_v10 = vld [vmem:[#allocation2 + $0x14] sm:$0x1] }
 0x3bc   : > { %4726 = vst [vmem:[#allocation2 + $0xcc] sm:$0xf] %v4725_v19  ;;  %v11635_v54 = vld [vmem:[#allocation2 + $0x58] sm:$0x8]  ;;  %v11637_v53 = vld [vmem:[#allocation2 + $0x48] sm:$0x2]  ;;  %v4972_v45 = vsel %vm9331_vm10, %v8722_v5, %v4971_v36  ;;  %v4969_v51 = vsel %vm9331_vm10, %v8721_v31, %v4968_v10 }
 0x3bd   : > { %4727 = vst.msk [vmem:[#allocation2 + $0xd0] sm:$0xf] %vm560_vm2, %v4539_v26  ;;  %v11642_v48 = vld [vmem:[#allocation2 + $0x64] sm:$0x8]  ;;  %v4742_v0 = vld [vmem:[#allocation2 + $0x84] sm:$0x2] }
 0x3be   : > { %4730 = vst [vmem:[#allocation2 + $0xd4] sm:$0x1] %v4729_v1  ;;  %v4995_v30 = vld [vmem:[#allocation2 + $0x80] sm:$0x1]  ;;  %v11646_v20 = vld [vmem:[#allocation2 + $0x88] sm:$0x8] }
 0x3bf   : > { %v4836_v34 = vld [vmem:[#allocation2 + $0x3c] sm:$0x1]  ;;  %v11648_v44 = vld [vmem:[#allocation2 + $0x90] sm:$0x2]  ;;  %4823 = vst [vmem:[#allocation2] sm:$0x1] %v4822_v18  ;;  %v4996_v21 = vsel %vm9331_vm10, %v8730_v62, %v4995_v30 }
 0x3c0   : > { %v11654_v2 = vld [vmem:[#allocation2 + $0x94] sm:$0x8]  ;;  %v11656_v46 = vld [vmem:[#allocation2 + $0x9c] sm:$0x2]  ;;  %4871 = vst [vmem:[#allocation2 + $0xc0] sm:$0x1] %v4870_v42  ;;  %v4837_v3 = vsel %vm9283_vm7, %v8707_v41, %v4836_v34 }
 0x3c1   : > { %v4974_v4 = vld [vmem:[#allocation2 + $0x2c] sm:$0x1]  ;;  %v8725_v55 = vrot.slane %v11628_v23, 11  ;;  %v8726_v43 = vrot.slane %v11630_v29, 11  ;;  %v8727_v58 = vrot.slane %v11635_v54, 11  ;;  %v8708_v24 = vrot.slane %v11637_v53, 9 }
 0x3c2   : > { %4967 = vst [vmem:[#allocation2 + $0x8] sm:$0x1] %v4966_v61  ;;  %v11662_v49 = vld [vmem:[#allocation2 + $0xa0] sm:$0x8]  ;;  %v4977_v6 = vld [vmem:[#allocation2 + $0x38] sm:$0x1]  ;;  %v4975_v8 = vsel %vm9331_vm10, %v8723_v56, %v4974_v4 }
 0x3c3   : > { %v8728_v47 = vrot.slane %v11642_v48, 11  ;;  %v8713_v52 = vrot.slane %v4742_v0, 9  ;;  %4973 = vst [vmem:[#allocation2 + $0x20] sm:$0x1] %v4972_v45  ;;  %v8731_v32 = vrot.slane %v11646_v20, 11  ;;  %v8732_v7 = vrot.slane %v11654_v2, 11 }
 0x3c4   : > { %v4854_v35 = vld [vmem:[#allocation2 + $0x84] sm:$0x1]  ;;  %v8714_v15 = vrot.slane %v11648_v44, 9  ;;  %v8715_v12 = vrot.slane %v11656_v46, 9  ;;  %v4748_v28 = vld [vmem:[#allocation2 + $0xcc] sm:$0x2]  ;;  %v4978_v59 = vsel %vm9331_vm10, %v8724_v25, %v4977_v6 }
 0x3c5   : > { %4970 = vst [vmem:[#allocation2 + $0x14] sm:$0x1] %v4969_v51  ;;  %v11675_v63 = vld [vmem:[#allocation2 + $0x54] sm:$0x2]  ;;  %v4889_v50 = vld [vmem:[#allocation2 + $0xac] sm:$0x8]  ;;  %v4855_v27 = vsel %vm9283_vm7, %v8713_v52, %v4854_v35 }
 0x3c6   : > { %v4980_v39 = vld [vmem:[#allocation2 + $0x44] sm:$0x1]  ;;  %v8719_v17 = vrot.slane %v4748_v28, 9  ;;  %v8733_v14 = vrot.slane %v11662_v49, 11  ;;  %4997 = vst [vmem:[#allocation2 + $0x80] sm:$0x1] %v4996_v21 }
 0x3c7   : > { %v4872_v26 = vld [vmem:[#allocation2 + $0xcc] sm:$0x1]  ;;  %v4983_v9 = vld [vmem:[#allocation2 + $0x50] sm:$0x1]  ;;  %v4986_v22 = vld [vmem:[#allocation2 + $0x5c] sm:$0x1]  ;;  %v4981_v31 = vsel %vm9331_vm10, %v8725_v55, %v4980_v39 }
 0x3c8   : > { %4838 = vst [vmem:[#allocation2 + $0x3c] sm:$0x1] %v4837_v3  ;;  %v11682_v5 = vld [vmem:[#allocation2 + $0x60] sm:$0x2]  ;;  %v4890_v11 = vld [vmem:[#allocation2 + $0xb8] sm:$0x8]  ;;  %v4873_v19 = vsel %vm9283_vm7, %v8719_v17, %v4872_v26  ;;  %v4984_v1 = vsel %vm9331_vm10, %v8726_v43, %v4983_v9  ;;  %v4987_v23 = vsel %vm9331_vm10, %v8727_v58, %v4986_v22 }
 0x3c9   : > { %v4892_v60 = vld [vmem:[#allocation2 + $0xd0] sm:$0x8]  ;;  %4976 = vst [vmem:[#allocation2 + $0x2c] sm:$0x1] %v4975_v8  ;;  %v4989_v57 = vld [vmem:[#allocation2 + $0x68] sm:$0x1] }
 0x3ca   : > { %v8734_v40 = vrot.slane %v4889_v50, 11  ;;  %4979 = vst [vmem:[#allocation2 + $0x38] sm:$0x1] %v4978_v59  ;;  %v8709_v62 = vrot.slane %v11675_v63, 9  ;;  %v11689_v56 = vld [vmem:[#allocation2 + $0x4] sm:$0xf]  ;;  %v4990_v48 = vsel %vm9331_vm10, %v8728_v47, %v4989_v57 }
 0x3cb   : > { %v4998_v13 = vld [vmem:[#allocation2 + $0x8c] sm:$0x1]  ;;  %4856 = vst [vmem:[#allocation2 + $0x84] sm:$0x1] %v4855_v27  ;;  %v5051_v29 = vld [vmem:[#allocation2 + $0x8] sm:$0x1] }
 0x3cc   : > { %v11695_v25 = vld [vmem:[#allocation2] sm:$0xe]  ;;  %v5001_v41 = vld [vmem:[#allocation2 + $0x98] sm:$0x1]  ;;  %v8735_v36 = vrot.slane %v4890_v11, 11  ;;  %v8737_v18 = vrot.slane %v4892_v60, 11  ;;  %v4999_v20 = vsel %vm9331_vm10, %v8731_v32, %v4998_v13 }
 0x3cd   : > { %4874 = vst [vmem:[#allocation2 + $0xcc] sm:$0x1] %v4873_v19  ;;  %v8710_v10 = vrot.slane %v11682_v5, 9  ;;  %v5517_v54 = vrot.slane %v11689_v56, 5  ;;  %v5004_v42 = vld [vmem:[#allocation2 + $0xa4] sm:$0x1]  ;;  %v5002_v55 = vsel %vm9331_vm10, %v8732_v7, %v5001_v41 }
 0x3ce   : > { %4982 = vst [vmem:[#allocation2 + $0x44] sm:$0x1] %v4981_v31  ;;  %v5022_v0 = vld [vmem:[#allocation2 + $0x10] sm:$0xf]  ;;  %v5052_v61 = vld [vmem:[#allocation2 + $0x14] sm:$0x1]  ;;  %v5005_v6 = vsel %vm9331_vm10, %v8733_v14, %v5004_v42 }
 0x3cf   : > { %v5007_v30 = vld [vmem:[#allocation2 + $0xb0] sm:$0x1]  ;;  %4985 = vst [vmem:[#allocation2 + $0x50] sm:$0x1] %v4984_v1  ;;  %v11703_v34 = vld [vmem:[#allocation2 + $0xa8] sm:$0x2] }
 0x3d0   : > { %v8738_v45 = vrot.slane %v11695_v25, 9  ;;  %v5520_v51 = vrot.slane %v5051_v29, 5  ;;  %v5010_v2 = vld [vmem:[#allocation2 + $0xbc] sm:$0x1]  ;;  %4988 = vst [vmem:[#allocation2 + $0x5c] sm:$0x1] %v4987_v23  ;;  %v5008_v32 = vsel %vm9331_vm10, %v8734_v40, %v5007_v30 }
 0x3d1   : > { %v9091_v4 = vld [vmem:[#allocation2 + $0x3c] sm:$0xff]  ;;  %v5452_v43 = vld [vmem:[#allocation2 + $0xc] sm:$0xe]  ;;  %v5524_v58 = vrot.slane %v5022_v0, 5  ;;  %v5016_v49 = vld [vmem:[#allocation2 + $0xd4] sm:$0x1]  ;;  %v5011_v8 = vsel %vm9331_vm10, %v8735_v36, %v5010_v2 }
 0x3d2   : > { %4991 = vst [vmem:[#allocation2 + $0x68] sm:$0x1] %v4990_v48  ;;  %v4857_v21 = vld [vmem:[#allocation2 + $0x90] sm:$0x1]  ;;  %v5519_v47 = vrot.slane %v5517_v54, 4  ;;  %v5527_v3 = vrot.slane %v5052_v61, 5  ;;  %7393 = vrot.lane.b32.xlu2 %v9091_v4, %s9218_s19  ;;  %v5017_v59 = vsel %vm9331_vm10, %v8737_v18, %v5016_v49  ;;  %v5518_v56 = vsel %vm9372_vm11, %v8738_v45, %v5517_v54 }
 0x3d3   : > { %v5628_v52 = vld [vmem:[#allocation2 + $0x10] sm:$0xf]  ;;  %5000 = vst [vmem:[#allocation2 + $0x8c] sm:$0x1] %v4999_v20  ;;  %v4860_v35 = vld [vmem:[#allocation2 + $0x9c] sm:$0x1]  ;;  %v4858_v26 = vsel %vm9283_vm7, %v8714_v15, %v4857_v21  ;;  %v6987_v30 = vunpack.c.l.b16 %v5518_v56 }
 0x3d4   : > { %v5659_v7 = vld [vmem:[#allocation2 + $0x14] sm:$0x1]  ;;  %v6059_v28 = vld [vmem:[#allocation2 + $0xc] sm:$0xe]  ;;  %v9097_v50 = vld [vmem:[#allocation2 + $0x84] sm:$0xff]  ;;  %v8739_v17 = vrot.slane %v5452_v43, 9  ;;  %v4861_v33 = vsel %vm9283_vm7, %v8715_v12, %v4860_v35  ;;  %v5521_v15 = vsel %vm9372_vm11, %v5519_v47, %v5520_v51 }
 0x3d5   : > { %5003 = vst [vmem:[#allocation2 + $0x98] sm:$0x1] %v5002_v55  ;;  %v9082_v39 = vld [vmem:[#allocation2 + $0x84] sm:$0xff]  ;;  %v6125_v14 = vrot.slane %v5628_v52, 5  ;;  %v8716_v22 = vrot.slane %v11703_v34, 9  ;;  %v5526_v27 = vrot.slane %v5524_v58, 4  ;;  %7405 = vrot.lane.b32.xlu0 %v9097_v50, %s9218_s19  ;;  %v6988_v54 = vunpack.c.l.b16 %v5521_v15 }
 0x3d6   : > { %5006 = vst [vmem:[#allocation2 + $0xa4] sm:$0x1] %v5005_v6  ;;  %v4839_v9 = vld [vmem:[#allocation2 + $0x48] sm:$0x1]  ;;  %v11722_v11 = vld [vmem:[#allocation2 + $0x1c] sm:$0xf]  ;;  %7151 = vrot.lane.b32.xlu1 %v9082_v39, %s9217_s18  ;;  %v5525_v29 = vsel %vm9372_vm11, %v8739_v17, %v5524_v58 }
 0x3d7   : > { %5009 = vst [vmem:[#allocation2 + $0xb0] sm:$0x1] %v5008_v32  ;;  %v4842_v44 = vld [vmem:[#allocation2 + $0x54] sm:$0x1]  ;;  %v8754_v60 = vrot.slane %v6059_v28, 9  ;;  %v6132_v57 = vrot.slane %v11722_v11, 5  ;;  %v5528_v46 = vsel %vm9372_vm11, %v5526_v27, %v5527_v3  ;;  %v4840_v23 = vsel %vm9283_vm7, %v8708_v24, %v4839_v9 }
 0x3d8   : > { %v5660_v19 = vld [vmem:[#allocation2 + $0x20] sm:$0x1]  ;;  %5012 = vst [vmem:[#allocation2 + $0xbc] sm:$0x1] %v5011_v8  ;;  %v4863_v31 = vld [vmem:[#allocation2 + $0xa8] sm:$0x1]  ;;  %v4843_v18 = vsel %vm9283_vm7, %v8709_v62, %v4842_v44  ;;  %v6990_v20 = vunpack.c.l.b16 %v5528_v46  ;;  %v6989_v62 = vunpack.c.l.b16 %v5525_v29  ;;  %v11759_v49 = vpack.c.b16 %v6988_v54, %v6987_v30 }
 0x3d9   : > { %v4845_v40 = vld [vmem:[#allocation2 + $0x60] sm:$0x1]  ;;  %v6127_v13 = vrot.slane %v6125_v14, 4  ;;  %v6128_v1 = vrot.slane %v5659_v7, 5  ;;  %v6060_v12 = vld [vmem:[#allocation2 + $0x18] sm:$0xe]  ;;  %v4864_v61 = vsel %vm9283_vm7, %v8716_v22, %v4863_v31  ;;  %v6126_v45 = vsel %vm9372_vm11, %v8754_v60, %v6125_v14 }
 0x3da   : > { %5018 = vst [vmem:[#allocation2 + $0xd4] sm:$0x1] %v5017_v59  ;;  %v8755_v25 = vrot.slane %v6060_v12, 9  ;;  %v6135_v41 = vrot.slane %v5660_v19, 5  ;;  %v4746_v36 = vld [vmem:[#allocation2 + $0xb4] sm:$0x2]  ;;  %v4846_v24 = vsel %vm9283_vm7, %v8710_v10, %v4845_v40  ;;  %v11762_v47 = vpack.c.b16 %v6990_v20, %v6989_v62 }
 0x3db   : > { %4859 = vst [vmem:[#allocation2 + $0x90] sm:$0x1] %v4858_v26  ;;  %v6134_v42 = vrot.slane %v6132_v57, 4  ;;  %v8717_v48 = vrot.slane %v4746_v36, 9  ;;  %v4866_v0 = vld [vmem:[#allocation2 + $0xb4] sm:$0x1]  ;;  %v6129_v51 = vsel %vm9372_vm11, %v6127_v13, %v6128_v1  ;;  %v7243_v32 = vunpack.c.l.b16 %v6126_v45 }
 0x3dc   : > { %v9076_v53 = vld [vmem:[#allocation2 + $0x3c] sm:$0xff]  ;;  %4862 = vst [vmem:[#allocation2 + $0x9c] sm:$0x1] %v4861_v33  ;;  %v6667_v2 = vld [vmem:[#allocation2 + $0x18] sm:$0xe]  ;;  %v7244_v35 = vunpack.c.l.b16 %v6129_v51  ;;  %v6133_v17 = vsel %vm9372_vm11, %v8755_v25, %v6132_v57  ;;  %vm13560_vm2 = vcmask 1041408  }
 0x3dd   : > { %v6236_v63 = vld [vmem:[#allocation2 + $0x1c] sm:$0xf]  ;;  %v6267_v34 = vld [vmem:[#allocation2 + $0x20] sm:$0x1]  ;;  %4841 = vst [vmem:[#allocation2 + $0x48] sm:$0x1] %v4840_v23  ;;  %v4867_v5 = vsel %vm9283_vm7, %v8717_v48, %v4866_v0  ;;  %7139 = vrot.lane.b32.xlu0 %v9076_v53, %s9217_s18  ;;  %v6136_v37 = vsel %vm9372_vm11, %v6134_v42, %v6135_v41  ;;  %v7245_v56 = vunpack.c.l.b16 %v6133_v17 }
 0x3de   : > { %v6238_v10 = vld [vmem:[#allocation2 + $0x28] sm:$0xf]  ;;  %4844 = vst [vmem:[#allocation2 + $0x54] sm:$0x1] %v4843_v18  ;;  %v8770_v4 = vrot.slane %v6667_v2, 9  ;;  %v6733_v55 = vrot.slane %v6236_v63, 5  ;;  %v7246_v22 = vunpack.c.l.b16 %v6136_v37  ;;  %v11778_v31 = vpack.c.b16 %v7244_v35, %v7243_v32 }
 0x3df   : > { %v6736_v43 = vrot.slane %v6267_v34, 5  ;;  %v6740_v58 = vrot.slane %v6238_v10, 5  ;;  %4847 = vst [vmem:[#allocation2 + $0x60] sm:$0x1] %v4846_v24  ;;  %v6268_v6 = vld [vmem:[#allocation2 + $0x2c] sm:$0x1] }
 0x3e0   : > { %v6668_v21 = vld [vmem:[#allocation2 + $0x24] sm:$0xe]  ;;  %4865 = vst [vmem:[#allocation2 + $0xa8] sm:$0x1] %v4864_v61  ;;  %v6735_v3 = vrot.slane %v6733_v55, 4  ;;  %v6743_v28 = vrot.slane %v6268_v6, 5  ;;  %v6734_v14 = vsel %vm9372_vm11, %v8770_v4, %v6733_v55  ;;  %v11784_v54 = vpack.c.b16 %v7246_v22, %v7245_v56 }
 0x3e1   : > { %v8771_v52 = vrot.slane %v6668_v21, 9  ;;  %4868 = vst [vmem:[#allocation2 + $0xb4] sm:$0x1] %v4867_v5  ;;  %v6742_v7 = vrot.slane %v6740_v58, 4  ;;  %v5036_v8 = vld [vmem:[#allocation2 + $0x64] sm:$0xf]  ;;  %v7499_v46 = vunpack.c.l.b16 %v6734_v14 }
 0x3e2   : > { %v9083_v50 = vld [vmem:[#allocation2 + $0x90] sm:$0xff]  ;;  %v6737_v59 = vsel %vm9372_vm11, %v6735_v3, %v6736_v43  ;;  %v5059_v26 = vld [vmem:[#allocation2 + $0x68] sm:$0x1]  ;;  %v5573_v9 = vrot.slane %v5036_v8, 5  ;;  %v5459_v33 = vld [vmem:[#allocation2 + $0x60] sm:$0xe] }
 0x3e3   : > { %v9098_v39 = vld [vmem:[#allocation2 + $0x90] sm:$0xff]  ;;  %v6741_v27 = vsel %vm9372_vm11, %v8771_v52, %v6740_v58  ;;  %v6744_v11 = vsel %vm9372_vm11, %v6742_v7, %v6743_v28  ;;  %v5576_v44 = vrot.slane %v5059_v26, 5  ;;  %7153 = vrot.lane.b32.xlu2 %v9083_v50, %s9217_s18  ;;  %v7500_v15 = vunpack.c.l.b16 %v6737_v59  ;;  %v6252_v40 = vld [vmem:[#allocation2 + $0x7c] sm:$0xf]  ;;  %v6275_v13 = vld [vmem:[#allocation2 + $0x80] sm:$0x1] }
 0x3e4   : > { %7407 = vrot.lane.b32.xlu1 %v9098_v39, %s9218_s19  ;;  %v7502_v60 = vunpack.c.l.b16 %v6744_v11  ;;  %v8746_v19 = vrot.slane %v5459_v33, 9  ;;  %v5575_v57 = vrot.slane %v5573_v9, 4  ;;  %v6789_v1 = vrot.slane %v6252_v40, 5  ;;  %v9092_v12 = vld [vmem:[#allocation2 + $0x48] sm:$0xff]  ;;  %v6675_v41 = vld [vmem:[#allocation2 + $0x78] sm:$0xe] }
 0x3e5   : > { %v7501_v23 = vunpack.c.l.b16 %v6741_v27  ;;  %v6792_v36 = vrot.slane %v6275_v13, 5  ;;  %v5024_v18 = vld [vmem:[#allocation2 + $0x1c] sm:$0xf]  ;;  %v8778_v48 = vrot.slane %v6675_v41, 9  ;;  %v5053_v53 = vld [vmem:[#allocation2 + $0x20] sm:$0x1]  ;;  %7395 = vrot.lane.b32.xlu0 %v9092_v12, %s9218_s19  ;;  %v11787_v61 = vpack.c.b16 %v7500_v15, %v7499_v46 }
 0x3e6   : > { %v5574_v29 = vsel %vm9372_vm11, %v8746_v19, %v5573_v9  ;;  %v5577_v25 = vsel %vm9372_vm11, %v5575_v57, %v5576_v44  ;;  %v6791_v0 = vrot.slane %v6789_v1, 4  ;;  %v9099_v24 = vld [vmem:[#allocation2 + $0x9c] sm:$0xff]  ;;  %v5453_v20 = vld [vmem:[#allocation2 + $0x18] sm:$0xe]  ;;  %v5531_v63 = vrot.slane %v5024_v18, 5  ;;  %v9077_v62 = vld [vmem:[#allocation2 + $0x48] sm:$0xff] }
 0x3e7   : > { %v7004_v42 = vunpack.c.l.b16 %v5577_v25  ;;  %v11789_v30 = vpack.c.b16 %v7502_v60, %v7501_v23  ;;  %v5534_v34 = vrot.slane %v5053_v53, 5  ;;  %v7003_v45 = vunpack.c.l.b16 %v5574_v29  ;;  %v5644_v10 = vld [vmem:[#allocation2 + $0x70] sm:$0xf]  ;;  %v5667_v4 = vld [vmem:[#allocation2 + $0x74] sm:$0x1]  ;;  %v9084_v8 = vld [vmem:[#allocation2 + $0x9c] sm:$0xff] }
 0x3e8   : > { %v6790_v51 = vsel %vm9372_vm11, %v8778_v48, %v6789_v1  ;;  %v6793_v5 = vsel %vm9372_vm11, %v6791_v0, %v6792_v36  ;;  %v8740_v2 = vrot.slane %v5453_v20, 9  ;;  %v5533_v58 = vrot.slane %v5531_v63, 4  ;;  %v6067_v6 = vld [vmem:[#allocation2 + $0x6c] sm:$0xe]  ;;  %v5632_v37 = vld [vmem:[#allocation2 + $0x28] sm:$0xf] }
 0x3e9   : > { %v7515_v55 = vunpack.c.l.b16 %v6790_v51  ;;  %v7516_v43 = vunpack.c.l.b16 %v6793_v5  ;;  %v6181_v21 = vrot.slane %v5644_v10, 5  ;;  %v11795_v3 = vpack.c.b16 %v7004_v42, %v7003_v45  ;;  %v5661_v7 = vld [vmem:[#allocation2 + $0x2c] sm:$0x1]  ;;  %v6061_v28 = vld [vmem:[#allocation2 + $0x24] sm:$0xe]  ;;  %v9078_v20 = vld [vmem:[#allocation2 + $0x54] sm:$0xff] }
 0x3ea   : > { %v5532_v52 = vsel %vm9372_vm11, %v8740_v2, %v5531_v63  ;;  %v8762_v32 = vrot.slane %v6067_v6, 9  ;;  %v6184_v35 = vrot.slane %v5667_v4, 5  ;;  %v5535_v39 = vsel %vm9372_vm11, %v5533_v58, %v5534_v34  ;;  %v5038_v59 = vld [vmem:[#allocation2 + $0x70] sm:$0xf]  ;;  %v5060_v26 = vld [vmem:[#allocation2 + $0x74] sm:$0x1] }
 0x3eb   : > { %7409 = vrot.lane.b32.xlu2 %v9099_v24, %s9218_s19  ;;  %v11801_v50 = vpack.c.b16 %v7516_v43, %v7515_v55  ;;  %v6991_v17 = vunpack.c.l.b16 %v5532_v52  ;;  %v6183_v14 = vrot.slane %v6181_v21, 4  ;;  %v6992_v9 = vunpack.c.l.b16 %v5535_v39  ;;  %v5460_v33 = vld [vmem:[#allocation2 + $0x6c] sm:$0xe]  ;;  %v6254_v44 = vld [vmem:[#allocation2 + $0x88] sm:$0xf]  ;;  %v9093_v63 = vld [vmem:[#allocation2 + $0x54] sm:$0xff] }
 0x3ec   : > { %7141 = vrot.lane.b32.xlu1 %v9077_v62, %s9217_s18  ;;  %v6182_v22 = vsel %vm9372_vm11, %v8762_v32, %v6181_v21  ;;  %v8756_v27 = vrot.slane %v6061_v28, 9  ;;  %v6139_v11 = vrot.slane %v5632_v37, 5  ;;  %v6142_v19 = vrot.slane %v5661_v7, 5  ;;  %v6276_v40 = vld [vmem:[#allocation2 + $0x8c] sm:$0x1] }
 0x3ed   : > { %v6185_v15 = vsel %vm9372_vm11, %v6183_v14, %v6184_v35  ;;  %v7259_v60 = vunpack.c.l.b16 %v6182_v22  ;;  %v8747_v57 = vrot.slane %v5460_v33, 9  ;;  %v6676_v56 = vld [vmem:[#allocation2 + $0x84] sm:$0xe]  ;;  %v11809_v46 = vpack.c.b16 %v6992_v9, %v6991_v17  ;;  %v6240_v23 = vld [vmem:[#allocation2 + $0x34] sm:$0xf]  ;;  %7155 = vrot.lane.b32.xlu0 %v9084_v8, %s9217_s18  ;;  %v9100_v35 = vld [vmem:[#allocation2 + $0xa8] sm:$0xff] }
 0x3ee   : > { %v7260_v13 = vunpack.c.l.b16 %v6185_v15  ;;  %v6140_v1 = vsel %vm9372_vm11, %v8756_v27, %v6139_v11  ;;  %v6141_v12 = vrot.slane %v6139_v11, 4  ;;  %v5580_v25 = vrot.slane %v5038_v59, 5  ;;  %v6669_v18 = vld [vmem:[#allocation2 + $0x30] sm:$0xe]  ;;  %v6269_v24 = vld [vmem:[#allocation2 + $0x38] sm:$0x1] }
 0x3ef   : > { %v7247_v29 = vunpack.c.l.b16 %v6140_v1  ;;  %v5583_v41 = vrot.slane %v5060_v26, 5  ;;  %v8779_v36 = vrot.slane %v6676_v56, 9  ;;  %v6796_v0 = vrot.slane %v6254_v44, 5  ;;  %v5646_v55 = vld [vmem:[#allocation2 + $0x7c] sm:$0xf] }
 0x3f0   : > { %v11814_v42 = vpack.c.b16 %v7260_v13, %v7259_v60  ;;  %v6143_v48 = vsel %vm9372_vm11, %v6141_v12, %v6142_v19  ;;  %v6799_v53 = vrot.slane %v6276_v40, 5  ;;  %v5581_v62 = vsel %vm9372_vm11, %v8747_v57, %v5580_v25  ;;  %v6068_v43 = vld [vmem:[#allocation2 + $0x78] sm:$0xe]  ;;  %v5668_v52 = vld [vmem:[#allocation2 + $0x80] sm:$0x1] }
 0x3f1   : > { %v7248_v34 = vunpack.c.l.b16 %v6143_v48  ;;  %v5582_v45 = vrot.slane %v5580_v25, 4  ;;  %v8772_v51 = vrot.slane %v6669_v18, 9  ;;  %v7005_v5 = vunpack.c.l.b16 %v5581_v62  ;;  %v6062_v32 = vld [vmem:[#allocation2 + $0x30] sm:$0xe]  ;;  %v5634_v17 = vld [vmem:[#allocation2 + $0x34] sm:$0xf] }
 0x3f2   : > { %v6797_v2 = vsel %vm9372_vm11, %v8779_v36, %v6796_v0  ;;  %v6798_v10 = vrot.slane %v6796_v0, 4  ;;  %v6747_v4 = vrot.slane %v6240_v23, 5  ;;  %v6750_v37 = vrot.slane %v6269_v24, 5  ;;  %v5662_v22 = vld [vmem:[#allocation2 + $0x38] sm:$0x1]  ;;  %v9094_v36 = vld [vmem:[#allocation2 + $0x60] sm:$0xff] }
 0x3f3   : > { %7143 = vrot.lane.b32.xlu2 %v9078_v20, %s9217_s18  ;;  %v11824_v58 = vpack.c.b16 %v7248_v34, %v7247_v29  ;;  %v5584_v6 = vsel %vm9372_vm11, %v5582_v45, %v5583_v41  ;;  %v7517_v21 = vunpack.c.l.b16 %v6797_v2  ;;  %v8763_v26 = vrot.slane %v6068_v43, 9  ;;  %v5454_v27 = vld [vmem:[#allocation2 + $0x24] sm:$0xe]  ;;  %v5026_v60 = vld [vmem:[#allocation2 + $0x28] sm:$0xf] }
 0x3f4   : > { %7397 = vrot.lane.b32.xlu1 %v9093_v63, %s9218_s19  ;;  %v7006_v7 = vunpack.c.l.b16 %v5584_v6  ;;  %v6800_v28 = vsel %vm9372_vm11, %v6798_v10, %v6799_v53  ;;  %v6748_v8 = vsel %vm9372_vm11, %v8772_v51, %v6747_v4  ;;  %v6749_v39 = vrot.slane %v6747_v4, 4  ;;  %v5054_v19 = vld [vmem:[#allocation2 + $0x2c] sm:$0x1]  ;;  %v6677_v1 = vld [vmem:[#allocation2 + $0x90] sm:$0xe] }
 0x3f5   : > { %v7518_v14 = vunpack.c.l.b16 %v6800_v28  ;;  %v7503_v59 = vunpack.c.l.b16 %v6748_v8  ;;  %v6188_v9 = vrot.slane %v5646_v55, 5  ;;  %v6191_v44 = vrot.slane %v5668_v52, 5  ;;  %7411 = vrot.lane.b32.xlu0 %v9100_v35, %s9218_s19  ;;  %v6256_v41 = vld [vmem:[#allocation2 + $0x94] sm:$0xf]  ;;  %v9085_v18 = vld [vmem:[#allocation2 + $0xa8] sm:$0xff] }
 0x3f6   : > { %v11832_v11 = vpack.c.b16 %v7006_v7, %v7005_v5  ;;  %v6751_v33 = vsel %vm9372_vm11, %v6749_v39, %v6750_v37  ;;  %v8757_v15 = vrot.slane %v6062_v32, 9  ;;  %v6146_v23 = vrot.slane %v5634_v17, 5  ;;  %v6277_v20 = vld [vmem:[#allocation2 + $0x98] sm:$0x1]  ;;  %v6242_v4 = vld [vmem:[#allocation2 + $0x40] sm:$0xf] }
 0x3f7   : > { %v11837_v57 = vpack.c.b16 %v7518_v14, %v7517_v21  ;;  %v7504_v40 = vunpack.c.l.b16 %v6751_v33  ;;  %v6189_v56 = vsel %vm9372_vm11, %v8763_v26, %v6188_v9  ;;  %v6190_v13 = vrot.slane %v6188_v9, 4  ;;  %v6670_v55 = vld [vmem:[#allocation2 + $0x3c] sm:$0xe]  ;;  %v6270_v52 = vld [vmem:[#allocation2 + $0x44] sm:$0x1] }
 0x3f8   : > { %v7261_v12 = vunpack.c.l.b16 %v6189_v56  ;;  %v6149_v29 = vrot.slane %v5662_v22, 5  ;;  %v8741_v25 = vrot.slane %v5454_v27, 9  ;;  %v5538_v53 = vrot.slane %v5026_v60, 5  ;;  %v5461_v32 = vld [vmem:[#allocation2 + $0x78] sm:$0xe] }
 0x3f9   : > { %v11841_v48 = vpack.c.b16 %v7504_v40, %v7503_v59  ;;  %v6192_v0 = vsel %vm9372_vm11, %v6190_v13, %v6191_v44  ;;  %v5541_v24 = vrot.slane %v5054_v19, 5  ;;  %v6147_v34 = vsel %vm9372_vm11, %v8757_v15, %v6146_v23  ;;  %v5040_v39 = vld [vmem:[#allocation2 + $0x7c] sm:$0xf]  ;;  %v5061_v9 = vld [vmem:[#allocation2 + $0x80] sm:$0x1] }
 0x3fa   : > { %v7262_v63 = vunpack.c.l.b16 %v6192_v0  ;;  %v6148_v62 = vrot.slane %v6146_v23, 4  ;;  %v8780_v45 = vrot.slane %v6677_v1, 9  ;;  %v7249_v51 = vunpack.c.l.b16 %v6147_v34  ;;  %v6063_v22 = vld [vmem:[#allocation2 + $0x3c] sm:$0xe]  ;;  %v5636_v60 = vld [vmem:[#allocation2 + $0x40] sm:$0xf] }
 0x3fb   : > { %7399 = vrot.lane.b32.xlu2 %v9094_v36, %s9218_s19  ;;  %v5539_v5 = vsel %vm9372_vm11, %v8741_v25, %v5538_v53  ;;  %v5540_v2 = vrot.slane %v5538_v53, 4  ;;  %v6803_v10 = vrot.slane %v6256_v41, 5  ;;  %v6806_v37 = vrot.slane %v6277_v20, 5  ;;  %v5663_v19 = vld [vmem:[#allocation2 + $0x44] sm:$0x1]  ;;  %v9101_v23 = vld [vmem:[#allocation2 + $0xb4] sm:$0xff] }
 0x3fc   : > { %7157 = vrot.lane.b32.xlu1 %v9085_v18, %s9217_s18  ;;  %v11851_v43 = vpack.c.b16 %v7262_v63, %v7261_v12  ;;  %v6150_v6 = vsel %vm9372_vm11, %v6148_v62, %v6149_v29  ;;  %v6993_v21 = vunpack.c.l.b16 %v5539_v5  ;;  %v8773_v59 = vrot.slane %v6670_v55, 9  ;;  %v5455_v12 = vld [vmem:[#allocation2 + $0x30] sm:$0xe]  ;;  %v5028_v36 = vld [vmem:[#allocation2 + $0x34] sm:$0xf] }
 0x3fd   : > { %v7250_v35 = vunpack.c.l.b16 %v6150_v6  ;;  %v5542_v7 = vsel %vm9372_vm11, %v5540_v2, %v5541_v24  ;;  %v6804_v28 = vsel %vm9372_vm11, %v8780_v45, %v6803_v10  ;;  %v6805_v8 = vrot.slane %v6803_v10, 4  ;;  %7035 = vrot.lane.b32.xlu0 %v11759_v49, %s9220_s21  ;;  %v5055_v20 = vld [vmem:[#allocation2 + $0x38] sm:$0x1]  ;;  %v6069_v55 = vld [vmem:[#allocation2 + $0x84] sm:$0xe] }
 0x3fe   : > { %v6994_v17 = vunpack.c.l.b16 %v5542_v7  ;;  %v7519_v14 = vunpack.c.l.b16 %v6804_v28  ;;  %v6754_v26 = vrot.slane %v6242_v4, 5  ;;  %v6757_v44 = vrot.slane %v6270_v52, 5  ;;  %v5648_v4 = vld [vmem:[#allocation2 + $0x88] sm:$0xf]  ;;  %v5669_v52 = vld [vmem:[#allocation2 + $0x8c] sm:$0x1] }
 0x3ff   : > { %v11861_v27 = vpack.c.b16 %v7250_v35, %v7249_v51  ;;  %v6807_v33 = vsel %vm9372_vm11, %v6805_v8, %v6806_v37  ;;  %v8748_v15 = vrot.slane %v5461_v32, 9  ;;  %v5587_v49 = vrot.slane %v5040_v39, 5  ;;  %v6671_v32 = vld [vmem:[#allocation2 + $0x48] sm:$0xe]  ;;  %v6244_v39 = vld [vmem:[#allocation2 + $0x4c] sm:$0xf] }
 0x400   : > { %v11865_v40 = vpack.c.b16 %v6994_v17, %v6993_v21  ;;  %v7520_v56 = vunpack.c.l.b16 %v6807_v33  ;;  %v6755_v13 = vsel %vm9372_vm11, %v8773_v59, %v6754_v26  ;;  %v6756_v1 = vrot.slane %v6754_v26, 4 }
 0x401   : > { %v7505_v29 = vunpack.c.l.b16 %v6755_v13  ;;  %v5590_v25 = vrot.slane %v5061_v9, 5  ;;  %v8758_v41 = vrot.slane %v6063_v22, 9  ;;  %v6153_v53 = vrot.slane %v5636_v60, 5  ;;  %v6271_v9 = vld [vmem:[#allocation2 + $0x50] sm:$0x1] }
 0x402   : > { %v11869_v18 = vpack.c.b16 %v7520_v56, %v7519_v14  ;;  %v6758_v0 = vsel %vm9372_vm11, %v6756_v1, %v6757_v44  ;;  %v6156_v24 = vrot.slane %v5663_v19, 5  ;;  %v5588_v34 = vsel %vm9372_vm11, %v8748_v15, %v5587_v49  ;;  %v5462_v22 = vld [vmem:[#allocation2 + $0x84] sm:$0xe]  ;;  %v5042_v19 = vld [vmem:[#allocation2 + $0x88] sm:$0xf] }
 0x403   : > { %7037 = vrot.lane.b32.xlu2 %v11762_v47, %s9220_s21  ;;  %v7506_v63 = vunpack.c.l.b16 %v6758_v0  ;;  %v5589_v62 = vrot.slane %v5587_v49, 4  ;;  %v8742_v45 = vrot.slane %v5455_v12, 9  ;;  %v7007_v51 = vunpack.c.l.b16 %v5588_v34  ;;  %v5062_v56 = vld [vmem:[#allocation2 + $0x8c] sm:$0x1] }
 0x404   : > { %7413 = vrot.lane.b32.xlu1 %v9101_v23, %s9218_s19  ;;  %v6154_v5 = vsel %vm9372_vm11, %v8758_v41, %v6153_v53  ;;  %v6155_v2 = vrot.slane %v6153_v53, 4  ;;  %v5545_v10 = vrot.slane %v5028_v36, 5  ;;  %v5548_v37 = vrot.slane %v5055_v20, 5  ;;  %v6678_v23 = vld [vmem:[#allocation2 + $0x9c] sm:$0xe] }
 0x405   : > { %v11880_v6 = vpack.c.b16 %v7506_v63, %v7505_v29  ;;  %v5591_v47 = vsel %vm9372_vm11, %v5589_v62, %v5590_v25  ;;  %v7251_v21 = vunpack.c.l.b16 %v6154_v5  ;;  %7291 = vrot.lane.b32.xlu0 %v11778_v31, %s9219_s20  ;;  %v8764_v59 = vrot.slane %v6069_v55, 9  ;;  %v6258_v36 = vld [vmem:[#allocation2 + $0xa0] sm:$0xf]  ;;  %v6278_v63 = vld [vmem:[#allocation2 + $0xa4] sm:$0x1] }
 0x406   : > { %v7008_v35 = vunpack.c.l.b16 %v5591_v47  ;;  %v6157_v7 = vsel %vm9372_vm11, %v6155_v2, %v6156_v24  ;;  %v5546_v28 = vsel %vm9372_vm11, %v8742_v45, %v5545_v10  ;;  %v5547_v8 = vrot.slane %v5545_v10, 4  ;;  %v5030_v10 = vld [vmem:[#allocation2 + $0x40] sm:$0xf] }
 0x407   : > { %v7252_v17 = vunpack.c.l.b16 %v6157_v7  ;;  %v6995_v14 = vunpack.c.l.b16 %v5546_v28  ;;  %v6195_v26 = vrot.slane %v5648_v4, 5  ;;  %v6198_v15 = vrot.slane %v5669_v52, 5  ;;  %v5456_v4 = vld [vmem:[#allocation2 + $0x3c] sm:$0xe]  ;;  %v5056_v52 = vld [vmem:[#allocation2 + $0x44] sm:$0x1] }
 0x408   : > { %v11890_v33 = vpack.c.b16 %v7008_v35, %v7007_v51  ;;  %v5549_v44 = vsel %vm9372_vm11, %v5547_v8, %v5548_v37  ;;  %v8774_v60 = vrot.slane %v6671_v32, 9  ;;  %v6761_v49 = vrot.slane %v6244_v39, 5  ;;  %v6070_v32 = vld [vmem:[#allocation2 + $0x90] sm:$0xe]  ;;  %v5650_v39 = vld [vmem:[#allocation2 + $0x94] sm:$0xf] }
 0x409   : > { %v11894_v13 = vpack.c.b16 %v7252_v17, %v7251_v21  ;;  %v6996_v1 = vunpack.c.l.b16 %v5549_v44  ;;  %v6196_v31 = vsel %vm9372_vm11, %v8764_v59, %v6195_v26  ;;  %v6197_v12 = vrot.slane %v6195_v26, 4 }
 0x40a   : > { %v7263_v29 = vunpack.c.l.b16 %v6196_v31  ;;  %v6764_v25 = vrot.slane %v6271_v9, 5  ;;  %v8749_v41 = vrot.slane %v5462_v22, 9  ;;  %v5594_v24 = vrot.slane %v5042_v19, 5  ;;  %v5670_v9 = vld [vmem:[#allocation2 + $0x98] sm:$0x1] }
 0x40b   : > { %7293 = vrot.lane.b32.xlu2 %v11784_v54, %s9219_s20  ;;  %v11902_v0 = vpack.c.b16 %v6996_v1, %v6995_v14  ;;  %v6199_v53 = vsel %vm9372_vm11, %v6197_v12, %v6198_v15  ;;  %v5597_v20 = vrot.slane %v5062_v56, 5  ;;  %v6762_v62 = vsel %vm9372_vm11, %v8774_v60, %v6761_v49  ;;  %v6064_v22 = vld [vmem:[#allocation2 + $0x48] sm:$0xe]  ;;  %v5638_v19 = vld [vmem:[#allocation2 + $0x4c] sm:$0xf] }
 0x40c   : > { %7051 = vrot.lane.b32.xlu1 %v11795_v3, %s9220_s21  ;;  %v7264_v34 = vunpack.c.l.b16 %v6199_v53  ;;  %v6763_v45 = vrot.slane %v6761_v49, 4  ;;  %v8781_v51 = vrot.slane %v6678_v23, 9  ;;  %v7507_v5 = vunpack.c.l.b16 %v6762_v62  ;;  %v5664_v56 = vld [vmem:[#allocation2 + $0x50] sm:$0x1]  ;;  %v5044_v53 = vld [vmem:[#allocation2 + $0x94] sm:$0xf] }
 0x40d   : > { %v5595_v54 = vsel %vm9372_vm11, %v8749_v41, %v5594_v24  ;;  %v5596_v2 = vrot.slane %v5594_v24, 4  ;;  %v6810_v3 = vrot.slane %v6258_v36, 5  ;;  %v6813_v37 = vrot.slane %v6278_v63, 5  ;;  %7547 = vrot.lane.b32.xlu0 %v11787_v61, %s9221_s22  ;;  %v5063_v62 = vld [vmem:[#allocation2 + $0x98] sm:$0x1] }
 0x40e   : > { %v11910_v55 = vpack.c.b16 %v7264_v34, %v7263_v29  ;;  %v6765_v47 = vsel %vm9372_vm11, %v6763_v45, %v6764_v25  ;;  %v7009_v21 = vunpack.c.l.b16 %v5595_v54  ;;  %v8743_v59 = vrot.slane %v5456_v4, 9  ;;  %v5463_v29 = vld [vmem:[#allocation2 + $0x90] sm:$0xe]  ;;  %v11936_v45 = vpop.permute.xlu2 %7147  ;;  %v6260_v4 = vld [vmem:[#allocation2 + $0xac] sm:$0xf] }
 0x40f   : > { %v7508_v35 = vunpack.c.l.b16 %v6765_v47  ;;  %v5598_v7 = vsel %vm9372_vm11, %v5596_v2, %v5597_v20  ;;  %v6811_v28 = vsel %vm9372_vm11, %v8781_v51, %v6810_v3  ;;  %v6812_v8 = vrot.slane %v6810_v3, 4  ;;  %v6679_v47 = vld [vmem:[#allocation2 + $0xa8] sm:$0xe] }
 0x410   : > { %v7010_v17 = vunpack.c.l.b16 %v5598_v7  ;;  %v7521_v14 = vunpack.c.l.b16 %v6811_v28  ;;  %v5552_v26 = vrot.slane %v5030_v10, 5  ;;  %v5555_v15 = vrot.slane %v5056_v52, 5  ;;  %v6672_v7 = vld [vmem:[#allocation2 + $0x54] sm:$0xe] }
 0x411   : > { %v11920_v44 = vpack.c.b16 %v7508_v35, %v7507_v5  ;;  %v6814_v61 = vsel %vm9372_vm11, %v6812_v8, %v6813_v37  ;;  %v8765_v60 = vrot.slane %v6070_v32, 9  ;;  %v6202_v25 = vrot.slane %v5650_v39, 5  ;;  %v6279_v35 = vld [vmem:[#allocation2 + $0xb0] sm:$0x1] }
 0x412   : > { %v11924_v1 = vpack.c.b16 %v7010_v17, %v7009_v21  ;;  %v7522_v31 = vunpack.c.l.b16 %v6814_v61  ;;  %v5553_v12 = vsel %vm9372_vm11, %v8743_v59, %v5552_v26  ;;  %v5554_v23 = vrot.slane %v5552_v26, 4  ;;  %v6071_v61 = vld [vmem:[#allocation2 + $0x9c] sm:$0xe] }
 0x413   : > { %7549 = vrot.lane.b32.xlu2 %v11789_v30, %s9221_s22  ;;  %v6997_v49 = vunpack.c.l.b16 %v5553_v12  ;;  %v6205_v41 = vrot.slane %v5670_v9, 5  ;;  %v8759_v36 = vrot.slane %v6064_v22, 9  ;;  %v6160_v63 = vrot.slane %v5638_v19, 5  ;;  %v6272_v22 = vld [vmem:[#allocation2 + $0x5c] sm:$0x1] }
 0x414   : > { %7307 = vrot.lane.b32.xlu1 %v11814_v42, %s9219_s20  ;;  %v11932_v24 = vpack.c.b16 %v7522_v31, %v7521_v14  ;;  %v5556_v20 = vsel %vm9372_vm11, %v5554_v23, %v5555_v15  ;;  %v6163_v34 = vrot.slane %v5664_v56, 5  ;;  %v6203_v30 = vsel %vm9372_vm11, %v8765_v60, %v6202_v25  ;;  %v6246_v14 = vld [vmem:[#allocation2 + $0x58] sm:$0xf]  ;;  %v5652_v31 = vld [vmem:[#allocation2 + $0xa0] sm:$0xf] }
 0x415   : > { %v6998_v51 = vunpack.c.l.b16 %v5556_v20  ;;  %v6204_v42 = vrot.slane %v6202_v25, 4  ;;  %v8750_v5 = vrot.slane %v5463_v29, 9  ;;  %v7265_v54 = vunpack.c.l.b16 %v6203_v30  ;;  %7563 = vrot.lane.b32.xlu0 %v11801_v50, %s9221_s22  ;;  %v5671_v12 = vld [vmem:[#allocation2 + $0xa4] sm:$0x1]  ;;  %v5665_v30 = vld [vmem:[#allocation2 + $0x5c] sm:$0x1] }
 0x416   : > { %v6161_v2 = vsel %vm9372_vm11, %v8759_v36, %v6160_v63  ;;  %v6162_v3 = vrot.slane %v6160_v63, 4  ;;  %v5601_v10 = vrot.slane %v5044_v53, 5  ;;  %v5604_v32 = vrot.slane %v5063_v62, 5 }
 0x417   : > { %v11944_v21 = vpack.c.b16 %v6998_v51, %v6997_v49  ;;  %v6206_v37 = vsel %vm9372_vm11, %v6204_v42, %v6205_v41  ;;  %v7253_v52 = vunpack.c.l.b16 %v6161_v2  ;;  %v8782_v26 = vrot.slane %v6679_v47, 9  ;;  %v6065_v41 = vld [vmem:[#allocation2 + $0x54] sm:$0xe] }
 0x418   : > { %v7266_v28 = vunpack.c.l.b16 %v6206_v37  ;;  %v6164_v8 = vsel %vm9372_vm11, %v6162_v3, %v6163_v34  ;;  %v5602_v39 = vsel %vm9372_vm11, %v8750_v5, %v5601_v10  ;;  %v5603_v17 = vrot.slane %v5601_v10, 4  ;;  %v5640_v34 = vld [vmem:[#allocation2 + $0x58] sm:$0xf]  ;;  %v11972_v3 = vpop.permute.xlu2 %7403 }
 0x419   : > { %v7254_v59 = vunpack.c.l.b16 %v6164_v8  ;;  %v7011_v50 = vunpack.c.l.b16 %v5602_v39  ;;  %v6817_v9 = vrot.slane %v6260_v4, 5  ;;  %v6820_v19 = vrot.slane %v6279_v35, 5  ;;  %v5057_v39 = vld [vmem:[#allocation2 + $0x50] sm:$0x1] }
 0x41a   : > { %v11952_v15 = vpack.c.b16 %v7266_v28, %v7265_v54  ;;  %v5605_v60 = vsel %vm9372_vm11, %v5603_v17, %v5604_v32  ;;  %v8775_v56 = vrot.slane %v6672_v7, 9  ;;  %v6768_v53 = vrot.slane %v6246_v14, 5  ;;  %v5457_v32 = vld [vmem:[#allocation2 + $0x48] sm:$0xe]  ;;  %v5019_v17 = vld [vmem:[#allocation2] sm:$0xf] }
 0x41b   : > { %7039 = vrot.lane.b32.xlu2 %v11809_v46, %s9220_s21  ;;  %v11960_v23 = vpack.c.b16 %v7254_v59, %v7253_v52  ;;  %v7012_v29 = vunpack.c.l.b16 %v5605_v60  ;;  %v6818_v49 = vsel %vm9372_vm11, %v8782_v26, %v6817_v9  ;;  %v6819_v25 = vrot.slane %v6817_v9, 4  ;;  %v5032_v52 = vld [vmem:[#allocation2 + $0x4c] sm:$0xf]  ;;  %v11988_v60 = vpop.permute.xlu1 %7131 }
 0x41c   : > { %7565 = vrot.lane.b32.xlu1 %v11837_v57, %s9221_s22  ;;  %v7523_v36 = vunpack.c.l.b16 %v6818_v49  ;;  %v6771_v20 = vrot.slane %v6272_v22, 5  ;;  %v8766_v63 = vrot.slane %v6071_v61, 9  ;;  %v6209_v51 = vrot.slane %v5652_v31, 5 }
 0x41d   : > { %v11964_v62 = vpack.c.b16 %v7012_v29, %v7011_v50  ;;  %v6821_v46 = vsel %vm9372_vm11, %v6819_v25, %v6820_v19  ;;  %v6212_v57 = vrot.slane %v5671_v12, 5  ;;  %v6769_v5 = vsel %vm9372_vm11, %v8775_v56, %v6768_v53  ;;  %7295 = vrot.lane.b32.xlu0 %v11824_v58, %s9219_s20 }
 0x41e   : > { %v7524_v42 = vunpack.c.l.b16 %v6821_v46  ;;  %v6770_v54 = vrot.slane %v6768_v53, 4  ;;  %v8760_v2 = vrot.slane %v6065_v41, 9  ;;  %v7509_v10 = vunpack.c.l.b16 %v6769_v5  ;;  %v6273_v46 = vld [vmem:[#allocation2 + $0x68] sm:$0x1] }
 0x41f   : > { %v6210_v4 = vsel %vm9372_vm11, %v8766_v63, %v6209_v51  ;;  %v6211_v47 = vrot.slane %v6209_v51, 4  ;;  %v6167_v37 = vrot.slane %v5640_v34, 5  ;;  %v6170_v8 = vrot.slane %v5665_v30, 5  ;;  %v9133_v63 = vld [vmem:[#allocation2 + $0x4] sm:$0xf] }
 0x420   : > { %v11976_v35 = vpack.c.b16 %v7524_v42, %v7523_v36  ;;  %v6772_v7 = vsel %vm9372_vm11, %v6770_v54, %v6771_v20  ;;  %v7267_v28 = vunpack.c.l.b16 %v6210_v4  ;;  %v8744_v22 = vrot.slane %v5457_v32, 9  ;;  %v6673_v36 = vld [vmem:[#allocation2 + $0x60] sm:$0xe]  ;;  %v9134_v42 = vld [vmem:[#allocation2 + $0x8] sm:$0x1] }
 0x421   : > { %v7510_v58 = vunpack.c.l.b16 %v6772_v7  ;;  %v6213_v14 = vsel %vm9372_vm11, %v6211_v47, %v6212_v57  ;;  %v6168_v59 = vsel %vm9372_vm11, %v8760_v2, %v6167_v37  ;;  %v6169_v50 = vrot.slane %v6167_v37, 4  ;;  %v5046_v54 = vld [vmem:[#allocation2 + $0xa0] sm:$0xf]  ;;  %v5464_v2 = vld [vmem:[#allocation2 + $0x9c] sm:$0xe] }
 0x422   : > { %v7268_v26 = vunpack.c.l.b16 %v6213_v14  ;;  %v7255_v9 = vunpack.c.l.b16 %v6168_v59  ;;  %v5559_v61 = vrot.slane %v5032_v52, 5  ;;  %v5562_v31 = vrot.slane %v5057_v39, 5  ;;  %v5064_v52 = vld [vmem:[#allocation2 + $0xa4] sm:$0x1]  ;;  %v12004_v39 = vpop.permute.xlu2 %7137 }
 0x423   : > { %7053 = vrot.lane.b32.xlu2 %v11832_v11, %s9220_s21  ;;  %v11990_v19 = vpack.c.b16 %v7510_v58, %v7509_v10  ;;  %v6171_v56 = vsel %vm9372_vm11, %v6169_v50, %v6170_v8  ;;  %v5068_v12 = vshrl.u32 %v5019_v17, 16  ;;  %v6248_v11 = vld [vmem:[#allocation2 + $0x64] sm:$0xf]  ;;  %v5071_v20 = vshll.u32 %v5019_v17, 16  ;;  %v5627_v50 = vld [vmem:[#allocation2 + $0xc] sm:$0xf] }
 0x424   : > { %7297 = vrot.lane.b32.xlu1 %v11861_v27, %s9219_s20  ;;  %v11994_v29 = vpack.c.b16 %v7268_v26, %v7267_v28  ;;  %v7256_v49 = vunpack.c.l.b16 %v6171_v56  ;;  %v5560_v25 = vsel %vm9372_vm11, %v8744_v22, %v5559_v61  ;;  %v5561_v41 = vrot.slane %v5559_v61, 4  ;;  %v12014_v61 = vpop.permute.xlu0 %7133 }
 0x425   : > { %v6999_v53 = vunpack.c.l.b16 %v5560_v25  ;;  %v5070_v27 = vrot.slane %v5068_v12, 4  ;;  %v5077_v34 = vshll.u32 %v9133_v63, 16  ;;  %v5081_v30 = vshrl.u32 %v9133_v63, 16  ;;  %7551 = vrot.lane.b32.xlu0 %v11841_v48, %s9221_s22  ;;  %v5021_v63 = vld [vmem:[#allocation2 + $0xc] sm:$0xf] }
 0x426   : > { %v11998_v51 = vpack.c.b16 %v7256_v49, %v7255_v9  ;;  %v5563_v57 = vsel %vm9372_vm11, %v5561_v41, %v5562_v31  ;;  %v5087_v5 = vshll.u32 %v9134_v42, 16  ;;  %v5073_v4 = vrot.slane %v5071_v20, 5 }
 0x427   : > { %v7000_v10 = vunpack.c.l.b16 %v5563_v57  ;;  %v5079_v47 = vrot.slane %v5077_v34, 5  ;;  %v8776_v37 = vrot.slane %v6673_v36, 9  ;;  %v5083_v32 = vrot.slane %v5081_v30, 4 }
 0x428   : > { %v5089_v7 = vrot.slane %v5087_v5, 5  ;;  %v6775_v28 = vrot.slane %v6248_v11, 5  ;;  %v6778_v8 = vrot.slane %v6273_v46, 5  ;;  %v5074_v58 = vor.u32 %v5073_v4, %v5070_v27 }
 0x429   : > { %v12006_v17 = vpack.c.b16 %v7000_v10, %v6999_v53  ;;  %v8751_v14 = vrot.slane %v5464_v2, 9  ;;  %v5608_v59 = vrot.slane %v5046_v54, 5  ;;  %v5084_v26 = vor.u32 %v5083_v32, %v5079_v47  ;;  %v12020_v53 = vpop.permute.xlu1 %7387  ;;  %v9135_v2 = vld [vmem:[#allocation2 + $0x10] sm:$0xf] }
 0x42a   : > { %v6776_v48 = vsel %vm9372_vm11, %v8776_v37, %v6775_v28  ;;  %v6777_v9 = vrot.slane %v6775_v28, 4  ;;  %v5611_v22 = vrot.slane %v5064_v52, 5  ;;  %v5075_v56 = vrot.slane %v5074_v58, 4  ;;  %v9136_v37 = vld [vmem:[#allocation2 + $0x14] sm:$0x1] }
 0x42b   : > { %7309 = vrot.lane.b32.xlu2 %v11851_v43, %s9219_s20  ;;  %v7511_v31 = vunpack.c.l.b16 %v6776_v48  ;;  %v5609_v12 = vsel %vm9372_vm11, %v8751_v14, %v5608_v59  ;;  %v5610_v49 = vrot.slane %v5608_v59, 4  ;;  %v5085_v25 = vrot.slane %v5084_v26, 4  ;;  %v6072_v14 = vld [vmem:[#allocation2 + $0xa8] sm:$0xe]  ;;  %v9137_v48 = vld [vmem:[#allocation2 + $0x10] sm:$0xf] }
 0x42c   : > { %7553 = vrot.lane.b32.xlu1 %v11880_v6, %s9221_s22  ;;  %v6779_v41 = vsel %vm9372_vm11, %v6777_v9, %v6778_v8  ;;  %v7013_v11 = vunpack.c.l.b16 %v5609_v12  ;;  %v5676_v36 = vshrl.u32 %v5627_v50, 16  ;;  %v5080_v43 = vsel %vm9481_vm14, %v5075_v56, %v5079_v47 }
 0x42d   : > { %v7512_v6 = vunpack.c.l.b16 %v6779_v41  ;;  %v5612_v27 = vsel %vm9372_vm11, %v5610_v49, %v5611_v22  ;;  %v5679_v20 = vshll.u32 %v5627_v50, 16  ;;  %v5090_v34 = vsel %vm9481_vm14, %v5085_v25, %v5089_v7  ;;  %7041 = vrot.lane.b32.xlu0 %v11865_v40, %s9220_s21  ;;  %v5654_v40 = vld [vmem:[#allocation2 + $0xac] sm:$0xf]  ;;  %v12042_v22 = vpop.permute.xlu2 %7393  ;;  %v9138_v49 = vld [vmem:[#allocation2 + $0x14] sm:$0x1] }
 0x42e   : > { %v12028_v46 = vunpack.c.l.b16 %v5080_v43  ;;  %v7014_v57 = vunpack.c.l.b16 %v5612_v27  ;;  %v5678_v30 = vrot.slane %v5676_v36, 4  ;;  %v12032_v42 = vunpack.c.l.b16 %v5090_v34  ;;  %13513 = vst [vmem:[#allocation3_spill] sm:$0xff] %v12042_v22  ;;  %v5672_v36 = vld [vmem:[#allocation2 + $0xb0] sm:$0x1]  ;;  %v12046_v27 = vpop.permute.xlu0 %7389 }
 0x42f   : > { %v12034_v5 = vpack.c.b16 %v7512_v6, %v7511_v31  ;;  %v5681_v54 = vrot.slane %v5679_v20, 5  ;;  %v5685_v10 = vshll.u32 %v9135_v2, 16  ;;  %v5689_v47 = vshrl.u32 %v9135_v2, 16 }
 0x430   : > { %v12036_v4 = vpack.c.b16 %v7014_v57, %v7013_v11  ;;  %v5695_v52 = vshll.u32 %v9136_v37, 16  ;;  %v5092_v32 = vshrl.u32 %v5021_v63, 16  ;;  %v5095_v58 = vshll.u32 %v5021_v63, 16  ;;  %v6235_v57 = vld [vmem:[#allocation2 + $0x18] sm:$0xf] }
 0x431   : > { %v5682_v28 = vor.u32 %v5681_v54, %v5678_v30  ;;  %v5687_v8 = vrot.slane %v5685_v10, 5  ;;  %v5691_v59 = vrot.slane %v5689_v47, 4  ;;  %v5101_v9 = vshll.u32 %v9137_v48, 16  ;;  %v12056_v10 = vpop.permute.xlu1 %7135 }
 0x432   : > { %v5697_v50 = vrot.slane %v5695_v52, 5  ;;  %v5094_v26 = vrot.slane %v5092_v32, 4  ;;  %v5097_v31 = vrot.slane %v5095_v58, 5  ;;  %v5105_v12 = vshrl.u32 %v9137_v48, 16 }
 0x433   : > { %7567 = vrot.lane.b32.xlu2 %v11869_v18, %s9221_s22  ;;  %v5683_v56 = vrot.slane %v5682_v28, 4  ;;  %v5111_v25 = vshll.u32 %v9138_v49, 16  ;;  %v5692_v41 = vor.u32 %v5691_v59, %v5687_v8  ;;  %v5103_v11 = vrot.slane %v5101_v9, 5  ;;  %v5629_v49 = vld [vmem:[#allocation2 + $0x18] sm:$0xf] }
 0x434   : > { %7043 = vrot.lane.b32.xlu1 %v11902_v0, %s9220_s21  ;;  %v8767_v43 = vrot.slane %v6072_v14, 9  ;;  %v6216_v6 = vrot.slane %v5654_v40, 5  ;;  %v5098_v20 = vor.u32 %v5097_v31, %v5094_v26  ;;  %v5107_v63 = vrot.slane %v5105_v12, 4  ;;  %v9139_v40 = vld [vmem:[#allocation2 + $0x1c] sm:$0xf] }
 0x435   : > { %v5688_v18 = vsel %vm9481_vm14, %v5683_v56, %v5687_v8  ;;  %v5113_v34 = vrot.slane %v5111_v25, 5  ;;  %v5693_v0 = vrot.slane %v5692_v41, 4  ;;  %7055 = vrot.lane.b32.xlu0 %v11890_v33, %s9220_s21  ;;  %v6219_v52 = vrot.slane %v5672_v36, 5 }
 0x436   : > { %v12050_v30 = vunpack.c.l.b16 %v5688_v18  ;;  %v6217_v54 = vsel %vm9372_vm11, %v8767_v43, %v6216_v6  ;;  %v6218_v2 = vrot.slane %v6216_v6, 4  ;;  %v5099_v47 = vrot.slane %v5098_v20, 4  ;;  %v9140_v18 = vld [vmem:[#allocation2 + $0x20] sm:$0x1] }
 0x437   : > { %v5108_v37 = vor.u32 %v5107_v63, %v5103_v11  ;;  %v7269_v32 = vunpack.c.l.b16 %v6217_v54  ;;  %v5698_v28 = vsel %vm9481_vm14, %v5693_v0, %v5697_v50  ;;  %v6284_v8 = vshrl.u32 %v6235_v57, 16  ;;  %v9141_v0 = vld [vmem:[#allocation2 + $0x1c] sm:$0xf] }
 0x438   : > { %v6287_v58 = vshll.u32 %v6235_v57, 16  ;;  %v6293_v14 = vshll.u32 %v9139_v40, 16  ;;  %v12060_v59 = vunpack.c.l.b16 %v5698_v28  ;;  %v5104_v26 = vsel %vm9481_vm14, %v5099_v47, %v5103_v11 }
 0x439   : > { %v5109_v48 = vrot.slane %v5108_v37, 4  ;;  %v6220_v33 = vsel %vm9372_vm11, %v6218_v2, %v6219_v52  ;;  %v12066_v9 = vunpack.c.l.b16 %v5104_v26  ;;  %v6286_v31 = vrot.slane %v6284_v8, 4  ;;  %v5035_v2 = vld [vmem:[#allocation2 + $0x60] sm:$0xf] }
 0x43a   : > { %v7270_v56 = vunpack.c.l.b16 %v6220_v33  ;;  %v6289_v12 = vrot.slane %v6287_v58, 5  ;;  %v6295_v41 = vrot.slane %v6293_v14, 5  ;;  %v6297_v11 = vshrl.u32 %v9139_v40, 16 }
 0x43b   : > { %7299 = vrot.lane.b32.xlu2 %v11894_v13, %s9219_s20  ;;  %v5114_v25 = vsel %vm9481_vm14, %v5109_v48, %v5113_v34  ;;  %v6303_v20 = vshll.u32 %v9140_v18, 16  ;;  %v5700_v57 = vshrl.u32 %v5629_v49, 16  ;;  %v5709_v54 = vshll.u32 %v9141_v0, 16  ;;  %v9142_v48 = vld [vmem:[#allocation2 + $0x20] sm:$0x1] }
 0x43c   : > { %7057 = vrot.lane.b32.xlu1 %v11924_v1, %s9220_s21  ;;  %v12076_v36 = vunpack.c.l.b16 %v5114_v25  ;;  %v12078_v43 = vpack.c.b16 %v7270_v56, %v7269_v32  ;;  %v6290_v6 = vor.u32 %v6289_v12, %v6286_v31  ;;  %v6299_v13 = vrot.slane %v6297_v11, 4  ;;  %v12086_v32 = vpop.permute.xlu0 %7149  ;;  %v12090_v31 = vpop.permute.xlu1 %7391  ;;  %v6239_v34 = vld [vmem:[#allocation2 + $0x30] sm:$0xf] }
 0x43d   : > { %v12080_v63 = vpop.permute.xlu2 %7153  ;;  %v5703_v1 = vshll.u32 %v5629_v49, 16  ;;  %v6305_v37 = vrot.slane %v6303_v20, 5  ;;  %v5713_v52 = vshrl.u32 %v9141_v0, 16  ;;  %7311 = vrot.lane.b32.xlu0 %v11910_v55, %s9219_s20  ;;  %v5702_v8 = vrot.slane %v5700_v57, 4  ;;  %v9143_v20 = vld [vmem:[#allocation2 + $0x64] sm:$0xf] }
 0x43e   : > { %13514 = vst [vmem:[#allocation4_spill] sm:$0xff] %v12080_v63  ;;  %v6291_v47 = vrot.slane %v6290_v6, 4  ;;  %v6300_v28 = vor.u32 %v6299_v13, %v6295_v41  ;;  %v5711_v40 = vrot.slane %v5709_v54, 5  ;;  %v5719_v33 = vshll.u32 %v9142_v48, 16  ;;  %v5631_v57 = vld [vmem:[#allocation2 + $0x24] sm:$0xf] }
 0x43f   : > { %v5705_v58 = vrot.slane %v5703_v1, 5  ;;  %v5715_v26 = vrot.slane %v5713_v52, 4  ;;  %v5260_v56 = vshrl.u32 %v5035_v2, 16  ;;  %v5263_v55 = vshll.u32 %v5035_v2, 16 }
 0x440   : > { %v6296_v14 = vsel %vm9481_vm14, %v6291_v47, %v6295_v41  ;;  %v6301_v12 = vrot.slane %v6300_v28, 4  ;;  %v5721_v6 = vrot.slane %v5719_v33, 5  ;;  %v5269_v13 = vshll.u32 %v9143_v20, 16  ;;  %v9144_v28 = vld [vmem:[#allocation2 + $0x68] sm:$0x1] }
 0x441   : > { %v12092_v49 = vunpack.c.l.b16 %v6296_v14  ;;  %v5706_v25 = vor.u32 %v5705_v58, %v5702_v8  ;;  %v5716_v11 = vor.u32 %v5715_v26, %v5711_v40  ;;  %v5262_v18 = vrot.slane %v5260_v56, 4 }
 0x442   : > { %v6306_v41 = vsel %vm9481_vm14, %v6301_v12, %v6305_v37  ;;  %v5265_v0 = vrot.slane %v5263_v55, 5  ;;  %v5273_v54 = vshrl.u32 %v9143_v20, 16  ;;  %v5271_v52 = vrot.slane %v5269_v13, 5  ;;  %v6237_v12 = vld [vmem:[#allocation2 + $0x24] sm:$0xf] }
 0x443   : > { %7555 = vrot.lane.b32.xlu2 %v11920_v44, %s9221_s22  ;;  %v5707_v1 = vrot.slane %v5706_v25, 4  ;;  %v12100_v47 = vunpack.c.l.b16 %v6306_v41  ;;  %v5717_v2 = vrot.slane %v5716_v11, 4  ;;  %v5279_v8 = vshll.u32 %v9144_v28, 16  ;;  %v9145_v20 = vld [vmem:[#allocation2 + $0x28] sm:$0xf] }
 0x444   : > { %7313 = vrot.lane.b32.xlu1 %v11952_v15, %s9219_s20  ;;  %v5266_v14 = vor.u32 %v5265_v0, %v5262_v18  ;;  %v5275_v26 = vrot.slane %v5273_v54, 4  ;;  %v5724_v15 = vshrl.u32 %v5631_v57, 16  ;;  %v5727_v18 = vshll.u32 %v5631_v57, 16 }
 0x445   : > { %v12102_v58 = vpop.permute.xlu2 %7409  ;;  %v5712_v44 = vsel %vm9481_vm14, %v5707_v1, %v5711_v40  ;;  %v5722_v48 = vsel %vm9481_vm14, %v5717_v2, %v5721_v6  ;;  %v5281_v56 = vrot.slane %v5279_v8, 5  ;;  %7569 = vrot.lane.b32.xlu0 %v11932_v24, %s9221_s22  ;;  %v5733_v13 = vshll.u32 %v9145_v20, 16  ;;  %v9146_v1 = vld [vmem:[#allocation2 + $0x2c] sm:$0x1] }
 0x446   : > { %13515 = vst [vmem:[#allocation5_spill] sm:$0xff] %v12102_v58  ;;  %v12110_v33 = vunpack.c.l.b16 %v5712_v44  ;;  %v12114_v25 = vunpack.c.l.b16 %v5722_v48  ;;  %v5267_v55 = vrot.slane %v5266_v14, 4  ;;  %v5276_v40 = vor.u32 %v5275_v26, %v5271_v52  ;;  %v5643_v26 = vld [vmem:[#allocation2 + $0x6c] sm:$0xf]  ;;  %v9153_v58 = vld [vmem:[#allocation2 + $0x7c] sm:$0xf] }
 0x447   : > { %v5726_v11 = vrot.slane %v5724_v15, 4  ;;  %v5737_v41 = vshrl.u32 %v9145_v20, 16  ;;  %v5743_v0 = vshll.u32 %v9146_v1, 16  ;;  %v12116_v54 = vpop.permute.xlu0 %7405  ;;  %v6308_v28 = vshrl.u32 %v6237_v12, 16  ;;  %v9148_v6 = vld [vmem:[#allocation2 + $0x2c] sm:$0x1] }
 0x448   : > { %v5272_v2 = vsel %vm9481_vm14, %v5267_v55, %v5271_v52  ;;  %v5277_v24 = vrot.slane %v5276_v40, 4  ;;  %v5729_v44 = vrot.slane %v5727_v18, 5  ;;  %v5735_v14 = vrot.slane %v5733_v13, 5  ;;  %v12128_v15 = vpop.permute.xlu1 %7151 }
 0x449   : > { %v12122_v8 = vunpack.c.l.b16 %v5272_v2  ;;  %v5739_v57 = vrot.slane %v5737_v41, 4  ;;  %v5745_v52 = vrot.slane %v5743_v0, 5  ;;  %v6310_v55 = vrot.slane %v6308_v28, 4  ;;  %v9147_v41 = vld [vmem:[#allocation2 + $0x28] sm:$0xf] }
 0x44a   : > { %v5282_v48 = vsel %vm9481_vm14, %v5277_v24, %v5281_v56  ;;  %v6311_v40 = vshll.u32 %v6237_v12, 16  ;;  %v5730_v18 = vor.u32 %v5729_v44, %v5726_v11  ;;  %v6317_v1 = vshll.u32 %v9147_v41, 16 }
 0x44b   : > { %7045 = vrot.lane.b32.xlu2 %v11944_v21, %s9220_s21  ;;  %v12132_v20 = vunpack.c.l.b16 %v5282_v48  ;;  %v5740_v13 = vor.u32 %v5739_v57, %v5735_v14  ;;  %v6321_v37 = vshrl.u32 %v9147_v41, 16  ;;  %v5868_v50 = vshrl.u32 %v5643_v26, 16 }
 0x44c   : > { %7571 = vrot.lane.b32.xlu1 %v11976_v35, %s9221_s22  ;;  %v6313_v21 = vrot.slane %v6311_v40, 5  ;;  %v6327_v35 = vshll.u32 %v9148_v6, 16  ;;  %v5731_v56 = vrot.slane %v5730_v18, 4  ;;  %v6319_v24 = vrot.slane %v6317_v1, 5  ;;  %v9149_v40 = vld [vmem:[#allocation2 + $0x70] sm:$0xf] }
 0x44d   : > { %v12134_v2 = vpop.permute.xlu2 %7143  ;;  %v5741_v0 = vrot.slane %v5740_v13, 4  ;;  %7301 = vrot.lane.b32.xlu0 %v11960_v23, %s9219_s20  ;;  %v6323_v11 = vrot.slane %v6321_v37, 4  ;;  %v5870_v44 = vrot.slane %v5868_v50, 4  ;;  %v5871_v48 = vshll.u32 %v5643_v26, 16  ;;  %v9151_v26 = vld [vmem:[#allocation2 + $0x34] sm:$0xf] }
 0x44e   : > { %13516 = vst [vmem:[#allocation6_spill] sm:$0xff] %v12134_v2  ;;  %v6314_v12 = vor.u32 %v6313_v21, %v6310_v55  ;;  %v6329_v28 = vrot.slane %v6327_v35, 5  ;;  %v5736_v57 = vsel %vm9481_vm14, %v5731_v56, %v5735_v14  ;;  %v5877_v41 = vshll.u32 %v9149_v40, 16  ;;  %v9150_v35 = vld [vmem:[#allocation2 + $0x74] sm:$0x1] }
 0x44f   : > { %v5746_v6 = vsel %vm9481_vm14, %v5741_v0, %v5745_v52  ;;  %v12144_v18 = vpop.permute.xlu0 %7139  ;;  %v12146_v13 = vunpack.c.l.b16 %v5736_v57  ;;  %v6324_v37 = vor.u32 %v6323_v11, %v6319_v24  ;;  %v5873_v55 = vrot.slane %v5871_v48, 5  ;;  %v6251_v48 = vld [vmem:[#allocation2 + $0x78] sm:$0xf] }
 0x450   : > { %13517 = vst [vmem:[#allocation7_spill] sm:$0xff] %v12144_v18  ;;  %v12148_v1 = vunpack.c.l.b16 %v5746_v6  ;;  %v6315_v23 = vrot.slane %v6314_v12, 4  ;;  %v5879_v50 = vrot.slane %v5877_v41, 5  ;;  %v5881_v21 = vshrl.u32 %v9149_v40, 16 }
 0x451   : > { %v5887_v14 = vshll.u32 %v9150_v35, 16  ;;  %v6325_v56 = vrot.slane %v6324_v37, 4  ;;  %v6332_v0 = vshrl.u32 %v6239_v34, 16  ;;  %v5874_v11 = vor.u32 %v5873_v55, %v5870_v44 }
 0x452   : > { %v6320_v52 = vsel %vm9481_vm14, %v6315_v23, %v6319_v24  ;;  %v5883_v57 = vrot.slane %v5881_v21, 4  ;;  %v6335_v35 = vshll.u32 %v6239_v34, 16  ;;  %v6341_v7 = vshll.u32 %v9151_v26, 16  ;;  %v9152_v21 = vld [vmem:[#allocation2 + $0x38] sm:$0x1] }
 0x453   : > { %7059 = vrot.lane.b32.xlu2 %v11964_v62, %s9220_s21  ;;  %v12158_v12 = vunpack.c.l.b16 %v6320_v52  ;;  %v5889_v6 = vrot.slane %v5887_v14, 5  ;;  %v6334_v41 = vrot.slane %v6332_v0, 4  ;;  %v5875_v23 = vrot.slane %v5874_v11, 4 }
 0x454   : > { %7303 = vrot.lane.b32.xlu1 %v11998_v51, %s9219_s20  ;;  %v6330_v51 = vsel %vm9481_vm14, %v6325_v56, %v6329_v28  ;;  %v5884_v37 = vor.u32 %v5883_v57, %v5879_v50  ;;  %v6345_v52 = vshrl.u32 %v9151_v26, 16  ;;  %v6337_v44 = vrot.slane %v6335_v35, 5  ;;  %v5023_v35 = vld [vmem:[#allocation2 + $0x18] sm:$0xf] }
 0x455   : > { %v12160_v40 = vpop.permute.xlu2 %7399  ;;  %v12166_v24 = vunpack.c.l.b16 %v6330_v51  ;;  %7557 = vrot.lane.b32.xlu0 %v11990_v19, %s9221_s22  ;;  %v6343_v55 = vrot.slane %v6341_v7, 5  ;;  %v6351_v14 = vshll.u32 %v9152_v21, 16  ;;  %v5880_v34 = vsel %vm9481_vm14, %v5875_v23, %v5879_v50 }
 0x456   : > { %13518 = vst [vmem:[#allocation8_spill] sm:$0xff] %v12160_v40  ;;  %v12162_v62 = vpop.permute.xlu1 %7407  ;;  %v6476_v40 = vshrl.u32 %v6251_v48, 16  ;;  %v5885_v56 = vrot.slane %v5884_v37, 4  ;;  %v6347_v0 = vrot.slane %v6345_v52, 4  ;;  %v12176_v11 = vunpack.c.l.b16 %v5880_v34  ;;  %v9154_v37 = vld [vmem:[#allocation2 + $0x80] sm:$0x1] }
 0x457   : > { %13519 = vst [vmem:[#allocation9_spill] sm:$0xff] %v12162_v62  ;;  %v12174_v51 = vpop.permute.xlu0 %7395  ;;  %v6338_v26 = vor.u32 %v6337_v44, %v6334_v41  ;;  %v6353_v57 = vrot.slane %v6351_v14, 5  ;;  %v6479_v2 = vshll.u32 %v6251_v48, 16  ;;  %v6485_v28 = vshll.u32 %v9153_v58, 16 }
 0x458   : > { %13520 = vst [vmem:[#allocation10_spill] sm:$0xff] %v12174_v51  ;;  %v6478_v19 = vrot.slane %v6476_v40, 4  ;;  %v5890_v7 = vsel %vm9481_vm14, %v5885_v56, %v5889_v6  ;;  %v6348_v21 = vor.u32 %v6347_v0, %v6343_v55  ;;  %v6489_v41 = vshrl.u32 %v9153_v58, 16 }
 0x459   : > { %v12184_v50 = vunpack.c.l.b16 %v5890_v7  ;;  %v6339_v23 = vrot.slane %v6338_v26, 4  ;;  %v6495_v40 = vshll.u32 %v9154_v37, 16  ;;  %v6481_v44 = vrot.slane %v6479_v2, 5  ;;  %v6253_v26 = vld [vmem:[#allocation2 + $0x84] sm:$0xf] }
 0x45a   : > { %v6349_v52 = vrot.slane %v6348_v21, 4  ;;  %v6487_v14 = vrot.slane %v6485_v28, 5  ;;  %v5116_v6 = vshrl.u32 %v5023_v35, 16  ;;  %v6491_v56 = vrot.slane %v6489_v41, 4  ;;  %v9156_v41 = vld [vmem:[#allocation2 + $0x20] sm:$0x1] }
 0x45b   : > { %7315 = vrot.lane.b32.xlu2 %v11994_v29, %s9219_s20  ;;  %v6497_v0 = vrot.slane %v6495_v40, 5  ;;  %v6482_v2 = vor.u32 %v6481_v44, %v6478_v19  ;;  %v5119_v29 = vshll.u32 %v5023_v35, 16  ;;  %v5135_v40 = vshll.u32 %v9156_v41, 16 }
 0x45c   : > { %7559 = vrot.lane.b32.xlu1 %v12034_v5, %s9221_s22  ;;  %v6344_v5 = vsel %vm9481_vm14, %v6339_v23, %v6343_v55  ;;  %v6354_v58 = vsel %vm9481_vm14, %v6349_v52, %v6353_v57  ;;  %v5118_v28 = vrot.slane %v5116_v6, 4  ;;  %v6492_v37 = vor.u32 %v6491_v56, %v6487_v14  ;;  %v5037_v56 = vld [vmem:[#allocation2 + $0x6c] sm:$0xf] }
 0x45d   : > { %v12186_v34 = vpop.permute.xlu2 %7037  ;;  %v12196_v7 = vunpack.c.l.b16 %v6344_v5  ;;  %7047 = vrot.lane.b32.xlu0 %v12006_v17, %s9220_s21  ;;  %v12200_v21 = vunpack.c.l.b16 %v6354_v58  ;;  %v6483_v55 = vrot.slane %v6482_v2, 4  ;;  %v6500_v18 = vshrl.u32 %v6253_v26, 16 }
 0x45e   : > { %v12188_v48 = vpop.permute.xlu1 %7141  ;;  %v6493_v19 = vrot.slane %v6492_v37, 4  ;;  %v5121_v52 = vrot.slane %v5119_v29, 5  ;;  %v5137_v35 = vrot.slane %v5135_v40, 5  ;;  %v13524_v58 = vpack.c.b16 %v12076_v36, %v12066_v9  ;;  %v9158_v36 = vld [vmem:[#allocation2 + $0x8c] sm:$0x1] }
 0x45f   : > { %13521 = vst [vmem:[#allocation11_spill] sm:$0xff] %v12188_v48  ;;  %v9155_v48 = vld [vmem:[#allocation2 + $0x1c] sm:$0xf]  ;;  %v12202_v63 = vpop.permute.xlu0 %7155  ;;  %v6488_v17 = vsel %vm9481_vm14, %v6483_v55, %v6487_v14  ;;  %v6502_v5 = vrot.slane %v6500_v18, 4  ;;  %v6503_v2 = vshll.u32 %v6253_v26, 16  ;;  %v5287_v57 = vshll.u32 %v5037_v56, 16 }
 0x460   : > { %v5125_v51 = vshll.u32 %v9155_v48, 16  ;;  %v5129_v23 = vshrl.u32 %v9155_v48, 16  ;;  %13522 = vst [vmem:[#allocation12_spill] sm:$0xff] %v12202_v63  ;;  %v13523_v48 = vpack.c.b16 %v12032_v42, %v12028_v46  ;;  %v12218_v29 = vunpack.c.l.b16 %v6488_v17  ;;  %v9157_v55 = vld [vmem:[#allocation2 + $0x88] sm:$0xf] }
 0x461   : > { %v5122_v14 = vor.u32 %v5121_v52, %v5118_v28  ;;  %v6513_v41 = vshrl.u32 %v9157_v55, 16  ;;  %v6505_v9 = vrot.slane %v6503_v2, 5  ;;  %vm13564_vm5 = vcmask 228352  }
 0x462   : > { %v5127_v44 = vrot.slane %v5125_v51, 5  ;;  %v5131_v6 = vrot.slane %v5129_v23, 4  ;;  %v6498_v51 = vsel %vm9481_vm14, %v6493_v19, %v6497_v0  ;;  %v6509_v23 = vshll.u32 %v9157_v55, 16  ;;  %vm13568_vm10 = vmmov %vm13564_vm5 }
 0x463   : > { %6955 = vrot.lane.b32.xlu2 %v13523_v48, %s9223_s24  ;;  %v12220_v37 = vunpack.c.l.b16 %v6498_v51  ;;  %v5123_v40 = vrot.slane %v5122_v14, 4  ;;  %v6519_v48 = vshll.u32 %v9158_v36, 16  ;;  %v6515_v19 = vrot.slane %v6513_v41, 4  ;;  %v5633_v14 = vld [vmem:[#allocation2 + $0x30] sm:$0xf]  ;;  %vm13571_vm13 = vmmov %vm13564_vm5 }
 0x464   : > { %6957 = vrot.lane.b32.xlu1 %v13524_v58, %s9223_s24  ;;  %v5132_v18 = vor.u32 %v5131_v6, %v5127_v44  ;;  %v5284_v58 = vshrl.u32 %v5037_v56, 16  ;;  %v6511_v26 = vrot.slane %v6509_v23, 5  ;;  %v6506_v17 = vor.u32 %v6505_v9, %v6502_v5 }
 0x465   : > { %v12222_v46 = vpop.permute.xlu2 %7293  ;;  %7061 = vrot.lane.b32.xlu0 %v12036_v4, %s9220_s21  ;;  %v5128_v52 = vsel %vm9481_vm14, %v5123_v40, %v5127_v44  ;;  %v6521_v6 = vrot.slane %v6519_v48, 5  ;;  %v9159_v4 = vld [vmem:[#allocation2 + $0x70] sm:$0xf]  ;;  %v5289_v5 = vrot.slane %v5287_v57, 5  ;;  %v9160_v40 = vld [vmem:[#allocation2 + $0x74] sm:$0x1]  ;;  %v13528_v56 = vpack.c.b16 %v12114_v25, %v12110_v33 }
 0x466   : > { %v12224_v42 = vpop.permute.xlu1 %7397  ;;  %v5133_v28 = vrot.slane %v5132_v18, 4  ;;  %v5286_v51 = vrot.slane %v5284_v58, 4  ;;  %v12234_v55 = vunpack.c.l.b16 %v5128_v52  ;;  %v6516_v36 = vor.u32 %v6515_v19, %v6511_v26 }
 0x467   : > { %13525 = vst [vmem:[#allocation13_spill] sm:$0xff] %v12224_v42  ;;  %v12236_v18 = vpop.permute.xlu0 %7411  ;;  %v6507_v41 = vrot.slane %v6506_v17, 4  ;;  %v5293_v0 = vshll.u32 %v9159_v4, 16  ;;  %v5297_v42 = vshrl.u32 %v9159_v4, 16  ;;  %v5303_v9 = vshll.u32 %v9160_v40, 16 }
 0x468   : > { %v5138_v2 = vsel %vm9481_vm14, %v5133_v28, %v5137_v35  ;;  %13526 = vst [vmem:[#allocation14_spill] sm:$0xff] %v12236_v18  ;;  %v6517_v44 = vrot.slane %v6516_v36, 4  ;;  %v5748_v48 = vshrl.u32 %v5633_v14, 16  ;;  %v13527_v35 = vpack.c.b16 %v12060_v59, %v12050_v30 }
 0x469   : > { %v12238_v23 = vunpack.c.l.b16 %v5138_v2  ;;  %v6512_v28 = vsel %vm9481_vm14, %v6507_v41, %v6511_v26  ;;  %v5295_v57 = vrot.slane %v5293_v0, 5  ;;  %v5299_v19 = vrot.slane %v5297_v42, 4  ;;  %v5039_v2 = vld [vmem:[#allocation2 + $0x78] sm:$0xf]  ;;  %v9161_v0 = vld [vmem:[#allocation2 + $0x34] sm:$0xf] }
 0x46a   : > { %v6522_v52 = vsel %vm9481_vm14, %v6517_v44, %v6521_v6  ;;  %v12254_v17 = vunpack.c.l.b16 %v6512_v28  ;;  %v5290_v30 = vor.u32 %v5289_v5, %v5286_v51  ;;  %v5305_v59 = vrot.slane %v5303_v9, 5 }
 0x46b   : > { %7211 = vrot.lane.b32.xlu2 %v13527_v35, %s9222_s23  ;;  %v12260_v25 = vunpack.c.l.b16 %v6522_v52  ;;  %v5300_v4 = vor.u32 %v5299_v19, %v5295_v57  ;;  %v5750_v40 = vrot.slane %v5748_v48, 4  ;;  %v5751_v35 = vshll.u32 %v5633_v14, 16  ;;  %v5645_v52 = vld [vmem:[#allocation2 + $0x78] sm:$0xf] }
 0x46c   : > { %7213 = vrot.lane.b32.xlu1 %v13528_v56, %s9222_s23  ;;  %v5291_v26 = vrot.slane %v5290_v30, 4  ;;  %v5757_v42 = vshll.u32 %v9161_v0, 16  ;;  %v5761_v41 = vshrl.u32 %v9161_v0, 16  ;;  %v9162_v56 = vld [vmem:[#allocation2 + $0x38] sm:$0x1]  ;;  %v5308_v9 = vshrl.u32 %v5039_v2, 16 }
 0x46d   : > { %v12256_v36 = vpop.permute.xlu2 %7549  ;;  %v5767_v6 = vshll.u32 %v9162_v56, 16  ;;  %7317 = vrot.lane.b32.xlu0 %v12078_v43, %s9219_s20  ;;  %v5301_v44 = vrot.slane %v5300_v4, 4  ;;  %v5753_v5 = vrot.slane %v5751_v35, 5  ;;  %v5311_v35 = vshll.u32 %v5039_v2, 16 }
 0x46e   : > { %v12258_v33 = vpop.permute.xlu1 %7157  ;;  %v5296_v28 = vsel %vm9481_vm14, %v5291_v26, %v5295_v57  ;;  %v5759_v48 = vrot.slane %v5757_v42, 5  ;;  %v5763_v14 = vrot.slane %v5761_v41, 4  ;;  %v5310_v58 = vrot.slane %v5308_v9, 4 }
 0x46f   : > { %13529 = vst [vmem:[#allocation15_spill] sm:$0xff] %v12258_v33  ;;  %v5769_v19 = vrot.slane %v5767_v6, 5  ;;  %v12268_v30 = vpop.permute.xlu0 %7035  ;;  %v5306_v0 = vsel %vm9481_vm14, %v5301_v44, %v5305_v59  ;;  %v12272_v56 = vunpack.c.l.b16 %v5296_v28  ;;  %v5754_v43 = vor.u32 %v5753_v5, %v5750_v40  ;;  %v9163_v33 = vld [vmem:[#allocation2 + $0x7c] sm:$0xf]  ;;  %v9164_v40 = vld [vmem:[#allocation2 + $0x80] sm:$0x1] }
 0x470   : > { %v12274_v51 = vunpack.c.l.b16 %v5306_v0  ;;  %v5764_v4 = vor.u32 %v5763_v14, %v5759_v48  ;;  %v5317_v18 = vshll.u32 %v9163_v33, 16  ;;  %v13530_v57 = vpack.c.b16 %v12100_v47, %v12092_v49 }
 0x471   : > { %v13531_v26 = vpack.c.b16 %v12166_v24, %v12158_v12  ;;  %v5755_v59 = vrot.slane %v5754_v43, 4  ;;  %v5321_v42 = vshrl.u32 %v9163_v33, 16  ;;  %v5327_v41 = vshll.u32 %v9164_v40, 16  ;;  %v6241_v33 = vld [vmem:[#allocation2 + $0x3c] sm:$0xf] }
 0x472   : > { %v5892_v6 = vshrl.u32 %v5645_v52, 16  ;;  %v5765_v44 = vrot.slane %v5764_v4, 4  ;;  %v5313_v5 = vrot.slane %v5311_v35, 5  ;;  %v5319_v9 = vrot.slane %v5317_v18, 5 }
 0x473   : > { %7467 = vrot.lane.b32.xlu2 %v13530_v57, %s9224_s25  ;;  %v5760_v47 = vsel %vm9481_vm14, %v5755_v59, %v5759_v48  ;;  %v5323_v12 = vrot.slane %v5321_v42, 4  ;;  %v5329_v24 = vrot.slane %v5327_v41, 5  ;;  %v5895_v4 = vshll.u32 %v5645_v52, 16  ;;  %v9165_v48 = vld [vmem:[#allocation2 + $0x7c] sm:$0xf] }
 0x474   : > { %7469 = vrot.lane.b32.xlu1 %v13531_v26, %s9224_s25  ;;  %v5894_v14 = vrot.slane %v5892_v6, 4  ;;  %v5770_v0 = vsel %vm9481_vm14, %v5765_v44, %v5769_v19  ;;  %v12294_v43 = vunpack.c.l.b16 %v5760_v47  ;;  %v5314_v57 = vor.u32 %v5313_v5, %v5310_v58  ;;  %v9166_v6 = vld [vmem:[#allocation2 + $0x80] sm:$0x1] }
 0x475   : > { %v12286_v28 = vpop.permute.xlu2 %7039  ;;  %v13533_v18 = vpack.c.b16 %v12132_v20, %v12122_v8  ;;  %v12300_v35 = vunpack.c.l.b16 %v5770_v0  ;;  %v5324_v26 = vor.u32 %v5323_v12, %v5319_v9  ;;  %v5901_v59 = vshll.u32 %v9165_v48, 16 }
 0x476   : > { %v12288_v49 = vpop.permute.xlu1 %7413  ;;  %v5905_v42 = vshrl.u32 %v9165_v48, 16  ;;  %v5315_v40 = vrot.slane %v5314_v57, 4  ;;  %v5897_v41 = vrot.slane %v5895_v4, 5  ;;  %v5911_v2 = vshll.u32 %v9166_v6, 16 }
 0x477   : > { %13532 = vst [vmem:[#allocation16_spill] sm:$0xff] %v12288_v49  ;;  %6971 = vrot.lane.b32.xlu0 %v13533_v18, %s9223_s24  ;;  %v6356_v19 = vshrl.u32 %v6241_v33, 16  ;;  %v12302_v44 = vpop.permute.xlu0 %7291  ;;  %v5325_v52 = vrot.slane %v5324_v26, 4  ;;  %v5903_v5 = vrot.slane %v5901_v59, 5  ;;  %v5647_v18 = vld [vmem:[#allocation2 + $0x84] sm:$0xf]  ;;  %v13534_v57 = vpack.c.b16 %v12148_v1, %v12146_v13 }
 0x478   : > { %v5907_v8 = vrot.slane %v5905_v42, 4  ;;  %v5320_v20 = vsel %vm9481_vm14, %v5315_v40, %v5319_v9  ;;  %v5898_v47 = vor.u32 %v5897_v41, %v5894_v14  ;;  %v5913_v12 = vrot.slane %v5911_v2, 5  ;;  %v9167_v42 = vld [vmem:[#allocation2 + $0x40] sm:$0xf] }
 0x479   : > { %v6358_v0 = vrot.slane %v6356_v19, 4  ;;  %v13535_v4 = vpack.c.b16 %v12220_v37, %v12218_v29  ;;  %v5330_v26 = vsel %vm9481_vm14, %v5325_v52, %v5329_v24  ;;  %v12318_v48 = vunpack.c.l.b16 %v5320_v20  ;;  %v9168_v37 = vld [vmem:[#allocation2 + $0x44] sm:$0x1] }
 0x47a   : > { %v5908_v9 = vor.u32 %v5907_v8, %v5903_v5  ;;  %v6359_v14 = vshll.u32 %v6241_v33, 16  ;;  %v12320_v2 = vunpack.c.l.b16 %v5330_v26  ;;  %v5899_v59 = vrot.slane %v5898_v47, 4 }
 0x47b   : > { %7215 = vrot.lane.b32.xlu2 %v13534_v57, %s9222_s23  ;;  %v6365_v40 = vshll.u32 %v9167_v42, 16  ;;  %v6369_v41 = vshrl.u32 %v9167_v42, 16  ;;  %v6375_v19 = vshll.u32 %v9168_v37, 16  ;;  %v5916_v57 = vshrl.u32 %v5647_v18, 16 }
 0x47c   : > { %7483 = vrot.lane.b32.xlu1 %v13535_v4, %s9224_s25  ;;  %v5909_v6 = vrot.slane %v5908_v9, 4  ;;  %v6361_v29 = vrot.slane %v6359_v14, 5  ;;  %v5904_v33 = vsel %vm9481_vm14, %v5899_v59, %v5903_v5  ;;  %v13536_v20 = vpack.c.b16 %v12184_v50, %v12176_v11  ;;  %v5025_v14 = vld [vmem:[#allocation2 + $0x24] sm:$0xf]  ;;  %v9170_v11 = vld [vmem:[#allocation2 + $0x8c] sm:$0x1] }
 0x47d   : > { %v12322_v13 = vpop.permute.xlu2 %7053  ;;  %v6367_v52 = vrot.slane %v6365_v40, 5  ;;  %v6371_v8 = vrot.slane %v6369_v41, 4  ;;  %v12336_v4 = vunpack.c.l.b16 %v5904_v33  ;;  %v6377_v9 = vrot.slane %v6375_v19, 5  ;;  %v9169_v40 = vld [vmem:[#allocation2 + $0x88] sm:$0xf] }
 0x47e   : > { %v12324_v1 = vpop.permute.xlu1 %7051  ;;  %v5914_v47 = vsel %vm9481_vm14, %v5909_v6, %v5913_v12  ;;  %v6362_v26 = vor.u32 %v6361_v29, %v6358_v0  ;;  %v5918_v24 = vrot.slane %v5916_v57, 4  ;;  %v5919_v58 = vshll.u32 %v5647_v18, 16 }
 0x47f   : > { %7227 = vrot.lane.b32.xlu0 %v13536_v20, %s9222_s23  ;;  %v7182_v42 = vunpack.c.l.b16 %v5914_v47  ;;  %v6372_v37 = vor.u32 %v6371_v8, %v6367_v52  ;;  %v12338_v5 = vpop.permute.xlu0 %7547  ;;  %v5925_v41 = vshll.u32 %v9169_v40, 16  ;;  %v5929_v49 = vshrl.u32 %v9169_v40, 16  ;;  %v6255_v47 = vld [vmem:[#allocation2 + $0x90] sm:$0xf] }
 0x480   : > { %v6363_v59 = vrot.slane %v6362_v26, 4  ;;  %v5935_v50 = vshll.u32 %v9170_v11, 16  ;;  %v5921_v6 = vrot.slane %v5919_v58, 5  ;;  %v5140_v33 = vshrl.u32 %v5025_v14, 16 }
 0x481   : > { %v7204_v20 = vpack.c.b16 %v7182_v42, %v12336_v4  ;;  %v6373_v12 = vrot.slane %v6372_v37, 4  ;;  %v13537_v0 = vpack.c.b16 %v12200_v21, %v12196_v7  ;;  %v13538_v18 = vpack.c.b16 %v12274_v51, %v12272_v56 }
 0x482   : > { %v6368_v29 = vsel %vm9481_vm14, %v6363_v59, %v6367_v52  ;;  %v5927_v19 = vrot.slane %v5925_v41, 5  ;;  %v5931_v57 = vrot.slane %v5929_v49, 4  ;;  %v5937_v8 = vrot.slane %v5935_v50, 5  ;;  %v9171_v52 = vld [vmem:[#allocation2 + $0x28] sm:$0xf] }
 0x483   : > { %7471 = vrot.lane.b32.xlu2 %v13537_v0, %s9224_s25  ;;  %v6378_v58 = vsel %vm9481_vm14, %v6373_v12, %v6377_v9  ;;  %v12353_v4 = vunpack.c.l.b16 %v6368_v29  ;;  %v5922_v26 = vor.u32 %v5921_v6, %v5918_v24  ;;  %v5142_v7 = vrot.slane %v5140_v33, 4  ;;  %v9172_v41 = vld [vmem:[#allocation2 + $0x2c] sm:$0x1] }
 0x484   : > { %6973 = vrot.lane.b32.xlu1 %v13538_v18, %s9223_s24  ;;  %v12359_v51 = vunpack.c.l.b16 %v6378_v58  ;;  %v5932_v56 = vor.u32 %v5931_v57, %v5927_v19  ;;  %v5143_v37 = vshll.u32 %v5025_v14, 16  ;;  %v5149_v59 = vshll.u32 %v9171_v52, 16  ;;  %v5027_v57 = vld [vmem:[#allocation2 + $0x30] sm:$0xf] }
 0x485   : > { %v12355_v21 = vpop.permute.xlu2 %7309  ;;  %v5923_v49 = vrot.slane %v5922_v26, 4  ;;  %v5153_v40 = vshrl.u32 %v9171_v52, 16  ;;  %v5159_v11 = vshll.u32 %v9172_v41, 16  ;;  %v6524_v50 = vshrl.u32 %v6255_v47, 16 }
 0x486   : > { %v12357_v42 = vpop.permute.xlu1 %7307  ;;  %v13539_v24 = vpack.c.b16 %v12238_v23, %v12234_v55  ;;  %v5933_v12 = vrot.slane %v5932_v56, 4  ;;  %v5145_v6 = vrot.slane %v5143_v37, 5  ;;  %v5151_v33 = vrot.slane %v5149_v59, 5  ;;  %v9173_v37 = vld [vmem:[#allocation2 + $0x94] sm:$0xf] }
 0x487   : > { %v5928_v14 = vsel %vm9481_vm14, %v5923_v49, %v5927_v19  ;;  %v5155_v0 = vrot.slane %v5153_v40, 4  ;;  %v5161_v18 = vrot.slane %v5159_v11, 5  ;;  %v6526_v29 = vrot.slane %v6524_v50, 4  ;;  %v12369_v58 = vpop.permute.xlu0 %7563 }
 0x488   : > { %6959 = vrot.lane.b32.xlu0 %v13539_v24, %s9223_s24  ;;  %v5938_v26 = vsel %vm9481_vm14, %v5933_v12, %v5937_v8  ;;  %v12373_v55 = vunpack.c.l.b16 %v5928_v14  ;;  %v5146_v23 = vor.u32 %v5145_v6, %v5142_v7  ;;  %v6527_v52 = vshll.u32 %v6255_v47, 16  ;;  %v9174_v8 = vld [vmem:[#allocation2 + $0x98] sm:$0x1]  ;;  %v9175_v47 = vld [vmem:[#allocation2 + $0x34] sm:$0xf] }
 0x489   : > { %v12375_v41 = vunpack.c.l.b16 %v5938_v26  ;;  %v5156_v56 = vor.u32 %v5155_v0, %v5151_v33  ;;  %v6533_v59 = vshll.u32 %v9173_v37, 16  ;;  %v6537_v24 = vshrl.u32 %v9173_v37, 16 }
 0x48a   : > { %v13540_v19 = vpack.c.b16 %v12260_v25, %v12254_v17  ;;  %v5147_v49 = vrot.slane %v5146_v23, 4  ;;  %v6529_v40 = vrot.slane %v6527_v52, 5  ;;  %v6543_v11 = vshll.u32 %v9174_v8, 16  ;;  %v5635_v23 = vld [vmem:[#allocation2 + $0x3c] sm:$0xf] }
 0x48b   : > { %v5164_v50 = vshrl.u32 %v5027_v57, 16  ;;  %v5157_v7 = vrot.slane %v5156_v56, 4  ;;  %v6535_v12 = vrot.slane %v6533_v59, 5  ;;  %v6539_v6 = vrot.slane %v6537_v24, 4 }
 0x48c   : > { %7485 = vrot.lane.b32.xlu2 %v13540_v19, %s9224_s25  ;;  %7229 = vrot.lane.b32.xlu1 %v7204_v20, %s9222_s23  ;;  %v5152_v17 = vsel %vm9481_vm14, %v5147_v49, %v5151_v33  ;;  %v6530_v25 = vor.u32 %v6529_v40, %v6526_v29  ;;  %v6545_v20 = vrot.slane %v6543_v11, 5  ;;  %v5167_v8 = vshll.u32 %v5027_v57, 16  ;;  %v9176_v40 = vld [vmem:[#allocation2 + $0x38] sm:$0x1] }
 0x48d   : > { %v12384_v14 = vpop.permute.xlu2 %7567  ;;  %v5166_v26 = vrot.slane %v5164_v50, 4  ;;  %v5162_v52 = vsel %vm9481_vm14, %v5157_v7, %v5161_v18  ;;  %v6913_v37 = vunpack.c.l.b16 %v5152_v17  ;;  %v6540_v19 = vor.u32 %v6539_v6, %v6535_v12 }
 0x48e   : > { %13541 = vst [vmem:[#allocation17_spill] sm:$0xff] %v12384_v14  ;;  %v12386_v0 = vpop.permute.xlu1 %7565  ;;  %v13542_v56 = vpack.c.b16 %v12300_v35, %v12294_v43  ;;  %v6914_v59 = vunpack.c.l.b16 %v5162_v52  ;;  %v6531_v24 = vrot.slane %v6530_v25, 4  ;;  %v5173_v9 = vshll.u32 %v9175_v47, 16  ;;  %v5041_v25 = vld [vmem:[#allocation2 + $0x84] sm:$0xf] }
 0x48f   : > { %v5177_v33 = vshrl.u32 %v9175_v47, 16  ;;  %v6541_v29 = vrot.slane %v6540_v19, 4  ;;  %v5169_v49 = vrot.slane %v5167_v8, 5  ;;  %v5183_v11 = vshll.u32 %v9176_v40, 16  ;;  %v12396_v63 = vpop.permute.xlu0 %7295 }
 0x490   : > { %7217 = vrot.lane.b32.xlu0 %v13542_v56, %s9222_s23  ;;  %v5772_v50 = vshrl.u32 %v5635_v23, 16  ;;  %v6942_v18 = vpack.c.b16 %v6914_v59, %v6913_v37  ;;  %v6536_v57 = vsel %vm9481_vm14, %v6531_v24, %v6535_v12  ;;  %v5175_v7 = vrot.slane %v5173_v9, 5  ;;  %v9177_v56 = vld [vmem:[#allocation2 + $0x40] sm:$0xf]  ;;  %v9178_v24 = vld [vmem:[#allocation2 + $0x44] sm:$0x1] }
 0x491   : > { %v5179_v6 = vrot.slane %v5177_v33, 4  ;;  %v6546_v43 = vsel %vm9481_vm14, %v6541_v29, %v6545_v20  ;;  %v12402_v35 = vunpack.c.l.b16 %v6536_v57  ;;  %v5170_v17 = vor.u32 %v5169_v49, %v5166_v26  ;;  %v5637_v57 = vld [vmem:[#allocation2 + $0x48] sm:$0xf] }
 0x492   : > { %v5185_v47 = vrot.slane %v5183_v11, 5  ;;  %v13543_v52 = vpack.c.b16 %v12320_v2, %v12318_v48  ;;  %v12409_v37 = vunpack.c.l.b16 %v6546_v43  ;;  %v5774_v9 = vrot.slane %v5772_v50, 4 }
 0x493   : > { %v5180_v12 = vor.u32 %v5179_v6, %v5175_v7  ;;  %v5775_v19 = vshll.u32 %v5635_v23, 16  ;;  %v5171_v8 = vrot.slane %v5170_v17, 4  ;;  %v5781_v20 = vshll.u32 %v9177_v56, 16 }
 0x494   : > { %6975 = vrot.lane.b32.xlu2 %v13543_v52, %s9223_s24  ;;  %6961 = vrot.lane.b32.xlu1 %v6942_v18, %s9223_s24  ;;  %v5785_v59 = vshrl.u32 %v9177_v56, 16  ;;  %v5791_v26 = vshll.u32 %v9178_v24, 16  ;;  %v7461_v48 = vpack.c.b16 %v12409_v37, %v12402_v35  ;;  %v5332_v40 = vshrl.u32 %v5041_v25, 16  ;;  %v9179_v56 = vld [vmem:[#allocation2 + $0x88] sm:$0xf] }
 0x495   : > { %v12411_v33 = vpop.permute.xlu2 %7299  ;;  %v5181_v2 = vrot.slane %v5180_v12, 4  ;;  %v5777_v49 = vrot.slane %v5775_v19, 5  ;;  %v5176_v11 = vsel %vm9481_vm14, %v5171_v8, %v5175_v7  ;;  %v5783_v23 = vrot.slane %v5781_v20, 5  ;;  %v9180_v24 = vld [vmem:[#allocation2 + $0x8c] sm:$0x1] }
 0x496   : > { %13544 = vst [vmem:[#allocation18_spill] sm:$0xff] %v12411_v33  ;;  %v12413_v29 = vpop.permute.xlu1 %7297  ;;  %v5787_v50 = vrot.slane %v5785_v59, 4  ;;  %v5793_v18 = vrot.slane %v5791_v26, 5  ;;  %v13545_v6 = vpack.c.b16 %v12359_v51, %v12353_v4  ;;  %v6915_v17 = vunpack.c.l.b16 %v5176_v11 }
 0x497   : > { %v5186_v43 = vsel %vm9481_vm14, %v5181_v2, %v5185_v47  ;;  %v5778_v35 = vor.u32 %v5777_v49, %v5774_v9  ;;  %v5334_v52 = vrot.slane %v5332_v40, 4  ;;  %v5335_v19 = vshll.u32 %v5041_v25, 16  ;;  %v12425_v8 = vpop.permute.xlu0 %7551  ;;  %v6243_v40 = vld [vmem:[#allocation2 + $0x48] sm:$0xf] }
 0x498   : > { %7473 = vrot.lane.b32.xlu0 %v13545_v6, %s9224_s25  ;;  %v6916_v37 = vunpack.c.l.b16 %v5186_v43  ;;  %v5788_v12 = vor.u32 %v5787_v50, %v5783_v23  ;;  %v5341_v7 = vshll.u32 %v9179_v56, 16  ;;  %v5345_v59 = vshrl.u32 %v9179_v56, 16 }
 0x499   : > { %v5779_v20 = vrot.slane %v5778_v35, 4  ;;  %v5351_v26 = vshll.u32 %v9180_v24, 16  ;;  %v5796_v33 = vshrl.u32 %v5637_v57, 16  ;;  %v5337_v6 = vrot.slane %v5335_v19, 5 }
 0x49a   : > { %v6943_v4 = vpack.c.b16 %v6916_v37, %v6915_v17  ;;  %v5789_v51 = vrot.slane %v5788_v12, 4  ;;  %v5343_v14 = vrot.slane %v5341_v7, 5  ;;  %v13546_v47 = vpack.c.b16 %v12375_v41, %v12373_v55  ;;  %v9181_v41 = vld [vmem:[#allocation2 + $0x4c] sm:$0xf] }
 0x49b   : > { %v5784_v25 = vsel %vm9481_vm14, %v5779_v20, %v5783_v23  ;;  %v5347_v9 = vrot.slane %v5345_v59, 4  ;;  %v5353_v2 = vrot.slane %v5351_v26, 5  ;;  %v5798_v49 = vrot.slane %v5796_v33, 4  ;;  %v9182_v20 = vld [vmem:[#allocation2 + $0x50] sm:$0x1] }
 0x49c   : > { %7231 = vrot.lane.b32.xlu2 %v13546_v47, %s9222_s23  ;;  %v5794_v11 = vsel %vm9481_vm14, %v5789_v51, %v5793_v18  ;;  %v7171_v50 = vunpack.c.l.b16 %v5784_v25  ;;  %v5338_v43 = vor.u32 %v5337_v6, %v5334_v52  ;;  %v5799_v17 = vshll.u32 %v5637_v57, 16  ;;  %v5649_v25 = vld [vmem:[#allocation2 + $0x90] sm:$0xf] }
 0x49d   : > { %v12435_v35 = vpop.permute.xlu2 %7555  ;;  %v7172_v37 = vunpack.c.l.b16 %v5794_v11  ;;  %v5348_v55 = vor.u32 %v5347_v9, %v5343_v14  ;;  %v5805_v19 = vshll.u32 %v9181_v41, 16  ;;  %v5809_v56 = vshrl.u32 %v9181_v41, 16 }
 0x49e   : > { %13547 = vst [vmem:[#allocation19_spill] sm:$0xff] %v12435_v35  ;;  %v12437_v12 = vpop.permute.xlu1 %7553  ;;  %v5339_v23 = vrot.slane %v5338_v43, 4  ;;  %v5801_v7 = vrot.slane %v5799_v17, 5  ;;  %v5815_v33 = vshll.u32 %v9182_v20, 16  ;;  %v6380_v59 = vshrl.u32 %v6243_v40, 16 }
 0x49f   : > { %13548 = vst [vmem:[#allocation20_spill] sm:$0xff] %v12437_v12  ;;  %v7199_v18 = vpack.c.b16 %v7172_v37, %v7171_v50  ;;  %v5349_v24 = vrot.slane %v5348_v55, 4  ;;  %v5807_v52 = vrot.slane %v5805_v19, 5  ;;  %v5811_v57 = vrot.slane %v5809_v56, 4  ;;  %v12443_v9 = vpop.permute.xlu0 %7041  ;;  %v9183_v55 = vld [vmem:[#allocation2 + $0x4c] sm:$0xf] }
 0x4a0   : > { %7487 = vrot.lane.b32.xlu0 %v7461_v48, %s9224_s25  ;;  %v5344_v26 = vsel %vm9481_vm14, %v5339_v23, %v5343_v14  ;;  %v5802_v51 = vor.u32 %v5801_v7, %v5798_v49  ;;  %v5817_v6 = vrot.slane %v5815_v33, 5  ;;  %v6382_v47 = vrot.slane %v6380_v59, 4  ;;  %v9184_v56 = vld [vmem:[#allocation2 + $0x50] sm:$0x1]  ;;  %v9188_v35 = vld [vmem:[#allocation2 + $0x5c] sm:$0x1] }
 0x4a1   : > { %7219 = vrot.lane.b32.xlu1 %v7199_v18, %s9222_s23  ;;  %v5354_v11 = vsel %vm9481_vm14, %v5349_v24, %v5353_v2  ;;  %v6929_v43 = vunpack.c.l.b16 %v5344_v26  ;;  %v5812_v48 = vor.u32 %v5811_v57, %v5807_v52  ;;  %v6383_v50 = vshll.u32 %v6243_v40, 16 }
 0x4a2   : > { %v6930_v17 = vunpack.c.l.b16 %v5354_v11  ;;  %v5803_v37 = vrot.slane %v5802_v51, 4  ;;  %v6389_v41 = vshll.u32 %v9183_v55, 16  ;;  %v6393_v19 = vshrl.u32 %v9183_v55, 16  ;;  %v6245_v51 = vld [vmem:[#allocation2 + $0x54] sm:$0xf] }
 0x4a3   : > { %v5813_v14 = vrot.slane %v5812_v48, 4  ;;  %v6385_v49 = vrot.slane %v6383_v50, 5  ;;  %v6399_v23 = vshll.u32 %v9184_v56, 16  ;;  %v5940_v7 = vshrl.u32 %v5649_v25, 16 }
 0x4a4   : > { %6963 = vrot.lane.b32.xlu2 %v6943_v4, %s9223_s24  ;;  %v6950_v20 = vpack.c.b16 %v6930_v17, %v6929_v43  ;;  %v5808_v33 = vsel %vm9481_vm14, %v5803_v37, %v5807_v52  ;;  %v6391_v2 = vrot.slane %v6389_v41, 5  ;;  %v6395_v59 = vrot.slane %v6393_v19, 4  ;;  %v9185_v17 = vld [vmem:[#allocation2 + $0x94] sm:$0xf]  ;;  %v9186_v41 = vld [vmem:[#allocation2 + $0x98] sm:$0x1] }
 0x4a5   : > { %v12450_v18 = vpop.permute.xlu2 %7045  ;;  %v5818_v40 = vsel %vm9481_vm14, %v5813_v14, %v5817_v6  ;;  %v7173_v24 = vunpack.c.l.b16 %v5808_v33  ;;  %v6386_v57 = vor.u32 %v6385_v49, %v6382_v47  ;;  %v6401_v26 = vrot.slane %v6399_v23, 5 }
 0x4a6   : > { %13549 = vst [vmem:[#allocation21_spill] sm:$0xff] %v12450_v18  ;;  %v12454_v4 = vpop.permute.xlu1 %7043  ;;  %v7174_v11 = vunpack.c.l.b16 %v5818_v40  ;;  %v6396_v48 = vor.u32 %v6395_v59, %v6391_v2  ;;  %v5942_v50 = vrot.slane %v5940_v7, 4  ;;  %v5943_v43 = vshll.u32 %v5649_v25, 16  ;;  %v6257_v59 = vld [vmem:[#allocation2 + $0x9c] sm:$0xf] }
 0x4a7   : > { %13550 = vst [vmem:[#allocation22_spill] sm:$0xff] %v12454_v4  ;;  %v6387_v52 = vrot.slane %v6386_v57, 4  ;;  %v5949_v37 = vshll.u32 %v9185_v17, 16  ;;  %v5953_v55 = vshrl.u32 %v9185_v17, 16  ;;  %v5959_v19 = vshll.u32 %v9186_v41, 16  ;;  %v12459_v23 = vpop.permute.xlu0 %7055 }
 0x4a8   : > { %6977 = vrot.lane.b32.xlu0 %v6950_v20, %s9223_s24  ;;  %v7200_v56 = vpack.c.b16 %v7174_v11, %v7173_v24  ;;  %v6397_v6 = vrot.slane %v6396_v48, 4  ;;  %v5945_v14 = vrot.slane %v5943_v43, 5  ;;  %v6404_v47 = vshrl.u32 %v6245_v51, 16  ;;  %v9187_v43 = vld [vmem:[#allocation2 + $0x58] sm:$0xf] }
 0x4a9   : > { %v6392_v49 = vsel %vm9481_vm14, %v6387_v52, %v6391_v2  ;;  %v5951_v33 = vrot.slane %v5949_v37, 5  ;;  %v5955_v7 = vrot.slane %v5953_v55, 4  ;;  %v5961_v25 = vrot.slane %v5959_v19, 5 }
 0x4aa   : > { %v6402_v20 = vsel %vm9481_vm14, %v6397_v6, %v6401_v26  ;;  %v7427_v40 = vunpack.c.l.b16 %v6392_v49  ;;  %v5946_v57 = vor.u32 %v5945_v14, %v5942_v50  ;;  %v6406_v17 = vrot.slane %v6404_v47, 4  ;;  %v5029_v49 = vld [vmem:[#allocation2 + $0x3c] sm:$0xf] }
 0x4ab   : > { %v7428_v24 = vunpack.c.l.b16 %v6402_v20  ;;  %v5956_v11 = vor.u32 %v5955_v7, %v5951_v33  ;;  %v6407_v48 = vshll.u32 %v6245_v51, 16  ;;  %v6413_v41 = vshll.u32 %v9187_v43, 16 }
 0x4ac   : > { %7221 = vrot.lane.b32.xlu2 %v7200_v56, %s9222_s23  ;;  %v5947_v2 = vrot.slane %v5946_v57, 4  ;;  %v6417_v52 = vshrl.u32 %v9187_v43, 16  ;;  %v6423_v37 = vshll.u32 %v9188_v35, 16  ;;  %v6548_v55 = vshrl.u32 %v6257_v59, 16 }
 0x4ad   : > { %v7455_v19 = vpack.c.b16 %v7428_v24, %v7427_v40  ;;  %v12464_v18 = vpop.permute.xlu2 %7059  ;;  %v5957_v4 = vrot.slane %v5956_v11, 4  ;;  %v6409_v26 = vrot.slane %v6407_v48, 5  ;;  %v6415_v6 = vrot.slane %v6413_v41, 5  ;;  %v9189_v11 = vld [vmem:[#allocation2 + $0xa0] sm:$0xf] }
 0x4ae   : > { %13551 = vst [vmem:[#allocation23_spill] sm:$0xff] %v12464_v18  ;;  %v12466_v50 = vpop.permute.xlu1 %7057  ;;  %v5952_v56 = vsel %vm9481_vm14, %v5947_v2, %v5951_v33  ;;  %v6419_v14 = vrot.slane %v6417_v52, 4  ;;  %v6425_v51 = vrot.slane %v6423_v37, 5  ;;  %v6550_v47 = vrot.slane %v6548_v55, 4  ;;  %v9190_v33 = vld [vmem:[#allocation2 + $0xa4] sm:$0x1] }
 0x4af   : > { %13552 = vst [vmem:[#allocation24_spill] sm:$0xff] %v12466_v50  ;;  %7475 = vrot.lane.b32.xlu1 %v7455_v19, %s9224_s25  ;;  %v5962_v35 = vsel %vm9481_vm14, %v5957_v4, %v5961_v25  ;;  %v7185_v7 = vunpack.c.l.b16 %v5952_v56  ;;  %v6410_v20 = vor.u32 %v6409_v26, %v6406_v17  ;;  %v6551_v40 = vshll.u32 %v6257_v59, 16  ;;  %v12473_v52 = vpop.permute.xlu0 %7311  ;;  %v6259_v26 = vld [vmem:[#allocation2 + $0xa8] sm:$0xf] }
 0x4b0   : > { %v7186_v57 = vunpack.c.l.b16 %v5962_v35  ;;  %v6420_v24 = vor.u32 %v6419_v14, %v6415_v6  ;;  %v6557_v48 = vshll.u32 %v9189_v11, 16  ;;  %v6561_v43 = vshrl.u32 %v9189_v11, 16 }
 0x4b1   : > { %v6411_v41 = vrot.slane %v6410_v20, 4  ;;  %v6553_v18 = vrot.slane %v6551_v40, 5  ;;  %v6567_v2 = vshll.u32 %v9190_v33, 16  ;;  %v5188_v37 = vshrl.u32 %v5029_v49, 16 }
 0x4b2   : > { %v7206_v55 = vpack.c.b16 %v7186_v57, %v7185_v7  ;;  %v6421_v19 = vrot.slane %v6420_v24, 4  ;;  %v6559_v50 = vrot.slane %v6557_v48, 5  ;;  %v6563_v12 = vrot.slane %v6561_v43, 4  ;;  %v9191_v24 = vld [vmem:[#allocation2 + $0x40] sm:$0xf] }
 0x4b3   : > { %v6416_v4 = vsel %vm9481_vm14, %v6411_v41, %v6415_v6  ;;  %v6554_v25 = vor.u32 %v6553_v18, %v6550_v47  ;;  %v6569_v59 = vrot.slane %v6567_v2, 5  ;;  %v5190_v17 = vrot.slane %v5188_v37, 4  ;;  %v9192_v47 = vld [vmem:[#allocation2 + $0x44] sm:$0x1] }
 0x4b4   : > { %7233 = vrot.lane.b32.xlu0 %v7206_v55, %s9222_s23  ;;  %v6426_v56 = vsel %vm9481_vm14, %v6421_v19, %v6425_v51  ;;  %v7429_v14 = vunpack.c.l.b16 %v6416_v4  ;;  %v6564_v35 = vor.u32 %v6563_v12, %v6559_v50  ;;  %v5191_v20 = vshll.u32 %v5029_v49, 16 }
 0x4b5   : > { %v7430_v40 = vunpack.c.l.b16 %v6426_v56  ;;  %v6555_v7 = vrot.slane %v6554_v25, 4  ;;  %v12480_v57 = vpop.permute.xlu2 %7315  ;;  %v5197_v11 = vshll.u32 %v9191_v24, 16  ;;  %v5201_v48 = vshrl.u32 %v9191_v24, 16  ;;  %v5043_v25 = vld [vmem:[#allocation2 + $0x90] sm:$0xf] }
 0x4b6   : > { %13553 = vst [vmem:[#allocation25_spill] sm:$0xff] %v12480_v57  ;;  %v6565_v6 = vrot.slane %v6564_v35, 4  ;;  %v5193_v18 = vrot.slane %v5191_v20, 5  ;;  %v5207_v43 = vshll.u32 %v9192_v47, 16  ;;  %v6572_v41 = vshrl.u32 %v6259_v26, 16  ;;  %v12484_v12 = vpop.permute.xlu1 %7313 }
 0x4b7   : > { %v7456_v33 = vpack.c.b16 %v7430_v40, %v7429_v14  ;;  %v6560_v2 = vsel %vm9481_vm14, %v6555_v7, %v6559_v50  ;;  %v5199_v51 = vrot.slane %v5197_v11, 5  ;;  %v5203_v37 = vrot.slane %v5201_v48, 4  ;;  %13554 = vst [vmem:[#allocation26_spill] sm:$0xff] %v12484_v12  ;;  %v12489_v40 = vpop.permute.xlu0 %7569  ;;  %v9193_v7 = vld [vmem:[#allocation2 + $0xac] sm:$0xf] }
 0x4b8   : > { %v6570_v49 = vsel %vm9481_vm14, %v6565_v6, %v6569_v59  ;;  %v7441_v55 = vunpack.c.l.b16 %v6560_v2  ;;  %v5194_v19 = vor.u32 %v5193_v18, %v5190_v17  ;;  %v5209_v4 = vrot.slane %v5207_v43, 5  ;;  %13555 = vst [vmem:[#allocation27_spill] sm:$0xff] %v12489_v40  ;;  %v9194_v48 = vld [vmem:[#allocation2 + $0xb0] sm:$0x1] }
 0x4b9   : > { %7477 = vrot.lane.b32.xlu2 %v7456_v33, %s9224_s25  ;;  %v7442_v56 = vunpack.c.l.b16 %v6570_v49  ;;  %v5204_v35 = vor.u32 %v5203_v37, %v5199_v51  ;;  %v6574_v20 = vrot.slane %v6572_v41, 4  ;;  %v6575_v14 = vshll.u32 %v6259_v26, 16 }
 0x4ba   : > { %v5195_v50 = vrot.slane %v5194_v19, 4  ;;  %v6581_v24 = vshll.u32 %v9193_v7, 16  ;;  %v6585_v11 = vshrl.u32 %v9193_v7, 16  ;;  %v6591_v47 = vshll.u32 %v9194_v48, 16  ;;  %v9056_v19 = vld [vmem:[#allocation2] sm:$0xff] }
 0x4bb   : > { %v7462_v57 = vpack.c.b16 %v7442_v56, %v7441_v55  ;;  %v5205_v59 = vrot.slane %v5204_v35, 4  ;;  %v6577_v6 = vrot.slane %v6575_v14, 5  ;;  %v5356_v17 = vshrl.u32 %v5043_v25, 16  ;;  %v9195_v14 = vld [vmem:[#allocation2 + $0x94] sm:$0xf] }
 0x4bc   : > { %v5200_v18 = vsel %vm9481_vm14, %v5195_v50, %v5199_v51  ;;  %v6583_v43 = vrot.slane %v6581_v24, 5  ;;  %v6587_v33 = vrot.slane %v6585_v11, 4  ;;  %v6593_v2 = vrot.slane %v6591_v47, 5  ;;  %v9196_v50 = vld [vmem:[#allocation2 + $0x98] sm:$0x1] }
 0x4bd   : > { %7489 = vrot.lane.b32.xlu1 %v7462_v57, %s9224_s25  ;;  %v5210_v26 = vsel %vm9481_vm14, %v5205_v59, %v5209_v4  ;;  %v6917_v41 = vunpack.c.l.b16 %v5200_v18  ;;  %v6578_v37 = vor.u32 %v6577_v6, %v6574_v20  ;;  %v5358_v49 = vrot.slane %v5356_v17, 4  ;;  %v6956_v7 = vpop.permute.xlu2 %6955  ;;  %v5639_v57 = vld [vmem:[#allocation2 + $0x54] sm:$0xf] }
 0x4be   : > { %v6918_v55 = vunpack.c.l.b16 %v5210_v26  ;;  %v6588_v56 = vor.u32 %v6587_v33, %v6583_v43  ;;  %v5359_v35 = vshll.u32 %v5043_v25, 16  ;;  %v5365_v48 = vshll.u32 %v9195_v14, 16  ;;  %v12505_v33 = vpop.permute.xlu1 %7571 }
 0x4bf   : > { %v6579_v40 = vrot.slane %v6578_v37, 4  ;;  %v5369_v51 = vshrl.u32 %v9195_v14, 16  ;;  %v5375_v24 = vshll.u32 %v9196_v50, 16  ;;  %v7581_v11 = vsel %vm3549_vm15, %v9056_v19, %v6956_v7  ;;  %v12503_v18 = vpop.permute.xlu0 %7301  ;;  %13557 = vst [vmem:[#allocation29_spill] sm:$0xff] %v12505_v33 }
 0x4c0   : > { %v6944_v47 = vpack.c.b16 %v6918_v55, %v6917_v41  ;;  %v6589_v12 = vrot.slane %v6588_v56, 4  ;;  %v5361_v4 = vrot.slane %v5359_v35, 5  ;;  %v5367_v59 = vrot.slane %v5365_v48, 5  ;;  %13556 = vst [vmem:[#allocation28_spill] sm:$0xff] %v12503_v18  ;;  %v9197_v55 = vld [vmem:[#allocation2 + $0x58] sm:$0xf] }
 0x4c1   : > { %v6584_v20 = vsel %vm9481_vm14, %v6579_v40, %v6583_v43  ;;  %v5371_v6 = vrot.slane %v5369_v51, 4  ;;  %v5377_v17 = vrot.slane %v5375_v24, 5  ;;  %v12501_v25 = vsel %vm3598_vm0, %v7581_v11, %v12268_v30  ;;  %v5045_v35 = vld [vmem:[#allocation2 + $0x9c] sm:$0xf] }
 0x4c2   : > { %6965 = vrot.lane.b32.xlu0 %v6944_v47, %s9223_s24  ;;  %v6594_v26 = vsel %vm9481_vm14, %v6589_v12, %v6593_v2  ;;  %v7443_v41 = vunpack.c.l.b16 %v6584_v20  ;;  %v5362_v37 = vor.u32 %v5361_v4, %v5358_v49  ;;  %v5820_v19 = vshrl.u32 %v5639_v57, 16  ;;  %v9198_v51 = vld [vmem:[#allocation2 + $0x5c] sm:$0x1] }
 0x4c3   : > { %v7444_v7 = vunpack.c.l.b16 %v6594_v26  ;;  %v5372_v40 = vor.u32 %v5371_v6, %v5367_v59  ;;  %v5823_v43 = vshll.u32 %v5639_v57, 16  ;;  %v5829_v56 = vshll.u32 %v9197_v55, 16 }
 0x4c4   : > { %v5363_v30 = vrot.slane %v5362_v37, 4  ;;  %v5822_v14 = vrot.slane %v5820_v19, 4  ;;  %v5833_v48 = vshrl.u32 %v9197_v55, 16  ;;  %v5839_v50 = vshll.u32 %v9198_v51, 16  ;;  %v5651_v37 = vld [vmem:[#allocation2 + $0x9c] sm:$0xf] }
 0x4c5   : > { %v7463_v24 = vpack.c.b16 %v7444_v7, %v7443_v41  ;;  %v5373_v11 = vrot.slane %v5372_v40, 4  ;;  %v5825_v47 = vrot.slane %v5823_v43, 5  ;;  %v5831_v33 = vrot.slane %v5829_v56, 5  ;;  %v9199_v40 = vld [vmem:[#allocation2 + $0xa0] sm:$0xf] }
 0x4c6   : > { %v5368_v12 = vsel %vm9481_vm14, %v5363_v30, %v5367_v59  ;;  %v5835_v2 = vrot.slane %v5833_v48, 4  ;;  %v5841_v49 = vrot.slane %v5839_v50, 5  ;;  %v5380_v4 = vshrl.u32 %v5045_v35, 16  ;;  %v9200_v30 = vld [vmem:[#allocation2 + $0xa4] sm:$0x1] }
 0x4c7   : > { %7491 = vrot.lane.b32.xlu2 %v7463_v24, %s9224_s25  ;;  %v5378_v57 = vsel %vm9481_vm14, %v5373_v11, %v5377_v17  ;;  %v6931_v20 = vunpack.c.l.b16 %v5368_v12  ;;  %v5826_v6 = vor.u32 %v5825_v47, %v5822_v14  ;;  %v5383_v26 = vshll.u32 %v5045_v35, 16  ;;  %v12515_v62 = vpop.permute.xlu0 %7557  ;;  %v7855_v47 = vld [vmem:[%s13495_s2 + $0x10] sm:$0x3]  ;;  %v12522_v12 = vpop.permute.xlu1 %7303 }
 0x4c8   : > { %v6932_v19 = vunpack.c.l.b16 %v5378_v57  ;;  %v5836_v41 = vor.u32 %v5835_v2, %v5831_v33  ;;  %v5382_v7 = vrot.slane %v5380_v4, 4  ;;  %v5389_v43 = vshll.u32 %v9199_v40, 16  ;;  %13558 = vst [vmem:[#allocation30_spill] sm:$0xff] %v12515_v62 }
 0x4c9   : > { %v5827_v55 = vrot.slane %v5826_v6, 4  ;;  %v5385_v56 = vrot.slane %v5383_v26, 5  ;;  %v5393_v59 = vshrl.u32 %v9199_v40, 16  ;;  %v5399_v48 = vshll.u32 %v9200_v30, 16  ;;  %13559 = vst [vmem:[#allocation31_spill] sm:$0xff] %v12522_v12 }
 0x4ca   : > { %v6951_v51 = vpack.c.b16 %v6932_v19, %v6931_v20  ;;  %v5837_v50 = vrot.slane %v5836_v41, 4  ;;  %v5391_v24 = vrot.slane %v5389_v43, 5  ;;  %v5964_v18 = vshrl.u32 %v5651_v37, 16  ;;  %v9201_v19 = vld [vmem:[#allocation2 + $0xa0] sm:$0xf] }
 0x4cb   : > { %v5832_v17 = vsel %vm9481_vm14, %v5827_v55, %v5831_v33  ;;  %v5386_v35 = vor.u32 %v5385_v56, %v5382_v7  ;;  %v5395_v14 = vrot.slane %v5393_v59, 4  ;;  %v5401_v11 = vrot.slane %v5399_v48, 5  ;;  %v9202_v43 = vld [vmem:[#allocation2 + $0xa4] sm:$0x1]  ;;  %v6247_v59 = vld [vmem:[#allocation2 + $0x60] sm:$0xf] }
 0x4cc   : > { %6979 = vrot.lane.b32.xlu1 %v6951_v51, %s9223_s24  ;;  %v5842_v2 = vsel %vm9481_vm14, %v5837_v50, %v5841_v49  ;;  %v7175_v4 = vunpack.c.l.b16 %v5832_v17  ;;  %v5966_v57 = vrot.slane %v5964_v18, 4  ;;  %v5967_v20 = vshll.u32 %v5651_v37, 16  ;;  %v7212_v50 = vpop.permute.xlu2 %7211 }
 0x4cd   : > { %v7176_v6 = vunpack.c.l.b16 %v5842_v2  ;;  %v5387_v26 = vrot.slane %v5386_v35, 4  ;;  %v5396_v33 = vor.u32 %v5395_v14, %v5391_v24  ;;  %v5973_v41 = vshll.u32 %v9201_v19, 16 }
 0x4ce   : > { %v5969_v7 = vrot.slane %v5967_v20, 5  ;;  %v5977_v40 = vshrl.u32 %v9201_v19, 16  ;;  %v5983_v55 = vshll.u32 %v9202_v43, 16  ;;  %v7865_v56 = vunpack.c.l.b16 %v7855_v47  ;;  %v9203_v43 = vld [vmem:[#allocation2 + $0x64] sm:$0xf] }
 0x4cf   : > { %v7201_v30 = vpack.c.b16 %v7176_v6, %v7175_v4  ;;  %v5392_v48 = vsel %vm9481_vm14, %v5387_v26, %v5391_v24  ;;  %v5397_v51 = vrot.slane %v5396_v33, 4  ;;  %v5975_v49 = vrot.slane %v5973_v41, 5 }
 0x4d0   : > { %v6933_v18 = vunpack.c.l.b16 %v5392_v48  ;;  %v5970_v37 = vor.u32 %v5969_v7, %v5966_v57  ;;  %v5979_v17 = vrot.slane %v5977_v40, 4  ;;  %v5985_v35 = vrot.slane %v5983_v55, 5 }
 0x4d1   : > { %7223 = vrot.lane.b32.xlu0 %v7201_v30, %s9222_s23  ;;  %v5402_v14 = vsel %vm9481_vm14, %v5397_v51, %v5401_v11  ;;  %v7868_v2 = vpack.c.b16 %v7865_v56, %v7865_v56  ;;  %v7660_v47 = vsel %vm3631_vm1, %v12501_v25, %v11988_v60  ;;  %v6428_v4 = vshrl.u32 %v6247_v59, 16  ;;  %v5653_v11 = vld [vmem:[#allocation2 + $0xa8] sm:$0xf]  ;;  %v12546_v56 = vpop.permute.xlu0 %7047 }
 0x4d2   : > { %v6934_v20 = vunpack.c.l.b16 %v5402_v14  ;;  %v5971_v24 = vrot.slane %v5970_v37, 4  ;;  %v5980_v6 = vor.u32 %v5979_v17, %v5975_v49  ;;  %v7692_v26 = vsel %vm3664_vm3, %v7660_v47, %v7212_v50  ;;  %v9105_v25 = vld [vmem:[%s13495_s2 + $0x8] sm:$0xff]  ;;  %13561 = vst [vmem:[#allocation32_spill] sm:$0xff] %v12546_v56  ;;  %v12548_v50 = vpop.permute.xlu1 %7559 }
 0x4d3   : > { %v7904_v57 = vsel %vm13560_vm2, %v7868_v2, 0  ;;  %v12539_v33 = vsel %vm3697_vm4, %v7692_v26, %v12302_v44  ;;  %v6430_v19 = vrot.slane %v6428_v4, 4  ;;  %v6431_v41 = vshll.u32 %v6247_v59, 16  ;;  %v9204_v59 = vld [vmem:[#allocation2 + $0x68] sm:$0x1]  ;;  %13562 = vst [vmem:[#allocation33_spill] sm:$0xff] %v12548_v50 }
 0x4d4   : > { %v6952_v7 = vpack.c.b16 %v6934_v20, %v6933_v18  ;;  %v5976_v40 = vsel %vm9481_vm14, %v5971_v24, %v5975_v49  ;;  %v5981_v60 = vrot.slane %v5980_v6, 4  ;;  %7911 = vmatpush.bf16.msra.mxu1 %v7904_v57  ;;  %v6437_v55 = vshll.u32 %v9203_v43, 16  ;;  %9109 = vmatpush.bf16.msra.mxu3 %v7904_v57  ;;  %v5031_v20 = vld [vmem:[#allocation2 + $0x48] sm:$0xf]  ;;  %v9205_v26 = vld [vmem:[#allocation2 + $0xac] sm:$0xf] }
 0x4d5   : > { %v7187_v44 = vunpack.c.l.b16 %v5976_v40  ;;  %v6433_v30 = vrot.slane %v6431_v41, 5  ;;  %v6441_v48 = vshrl.u32 %v9203_v43, 16  ;;  %v6447_v51 = vshll.u32 %v9204_v59, 16 }
 0x4d6   : > { %6981 = vrot.lane.b32.xlu2 %v6952_v7, %s9223_s24  ;;  %v5986_v49 = vsel %vm9481_vm14, %v5981_v60, %v5985_v35  ;;  %v6439_v18 = vrot.slane %v6437_v55, 5  ;;  %v5988_v37 = vshrl.u32 %v5653_v11, 16  ;;  %v5991_v17 = vshll.u32 %v5653_v11, 16  ;;  %v9104_v7 = vld [vmem:[%s13495_s2] sm:$0xff]  ;;  %v9206_v11 = vld [vmem:[#allocation2 + $0xb0] sm:$0x1] }
 0x4d7   : > { %v7188_v14 = vunpack.c.l.b16 %v5986_v49  ;;  %v6434_v2 = vor.u32 %v6433_v30, %v6430_v19  ;;  %v6443_v47 = vrot.slane %v6441_v48, 4  ;;  %v6449_v4 = vrot.slane %v6447_v51, 5 }
 0x4d8   : > { %7912 = vmatpush.bf16.msra.mxu1 %v9105_v25  ;;  %v5990_v24 = vrot.slane %v5988_v37, 4  ;;  %v5993_v6 = vrot.slane %v5991_v17, 5  ;;  %v5997_v57 = vshll.u32 %v9205_v26, 16  ;;  %v6001_v41 = vshrl.u32 %v9205_v26, 16  ;;  %9110 = vmatpush.bf16.msra.mxu3 %v9105_v25 }
 0x4d9   : > { %v7207_v35 = vpack.c.b16 %v7188_v14, %v7187_v44  ;;  %v6435_v40 = vrot.slane %v6434_v2, 4  ;;  %v6444_v60 = vor.u32 %v6443_v47, %v6439_v18  ;;  %v6007_v43 = vshll.u32 %v9206_v11, 16  ;;  %v9207_v47 = vld [vmem:[#allocation2 + $0x4c] sm:$0xf] }
 0x4da   : > { %v5994_v19 = vor.u32 %v5993_v6, %v5990_v24  ;;  %v5999_v55 = vrot.slane %v5997_v57, 5  ;;  %v6003_v30 = vrot.slane %v6001_v41, 4  ;;  %v5212_v48 = vshrl.u32 %v5031_v20, 16 }
 0x4db   : > { %7235 = vrot.lane.b32.xlu1 %v7207_v35, %s9222_s23  ;;  %v6440_v59 = vsel %vm9481_vm14, %v6435_v40, %v6439_v18  ;;  %v6445_v51 = vrot.slane %v6444_v60, 4  ;;  %v6009_v49 = vrot.slane %v6007_v43, 5  ;;  %v5215_v37 = vshll.u32 %v5031_v20, 16  ;;  %v9208_v35 = vld [vmem:[#allocation2 + $0x50] sm:$0x1]  ;;  %v7468_v40 = vpop.permute.xlu2 %7467  ;;  %v12563_v60 = vpop.permute.xlu0 %7061 }
 0x4dc   : > { %v7431_v17 = vunpack.c.l.b16 %v6440_v59  ;;  %v5995_v26 = vrot.slane %v5994_v19, 4  ;;  %v6004_v25 = vor.u32 %v6003_v30, %v5999_v55  ;;  %v5214_v44 = vrot.slane %v5212_v48, 4  ;;  %7913 = vmatpush.bf16.msra.mxu1 %v9104_v7  ;;  %9111 = vmatpush.bf16.msra.mxu3 %v9104_v7  ;;  %13563 = vst [vmem:[#allocation34_spill] sm:$0xff] %v12563_v60  ;;  %v6261_v30 = vld [vmem:[#allocation2 + $0xb4] sm:$0xf]  ;;  %v12567_v48 = vpop.permute.xlu1 %6957 }
 0x4dd   : > { %v6450_v14 = vsel %vm9481_vm14, %v6445_v51, %v6449_v4  ;;  %v5217_v2 = vrot.slane %v5215_v37, 5  ;;  %v5221_v24 = vshll.u32 %v9207_v47, 16  ;;  %v5225_v6 = vshrl.u32 %v9207_v47, 16  ;;  %v12565_v4 = vld [vmem:[#allocation2 + $0xb8] sm:$0xf] }
 0x4de   : > { %v7432_v57 = vunpack.c.l.b16 %v6450_v14  ;;  %v6000_v18 = vsel %vm9481_vm14, %v5995_v26, %v5999_v55  ;;  %v6005_v41 = vrot.slane %v6004_v25, 4  ;;  %v5231_v20 = vshll.u32 %v9208_v35, 16 }
 0x4df   : > { %v7189_v11 = vunpack.c.l.b16 %v6000_v18  ;;  %v5218_v43 = vor.u32 %v5217_v2, %v5214_v44  ;;  %v5223_v7 = vrot.slane %v5221_v24, 5  ;;  %v5227_v19 = vrot.slane %v5225_v6, 4  ;;  %v12575_v2 = vld [vmem:[#allocation2 + $0xbc] sm:$0x1]  ;;  %v5033_v6 = vld [vmem:[#allocation2 + $0x54] sm:$0xf] }
 0x4e0   : > { %v7457_v59 = vpack.c.b16 %v7432_v57, %v7431_v17  ;;  %v6010_v51 = vsel %vm9481_vm14, %v6005_v41, %v6009_v49  ;;  %v5233_v55 = vrot.slane %v5231_v20, 5  ;;  %v7756_v37 = vsel %vm3730_vm8, %v12539_v33, %v12020_v53  ;;  %v5034_v41 = vld [vmem:[#allocation2 + $0x58] sm:$0xf] }
 0x4e1   : > { %v7190_v26 = vunpack.c.l.b16 %v6010_v51  ;;  %v5219_v25 = vrot.slane %v5218_v43, 4  ;;  %v5228_v14 = vor.u32 %v5227_v19, %v5223_v7  ;;  %v7788_v44 = vsel %vm13564_vm5, %v7756_v37, %v7468_v40  ;;  %v5058_v51 = vld [vmem:[#allocation2 + $0x5c] sm:$0x1] }
 0x4e2   : > { %7479 = vrot.lane.b32.xlu0 %v7457_v59, %s9224_s25  ;;  %vm13565_vm6 = vcmask 261120   ;;  %v6596_v47 = vshrl.u32 %v6261_v30, 16  ;;  %v6599_v24 = vshll.u32 %v6261_v30, 16  ;;  %v6605_v49 = vshll.u32 %v12565_v4, 16 }
 0x4e3   : > { %v7820_v17 = vsel %vm13565_vm6, %v7788_v44, %v12338_v5  ;;  %v7208_v57 = vpack.c.b16 %v7190_v26, %v7189_v11  ;;  %v5224_v53 = vsel %vm9481_vm14, %v5219_v25, %v5223_v7  ;;  %v5229_v33 = vrot.slane %v5228_v14, 4  ;;  %v5458_v25 = vld [vmem:[#allocation2 + $0x54] sm:$0xe]  ;;  %v12589_v14 = vpop.permute.xlu0 %7317  ;;  %vm13569_vm9 = vmmov %vm13565_vm6 }
 0x4e4   : > { %vm13566_vm7 = vcmask 293888   ;;  %v6609_v18 = vshrl.u32 %v12565_v4, 16  ;;  %v6919_v35 = vunpack.c.l.b16 %v5224_v53  ;;  %v6598_v20 = vrot.slane %v6596_v47, 4  ;;  %13567 = vst [vmem:[#allocation35_spill] sm:$0xff] %v12589_v14  ;;  %v5048_v14 = vld [vmem:[#allocation2 + $0xac] sm:$0xf]  ;;  %vm13572_vm2 = vmmov %vm13565_vm6 }
 0x4e5   : > { %8986 = vmatmul.msk.bf16.vlgmr.msra.gmra.mxu1 %vm13566_vm7, %v7820_v17  ;;  %v6601_v40 = vrot.slane %v6599_v24, 5  ;;  %v6607_v43 = vrot.slane %v6605_v49, 5  ;;  %7237 = vrot.lane.b32.xlu2 %v7208_v57, %s9222_s23  ;;  %v5234_v5 = vsel %vm9481_vm14, %v5229_v33, %v5233_v55  ;;  %v6615_v11 = vshll.u32 %v12575_v2, 16  ;;  %vm13570_vm12 = vmmov %vm13566_vm7 }
 0x4e6   : > { %v6611_v19 = vrot.slane %v6609_v18, 4  ;;  %v5236_v30 = vshrl.u32 %v5033_v6, 16  ;;  %v6920_v7 = vunpack.c.l.b16 %v5234_v5  ;;  %v5239_v37 = vshll.u32 %v5033_v6, 16  ;;  %v12591_v5 = vpop.permute.xlu1 %7213  ;;  %vm13573_vm5 = vmmov %vm13566_vm7 }
 0x4e7   : > { %v6602_v59 = vor.u32 %v6601_v40, %v6598_v20  ;;  %v5245_v26 = vshll.u32 %v5034_v41, 16  ;;  %v6617_v17 = vrot.slane %v6615_v11, 5  ;;  %v5249_v24 = vshrl.u32 %v5034_v41, 16  ;;  %v6680_v11 = vld [vmem:[#allocation2 + $0xb4] sm:$0xe]  ;;  %vm13574_vm6 = vmmov %vm13568_vm10 }
 0x4e8   : > { %v6612_v44 = vor.u32 %v6611_v19, %v6607_v43  ;;  %v5238_v47 = vrot.slane %v5236_v30, 4  ;;  %v6945_v49 = vpack.c.b16 %v6920_v7, %v6919_v35  ;;  %v5241_v53 = vrot.slane %v5239_v37, 5  ;;  %v12598_v37 = vpop.permute.xlu2 %7215  ;;  %vm13575_vm7 = vmmov %vm13572_vm2 }
 0x4e9   : > { %v6603_v57 = vrot.slane %v6602_v59, 4  ;;  %v5247_v55 = vrot.slane %v5245_v26, 5  ;;  %v5251_v18 = vrot.slane %v5249_v24, 4  ;;  %v5255_v50 = vshll.u32 %v5058_v51, 16 }
 0x4ea   : > { %v6613_v33 = vrot.slane %v6612_v44, 4  ;;  %v8745_v12 = vrot.slane %v5458_v25, 9  ;;  %6967 = vrot.lane.b32.xlu1 %v6945_v49, %s9223_s24  ;;  %v5242_v20 = vor.u32 %v5241_v53, %v5238_v47  ;;  %v5566_v40 = vrot.slane %v5034_v41, 5 }
 0x4eb   : > { %v6608_v6 = vsel %vm9481_vm14, %v6603_v57, %v6607_v43  ;;  %v5569_v19 = vrot.slane %v5058_v51, 5  ;;  %v5252_v7 = vor.u32 %v5251_v18, %v5247_v55  ;;  %v5257_v59 = vrot.slane %v5255_v50, 5  ;;  %v5641_v51 = vld [vmem:[#allocation2 + $0x60] sm:$0xf]  ;;  %v12608_v18 = vpop.permute.xlu0 %6971 }
 0x4ec   : > { %v6618_v35 = vsel %vm9481_vm14, %v6613_v33, %v6617_v17  ;;  %v7445_v30 = vunpack.c.l.b16 %v6608_v6  ;;  %v5243_v25 = vrot.slane %v5242_v20, 4  ;;  %v5567_v44 = vsel %vm9372_vm11, %v8745_v12, %v5566_v40  ;;  %v5642_v33 = vld [vmem:[#allocation2 + $0x64] sm:$0xf] }
 0x4ed   : > { %v7446_v26 = vunpack.c.l.b16 %v6618_v35  ;;  %v5568_v24 = vrot.slane %v5566_v40, 4  ;;  %v5253_v49 = vrot.slane %v5252_v7, 4  ;;  %v7001_v43 = vunpack.c.l.b16 %v5567_v44  ;;  %v5666_v40 = vld [vmem:[#allocation2 + $0x68] sm:$0x1] }
 0x4ee   : > { %v8783_v47 = vrot.slane %v6680_v11, 9  ;;  %v6824_v41 = vrot.slane %v12565_v4, 5  ;;  %v5248_v17 = vsel %vm9481_vm14, %v5243_v25, %v5247_v55  ;;  %v6827_v53 = vrot.slane %v12575_v2, 5  ;;  %v6066_v25 = vld [vmem:[#allocation2 + $0x60] sm:$0xe] }
 0x4ef   : > { %v7464_v57 = vpack.c.b16 %v7446_v26, %v7445_v30  ;;  %v5570_v50 = vsel %vm9372_vm11, %v5568_v24, %v5569_v19  ;;  %v5258_v12 = vsel %vm9481_vm14, %v5253_v49, %v5257_v59  ;;  %v6921_v6 = vunpack.c.l.b16 %v5248_v17  ;;  %v9057_v17 = vld [vmem:[#allocation2 + $0xc] sm:$0xff] }
 0x4f0   : > { %v7002_v20 = vunpack.c.l.b16 %v5570_v50  ;;  %v6825_v4 = vsel %vm9372_vm11, %v8783_v47, %v6824_v41  ;;  %v6922_v55 = vunpack.c.l.b16 %v5258_v12  ;;  %v6826_v11 = vrot.slane %v6824_v41, 4  ;;  %v6249_v12 = vld [vmem:[#allocation2 + $0x6c] sm:$0xf] }
 0x4f1   : > { %7493 = vrot.lane.b32.xlu0 %v7464_v57, %s9224_s25  ;;  %v7525_v35 = vunpack.c.l.b16 %v6825_v4  ;;  %v5844_v19 = vshrl.u32 %v5641_v51, 16  ;;  %v5847_v2 = vshll.u32 %v5641_v51, 16  ;;  %v5853_v7 = vshll.u32 %v5642_v33, 16  ;;  %v12618_v4 = vpop.permute.xlu1 %7469 }
 0x4f2   : > { %v7026_v30 = vpack.c.b16 %v7002_v20, %v7001_v43  ;;  %v5857_v26 = vshrl.u32 %v5642_v33, 16  ;;  %v6946_v44 = vpack.c.b16 %v6922_v55, %v6921_v6  ;;  %v6828_v59 = vsel %vm9372_vm11, %v6826_v11, %v6827_v53 }
 0x4f3   : > { %v5846_v24 = vrot.slane %v5844_v19, 4  ;;  %v5863_v49 = vshll.u32 %v5666_v40, 16  ;;  %v7526_v47 = vunpack.c.l.b16 %v6828_v59  ;;  %v5849_v57 = vrot.slane %v5847_v2, 5  ;;  %v12623_v19 = vpop.permute.xlu2 %7471  ;;  %v12627_v2 = vld [vmem:[#allocation2 + $0x70] sm:$0xf] }
 0x4f4   : > { %7049 = vrot.lane.b32.xlu1 %v7026_v30, %s9220_s21  ;;  %v5855_v50 = vrot.slane %v5853_v7, 5  ;;  %v5859_v41 = vrot.slane %v5857_v26, 4  ;;  %6969 = vrot.lane.b32.xlu2 %v6946_v44, %s9223_s24  ;;  %v7584_v51 = vsel %vm3549_vm15, %v9057_v17, %v12567_v48  ;;  %v8761_v6 = vrot.slane %v6066_v25, 9  ;;  %v9079_v7 = vld [vmem:[#allocation2 + $0x60] sm:$0xff]  ;;  %v12636_v17 = vld [vmem:[#allocation2 + $0x74] sm:$0x1] }
 0x4f5   : > { %v5865_v43 = vrot.slane %v5863_v49, 5  ;;  %v6174_v53 = vrot.slane %v5642_v33, 5  ;;  %v7544_v20 = vpack.c.b16 %v7526_v47, %v7525_v35  ;;  %v5850_v55 = vor.u32 %v5849_v57, %v5846_v24  ;;  %v12631_v24 = vpop.permute.xlu0 %7227 }
 0x4f6   : > { %v5860_v11 = vor.u32 %v5859_v41, %v5855_v50  ;;  %v7630_v30 = vsel %vm3598_vm0, %v7584_v51, %v12186_v34  ;;  %v6177_v59 = vrot.slane %v5666_v40, 5  ;;  %v6452_v49 = vshrl.u32 %v6249_v12, 16 }
 0x4f7   : > { %v6175_v26 = vsel %vm9372_vm11, %v8761_v6, %v6174_v53  ;;  %v6176_v44 = vrot.slane %v6174_v53, 4  ;;  %v5851_v48 = vrot.slane %v5850_v55, 4  ;;  %v6455_v35 = vshll.u32 %v6249_v12, 16  ;;  %v5047_v53 = vld [vmem:[#allocation2 + $0xa8] sm:$0xf] }
 0x4f8   : > { %v5861_v25 = vrot.slane %v5860_v11, 4  ;;  %v7257_v33 = vunpack.c.l.b16 %v6175_v26  ;;  %v6454_v47 = vrot.slane %v6452_v49, 4  ;;  %v6461_v57 = vshll.u32 %v12627_v2, 16 }
 0x4f9   : > { %7145 = vrot.lane.b32.xlu0 %v9079_v7, %s9217_s18  ;;  %v6178_v34 = vsel %vm9372_vm11, %v6176_v44, %v6177_v59  ;;  %v6465_v41 = vshrl.u32 %v12627_v2, 16  ;;  %v5856_v40 = vsel %vm9481_vm14, %v5851_v48, %v5855_v50  ;;  %v6457_v6 = vrot.slane %v6455_v35, 5 }
 0x4fa   : > { %v5866_v12 = vsel %vm9481_vm14, %v5861_v25, %v5865_v43  ;;  %v7258_v51 = vunpack.c.l.b16 %v6178_v34  ;;  %v7177_v55 = vunpack.c.l.b16 %v5856_v40  ;;  %v6463_v7 = vrot.slane %v6461_v57, 5  ;;  %v5065_v43 = vld [vmem:[#allocation2 + $0xb0] sm:$0x1]  ;;  %v6674_v25 = vld [vmem:[#allocation2 + $0x6c] sm:$0xe] }
 0x4fb   : > { %v7178_v11 = vunpack.c.l.b16 %v5866_v12  ;;  %v6467_v26 = vrot.slane %v6465_v41, 4  ;;  %v6458_v59 = vor.u32 %v6457_v6, %v6454_v47  ;;  %v6471_v49 = vshll.u32 %v12636_v17, 16  ;;  %v12650_v47 = vpop.permute.xlu1 %7483  ;;  %v9095_v41 = vld [vmem:[#allocation2 + $0x6c] sm:$0xff] }
 0x4fc   : > { %v7282_v44 = vpack.c.b16 %v7258_v51, %v7257_v33  ;;  %7573 = vrot.lane.b32.xlu2 %v7544_v20, %s9221_s22  ;;  %v7662_v50 = vsel %vm3631_vm1, %v7630_v30, %v12014_v61  ;;  %v5404_v48 = vshrl.u32 %v5047_v53, 16  ;;  %v5407_v33 = vshll.u32 %v5047_v53, 16  ;;  %v12655_v30 = vpop.permute.xlu2 %7485 }
 0x4fd   : > { %v7202_v56 = vpack.c.b16 %v7178_v11, %v7177_v55  ;;  %v6468_v60 = vor.u32 %v6467_v26, %v6463_v7  ;;  %v6459_v35 = vrot.slane %v6458_v59, 4  ;;  %v6473_v34 = vrot.slane %v6471_v49, 5  ;;  %v5465_v26 = vld [vmem:[#allocation2 + $0xa8] sm:$0xe] }
 0x4fe   : > { %v7694_v57 = vsel %vm3664_vm3, %v7662_v50, %v12591_v5  ;;  %v5406_v40 = vrot.slane %v5404_v48, 4  ;;  %v5413_v12 = vshll.u32 %v5048_v14, 16  ;;  %v5417_v51 = vshrl.u32 %v5048_v14, 16 }
 0x4ff   : > { %7225 = vrot.lane.b32.xlu1 %v7202_v56, %s9222_s23  ;;  %v6469_v20 = vrot.slane %v6468_v60, 4  ;;  %v6464_v61 = vsel %vm9481_vm14, %v6459_v35, %v6463_v7  ;;  %v5409_v6 = vrot.slane %v5407_v33, 5  ;;  %v5423_v55 = vshll.u32 %v5065_v43, 16  ;;  %v12661_v7 = vpop.permute.xlu0 %6959 }
 0x500   : > { %v8777_v11 = vrot.slane %v6674_v25, 9  ;;  %v7433_v56 = vunpack.c.l.b16 %v6464_v61  ;;  %v5415_v53 = vrot.slane %v5413_v12, 5  ;;  %v5419_v60 = vrot.slane %v5417_v51, 4  ;;  %v9064_v61 = vld [vmem:[#allocation2 + $0x60] sm:$0xff] }
 0x501   : > { %7401 = vrot.lane.b32.xlu0 %v9095_v41, %s9218_s19  ;;  %v6474_v5 = vsel %vm9481_vm14, %v6469_v20, %v6473_v34  ;;  %v5410_v49 = vor.u32 %v5409_v6, %v5406_v40  ;;  %v5425_v50 = vrot.slane %v5423_v55, 5  ;;  %v6782_v48 = vrot.slane %v12627_v2, 5 }
 0x502   : > { %v7434_v59 = vunpack.c.l.b16 %v6474_v5  ;;  %v5420_v35 = vor.u32 %v5419_v60, %v5415_v53  ;;  %v6785_v33 = vrot.slane %v12636_v17, 5  ;;  %v8752_v25 = vrot.slane %v5465_v26, 9  ;;  %v5655_v26 = vld [vmem:[#allocation2 + $0xb4] sm:$0xf] }
 0x503   : > { %v5615_v62 = vrot.slane %v5048_v14, 5  ;;  %v7726_v41 = vsel %vm3697_vm4, %v7694_v57, %v12222_v46  ;;  %v5411_v22 = vrot.slane %v5410_v49, 4  ;;  %v6783_v34 = vsel %vm9372_vm11, %v8777_v11, %v6782_v48  ;;  %v12682_v60 = vpop.permute.xlu1 %6973 }
 0x504   : > { %v6784_v20 = vrot.slane %v6782_v48, 4  ;;  %7305 = vrot.lane.b32.xlu2 %v7282_v44, %s9219_s20  ;;  %v7458_v40 = vpack.c.b16 %v7434_v59, %v7433_v56  ;;  %v5421_v12 = vrot.slane %v5420_v35, 4  ;;  %v7513_v2 = vunpack.c.l.b16 %v6783_v34  ;;  %v6073_v48 = vld [vmem:[#allocation2 + $0xb4] sm:$0xe]  ;;  %v6976_v35 = vpop.permute.xlu2 %6975 }
 0x505   : > { %v5616_v51 = vsel %vm9372_vm11, %v8752_v25, %v5615_v62  ;;  %v5416_v14 = vsel %vm9481_vm14, %v5411_v22, %v5415_v53  ;;  %v5617_v17 = vrot.slane %v5615_v62, 4  ;;  %v5618_v57 = vrot.slane %v5065_v43, 5  ;;  %v5656_v53 = vld [vmem:[#allocation2 + $0xb8] sm:$0xf] }
 0x506   : > { %v6786_v46 = vsel %vm9372_vm11, %v6784_v20, %v6785_v33  ;;  %v5426_v44 = vsel %vm9481_vm14, %v5421_v12, %v5425_v50  ;;  %v6935_v6 = vunpack.c.l.b16 %v5416_v14  ;;  %v7605_v11 = vsel %vm3549_vm15, %v9064_v61, %v12608_v18  ;;  %v5673_v50 = vld [vmem:[#allocation2 + $0xbc] sm:$0x1] }
 0x507   : > { %7481 = vrot.lane.b32.xlu1 %v7458_v40, %s9224_s25  ;;  %v7514_v55 = vunpack.c.l.b16 %v6786_v46  ;;  %v6936_v5 = vunpack.c.l.b16 %v5426_v44  ;;  %v5619_v22 = vsel %vm9372_vm11, %v5617_v17, %v5618_v57  ;;  %v7015_v56 = vunpack.c.l.b16 %v5616_v51  ;;  %v12694_v61 = vpop.permute.xlu0 %7217  ;;  %v9066_v57 = vld [vmem:[#allocation2 + $0x78] sm:$0xff] }
 0x508   : > { %v7016_v43 = vunpack.c.l.b16 %v5619_v22  ;;  %v7644_v59 = vsel %vm3598_vm0, %v7605_v11, %v12324_v1  ;;  %v7758_v49 = vsel %vm3730_vm8, %v7726_v41, %v12046_v27  ;;  %v6012_v25 = vshrl.u32 %v5655_v26, 16  ;;  %v6263_v22 = vld [vmem:[#allocation2 + $0xc0] sm:$0xf] }
 0x509   : > { %v7538_v62 = vpack.c.b16 %v7514_v55, %v7513_v2  ;;  %v6953_v18 = vpack.c.b16 %v6936_v5, %v6935_v6  ;;  %v7790_v33 = vsel %vm13568_vm10, %v7758_v49, %v12618_v4  ;;  %v6015_v34 = vshll.u32 %v5655_v26, 16  ;;  %vm13576_vm10 = vmmov %vm13573_vm5 }
 0x50a   : > { %v7033_v20 = vpack.c.b16 %v7016_v43, %v7015_v56  ;;  %v7822_v40 = vsel %vm13569_vm9, %v7790_v33, %v12256_v36  ;;  %v6021_v12 = vshll.u32 %v5656_v53, 16  ;;  %v6025_v2 = vshrl.u32 %v5656_v53, 16  ;;  %v6264_v43 = vld [vmem:[#allocation2 + $0xc4] sm:$0xf]  ;;  %vm13577_vm9 = vmmov %vm13574_vm6 }
 0x50b   : > { %6983 = vrot.lane.b32.xlu0 %v6953_v18, %s9223_s24  ;;  %8987 = vmatmul.msk.bf16.gmra.mxu1 %vm13570_vm12, %v7822_v40  ;;  %v6014_v27 = vrot.slane %v6012_v25, 4  ;;  %v6017_v1 = vrot.slane %v6015_v34, 5  ;;  %v6031_v41 = vshll.u32 %v5673_v50, 16  ;;  %v8768_v51 = vrot.slane %v6073_v48, 9  ;;  %v6681_v25 = vld [vmem:[#allocation2 + $0xc0] sm:$0xe]  ;;  %vm13578_vm12 = vmmov %vm13572_vm2 }
 0x50c   : > { %7561 = vrot.lane.b32.xlu2 %v7538_v62, %s9221_s22  ;;  %v6023_v4 = vrot.slane %v6021_v12, 5  ;;  %v6027_v14 = vrot.slane %v6025_v2, 4  ;;  %v6223_v46 = vrot.slane %v5656_v53, 5  ;;  %v6226_v17 = vrot.slane %v5673_v50, 5  ;;  %v9086_v40 = vld [vmem:[#allocation2 + $0xb4] sm:$0xff] }
 0x50d   : > { %v6018_v36 = vor.u32 %v6017_v1, %v6014_v27  ;;  %v6033_v44 = vrot.slane %v6031_v41, 5  ;;  %v7676_v6 = vsel %vm3631_vm1, %v7644_v59, %v11936_v45  ;;  %v7611_v56 = vsel %vm3549_vm15, %v9066_v57, %v6976_v35  ;;  %v6281_v35 = vld [vmem:[#allocation2 + $0xc8] sm:$0x1]  ;;  %v12719_v1 = vpop.permute.xlu2 %7231 }
 0x50e   : > { %v6028_v55 = vor.u32 %v6027_v14, %v6023_v4  ;;  %v6224_v11 = vsel %vm9372_vm11, %v8768_v51, %v6223_v46  ;;  %v6225_v26 = vrot.slane %v6223_v46, 4  ;;  %v7708_v5 = vsel %vm3664_vm3, %v7676_v6, %v12631_v24 }
 0x50f   : > { %7063 = vrot.lane.b32.xlu1 %v7033_v20, %s9220_s21  ;;  %v6019_v53 = vrot.slane %v6018_v36, 4  ;;  %v7740_v62 = vsel %vm3697_vm4, %v7708_v5, %v12357_v42  ;;  %v7271_v59 = vunpack.c.l.b16 %v6224_v11  ;;  %v6620_v33 = vshrl.u32 %v6263_v22, 16  ;;  %v12715_v42 = vpop.permute.xlu1 %7229 }
 0x510   : > { %v6029_v49 = vrot.slane %v6028_v55, 4  ;;  %v6227_v45 = vsel %vm9372_vm11, %v6225_v26, %v6226_v17  ;;  %v7772_v50 = vsel %vm3730_vm8, %v7740_v62, %v11972_v3  ;;  %v6623_v12 = vshll.u32 %v6263_v22, 16  ;;  %v9058_v17 = vld [vmem:[#allocation2 + $0x18] sm:$0xff]  ;;  %v12722_v55 = vpop.permute.xlu0 %7473 }
 0x511   : > { %v6024_v48 = vsel %vm9481_vm14, %v6019_v53, %v6023_v4  ;;  %v7272_v24 = vunpack.c.l.b16 %v6227_v45  ;;  %v7804_v18 = vsel %vm13571_vm13, %v7772_v50, %v12650_v47  ;;  %v6629_v2 = vshll.u32 %v6264_v43, 16  ;;  %v5466_v45 = vld [vmem:[#allocation2 + $0xb4] sm:$0xe]  ;;  %v5050_v50 = vld [vmem:[#allocation2 + $0xb8] sm:$0xf]  ;;  %vm13579_vm13 = vmmov %vm13573_vm5 }
 0x512   : > { %v6034_v34 = vsel %vm9481_vm14, %v6029_v49, %v6033_v44  ;;  %v7191_v20 = vunpack.c.l.b16 %v6024_v48  ;;  %v6622_v41 = vrot.slane %v6620_v33, 4  ;;  %v6633_v51 = vshrl.u32 %v6264_v43, 16  ;;  %v5066_v33 = vld [vmem:[#allocation2 + $0xbc] sm:$0x1] }
 0x513   : > { %v7192_v3 = vunpack.c.l.b16 %v6034_v34  ;;  %v7289_v27 = vpack.c.b16 %v7272_v24, %v7271_v59  ;;  %v6625_v47 = vrot.slane %v6623_v12, 5  ;;  %v6631_v4 = vrot.slane %v6629_v2, 5  ;;  %v9102_v34 = vld [vmem:[#allocation2 + $0xc0] sm:$0xff] }
 0x514   : > { %7159 = vrot.lane.b32.xlu2 %v9086_v40, %s9217_s18  ;;  %v6639_v14 = vshll.u32 %v6281_v35, 16  ;;  %v8784_v46 = vrot.slane %v6681_v25, 9  ;;  %v6635_v36 = vrot.slane %v6633_v51, 4  ;;  %v6831_v44 = vrot.slane %v6264_v43, 5  ;;  %v5049_v25 = vld [vmem:[#allocation2 + $0xb4] sm:$0xf] }
 0x515   : > { %v7209_v57 = vpack.c.b16 %v7192_v3, %v7191_v20  ;;  %v6834_v6 = vrot.slane %v6281_v35, 5  ;;  %v6626_v11 = vor.u32 %v6625_v47, %v6622_v41  ;;  %v7836_v5 = vsel %vm13572_vm2, %v7804_v18, %v12369_v58  ;;  %v9065_v35 = vld [vmem:[#allocation2 + $0x6c] sm:$0xff]  ;;  %vm13583_vm2 = vmmov %vm13574_vm6 }
 0x516   : > { %v6641_v26 = vrot.slane %v6639_v14, 5  ;;  %v7587_v22 = vsel %vm3549_vm15, %v9058_v17, %v12661_v7  ;;  %v6636_v53 = vor.u32 %v6635_v36, %v6631_v4  ;;  %v6832_v62 = vsel %vm9372_vm11, %v8784_v46, %v6831_v44  ;;  %8994 = vmatmul.msk.bf16.vlgmr.msra.gmra.mxu3 %vm13573_vm5, %v7836_v5  ;;  %vm13585_vm5 = vmmov %vm13575_vm7 }
 0x517   : > { %7319 = vrot.lane.b32.xlu1 %v7289_v27, %s9219_s20  ;;  %7239 = vrot.lane.b32.xlu0 %v7209_v57, %s9222_s23  ;;  %v6833_v43 = vrot.slane %v6831_v44, 4  ;;  %v7632_v49 = vsel %vm3598_vm0, %v7587_v22, %v12286_v28  ;;  %v6627_v59 = vrot.slane %v6626_v11, 4  ;;  %v7648_v7 = vsel %vm3598_vm0, %v7611_v56, %v12459_v23  ;;  %v12749_v3 = vpop.permute.xlu1 %6961 }
 0x518   : > { %v7664_v58 = vsel %vm3631_vm1, %v7632_v49, %v12056_v10  ;;  %v6637_v48 = vrot.slane %v6636_v53, 4  ;;  %v7527_v18 = vunpack.c.l.b16 %v6832_v62  ;;  %v8753_v40 = vrot.slane %v5466_v45, 9  ;;  %v12761_v22 = vpop.permute.xlu0 %7487  ;;  %v5658_v49 = vld [vmem:[#allocation2 + $0xc4] sm:$0xf]  ;;  %v6074_v45 = vld [vmem:[#allocation2 + $0xc0] sm:$0xe] }
 0x519   : > { %v6835_v24 = vsel %vm9372_vm11, %v6833_v43, %v6834_v6  ;;  %v6632_v28 = vsel %vm9481_vm14, %v6627_v59, %v6631_v4  ;;  %v7696_v10 = vsel %vm3664_vm3, %v7664_v58, %v12598_v37  ;;  %v7608_v12 = vsel %vm3549_vm15, %v9065_v35, %v12682_v60  ;;  %v12752_v4 = vpop.permute.xlu2 %6963 }
 0x51a   : > { %v7528_v20 = vunpack.c.l.b16 %v6835_v24  ;;  %v6642_v23 = vsel %vm9481_vm14, %v6637_v48, %v6641_v26  ;;  %v7447_v56 = vunpack.c.l.b16 %v6632_v28  ;;  %v5622_v2 = vrot.slane %v5050_v50, 5  ;;  %v5674_v24 = vld [vmem:[#allocation2 + $0xc8] sm:$0x1] }
 0x51b   : > { %v7448_v27 = vunpack.c.l.b16 %v6642_v23  ;;  %v5625_v51 = vrot.slane %v5066_v33, 5  ;;  %v5428_v47 = vshrl.u32 %v5049_v25, 16  ;;  %v5431_v46 = vshll.u32 %v5049_v25, 16 }
 0x51c   : > { %7415 = vrot.lane.b32.xlu2 %v9102_v34, %s9218_s19  ;;  %v7545_v41 = vpack.c.b16 %v7528_v20, %v7527_v18  ;;  %v5623_v37 = vsel %vm9372_vm11, %v8753_v40, %v5622_v2  ;;  %v5624_v14 = vrot.slane %v5622_v2, 4  ;;  %v5437_v17 = vshll.u32 %v5050_v50, 16  ;;  %v9087_v20 = vld [vmem:[#allocation2 + $0xc0] sm:$0xff] }
 0x51d   : > { %v7465_v57 = vpack.c.b16 %v7448_v27, %v7447_v56  ;;  %v7646_v60 = vsel %vm3598_vm0, %v7608_v12, %v12322_v13  ;;  %v5430_v36 = vrot.slane %v5428_v47, 4  ;;  %v5441_v44 = vshrl.u32 %v5050_v50, 16 }
 0x51e   : > { %v5626_v6 = vsel %vm9372_vm11, %v5624_v14, %v5625_v51  ;;  %v5433_v11 = vrot.slane %v5431_v46, 5  ;;  %v5439_v26 = vrot.slane %v5437_v17, 5  ;;  %v5447_v5 = vshll.u32 %v5066_v33, 16  ;;  %v9059_v46 = vld [vmem:[#allocation2 + $0x24] sm:$0xff] }
 0x51f   : > { %7575 = vrot.lane.b32.xlu1 %v7545_v41, %s9221_s22  ;;  %v12765_v53 = vsel %vm3631_vm1, %v7648_v7, %v12128_v15  ;;  %7495 = vrot.lane.b32.xlu0 %v7465_v57, %s9224_s25  ;;  %v7017_v62 = vunpack.c.l.b16 %v5623_v37  ;;  %v5443_v43 = vrot.slane %v5441_v44, 4  ;;  %v7728_v13 = vsel %vm3697_vm4, %v7696_v10, %v12396_v63  ;;  %v5657_v15 = vld [vmem:[#allocation2 + $0xc0] sm:$0xf]  ;;  %v12785_v12 = vpop.permute.xlu1 %7219  ;;  %v6266_v44 = vld [vmem:[#allocation2 + $0xd0] sm:$0xf] }
 0x520   : > { %v7018_v59 = vunpack.c.l.b16 %v5626_v6  ;;  %v5434_v58 = vor.u32 %v5433_v11, %v5430_v36  ;;  %v7678_v50 = vsel %vm3631_vm1, %v7646_v60, %v12086_v32  ;;  %v7760_v48 = vsel %vm3730_vm8, %v7728_v13, %v12090_v31  ;;  %v6265_v13 = vld [vmem:[#allocation2 + $0xcc] sm:$0xf] }
 0x521   : > { %v5444_v7 = vor.u32 %v5443_v43, %v5439_v26  ;;  %v5449_v18 = vrot.slane %v5447_v5, 5  ;;  %v7710_v35 = vsel %vm3664_vm3, %v7678_v50, %v12715_v42  ;;  %v7792_v63 = vsel %vm13574_vm6, %v7760_v48, %v12623_v19  ;;  %v12790_v47 = vpop.permute.xlu2 %7221  ;;  %v6682_v43 = vld [vmem:[#allocation2 + $0xcc] sm:$0xe] }
 0x522   : > { %v5435_v33 = vrot.slane %v5434_v58, 4  ;;  %v7824_v25 = vsel %vm13575_vm7, %v7792_v63, %v12425_v8  ;;  %v8769_v28 = vrot.slane %v6074_v45, 9  ;;  %v6230_v34 = vrot.slane %v5658_v49, 5  ;;  %v6978_v45 = vpop.permute.xlu0 %6977 }
 0x523   : > { %v5445_v32 = vrot.slane %v5444_v7, 4  ;;  %8988 = vmatmul.msk.bf16.gmra.mxu1 %vm13576_vm10, %v7824_v25  ;;  %v6233_v31 = vrot.slane %v5674_v24, 5  ;;  %v6036_v10 = vshrl.u32 %v5657_v15, 16  ;;  %v6039_v40 = vshll.u32 %v5657_v15, 16  ;;  %v9103_v15 = vld [vmem:[#allocation2 + $0xcc] sm:$0xff] }
 0x524   : > { %v5440_v23 = vsel %vm9481_vm14, %v5435_v33, %v5439_v26  ;;  %v7742_v42 = vsel %vm3697_vm4, %v7710_v35, %v12355_v21  ;;  %v6232_v19 = vrot.slane %v6230_v34, 4  ;;  %v6045_v56 = vshll.u32 %v5658_v49, 16 }
 0x525   : > { %v7034_v8 = vpack.c.b16 %v7018_v59, %v7017_v62  ;;  %v5450_v2 = vsel %vm9481_vm14, %v5445_v32, %v5449_v18  ;;  %v6937_v27 = vunpack.c.l.b16 %v5440_v23  ;;  %v6038_v41 = vrot.slane %v6036_v10, 4  ;;  %v6282_v62 = vld [vmem:[#allocation2 + $0xd4] sm:$0x1] }
 0x526   : > { %v6938_v51 = vunpack.c.l.b16 %v5450_v2  ;;  %v6231_v37 = vsel %vm9372_vm11, %v8769_v28, %v6230_v34  ;;  %v6234_v21 = vsel %vm9372_vm11, %v6232_v19, %v6233_v31  ;;  %v6041_v14 = vrot.slane %v6039_v40, 5 }
 0x527   : > { %7161 = vrot.lane.b32.xlu1 %v9087_v20, %s9217_s18  ;;  %7065 = vrot.lane.b32.xlu0 %v7034_v8, %s9220_s21  ;;  %v6047_v17 = vrot.slane %v6045_v56, 5  ;;  %v6049_v57 = vshrl.u32 %v5658_v49, 16  ;;  %v6055_v60 = vshll.u32 %v5674_v24, 16  ;;  %v7774_v36 = vsel %vm3730_vm8, %v7742_v42, %v12116_v54 }
 0x528   : > { %v6954_v6 = vpack.c.b16 %v6938_v51, %v6937_v27  ;;  %v6042_v11 = vor.u32 %v6041_v14, %v6038_v41  ;;  %v7806_v26 = vsel %vm13577_vm9, %v7774_v36, %v12655_v30  ;;  %v7590_v5 = vsel %vm3549_vm15, %v9059_v46, %v12749_v3  ;;  %vm13600_vm9 = vmmov %vm13583_vm2 }
 0x529   : > { %v7273_v59 = vunpack.c.l.b16 %v6231_v37  ;;  %v7274_v58 = vunpack.c.l.b16 %v6234_v21  ;;  %v6051_v49 = vrot.slane %v6049_v57, 4  ;;  %v7838_v50 = vsel %vm13578_vm12, %v7806_v26, %v12386_v0  ;;  %v12826_v56 = vpop.permute.xlu2 %7477  ;;  %v9060_v57 = vld [vmem:[#allocation2 + $0x30] sm:$0xff]  ;;  %vm13603_vm12 = vmmov %vm13585_vm5 }
 0x52a   : > { %6985 = vrot.lane.b32.xlu2 %v6954_v6, %s9223_s24  ;;  %v6043_v54 = vrot.slane %v6042_v11, 4  ;;  %v6057_v48 = vrot.slane %v6055_v60, 5  ;;  %8995 = vmatmul.msk.bf16.gmra.mxu3 %vm13579_vm13, %v7838_v50  ;;  %v7634_v30 = vsel %vm3598_vm0, %v7590_v5, %v12443_v9  ;;  %v6838_v3 = vrot.slane %v6266_v44, 5  ;;  %v13580_v6 = vld [vmem:[#allocation3_spill] sm:$0xff]  ;;  %v13587_v50 = vld [vmem:[#allocation24_spill] sm:$0xff] }
 0x52b   : > { %v6052_v24 = vor.u32 %v6051_v49, %v6047_v17  ;;  %v8785_v7 = vrot.slane %v6682_v43, 9  ;;  %v6841_v18 = vrot.slane %v6282_v62, 5  ;;  %v6644_v35 = vshrl.u32 %v6265_v13, 16 }
 0x52c   : > { %v7712_v63 = vsel %vm3664_vm3, %v12765_v53, %v12719_v1  ;;  %v6048_v0 = vsel %vm9481_vm14, %v6043_v54, %v6047_v17  ;;  %v7666_v33 = vsel %vm3631_vm1, %v7634_v30, %v12004_v39  ;;  %v6840_v25 = vrot.slane %v6838_v3, 4  ;;  %v7476_v1 = vpop.permute.xlu1 %7475  ;;  %v9067_v17 = vld [vmem:[#allocation2 + $0x84] sm:$0xff]  ;;  %v13588_v54 = vld [vmem:[#allocation22_spill] sm:$0xff] }
 0x52d   : > { %v7290_v28 = vpack.c.b16 %v7274_v58, %v7273_v59  ;;  %v6053_v34 = vrot.slane %v6052_v24, 4  ;;  %v7193_v9 = vunpack.c.l.b16 %v6048_v0  ;;  %v6646_v32 = vrot.slane %v6644_v35, 4  ;;  %v13593_v35 = vld [vmem:[#allocation7_spill] sm:$0xff] }
 0x52e   : > { %v6842_v20 = vsel %vm9372_vm11, %v6840_v25, %v6841_v18  ;;  %v6647_v31 = vshll.u32 %v6265_v13, 16  ;;  %v6653_v10 = vshll.u32 %v6266_v44, 16  ;;  %v6657_v40 = vshrl.u32 %v6266_v44, 16 }
 0x52f   : > { %7417 = vrot.lane.b32.xlu1 %v9103_v15, %s9218_s19  ;;  %7321 = vrot.lane.b32.xlu0 %v7290_v28, %s9219_s20  ;;  %v6058_v53 = vsel %vm9481_vm14, %v6053_v34, %v6057_v48  ;;  %v7698_v39 = vsel %vm3664_vm3, %v7666_v33, %v12694_v61  ;;  %v6839_v23 = vsel %vm9372_vm11, %v8785_v7, %v6838_v3  ;;  %v6663_v42 = vshll.u32 %v6282_v62, 16  ;;  %v7234_v61 = vpop.permute.xlu0 %7233  ;;  %v13581_v62 = vld [vmem:[#allocation9_spill] sm:$0xff]  ;;  %vm13582_vm11 = vmmov %vm13574_vm6  ;;  %v13592_v7 = vld [vmem:[#allocation4_spill] sm:$0xff] }
 0x530   : > { %v7194_v19 = vunpack.c.l.b16 %v6058_v53  ;;  %v6649_v8 = vrot.slane %v6647_v31, 5  ;;  %v6655_v2 = vrot.slane %v6653_v10, 5  ;;  %v6659_v27 = vrot.slane %v6657_v40, 4  ;;  %vm13586_vm6 = vmmov %vm13576_vm10  ;;  %v13589_v3 = vld [vmem:[#allocation17_spill] sm:$0xff]  ;;  %v9061_v28 = vld [vmem:[#allocation2 + $0x3c] sm:$0xff] }
 0x531   : > { %v7744_v41 = vsel %vm3697_vm4, %v7712_v63, %v12473_v52  ;;  %v7530_v51 = vunpack.c.l.b16 %v6842_v20  ;;  %v6665_v46 = vrot.slane %v6663_v42, 5  ;;  %v7529_v16 = vunpack.c.l.b16 %v6839_v23  ;;  %v7492_v15 = vpop.permute.xlu2 %7491  ;;  %vm13591_vm7 = vmmov %vm13586_vm6  ;;  %v13594_v34 = vld [vmem:[#allocation26_spill] sm:$0xff]  ;;  %v13596_v10 = vld [vmem:[#allocation5_spill] sm:$0xff] }
 0x532   : > { %v7210_v37 = vpack.c.b16 %v7194_v19, %v7193_v9  ;;  %v6650_v21 = vor.u32 %v6649_v8, %v6646_v32  ;;  %v6660_v14 = vor.u32 %v6659_v27, %v6655_v2  ;;  %v7730_v60 = vsel %vm3697_vm4, %v7698_v39, %v12413_v29  ;;  %v13595_v32 = vld [vmem:[#allocation18_spill] sm:$0xff]  ;;  %v13598_v23 = vld [vmem:[#allocation21_spill] sm:$0xff]  ;;  %vm13599_vm10 = vmmov %vm13583_vm2 }
 0x533   : > { %v7762_v11 = vsel %vm3730_vm8, %v7730_v60, %v13580_v6  ;;  %v7614_v52 = vsel %vm3549_vm15, %v9067_v17, %v6978_v45  ;;  %v7593_v26 = vsel %vm3549_vm15, %v9060_v57, %v12752_v4  ;;  %v7546_v5 = vpack.c.b16 %v7530_v51, %v7529_v16  ;;  %v13584_v45 = vld [vmem:[#allocation20_spill] sm:$0xff]  ;;  %v13597_v53 = vld [vmem:[#allocation10_spill] sm:$0xff]  ;;  %vm13604_vm13 = vmmov %vm13586_vm6 }
 0x534   : > { %7241 = vrot.lane.b32.xlu2 %v7210_v37, %s9222_s23  ;;  %v6651_v36 = vrot.slane %v6650_v21, 4  ;;  %v6661_v44 = vrot.slane %v6660_v14, 4  ;;  %v7776_v43 = vsel %vm3730_vm8, %v7744_v41, %v13581_v62  ;;  %v7794_v13 = vsel %vm13582_vm11, %v7762_v11, %v12722_v55  ;;  %v7490_v38 = vpop.permute.xlu1 %7489  ;;  %v9068_v27 = vld [vmem:[#allocation2 + $0x90] sm:$0xff]  ;;  %v13601_v41 = vld [vmem:[#allocation11_spill] sm:$0xff]  ;;  %vm13606_vm11 = vmmov %vm13585_vm5 }
 0x535   : > { %v7808_v58 = vsel %vm13583_vm2, %v7776_v43, %v12761_v22  ;;  %v7826_v49 = vsel %vm13585_vm5, %v7794_v13, %v13584_v45  ;;  %v7650_v55 = vsel %vm3598_vm0, %v7614_v52, %v13587_v50  ;;  %v7636_v48 = vsel %vm3598_vm0, %v7593_v26, %v13588_v54  ;;  %v13602_v37 = vld [vmem:[#allocation19_spill] sm:$0xff]  ;;  %vm13608_vm2 = vmmov %vm13586_vm6  ;;  %v13609_v16 = vld [vmem:[#allocation28_spill] sm:$0xff] }
 0x536   : > { %v6656_v29 = vsel %vm9481_vm14, %v6651_v36, %v6655_v2  ;;  %v6666_v59 = vsel %vm9481_vm14, %v6661_v44, %v6665_v46  ;;  %8989 = vmatmul.msk.bf16.gmra.mxu1 %vm13586_vm6, %v7826_v49  ;;  %vm13590_vm14 = vmmov %vm13585_vm5  ;;  %v7682_v18 = vsel %vm3631_vm1, %v7650_v55, %v13592_v7  ;;  %v7668_v63 = vsel %vm3631_vm1, %v7636_v48, %v13593_v35  ;;  %v13605_v46 = vld [vmem:[#allocation27_spill] sm:$0xff]  ;;  %v13610_v36 = vld [vmem:[#allocation12_spill] sm:$0xff] }
 0x537   : > { %7577 = vrot.lane.b32.xlu0 %v7546_v5, %s9221_s22  ;;  %v7449_v4 = vunpack.c.l.b16 %v6656_v29  ;;  %v7450_v30 = vunpack.c.l.b16 %v6666_v59  ;;  %v7840_v24 = vsel %vm13590_vm14, %v7808_v58, %v13589_v3  ;;  %v7714_v0 = vsel %vm3664_vm3, %v7682_v18, %v7234_v61  ;;  %v6966_v25 = vpop.permute.xlu0 %6965  ;;  %v13607_v61 = vld [vmem:[#allocation23_spill] sm:$0xff]  ;;  %v13611_v5 = vld [vmem:[#allocation25_spill] sm:$0xff]  ;;  %vm13613_vm5 = vmmov %vm13600_vm9 }
 0x538   : > { %v7700_v33 = vsel %vm3664_vm3, %v7668_v63, %v12785_v12  ;;  %v7746_v9 = vsel %vm3697_vm4, %v7714_v0, %v13594_v34  ;;  %v7596_v31 = vsel %vm3549_vm15, %v9061_v28, %v6966_v25  ;;  %v13614_v29 = vld [vmem:[#allocation14_spill] sm:$0xff]  ;;  %vm13616_vm6 = vmmov %vm13606_vm11  ;;  %v13619_v50 = vld [vmem:[#allocation29_spill] sm:$0xff] }
 0x539   : > { %v7466_v22 = vpack.c.b16 %v7450_v30, %v7449_v4  ;;  %v7732_v20 = vsel %vm3697_vm4, %v7700_v33, %v13595_v32  ;;  %v7778_v40 = vsel %vm3730_vm8, %v7746_v9, %v13596_v10  ;;  %v7638_v42 = vsel %vm3598_vm0, %v7596_v31, %v13598_v23  ;;  %v6982_v8 = vpop.permute.xlu2 %6981  ;;  %v13615_v58 = vld [vmem:[#allocation30_spill] sm:$0xff]  ;;  %vm13617_vm14 = vmmov %vm13613_vm5  ;;  %v9069_v4 = vld [vmem:[#allocation2 + $0x9c] sm:$0xff] }
 0x53a   : > { %8996 = vmatmul.msk.bf16.gmra.mxu3 %vm13591_vm7, %v7840_v24  ;;  %v7764_v39 = vsel %vm3730_vm8, %v7732_v20, %v13597_v53  ;;  %v7810_v2 = vsel %vm13600_vm9, %v7778_v40, %v7490_v38  ;;  %v7670_v51 = vsel %vm3631_vm1, %v7638_v42, %v13601_v41  ;;  %vm13618_vm7 = vmmov %vm13608_vm2  ;;  %v7620_v48 = vsel %vm3549_vm15, %v9069_v4, %v6982_v8  ;;  %v13622_v38 = vld [vmem:[#allocation34_spill] sm:$0xff]  ;;  %v13624_v18 = vld [vmem:[#allocation15_spill] sm:$0xff] }
 0x53b   : > { %v7796_v19 = vsel %vm13599_vm10, %v7764_v39, %v7476_v1  ;;  %v7842_v17 = vsel %vm13606_vm11, %v7810_v2, %v13605_v46  ;;  %v7702_v1 = vsel %vm3664_vm3, %v7670_v51, %v12790_v47  ;;  %v13612_v47 = vld [vmem:[#allocation13_spill] sm:$0xff]  ;;  %vm13620_vm10 = vmmov %vm13616_vm6  ;;  %v7654_v3 = vsel %vm3598_vm0, %v7620_v48, %v13622_v38  ;;  %v13625_v63 = vld [vmem:[#allocation6_spill] sm:$0xff] }
 0x53c   : > { %7497 = vrot.lane.b32.xlu2 %v7466_v22, %s9224_s25  ;;  %v7828_v21 = vsel %vm13603_vm12, %v7796_v19, %v13602_v37  ;;  %v7734_v60 = vsel %vm3697_vm4, %v7702_v1, %v13609_v16  ;;  %vm13621_vm9 = vmmov %vm13608_vm2  ;;  %v7686_v35 = vsel %vm3631_vm1, %v7654_v3, %v13624_v18  ;;  %v13626_v28 = vld [vmem:[#allocation31_spill] sm:$0xff]  ;;  %v13627_v32 = vld [vmem:[#allocation8_spill] sm:$0xff] }
 0x53d   : > { %v7766_v43 = vsel %vm3730_vm8, %v7734_v60, %v13612_v47  ;;  %v13628_v31 = vld [vmem:[#allocation35_spill] sm:$0xff]  ;;  %vm13629_vm12 = vmmov %vm13613_vm5  ;;  %v13630_v39 = vld [vmem:[#allocation33_spill] sm:$0xff] }
 0x53e   : > { %v6980_v12 = vpop.permute.xlu1 %6979  ;;  %v7798_v13 = vsel %vm13613_vm5, %v7766_v43, %v12826_v56  ;;  %v9062_v56 = vld [vmem:[#allocation2 + $0x48] sm:$0xff]  ;;  %v13632_v42 = vld [vmem:[#allocation16_spill] sm:$0xff]  ;;  %vm13633_vm11 = vmmov %vm13613_vm5 }
 0x53f   : > { %v7617_v14 = vsel %vm3549_vm15, %v9068_v27, %v6980_v12  ;;  %v7830_v45 = vsel %vm13616_vm6, %v7798_v13, %v13615_v58  ;;  %vm13634_vm5 = vmmov %vm13616_vm6  ;;  %v9063_v41 = vld [vmem:[#allocation2 + $0x54] sm:$0xff] }
 0x540   : > { %v7652_v57 = vsel %vm3598_vm0, %v7617_v14, %v13607_v61  ;;  %v9071_v3 = vld [vmem:[#allocation2 + $0xb4] sm:$0xff] }
 0x541   : > { %v7684_v44 = vsel %vm3631_vm1, %v7652_v57, %v13610_v36  ;;  %v7238_v26 = vpop.permute.xlu2 %7237 }
 0x542   : > { %v7718_v33 = vsel %vm3664_vm3, %v7686_v35, %v7238_v26 }
 0x543   : > { %v7224_v11 = vpop.permute.xlu0 %7223  ;;  %v7750_v10 = vsel %vm3697_vm4, %v7718_v33, %v13628_v31 }
 0x544   : > { %v7782_v12 = vsel %vm3730_vm8, %v7750_v10, %v13632_v42 }
 0x546   : > { %8990 = vmatmul.msk.bf16.gmra.mxu1 %vm13604_vm13, %v7828_v21  ;;  %vm13631_vm13 = vmmov %vm13616_vm6 }
 0x547   : > { %vm13635_vm6 = vmmov %vm13608_vm2 }
 0x54a   : > { %8997 = vmatmul.msk.bf16.gmra.mxu3 %vm13608_vm2, %v7842_v17 }
 0x54d   : > { %v7236_v6 = vpop.permute.xlu1 %7235 }
 0x54e   : > { %v7716_v52 = vsel %vm3664_vm3, %v7684_v44, %v7236_v6  ;;  %v6970_v30 = vpop.permute.xlu2 %6969 }
 0x54f   : > { %v7748_v62 = vsel %vm3697_vm4, %v7716_v52, %v13611_v5  ;;  %v7602_v51 = vsel %vm3549_vm15, %v9063_v41, %v6970_v30  ;;  %v9070_v5 = vld [vmem:[#allocation2 + $0xa8] sm:$0xff] }
 0x550   : > { %v7780_v59 = vsel %vm3730_vm8, %v7748_v62, %v13614_v29 }
 0x551   : > { %v7812_v49 = vsel %vm13617_vm14, %v7780_v59, %v7492_v15  ;;  %v13623_v15 = vld [vmem:[#allocation32_spill] sm:$0xff]  ;;  %vm13636_vm14 = vmmov %vm13633_vm11 }
 0x552   : > { %v7844_v55 = vsel %vm13620_vm10, %v7812_v49, %v13619_v50  ;;  %vm13638_vm10 = vmmov %vm13608_vm2 }
 0x554   : > { %v7480_v54 = vpop.permute.xlu0 %7479 }
 0x556   : > { %8991 = vmatmul.msk.bf16.gmra.mxu1 %vm13618_vm7, %v7830_v45  ;;  %v7574_v40 = vpop.permute.xlu2 %7573  ;;  %vm13637_vm7 = vmmov %vm13634_vm5 }
 0x55a   : > { %8998 = vmatmul.msk.bf16.gmra.mxu3 %vm13621_vm9, %v7844_v55  ;;  %vm13639_vm9 = vmmov %vm13633_vm11 }
 0x55c   : > { %v6968_v24 = vpop.permute.xlu1 %6967 }
 0x55d   : > { %v7599_v22 = vsel %vm3549_vm15, %v9062_v56, %v6968_v24 }
 0x55e   : > { %v7640_v7 = vsel %vm3598_vm0, %v7599_v22, %v13623_v15  ;;  %v7306_v37 = vpop.permute.xlu2 %7305 }
 0x55f   : > { %v7672_v0 = vsel %vm3631_vm1, %v7640_v7, %v13625_v63 }
 0x560   : > { %v7704_v25 = vsel %vm3664_vm3, %v7672_v0, %v7224_v11 }
 0x561   : > { %v7736_v34 = vsel %vm3697_vm4, %v7704_v25, %v13626_v28 }
 0x562   : > { %v7768_v20 = vsel %vm3730_vm8, %v7736_v34, %v13627_v32  ;;  %v12949_v6 = vpop.f32.mrf.mxu1 }
 0x563   : > { %v7494_v9 = vpop.permute.xlu0 %7493  ;;  %v7800_v53 = vsel %vm13629_vm12, %v7768_v20, %v7480_v54  ;;  %vm13640_vm12 = vmmov %vm13634_vm5 }
 0x564   : > { %v7832_v23 = vsel %vm13631_vm13, %v7800_v53, %v13630_v39  ;;  %v7814_v8 = vsel %vm13633_vm11, %v7782_v12, %v7494_v9  ;;  %vm13641_vm13 = vmmov %vm13608_vm2 }
 0x565   : > { %v7846_v2 = vsel %vm13634_vm5, %v7814_v8, %v7574_v40  ;;  %vm13642_vm11 = vmmov %vm13639_vm9 }
 0x566   : > { %v7050_v19 = vpop.permute.xlu1 %7049  ;;  %8992 = vmatmul.msk.bf16.gmra.mxu1 %vm13608_vm2, %v7832_v23  ;;  %v7562_v16 = vpop.permute.xlu2 %7561 }
 0x567   : > { %v7642_v21 = vsel %vm3598_vm0, %v7602_v51, %v7050_v19 }
 0x56a   : > { %8999 = vmatmul.msk.bf16.gmra.mxu3 %vm13635_vm6, %v7846_v2  ;;  %v12952_v47 = vpop.f32.mrf.mxu1 }
 0x56b   : > { %v7146_v27 = vpop.permute.xlu0 %7145 }
 0x56c   : > { %v7674_v14 = vsel %vm3631_vm1, %v7642_v21, %v7146_v27 }
 0x56e   : > { %v7160_v26 = vpop.permute.xlu2 %7159 }
 0x571   : > { %v7226_v46 = vpop.permute.xlu1 %7225 }
 0x572   : > { %v7706_v17 = vsel %vm3664_vm3, %v7674_v14, %v7226_v46  ;;  %v7995_v14 = vsel %vm3549_vm15, %v12949_v6, 0.0 }
 0x573   : > { %v7402_v1 = vpop.permute.xlu0 %7401  ;;  %v7738_v61 = vsel %vm3697_vm4, %v7706_v17, %v7306_v37  ;;  %v7996_v37 = vsel %vm3549_vm15, %v12952_v47, 0.0 }
 0x574   : > { %v7770_v57 = vsel %vm3730_vm8, %v7738_v61, %v7402_v1  ;;  %v7997_v17 = vadd.f32 %v7996_v37, %v7995_v14 }
 0x576   : > { %v7416_v59 = vpop.permute.xlu2 %7415 }
 0x579   : > { %v7482_v60 = vpop.permute.xlu1 %7481 }
 0x57a   : > { %v7802_v36 = vsel %vm13636_vm14, %v7770_v57, %v7482_v60 }
 0x57b   : > { %v7834_v44 = vsel %vm13637_vm7, %v7802_v36, %v7562_v16 }
 0x57c   : > { %8993 = vmatmul.msk.bf16.gmra.mxu1 %vm13638_vm10, %v7834_v44 }
 0x57d   : > { %v6984_v11 = vpop.permute.xlu0 %6983 }
 0x57e   : > { %v7623_v62 = vsel %vm3549_vm15, %v9070_v5, %v6984_v11 }
 0x581   : > { %v7064_v52 = vpop.permute.xlu1 %7063 }
 0x582   : > { %v7656_v43 = vsel %vm3598_vm0, %v7623_v62, %v7064_v52 }
 0x583   : > { %v7688_v58 = vsel %vm3631_vm1, %v7656_v43, %v7160_v26 }
 0x584   : > { %v6986_v56 = vpop.permute.xlu2 %6985 }
 0x585   : > { %v7626_v15 = vsel %vm3549_vm15, %v9071_v3, %v6986_v56 }
 0x588   : > { %v12958_v4 = vpop.f32.mrf.mxu1 }
 0x589   : > { %v7320_v13 = vpop.permute.xlu1 %7319  ;;  %v7240_v29 = vpop.permute.xlu0 %7239  ;;  %v7998_v46 = vsel %vm3549_vm15, %v12958_v4, 0.0 }
 0x58a   : > { %v7720_v45 = vsel %vm3664_vm3, %v7688_v58, %v7240_v29  ;;  %v7999_v57 = vadd.f32 %v7998_v46, %v7997_v17 }
 0x58b   : > { %v7752_v49 = vsel %vm3697_vm4, %v7720_v45, %v7320_v13 }
 0x58c   : > { %v7784_v54 = vsel %vm3730_vm8, %v7752_v49, %v7416_v59 }
 0x58e   : > { %v7242_v18 = vpop.permute.xlu2 %7241 }
 0x590   : > { %v12964_v38 = vpop.f32.mrf.mxu1 }
 0x591   : > { %v7576_v50 = vpop.permute.xlu1 %7575  ;;  %v7496_v55 = vpop.permute.xlu0 %7495  ;;  %v8000_v61 = vsel %vm3549_vm15, %v12964_v38, 0.0 }
 0x592   : > { %v7816_v48 = vsel %vm13639_vm9, %v7784_v54, %v7496_v55  ;;  %v8001_v60 = vadd.f32 %v8000_v61, %v7999_v57 }
 0x593   : > { %v7848_v30 = vsel %vm13640_vm12, %v7816_v48, %v7576_v50 }
 0x594   : > { %9000 = vmatmul.msk.bf16.gmra.mxu3 %vm13641_vm13, %v7848_v30 }
 0x596   : > { %v7498_v32 = vpop.permute.xlu2 %7497 }
 0x599   : > { %v7066_v24 = vpop.permute.xlu0 %7065  ;;  %v7162_v22 = vpop.permute.xlu1 %7161 }
 0x59a   : > { %v7658_v7 = vsel %vm3598_vm0, %v7626_v15, %v7066_v24  ;;  %v12974_v9 = vpop.f32.mrf.mxu3  ;;  %vm13643_vm0 = vmmov %vm13634_vm5 }
 0x59b   : > { %v7690_v35 = vsel %vm3631_vm1, %v7658_v7, %v7162_v22  ;;  %vm13644_vm1 = vmmov %vm13608_vm2 }
 0x59c   : > { %v7722_v33 = vsel %vm3664_vm3, %v7690_v35, %v7242_v18 }
 0x5a0   : > { %v12969_v63 = vpop.f32.mrf.mxu1 }
 0x5a1   : > { %v7322_v0 = vpop.permute.xlu0 %7321  ;;  %v7418_v28 = vpop.permute.xlu1 %7417  ;;  %v8002_v16 = vsel %vm3549_vm15, %v12969_v63, 0.0 }
 0x5a2   : > { %v7754_v25 = vsel %vm3697_vm4, %v7722_v33, %v7322_v0  ;;  %v12981_v53 = vpop.f32.mrf.mxu3  ;;  %v8003_v44 = vadd.f32 %v8002_v16, %v8001_v60 }
 0x5a3   : > { %v7786_v34 = vsel %vm3730_vm8, %v7754_v25, %v7418_v28  ;;  %v8026_v25 = vsel %vm3549_vm15, %v12974_v9, 0.0 }
 0x5a4   : > { %v7818_v31 = vsel %vm13642_vm11, %v7786_v34, %v7498_v32  ;;  %v8028_v34 = vsel %vm3549_vm15, %v12981_v53, 0.0 }
 0x5a8   : > { %v12978_v40 = vpop.f32.mrf.mxu1 }
 0x5a9   : > { %v7578_v20 = vpop.permute.xlu0 %7577  ;;  %v8004_v36 = vsel %vm3549_vm15, %v12978_v40, 0.0 }
 0x5aa   : > { %v7850_v10 = vsel %vm13643_vm0, %v7818_v31, %v7578_v20  ;;  %v8005_v26 = vadd.f32 %v8004_v36, %v8003_v44 }
 0x5ab   : > { %9001 = vmatmul.msk.bf16.gmra.mxu3 %vm13644_vm1, %v7850_v10 }
 0x5ad   : > { %v12985_v23 = vpop.f32.mrf.mxu3 }
 0x5ae   : > { %v8030_v20 = vsel %vm3549_vm15, %v12985_v23, 0.0 }
 0x5b3   : > { %v12983_v39 = vpop.f32.mrf.mxu1 }
 0x5b4   : > { %v8006_v11 = vsel %vm3549_vm15, %v12983_v39, 0.0 }
 0x5b5   : > { %v12989_v12 = vpop.f32.mrf.mxu3  ;;  %v8007_v62 = vadd.f32 %v8006_v11, %v8005_v26 }
 0x5b6   : > { %v8032_v37 = vsel %vm3549_vm15, %v12989_v12, 0.0 }
 0x5bb   : > { %v12987_v42 = vpop.f32.mrf.mxu1 }
 0x5bc   : > { %v8008_v5 = vsel %vm3549_vm15, %v12987_v42, 0.0 }
 0x5bd   : > { %v12995_v2 = vpop.f32.mrf.mxu3  ;;  %v8009_v29 = vadd.f32 %v8008_v5, %v8007_v62 }
 0x5be   : > { %v8034_v46 = vsel %vm3549_vm15, %v12995_v2, 0.0 }
 0x5c3   : > { %v12991_v19 = vpop.f32.mrf.mxu1 }
 0x5c4   : > { %v8010_v13 = vsel %vm3549_vm15, %v12991_v19, 0.0 }
 0x5c5   : > { %v12999_v41 = vpop.f32.mrf.mxu3  ;;  %v8011_v58 = vadd.f32 %v8010_v13, %v8009_v29 }
 0x5c6   : > { %v8036_v61 = vsel %vm3549_vm15, %v12999_v41, 0.0 }
 0x5cb   : > { %v12993_v8 = vpop.f32.mrf.mxu1 }
 0x5cc   : > { %v8012_v59 = vsel %vm3549_vm15, %v12993_v8, 0.0 }
 0x5cd   : > { %v13005_v21 = vpop.f32.mrf.mxu3  ;;  %v8013_v49 = vadd.f32 %v8012_v59, %v8011_v58 }
 0x5ce   : > { %v8038_v60 = vsel %vm3549_vm15, %v13005_v21, 0.0 }
 0x5d3   : > { %v12997_v27 = vpop.f32.mrf.mxu1 }
 0x5d4   : > { %v8014_v45 = vsel %vm3549_vm15, %v12997_v27, 0.0 }
 0x5d5   : > { %v13021_v52 = vpop.f32.mrf.mxu3  ;;  %v8015_v54 = vadd.f32 %v8014_v45, %v8013_v49 }
 0x5d6   : > { %v8040_v44 = vsel %vm3549_vm15, %v13021_v52, 0.0 }
 0x5db   : > { %v13001_v51 = vpop.f32.mrf.mxu1 }
 0x5dc   : > { %v8016_v50 = vsel %vm3549_vm15, %v13001_v51, 0.0 }
 0x5dd   : > { %v13035_v55 = vpop.f32.mrf.mxu3  ;;  %v8017_v56 = vadd.f32 %v8016_v50, %v8015_v54 }
 0x5de   : > { %v8042_v5 = vsel %vm3549_vm15, %v13035_v55, 0.0 }
 0x5e3   : > { %v13011_v1 = vpop.f32.mrf.mxu1 }
 0x5e4   : > { %v8018_v30 = vsel %vm3549_vm15, %v13011_v1, 0.0 }
 0x5e5   : > { %v8019_v24 = vadd.f32 %v8018_v30, %v8017_v56  ;;  %v13047_v35 = vpop.f32.mrf.mxu3 }
 0x5e6   : > { %v8044_v13 = vsel %vm3549_vm15, %v13047_v35, 0.0 }
 0x5eb   : > { %v13025_v43 = vpop.f32.mrf.mxu1 }
 0x5ec   : > { %v8020_v3 = vsel %vm3549_vm15, %v13025_v43, 0.0 }
 0x5ed   : > { %v8021_v15 = vadd.f32 %v8020_v3, %v8019_v24  ;;  %v13057_v10 = vpop.f32.mrf.mxu3 }
 0x5ee   : > { %v8046_v58 = vsel %vm3549_vm15, %v13057_v10, 0.0 }
 0x5f5   : > { %v13065_v57 = vpop.f32.mrf.mxu3 }
 0x5f6   : > { %v8048_v49 = vsel %vm3549_vm15, %v13065_v57, 0.0 }
 0x5f9   : > { %v13037_v48 = vpop.f32.mrf.mxu1 }
 0x5fa   : > { %v8022_v22 = vsel %vm3549_vm15, %v13037_v48, 0.0 }
 0x5fb   : > { %v8023_v7 = vadd.f32 %v8022_v22, %v8021_v15 }
 0x601   : > { %v13045_v18 = vpop.f32.mrf.mxu1 }
 0x602   : > { %v8024_v0 = vsel %vm3549_vm15, %v13045_v18, 0.0 }
 0x603   : > { %v8025_v33 = vadd.f32 %v8024_v0, %v8023_v7 }
 0x605   : > { %v8027_v28 = vadd.f32 %v8026_v25, %v8025_v33 }
 0x607   : > { %v8029_v32 = vadd.f32 %v8028_v34, %v8027_v28 }
 0x609   : > { %v8031_v31 = vadd.f32 %v8030_v20, %v8029_v32 }
 0x60b   : > { %v8033_v14 = vadd.f32 %v8032_v37, %v8031_v31 }
 0x60d   : > { %v8035_v17 = vadd.f32 %v8034_v46, %v8033_v14 }
 0x60f   : > { %v8037_v16 = vadd.f32 %v8036_v61, %v8035_v17 }
 0x611   : > { %v8039_v36 = vadd.f32 %v8038_v60, %v8037_v16 }
 0x613   : > { %v8041_v26 = vadd.f32 %v8040_v44, %v8039_v36 }
 0x615   : > { %v8043_v62 = vadd.f32 %v8042_v5, %v8041_v26 }
 0x617   : > { %v13071_v11 = vpop.f32.mrf.mxu3  ;;  %v8045_v29 = vadd.f32 %v8044_v13, %v8043_v62 }
 0x618   : > { %v8050_v30 = vsel %vm3549_vm15, %v13071_v11, 0.0 }
 0x619   : > { %v8047_v45 = vadd.f32 %v8046_v58, %v8045_v29 }
 0x61b   : > { %v8049_v50 = vadd.f32 %v8048_v49, %v8047_v45 }
 0x61d   : > { %v8051_v56 = vadd.f32 %v8050_v30, %v8049_v50 }
 0x61f   : > { %v13077_v59 = vpop.f32.mrf.mxu3 }
 0x620   : > { %v8052_v3 = vsel %vm3549_vm15, %v13077_v59, 0.0 }
 0x621   : > { %v8053_v22 = vadd.f32 %v8052_v3, %v8051_v56 }
 0x62e   : > { %v13083_v54 = vpop.f32.mrf.mxu3 }
 0x62f   : > { %v8054_v24 = vsel %vm3549_vm15, %v13083_v54, 0.0 }
 0x630   : > { %v8055_v15 = vadd.f32 %v8054_v24, %v8053_v22 }
 0x636   : > { %v13091_v7 = vpop.f32.mrf.mxu3 }
 0x637   : > { %v8056_v0 = vsel %vm3549_vm15, %v13091_v7, 0.0 }
 0x638   : > { %v8057_v33 = vadd.f32 %v8056_v0, %v8055_v15 }
 0x63a   : > { %v8058_v25 = vrot.slane %v8057_v33, 4 }
 0x63c   : > { %v8059_v28 = vadd.f32 %v8058_v25, %v8057_v33 }
 0x63e   : > { %v8060_v34 = vrot.slane %v8059_v28, 2 }
 0x640   : > { %v8061_v32 = vadd.f32 %v8060_v34, %v8059_v28 }
 0x642   : > { %v8062_v20 = vrot.slane %v8061_v32, 1 }
 0x644   : > { %v8063_v31 = vadd.f32 %v8062_v20, %v8061_v32 }
 0x646   : > { %v13095_v37 = vmul.f32 0.00390625, %v8063_v31 }
 0x648   : > { %v13099_v14 = vsub.f32 %v12949_v6, %v13095_v37  ;;  %v13103_v46 = vsub.f32 %v12952_v47, %v13095_v37  ;;  %v13107_v17 = vsub.f32 %v12958_v4, %v13095_v37  ;;  %v13111_v61 = vsub.f32 %v12964_v38, %v13095_v37 }
 0x649   : > { %v13119_v6 = vsub.f32 %v12969_v63, %v13095_v37  ;;  %v13125_v4 = vsub.f32 %v12978_v40, %v13095_v37  ;;  %v13133_v5 = vsub.f32 %v12983_v39, %v13095_v37  ;;  %v13140_v40 = vsub.f32 %v12987_v42, %v13095_v37 }
 0x64a   : > { %v8097_v16 = vmul.f32 %v13099_v14, %v13099_v14  ;;  %v8098_v60 = vmul.f32 %v13103_v46, %v13103_v46  ;;  %v8099_v47 = vmul.f32 %v13107_v17, %v13107_v17  ;;  %v8100_v38 = vmul.f32 %v13111_v61, %v13111_v61 }
 0x64b   : > { %v8101_v63 = vmul.f32 %v13119_v6, %v13119_v6  ;;  %v8102_v29 = vmul.f32 %v13125_v4, %v13125_v4  ;;  %v13147_v39 = vsub.f32 %v12991_v19, %v13095_v37  ;;  %v8103_v49 = vmul.f32 %v13133_v5, %v13133_v5 }
 0x64c   : > { %v8129_v36 = vsel %vm3549_vm15, %v8097_v16, 0.0  ;;  %v8130_v44 = vsel %vm3549_vm15, %v8098_v60, 0.0  ;;  %v8132_v62 = vsel %vm3549_vm15, %v8099_v47, 0.0  ;;  %v8134_v58 = vsel %vm3549_vm15, %v8100_v38, 0.0 }
 0x64d   : > { %v8131_v26 = vadd.f32 %v8130_v44, %v8129_v36  ;;  %v8136_v50 = vsel %vm3549_vm15, %v8101_v63, 0.0  ;;  %v13154_v42 = vsub.f32 %v12993_v8, %v13095_v37  ;;  %v8104_v56 = vmul.f32 %v13140_v40, %v13140_v40 }
 0x64e   : > { %v8138_v3 = vsel %vm3549_vm15, %v8102_v29, 0.0  ;;  %v13161_v19 = vsub.f32 %v12997_v27, %v13095_v37  ;;  %v8105_v22 = vmul.f32 %v13147_v39, %v13147_v39  ;;  %v8140_v15 = vsel %vm3549_vm15, %v8103_v49, 0.0 }
 0x64f   : > { %v8133_v13 = vadd.f32 %v8132_v62, %v8131_v26  ;;  %v13168_v8 = vsub.f32 %v13001_v51, %v13095_v37  ;;  %v8106_v33 = vmul.f32 %v13154_v42, %v13154_v42  ;;  %v8142_v25 = vsel %vm3549_vm15, %v8104_v56, 0.0 }
 0x650   : > { %v13175_v27 = vsub.f32 %v13011_v1, %v13095_v37  ;;  %v8107_v34 = vmul.f32 %v13161_v19, %v13161_v19  ;;  %v8144_v32 = vsel %vm3549_vm15, %v8105_v22, 0.0  ;;  %v13182_v51 = vsub.f32 %v13025_v43, %v13095_v37 }
 0x651   : > { %v8135_v45 = vadd.f32 %v8134_v58, %v8133_v13  ;;  %v8108_v31 = vmul.f32 %v13168_v8, %v13168_v8  ;;  %v8146_v16 = vsel %vm3549_vm15, %v8106_v33, 0.0  ;;  %v13189_v1 = vsub.f32 %v13037_v48, %v13095_v37 }
 0x652   : > { %v8109_v47 = vmul.f32 %v13175_v27, %v13175_v27  ;;  %v8148_v38 = vsel %vm3549_vm15, %v8107_v34, 0.0  ;;  %v13196_v43 = vsub.f32 %v13045_v18, %v13095_v37  ;;  %v8110_v44 = vmul.f32 %v13182_v51, %v13182_v51 }
 0x653   : > { %v8137_v30 = vadd.f32 %v8136_v50, %v8135_v45  ;;  %v8150_v26 = vsel %vm3549_vm15, %v8108_v31, 0.0  ;;  %v13203_v48 = vsub.f32 %v12974_v9, %v13095_v37  ;;  %v8111_v62 = vmul.f32 %v13189_v1, %v13189_v1 }
 0x654   : > { %v8152_v13 = vsel %vm3549_vm15, %v8109_v47, 0.0  ;;  %v13210_v18 = vsub.f32 %v12981_v53, %v13095_v37  ;;  %v8112_v58 = vmul.f32 %v13196_v43, %v13196_v43  ;;  %v8154_v45 = vsel %vm3549_vm15, %v8110_v44, 0.0 }
 0x655   : > { %v8139_v24 = vadd.f32 %v8138_v3, %v8137_v30  ;;  %v13217_v9 = vsub.f32 %v12985_v23, %v13095_v37  ;;  %v8113_v50 = vmul.f32 %v13203_v48, %v13203_v48  ;;  %v8156_v30 = vsel %vm3549_vm15, %v8111_v62, 0.0 }
 0x656   : > { %v13224_v53 = vsub.f32 %v12989_v12, %v13095_v37  ;;  %v8114_v3 = vmul.f32 %v13210_v18, %v13210_v18  ;;  %v13231_v23 = vsub.f32 %v12995_v2, %v13095_v37  ;;  %v13238_v12 = vsub.f32 %v12999_v41, %v13095_v37 }
 0x657   : > { %v8141_v0 = vadd.f32 %v8140_v15, %v8139_v24  ;;  %v8158_v24 = vsel %vm3549_vm15, %v8112_v58, 0.0  ;;  %v8115_v15 = vmul.f32 %v13217_v9, %v13217_v9  ;;  %v13245_v2 = vsub.f32 %v13005_v21, %v13095_v37 }
 0x658   : > { %v13252_v41 = vsub.f32 %v13021_v52, %v13095_v37  ;;  %v13259_v21 = vsub.f32 %v13035_v55, %v13095_v37  ;;  %v13266_v52 = vsub.f32 %v13047_v35, %v13095_v37  ;;  %v13273_v55 = vsub.f32 %v13057_v10, %v13095_v37 }
 0x659   : > { %v8143_v28 = vadd.f32 %v8142_v25, %v8141_v0  ;;  %v8160_v0 = vsel %vm3549_vm15, %v8113_v50, 0.0  ;;  %v8116_v25 = vmul.f32 %v13224_v53, %v13224_v53  ;;  %v13280_v35 = vsub.f32 %v13065_v57, %v13095_v37 }
 0x65a   : > { %v13287_v10 = vsub.f32 %v13071_v11, %v13095_v37  ;;  %v13294_v57 = vsub.f32 %v13077_v59, %v13095_v37  ;;  %v13301_v11 = vsub.f32 %v13083_v54, %v13095_v37  ;;  %v13308_v59 = vsub.f32 %v13091_v7, %v13095_v37 }
 0x65b   : > { %v8145_v20 = vadd.f32 %v8144_v32, %v8143_v28  ;;  %v8162_v28 = vsel %vm3549_vm15, %v8114_v3, 0.0  ;;  %v8117_v32 = vmul.f32 %v13231_v23, %v13231_v23 }
 0x65c   : > { %v8127_v54 = vmul.f32 %v13301_v11, %v13301_v11 }
 0x65d   : > { %v8147_v60 = vadd.f32 %v8146_v16, %v8145_v20  ;;  %v8164_v20 = vsel %vm3549_vm15, %v8115_v15, 0.0  ;;  %v8118_v16 = vmul.f32 %v13238_v12, %v13238_v12 }
 0x65e   : > { %v8188_v7 = vsel %vm3549_vm15, %v8127_v54, 0.0 }
 0x65f   : > { %v8149_v36 = vadd.f32 %v8148_v38, %v8147_v60  ;;  %v8166_v60 = vsel %vm3549_vm15, %v8116_v25, 0.0  ;;  %v8119_v38 = vmul.f32 %v13245_v2, %v13245_v2 }
 0x661   : > { %v8151_v63 = vadd.f32 %v8150_v26, %v8149_v36  ;;  %v8168_v36 = vsel %vm3549_vm15, %v8117_v32, 0.0  ;;  %v8120_v26 = vmul.f32 %v13252_v41, %v13252_v41 }
 0x663   : > { %v8153_v29 = vadd.f32 %v8152_v13, %v8151_v63  ;;  %v8170_v63 = vsel %vm3549_vm15, %v8118_v16, 0.0  ;;  %v8121_v13 = vmul.f32 %v13259_v21, %v13259_v21  ;;  %v8128_v16 = vmul.f32 %v13308_v59, %v13308_v59 }
 0x665   : > { %v8155_v49 = vadd.f32 %v8154_v45, %v8153_v29  ;;  %v8172_v29 = vsel %vm3549_vm15, %v8119_v38, 0.0  ;;  %v8122_v45 = vmul.f32 %v13266_v52, %v13266_v52  ;;  %v8190_v38 = vsel %vm3549_vm15, %v8128_v16, 0.0 }
 0x667   : > { %v8157_v56 = vadd.f32 %v8156_v30, %v8155_v49  ;;  %v8174_v49 = vsel %vm3549_vm15, %v8120_v26, 0.0  ;;  %v8123_v30 = vmul.f32 %v13273_v55, %v13273_v55 }
 0x669   : > { %v8159_v22 = vadd.f32 %v8158_v24, %v8157_v56  ;;  %v8176_v56 = vsel %vm3549_vm15, %v8121_v13, 0.0  ;;  %v8124_v24 = vmul.f32 %v13280_v35, %v13280_v35 }
 0x66b   : > { %v8161_v33 = vadd.f32 %v8160_v0, %v8159_v22  ;;  %v8178_v22 = vsel %vm3549_vm15, %v8122_v45, 0.0  ;;  %v8125_v0 = vmul.f32 %v13287_v10, %v13287_v10 }
 0x66d   : > { %v8163_v34 = vadd.f32 %v8162_v28, %v8161_v33  ;;  %v8180_v33 = vsel %vm3549_vm15, %v8123_v30, 0.0  ;;  %v8126_v28 = vmul.f32 %v13294_v57, %v13294_v57 }
 0x66f   : > { %v8165_v31 = vadd.f32 %v8164_v20, %v8163_v34  ;;  %v8182_v34 = vsel %vm3549_vm15, %v8124_v24, 0.0  ;;  %v8184_v20 = vsel %vm3549_vm15, %v8125_v0, 0.0 }
 0x671   : > { %v8167_v47 = vadd.f32 %v8166_v60, %v8165_v31  ;;  %v8186_v60 = vsel %vm3549_vm15, %v8126_v28, 0.0  ;;  %v8242_v28 = vld [vmem:[%s9261_s17] sm:$0xff] }
 0x673   : > { %v8169_v44 = vadd.f32 %v8168_v36, %v8167_v47 }
 0x675   : > { %v8171_v62 = vadd.f32 %v8170_v63, %v8169_v44 }
 0x677   : > { %v8173_v58 = vadd.f32 %v8172_v29, %v8171_v62 }
 0x679   : > { %v8175_v50 = vadd.f32 %v8174_v49, %v8173_v58 }
 0x67b   : > { %v8177_v3 = vadd.f32 %v8176_v56, %v8175_v50 }
 0x67d   : > { %v8179_v15 = vadd.f32 %v8178_v22, %v8177_v3 }
 0x67f   : > { %v8181_v25 = vadd.f32 %v8180_v33, %v8179_v15 }
 0x681   : > { %v8183_v32 = vadd.f32 %v8182_v34, %v8181_v25  ;;  %v8243_v34 = vld [vmem:[%s9261_s17 + $0x8] sm:$0xff] }
 0x683   : > { %v8185_v31 = vadd.f32 %v8184_v20, %v8183_v32  ;;  %v8244_v32 = vld [vmem:[%s9261_s17 + $0x10] sm:$0xff]  ;;  %v8245_v20 = vld [vmem:[%s9261_s17 + $0x18] sm:$0xff] }
 0x685   : > { %v8187_v47 = vadd.f32 %v8186_v60, %v8185_v31 }
 0x687   : > { %v8189_v37 = vadd.f32 %v8188_v7, %v8187_v47  ;;  %v8248_v47 = vld [vmem:[%s9261_s17 + $0x30] sm:$0xff] }
 0x689   : > { %v8191_v36 = vadd.f32 %v8190_v38, %v8189_v37  ;;  %v8249_v37 = vld [vmem:[%s9261_s17 + $0x38] sm:$0xff] }
 0x68b   : > { %v8192_v44 = vrot.slane %v8191_v36, 4 }
 0x68d   : > { %v8193_v26 = vadd.f32 %v8192_v44, %v8191_v36  ;;  %v8250_v36 = vld [vmem:[%s9261_s17 + $0x40] sm:$0xff] }
 0x68f   : > { %v8194_v63 = vrot.slane %v8193_v26, 2 }
 0x691   : > { %v8195_v62 = vadd.f32 %v8194_v63, %v8193_v26  ;;  %v8251_v26 = vld [vmem:[%s9261_s17 + $0x48] sm:$0xff] }
 0x693   : > { %v8196_v13 = vrot.slane %v8195_v62, 1 }
 0x695   : > { %v8197_v29 = vadd.f32 %v8196_v13, %v8195_v62  ;;  %v8252_v62 = vld [vmem:[%s9261_s17 + $0x50] sm:$0xff] }
 0x697   : > { %v8198_v58 = vmul.f32 0.00390625, %v8197_v29  ;;  %v8253_v29 = vld [vmem:[%s9261_s17 + $0x58] sm:$0xff] }
 0x699   : > { %v8199_v45 = vadd.f32 1e-05, %v8198_v58 }
 0x69b   : > { %9130 = vrsqrt.f32 %v8199_v45  ;;  %vm8206_vm4 = vweird.f32 %v8199_v45 }
 0x6a1   : > { %v9131_v49 = vpop.eup %9130 }
 0x6a2   : > { %v8201_v50 = vmul.f32 %v9131_v49, %v8199_v45  ;;  %vm8207_vm3 = vweird.f32 %v9131_v49  ;;  %v8254_v45 = vld [vmem:[%s9261_s17 + $0x60] sm:$0xff] }
 0x6a3   : > { %vm8208_vm8 = vmor %vm8206_vm4, %vm8207_vm3 }
 0x6a4   : > { %v8202_v30 = vmul.f32 %v9131_v49, %v8201_v50  ;;  %v8255_v50 = vld [vmem:[%s9261_s17 + $0x68] sm:$0xff] }
 0x6a6   : > { %v8203_v56 = vmul.f32 0.5, %v8202_v30 }
 0x6a8   : > { %v8204_v3 = vsub.f32 1.5, %v8203_v56  ;;  %v8256_v56 = vld [vmem:[%s9261_s17 + $0x70] sm:$0xff] }
 0x6aa   : > { %v8205_v24 = vmul.f32 %v9131_v49, %v8204_v3 }
 0x6ac   : > { %v13321_v22 = vsel %vm8208_vm8, %v9131_v49, %v8205_v24  ;;  %v8257_v24 = vld [vmem:[%s9261_s17 + $0x78] sm:$0xff] }
 0x6ad   : > { %v8210_v15 = vmul.f32 %v13321_v22, %v13099_v14  ;;  %v8211_v0 = vmul.f32 %v13321_v22, %v13103_v46  ;;  %v8212_v33 = vmul.f32 %v13321_v22, %v13107_v17  ;;  %v8213_v25 = vmul.f32 %v13321_v22, %v13111_v61  ;;  %v8246_v46 = vld [vmem:[%s9261_s17 + $0x20] sm:$0xff]  ;;  %v8247_v61 = vld [vmem:[%s9261_s17 + $0x28] sm:$0xff] }
 0x6ae   : > { %v8214_v54 = vmul.f32 %v13321_v22, %v13119_v6  ;;  %v8215_v14 = vmul.f32 %v13321_v22, %v13125_v4  ;;  %v8216_v17 = vmul.f32 %v13321_v22, %v13133_v5  ;;  %v8217_v60 = vmul.f32 %v13321_v22, %v13140_v40 }
 0x6af   : > { %v8274_v6 = vadd.f32 %v8242_v28, %v8210_v15  ;;  %v8275_v31 = vadd.f32 %v8243_v34, %v8211_v0  ;;  %v8276_v16 = vadd.f32 %v8244_v32, %v8212_v33  ;;  %v8277_v7 = vadd.f32 %v8245_v20, %v8213_v25  ;;  %v8258_v0 = vld [vmem:[%s9261_s17 + $0x80] sm:$0xff]  ;;  %v8259_v25 = vld [vmem:[%s9261_s17 + $0x88] sm:$0xff]  ;;  %v8260_v34 = vld [vmem:[%s9261_s17 + $0x90] sm:$0xff] }
 0x6b0   : > { %v8218_v4 = vmul.f32 %v13321_v22, %v13147_v39  ;;  %v8278_v38 = vadd.f32 %v8246_v46, %v8214_v54  ;;  %v8219_v5 = vmul.f32 %v13321_v22, %v13154_v42  ;;  %v8279_v44 = vadd.f32 %v8247_v61, %v8215_v14  ;;  %v8261_v54 = vld [vmem:[%s9261_s17 + $0x98] sm:$0xff]  ;;  %v8262_v14 = vld [vmem:[%s9261_s17 + $0xa0] sm:$0xff] }
 0x6b1   : > { %8306 = vst.msk [vmem:[%s13342_s16] sm:$0xff] %vm3549_vm15, %v8274_v6  ;;  %v8220_v40 = vmul.f32 %v13321_v22, %v13161_v19  ;;  %v8280_v39 = vadd.f32 %v8248_v47, %v8216_v17  ;;  %v8221_v63 = vmul.f32 %v13321_v22, %v13168_v8  ;;  %v8281_v42 = vadd.f32 %v8249_v37, %v8217_v60  ;;  %v8263_v17 = vld [vmem:[%s9261_s17 + $0xa8] sm:$0xff]  ;;  %v8264_v6 = vld [vmem:[%s9261_s17 + $0xb0] sm:$0xff]  ;;  %v8266_v47 = vld [vmem:[%s9261_s17 + $0xc0] sm:$0xff] }
 0x6b2   : > { %8307 = vst.msk [vmem:[%s13342_s16 + $0x8] sm:$0xff] %vm3549_vm15, %v8275_v31  ;;  %v8222_v13 = vmul.f32 %v13321_v22, %v13175_v27  ;;  %v8282_v19 = vadd.f32 %v8250_v36, %v8218_v4  ;;  %v8223_v58 = vmul.f32 %v13321_v22, %v13182_v51  ;;  %v8283_v8 = vadd.f32 %v8251_v26, %v8219_v5  ;;  %v8267_v4 = vld [vmem:[%s9261_s17 + $0xc8] sm:$0xff] }
 0x6b3   : > { %8308 = vst.msk [vmem:[%s13342_s16 + $0x10] sm:$0xff] %vm3549_vm15, %v8276_v16  ;;  %v8224_v49 = vmul.f32 %v13321_v22, %v13189_v1  ;;  %v8284_v27 = vadd.f32 %v8252_v62, %v8220_v40  ;;  %v8225_v30 = vmul.f32 %v13321_v22, %v13196_v43  ;;  %v8285_v51 = vadd.f32 %v8253_v29, %v8221_v63  ;;  %v8265_v16 = vld [vmem:[%s9261_s17 + $0xb8] sm:$0xff]  ;;  %v8272_v63 = vld [vmem:[%s9261_s17 + $0xf0] sm:$0xff] }
 0x6b4   : > { %8309 = vst.msk [vmem:[%s13342_s16 + $0x18] sm:$0xff] %vm3549_vm15, %v8277_v7  ;;  %v8226_v3 = vmul.f32 %v13321_v22, %v13203_v48  ;;  %v8286_v1 = vadd.f32 %v8254_v45, %v8222_v13  ;;  %v8227_v15 = vmul.f32 %v13321_v22, %v13210_v18  ;;  %v8287_v43 = vadd.f32 %v8255_v50, %v8223_v58 }
 0x6b5   : > { %8310 = vst.msk [vmem:[%s13342_s16 + $0x20] sm:$0xff] %vm3549_vm15, %v8278_v38  ;;  %v8228_v33 = vmul.f32 %v13321_v22, %v13217_v9  ;;  %v8288_v48 = vadd.f32 %v8256_v56, %v8224_v49  ;;  %v8229_v28 = vmul.f32 %v13321_v22, %v13224_v53  ;;  %v8289_v18 = vadd.f32 %v8257_v24, %v8225_v30  ;;  %v8268_v38 = vld [vmem:[%s9261_s17 + $0xd0] sm:$0xff] }
 0x6b6   : > { %8311 = vst.msk [vmem:[%s13342_s16 + $0x28] sm:$0xff] %vm3549_vm15, %v8279_v44  ;;  %v8230_v32 = vmul.f32 %v13321_v22, %v13231_v23  ;;  %v8290_v9 = vadd.f32 %v8258_v0, %v8226_v3  ;;  %v8231_v20 = vmul.f32 %v13321_v22, %v13238_v12  ;;  %v8291_v53 = vadd.f32 %v8259_v25, %v8227_v15 }
 0x6b7   : > { %8312 = vst.msk [vmem:[%s13342_s16 + $0x30] sm:$0xff] %vm3549_vm15, %v8280_v39  ;;  %v8232_v46 = vmul.f32 %v13321_v22, %v13245_v2  ;;  %v8292_v23 = vadd.f32 %v8260_v34, %v8228_v33  ;;  %v8233_v61 = vmul.f32 %v13321_v22, %v13252_v41  ;;  %v8293_v12 = vadd.f32 %v8261_v54, %v8229_v28 }
 0x6b8   : > { %8313 = vst.msk [vmem:[%s13342_s16 + $0x38] sm:$0xff] %vm3549_vm15, %v8281_v42  ;;  %v8234_v31 = vmul.f32 %v13321_v22, %v13259_v21  ;;  %v8294_v2 = vadd.f32 %v8262_v14, %v8230_v32  ;;  %v8235_v60 = vmul.f32 %v13321_v22, %v13266_v52  ;;  %v8295_v41 = vadd.f32 %v8263_v17, %v8231_v20  ;;  %v8273_v42 = vld [vmem:[%s9261_s17 + $0xf8] sm:$0xff] }
 0x6b9   : > { %8314 = vst.msk [vmem:[%s13342_s16 + $0x40] sm:$0xff] %vm3549_vm15, %v8282_v19  ;;  %v8236_v7 = vmul.f32 %v13321_v22, %v13273_v55  ;;  %v8296_v21 = vadd.f32 %v8264_v6, %v8232_v46  ;;  %v8237_v37 = vmul.f32 %v13321_v22, %v13280_v35  ;;  %v8297_v52 = vadd.f32 %v8265_v16, %v8233_v61  ;;  %v8269_v55 = vld [vmem:[%s9261_s17 + $0xd8] sm:$0xff]  ;;  %v8270_v35 = vld [vmem:[%s9261_s17 + $0xe0] sm:$0xff] }
 0x6ba   : > { %8315 = vst.msk [vmem:[%s13342_s16 + $0x48] sm:$0xff] %vm3549_vm15, %v8283_v8  ;;  %v8238_v5 = vmul.f32 %v13321_v22, %v13287_v10  ;;  %v8298_v36 = vadd.f32 %v8266_v47, %v8234_v31  ;;  %v8239_v44 = vmul.f32 %v13321_v22, %v13294_v57  ;;  %v8299_v40 = vadd.f32 %v8267_v4, %v8235_v60  ;;  %v8271_v10 = vld [vmem:[%s9261_s17 + $0xe8] sm:$0xff] }
 0x6bb   : > { %8316 = vst.msk [vmem:[%s13342_s16 + $0x50] sm:$0xff] %vm3549_vm15, %v8284_v27  ;;  %v8240_v26 = vmul.f32 %v13321_v22, %v13301_v11  ;;  %v8300_v39 = vadd.f32 %v8268_v38, %v8236_v7  ;;  %v8241_v57 = vmul.f32 %v13321_v22, %v13308_v59  ;;  %v8301_v62 = vadd.f32 %v8269_v55, %v8237_v37 }
 0x6bc   : > { %8317 = vst.msk [vmem:[%s13342_s16 + $0x58] sm:$0xff] %vm3549_vm15, %v8285_v51  ;;  %v8302_v13 = vadd.f32 %v8270_v35, %v8238_v5  ;;  %v8303_v11 = vadd.f32 %v8271_v10, %v8239_v44 }
 0x6bd   : > { %8318 = vst.msk [vmem:[%s13342_s16 + $0x60] sm:$0xff] %vm3549_vm15, %v8286_v1  ;;  %v8304_v29 = vadd.f32 %v8272_v63, %v8240_v26  ;;  %v8305_v19 = vadd.f32 %v8273_v42, %v8241_v57 }
 0x6be   : > { %8319 = vst.msk [vmem:[%s13342_s16 + $0x68] sm:$0xff] %vm3549_vm15, %v8287_v43 }
 0x6bf   : > { %8320 = vst.msk [vmem:[%s13342_s16 + $0x70] sm:$0xff] %vm3549_vm15, %v8288_v48 }
 0x6c0   : > { %8321 = vst.msk [vmem:[%s13342_s16 + $0x78] sm:$0xff] %vm3549_vm15, %v8289_v18 }
 0x6c1   : > { %8322 = vst.msk [vmem:[%s13342_s16 + $0x80] sm:$0xff] %vm3549_vm15, %v8290_v9 }
 0x6c2   : > { %8323 = vst.msk [vmem:[%s13342_s16 + $0x88] sm:$0xff] %vm3549_vm15, %v8291_v53 }
 0x6c3   : > { %8324 = vst.msk [vmem:[%s13342_s16 + $0x90] sm:$0xff] %vm3549_vm15, %v8292_v23 }
 0x6c4   : > { %8325 = vst.msk [vmem:[%s13342_s16 + $0x98] sm:$0xff] %vm3549_vm15, %v8293_v12 }
 0x6c5   : > { %8326 = vst.msk [vmem:[%s13342_s16 + $0xa0] sm:$0xff] %vm3549_vm15, %v8294_v2 }
 0x6c6   : > { %8327 = vst.msk [vmem:[%s13342_s16 + $0xa8] sm:$0xff] %vm3549_vm15, %v8295_v41 }
 0x6c7   : > { %8328 = vst.msk [vmem:[%s13342_s16 + $0xb0] sm:$0xff] %vm3549_vm15, %v8296_v21 }
 0x6c8   : > { %8329 = vst.msk [vmem:[%s13342_s16 + $0xb8] sm:$0xff] %vm3549_vm15, %v8297_v52 }
 0x6c9   : > { %8330 = vst.msk [vmem:[%s13342_s16 + $0xc0] sm:$0xff] %vm3549_vm15, %v8298_v36 }
 0x6ca   : > { %8331 = vst.msk [vmem:[%s13342_s16 + $0xc8] sm:$0xff] %vm3549_vm15, %v8299_v40 }
 0x6cb   : > { %8332 = vst.msk [vmem:[%s13342_s16 + $0xd0] sm:$0xff] %vm3549_vm15, %v8300_v39 }
 0x6cc   : > { %8333 = vst.msk [vmem:[%s13342_s16 + $0xd8] sm:$0xff] %vm3549_vm15, %v8301_v62 }
 0x6cd   : > { %8334 = vst.msk [vmem:[%s13342_s16 + $0xe0] sm:$0xff] %vm3549_vm15, %v8302_v13 }
 0x6ce   : > { %8335 = vst.msk [vmem:[%s13342_s16 + $0xe8] sm:$0xff] %vm3549_vm15, %v8303_v11 }
 0x6cf   : > { %8336 = vst.msk [vmem:[%s13342_s16 + $0xf0] sm:$0xff] %vm3549_vm15, %v8304_v29 }
 0x6d0   : > { %8337 = vst.msk [vmem:[%s13342_s16 + $0xf8] sm:$0xff] %vm3549_vm15, %v8305_v19 }
 0x6d1 PF: > { %s13_s12 = sadd.s32 1, %s9215_s12  }
 0x6d2   : > { %p10_p4 = scmp.ge.s32.totalorder %s13_s12, 4  }
 0x6d4   :  { %12 = sbr.rel (!%p10_p4) target bundleno = 1 (0x1), region = 65 }

</bundles_post_ra>
